<compile_context>
chip_gen: v7x
topology: tpu7x:2x2x1
jax: 0.10.0
libtpu: 0.0.40
codegen_flags: <defaults>
</compile_context>

<pallas_src>
import functools

import numpy as np
import jax
import jax.numpy as jnp
from jax.experimental import pallas as pl
from jax.experimental.pallas import tpu as pltpu

CPAD = 128                           # lane-dense channel padding (one vreg of lanes)
VMEM_LIMIT_BYTES = 32 * 1024 * 1024  # scoped-VMEM budget (safe on v5e/v6e/v7x)


# ----------------------------------------------------------------------------
# Shared in-kernel helper: SearchBigDAG_CS mixing (stand-in)
# ----------------------------------------------------------------------------
def _dag_mix(s, w_dag_ref, w_cat_ref, *, n_big_nodes, window, c_valid):
    """Sliding-window DAG mix + concat-distribution + channel-concat.

    s: (R, 128) f32 slab, valid channels in lanes [0:c_valid], rest exactly 0.
    Returns (R, 128) f32 slab with 2*c_valid valid lanes.

    TODO(synk): SearchBigDAG_CS / GetCell bodies were not provided; each DAG
    node is a weighted mix of the previous `window` states instead of a
    mixed-op cell applied to them (channel bookkeeping is faithful).
    Mix math stays f32 (v5e has no bf16 VPU); on v6e/v7x bf16 is a free
    pressure reduction if needed.
    """
    states = [s, s]                              # s0 == s1 in the reference forward
    mix = None
    for i in range(n_big_nodes):                 # small & static -> fully unrolled
        k = min(window, len(states))
        prev = states[-k:]
        node = w_dag_ref[i, 0] * prev[0]
        for j in range(1, k):
            node = node + w_dag_ref[i, j] * prev[j]
        # incremental concat-distribution accumulation; keep only the sliding
        # window of states live (fewer live (R,128) f32 slabs -> less VMEM/spill).
        contrib = w_cat_ref[i] * node
        mix = contrib if mix is None else mix + contrib
        states.append(node)
        states = states[-window:]
    # channel concat [mix | last_state]: padded lanes are exactly zero end-to-end
    # (BN padding convention scale=1 / shift=0), so a lane roll + add is the concat.
    return mix + pltpu.roll(states[-1], shift=c_valid, axis=1)


# ----------------------------------------------------------------------------
# Kernel 1: stem Conv3x3(pad=1, no bias) + BN, im2col fused in-kernel
# ----------------------------------------------------------------------------
def stem_kernel(x_ref, w_ref, scale_ref, shift_ref, o_ref, *, h, w):
    """x_ref: (1, h+2, w+2, cin_pad) halo-padded image; o_ref: (1, h*w, 128)."""
    acc = None
    for dy in range(3):
        for dx in range(3):
            patch = x_ref[0, pl.ds(dy, h), pl.ds(dx, w), :]          # (h, w, cin_pad) bf16
            a = patch.reshape(h * w, patch.shape[-1])
            d = jnp.dot(a, w_ref[dy * 3 + dx], preferred_element_type=jnp.float32)
            acc = d if acc is None else acc + d
    o_ref[0] = (acc * scale_ref[...] + shift_ref[...]).astype(o_ref.dtype)


def stem_conv_bn(xp, w9, scale, shift, *, H, W):
    """xp: (N, H+2, W+2, cin_pad) bf16 halo-padded input -> (N, H*W, 128) bf16."""
    # TODO(synk): at real image sizes, use a compact channel pad (8 lanes) and a
    # halo row-tiled grid instead of whole-image blocks + 128-lane input padding.
    N, _, _, cin_pad = xp.shape
    CP = w9.shape[-1]
    return pl.pallas_call(
        functools.partial(stem_kernel, h=H, w=W),
        out_shape=jax.ShapeDtypeStruct((N, H * W, CP), jnp.bfloat16),
        grid=(N,),
        in_specs=[
            pl.BlockSpec((1, H + 2, W + 2, cin_pad), lambda n: (n, 0, 0, 0)),
            pl.BlockSpec((9, cin_pad, CP), lambda n: (0, 0, 0)),     # resident weights
            pl.BlockSpec((1, CP), lambda n: (0, 0)),
            pl.BlockSpec((1, CP), lambda n: (0, 0)),
        ],
        out_specs=pl.BlockSpec((1, H * W, CP), lambda n: (n, 0, 0)),
        compiler_params=pltpu.CompilerParams(
            dimension_semantics=("parallel",),
            vmem_limit_bytes=VMEM_LIMIT_BYTES),
    )(xp, w9, scale, shift)


# ----------------------------------------------------------------------------
# Kernel 2: fused [SearchBigDAG_CS mix -> 2x2 avgpool -> ReLU -> 1x1 conv -> BN]
# ----------------------------------------------------------------------------
def dag_reduce_kernel(w_dag_ref, w_cat_ref, x_ref, pool_ref, wt_ref, scale_ref,
                      shift_ref, o_ref, *, n_big_nodes, window, c_valid):
    s = x_ref[0].astype(jnp.float32)                                 # (H*W, 128)
    mixed = _dag_mix(s, w_dag_ref, w_cat_ref,
                     n_big_nodes=n_big_nodes, window=window, c_valid=c_valid)
    # 2x2 average pool fused as a tiny resident MXU operator (4 entries of 0.25
    # per output row).  TODO(synk): at large spatial sizes replace the dense
    # pooling operator with strided/halo row loads to keep it O(HW).
    pooled = jnp.dot(pool_ref[...], mixed, preferred_element_type=jnp.float32)  # (HW/4, 128)
    a = jnp.maximum(pooled, 0.0).astype(jnp.bfloat16)
    acc = jnp.dot(a, wt_ref[...], preferred_element_type=jnp.float32)           # (HW/4, 128)
    o_ref[0] = (acc * scale_ref[...] + shift_ref[...]).astype(o_ref.dtype)


def _pool_matrix(H, W):
    """(H//2*W//2, H*W) operator P with P @ x == 2x2 average pool, rows (h,w)-major."""
    H2, W2 = H // 2, W // 2
    P = np.zeros((H2 * W2, H * W), np.float32)
    out = np.arange(H2 * W2)
    i, j = out // W2, out % W2
    for a in range(2):
        for b in range(2):
            P[out, (2 * i + a) * W + (2 * j + b)] = 0.25
    return jnp.asarray(P)


def dag_reduce(s, w_dag, w_cat, wt, scale, shift, *, N, H, W, c_valid, n_big, window):
    """s: (N, H*W, 128) bf16 -> ((N, H//2*W//2, 128) bf16, (H//2, W//2))."""
    # TODO(synk): genotype-defined mixed ops of the reduction GetCell are
    # unavailable; a channel/stride-faithful AvgPool-ReLU-Conv1x1-BN is used.
    CP = s.shape[-1]
    H2, W2 = H // 2, W // 2
    pool = _pool_matrix(H, W)
    out = pl.pallas_call(
        functools.partial(dag_reduce_kernel, n_big_nodes=n_big, window=window,
                          c_valid=c_valid),
        out_shape=jax.ShapeDtypeStruct((N, H2 * W2, CP), jnp.bfloat16),
        grid=(N,),
        in_specs=[
            pl.BlockSpec(memory_space=pltpu.MemorySpace.SMEM),       # (n_big, window) arch w
            pl.BlockSpec(memory_space=pltpu.MemorySpace.SMEM),       # (n_big,) concat w
            pl.BlockSpec((1, H * W, CP), lambda n: (n, 0, 0)),       # per-image state slab
            pl.BlockSpec((H2 * W2, H * W), lambda n: (0, 0)),        # resident pool operator
            pl.BlockSpec((CP, CP), lambda n: (0, 0)),                # 1x1 reduction conv
            pl.BlockSpec((1, CP), lambda n: (0, 0)),                 # fused BN scale
            pl.BlockSpec((1, CP), lambda n: (0, 0)),                 # fused BN shift
        ],
        out_specs=pl.BlockSpec((1, H2 * W2, CP), lambda n: (n, 0, 0)),
        compiler_params=pltpu.CompilerParams(
            dimension_semantics=("parallel",),
            vmem_limit_bytes=VMEM_LIMIT_BYTES),
    )(w_dag, w_cat, s, pool, wt, scale, shift)
    return out, (H2, W2)


# ----------------------------------------------------------------------------
# Kernel 3: fused [SearchBigDAG_CS mix -> GAP -> flatten -> Linear]
# ----------------------------------------------------------------------------
def dag_gap_fc_kernel(w_dag_ref, w_cat_ref, x_ref, w_ref, b_ref, o_ref, *,
                      n_big_nodes, window, c_valid, inv_hw):
    n, hw, cp = x_ref.shape
    x = x_ref[...].astype(jnp.float32).reshape(n * hw, cp)
    mixed = _dag_mix(x, w_dag_ref, w_cat_ref,
                     n_big_nodes=n_big_nodes, window=window, c_valid=c_valid)
    pooled = jnp.sum(mixed.reshape(n, hw, cp), axis=1) * inv_hw      # (n, 128)
    logits = jnp.dot(pooled.astype(jnp.bfloat16), w_ref[...],
                     preferred_element_type=jnp.float32)
    o_ref[...] = logits + b_ref[...]


def dag_gap_fc(s, w_dag, w_cat, fc_w, fc_b, *, c_valid, n_big, window):
    """s: (N, HW, 128) bf16 -> (N, 128) f32 padded logits."""
    # TODO(synk): at realistic batch sizes tile the grid over N in >=8-row blocks
    # (keeps both v7x TensorCores busy); N=2 / HW=16 here -> a single tiny block.
    N, HW, CP = s.shape
    NP = fc_w.shape[-1]
    return pl.pallas_call(
        functools.partial(dag_gap_fc_kernel, n_big_nodes=n_big, window=window,
                          c_valid=c_valid, inv_hw=1.0 / HW),
        out_shape=jax.ShapeDtypeStruct((N, NP), jnp.float32),
        grid=(1,),
        in_specs=[
            pl.BlockSpec(memory_space=pltpu.MemorySpace.SMEM),
            pl.BlockSpec(memory_space=pltpu.MemorySpace.SMEM),
            pl.BlockSpec((N, HW, CP), lambda i: (0, 0, 0)),
            pl.BlockSpec((CP, NP), lambda i: (0, 0)),
            pl.BlockSpec((1, NP), lambda i: (0, 0)),
        ],
        out_specs=pl.BlockSpec((N, NP), lambda i: (0, 0)),
        compiler_params=pltpu.CompilerParams(
            dimension_semantics=("arbitrary",),
            vmem_limit_bytes=VMEM_LIMIT_BYTES),
    )(w_dag, w_cat, s, fc_w, fc_b)


# ----------------------------------------------------------------------------
# Parameters (deterministic in-script init; channel dims zero-padded to 128 lanes)
# ----------------------------------------------------------------------------
def init_params(key, C_in, C, n_classes, stem_multiplier=4, cell_multiplier=4, cpad=CPAD):
    keys = jax.random.split(key, 8)
    C_stem = stem_multiplier * C                    # 4C
    C_r1 = 2 * cell_multiplier * C                  # 8C   (reduce cell 1: 8C -> 8C)
    C_r2 = 2 * cell_multiplier * 2 * C              # 16C  (reduce cell 2: 16C -> 16C)
    C_fc_in = 32 * C                                # nn.Linear(32*C, n_classes)

    def bn_affine(k, c):
        g = 1.0 + 0.1 * jax.random.normal(k, (c,), jnp.float32)
        b = 0.05 * jax.random.normal(jax.random.fold_in(k, 1), (c,), jnp.float32)
        m = 0.05 * jax.random.normal(jax.random.fold_in(k, 2), (c,), jnp.float32)
        v = 0.5 + jnp.abs(jax.random.normal(jax.random.fold_in(k, 3), (c,), jnp.float32))
        scale = g / jnp.sqrt(v + 1e-5)
        shift = b - m * scale
        # padded lanes: scale 1 / shift 0 so they stay exactly zero end-to-end
        # (this invariant is what makes the roll-as-concat in _dag_mix valid).
        sp = jnp.ones((1, cpad), jnp.float32).at[0, :c].set(scale)
        hp = jnp.zeros((1, cpad), jnp.float32).at[0, :c].set(shift)
        return sp, hp

    def pad_w(w, kp, np_):
        return (jnp.zeros((kp, np_), jnp.float32)
                .at[:w.shape[0], :w.shape[1]].set(w).astype(jnp.bfloat16))

    p = {}
    # stem 3x3 conv as 9 (dy,dx) weight sub-blocks, zero-padded (C_in->128, 4C->128).
    stem_w = 0.1 * jax.random.normal(keys[0], (9, C_in, C_stem), jnp.float32)
    p["stem_w"] = (jnp.zeros((9, cpad, cpad), jnp.float32)
                   .at[:, :C_in, :C_stem].set(stem_w).astype(jnp.bfloat16))
    p["stem_scale"], p["stem_shift"] = bn_affine(keys[1], C_stem)
    p["red1_w"] = pad_w(0.1 * jax.random.normal(keys[2], (C_r1, C_r1), jnp.float32), cpad, cpad)
    p["red1_scale"], p["red1_shift"] = bn_affine(keys[3], C_r1)
    p["red2_w"] = pad_w(0.1 * jax.random.normal(keys[4], (C_r2, C_r2), jnp.float32), cpad, cpad)
    p["red2_scale"], p["red2_shift"] = bn_affine(keys[5], C_r2)
    p["fc_w"] = pad_w(0.1 * jax.random.normal(keys[6], (C_fc_in, n_classes), jnp.float32),
                      cpad, cpad)
    p["fc_b"] = jnp.zeros((1, cpad), jnp.float32).at[0, :n_classes].set(
        0.05 * jax.random.normal(keys[7], (n_classes,), jnp.float32))
    return p


# ----------------------------------------------------------------------------
# Full forward (mirrors SearchDistributionDag.forward; s0 == s1 throughout)
# ----------------------------------------------------------------------------
@functools.partial(jax.jit, static_argnames=("C", "n_classes", "n_big_nodes", "window"))
def search_distribution_dag_forward(x_nchw, params, weights_DAG, weights_concat, *,
                                    C, n_classes, n_big_nodes, window):
    x = jnp.transpose(x_nchw, (0, 2, 3, 1)).astype(jnp.bfloat16)     # NCHW -> NHWC, bf16
    N, H, W, C_in = x.shape
    cin_pad = params["stem_w"].shape[1]
    # 3x3/pad=1 halo + channel lane padding (once, in XLA).
    xp = jnp.pad(x, ((0, 0), (1, 1), (1, 1), (0, cin_pad - C_in)))

    wd = weights_DAG.astype(jnp.float32)
    wc = weights_concat.astype(jnp.float32)

    # stem: Conv3x3(pad=1, no bias) + BN (non-ImageNet branch), im2col fused.
    s = stem_conv_bn(xp, params["stem_w"], params["stem_scale"], params["stem_shift"],
                     H=H, W=W)

    # bigDAG1 + reduction cell 1 (fused).
    s, (H, W) = dag_reduce(s, wd[0 * n_big_nodes:1 * n_big_nodes], wc[0],
                           params["red1_w"], params["red1_scale"], params["red1_shift"],
                           N=N, H=H, W=W, c_valid=4 * C, n_big=n_big_nodes, window=window)
    # bigDAG2 + reduction cell 2 (fused).
    s, (H, W) = dag_reduce(s, wd[1 * n_big_nodes:2 * n_big_nodes], wc[1],
                           params["red2_w"], params["red2_scale"], params["red2_shift"],
                           N=N, H=H, W=W, c_valid=8 * C, n_big=n_big_nodes, window=window)
    # bigDAG3 + AdaptiveAvgPool2d(1) + flatten + Linear(32*C, n_classes) (fused).
    logits_pad = dag_gap_fc(s, wd[2 * n_big_nodes:3 * n_big_nodes], wc[2],
                            params["fc_w"], params["fc_b"],
                            c_valid=16 * C, n_big=n_big_nodes, window=window)
    return logits_pad[:, :n_classes]


if __name__ == "__main__":
    key = jax.random.PRNGKey(0)

    # Small configuration consistent with the module's __init__.
    C_in, C = 3, 4
    n_classes = 10
    n_big_nodes = 4
    window = 3
    N, H = 2, 16

    k_param, k_x, k_dag, k_cat = jax.random.split(key, 4)
    params = init_params(k_param, C_in, C, n_classes)

    x = jax.random.normal(k_x, (N, C_in, H, H), jnp.float32)
    weights_DAG = jax.nn.softmax(
        jax.random.normal(k_dag, (3 * n_big_nodes, window), jnp.float32), axis=-1)
    weights_concat = jax.nn.softmax(
        jax.random.normal(k_cat, (3, n_big_nodes), jnp.float32), axis=-1)

    logits = search_distribution_dag_forward(
        x, params, weights_DAG, weights_concat,
        C=C, n_classes=n_classes, n_big_nodes=n_big_nodes, window=window)
    jax.block_until_ready(logits)

    assert logits.shape == (N, n_classes), logits.shape
    assert bool(jnp.all(jnp.isfinite(logits)))
    print("KERNEL_OK")
</pallas_src>

<mosaic_0001>
module attributes {stable_mosaic.version = 11 : i64} {
  func.func @dag_reduce_kernel(%arg0: i32, %arg1: memref<4x3xf32, #tpu.memory_space<smem>>, %arg2: memref<4xf32, #tpu.memory_space<smem>>, %arg3: memref<1x256x128xbf16, #tpu.memory_space<vmem>>, %arg4: memref<64x256xf32, #tpu.memory_space<vmem>>, %arg5: memref<128x128xbf16, #tpu.memory_space<vmem>>, %arg6: memref<1x128xf32, #tpu.memory_space<vmem>>, %arg7: memref<1x128xf32, #tpu.memory_space<vmem>>, %arg8: memref<1x64x128xbf16, #tpu.memory_space<vmem>>) attributes {dimension_semantics = [#tpu.dimension_semantics<parallel>], iteration_bounds = array<i64: 2>, scalar_prefetch = 0 : i64, scratch_operands = 0 : i64, tpu.core_type = #tpu.core_type<tc>, window_params = [{transform_indices = @transform_0, window_bounds = array<i64: 4, 3>}, {transform_indices = @transform_1, window_bounds = array<i64: 4>}, {transform_indices = @transform_2, window_bounds = array<i64: 1, 256, 128>}, {pipeline_mode = #tpu.pipeline_mode<synchronous>, transform_indices = @transform_3, window_bounds = array<i64: 64, 256>}, {pipeline_mode = #tpu.pipeline_mode<synchronous>, transform_indices = @transform_4, window_bounds = array<i64: 128, 128>}, {pipeline_mode = #tpu.pipeline_mode<synchronous>, transform_indices = @transform_5, window_bounds = array<i64: 1, 128>}, {pipeline_mode = #tpu.pipeline_mode<synchronous>, transform_indices = @transform_6, window_bounds = array<i64: 1, 128>}, {transform_indices = @transform_7, window_bounds = array<i64: 1, 64, 128>}]} {
    %c0 = arith.constant 0 : index
    %c0_0 = arith.constant 0 : index
    %c0_1 = arith.constant 0 : index
    %0 = vector.load %arg3[%c0, %c0_0, %c0_1] : memref<1x256x128xbf16, #tpu.memory_space<vmem>>, vector<1x256x128xbf16>
    %1 = vector.shape_cast %0 : vector<1x256x128xbf16> to vector<256x128xbf16>
    %2 = arith.extf %1 : vector<256x128xbf16> to vector<256x128xf32>
    %c0_2 = arith.constant 0 : index
    %c0_3 = arith.constant 0 : index
    %3 = memref.load %arg1[%c0_2, %c0_3] : memref<4x3xf32, #tpu.memory_space<smem>>
    %4 = vector.broadcast %3 : f32 to vector<256x128xf32>
    %5 = arith.mulf %4, %2 : vector<256x128xf32>
    %c0_4 = arith.constant 0 : index
    %c1 = arith.constant 1 : index
    %6 = memref.load %arg1[%c0_4, %c1] : memref<4x3xf32, #tpu.memory_space<smem>>
    %7 = vector.broadcast %6 : f32 to vector<256x128xf32>
    %8 = arith.mulf %7, %2 : vector<256x128xf32>
    %9 = arith.addf %5, %8 : vector<256x128xf32>
    %c0_5 = arith.constant 0 : index
    %10 = memref.load %arg2[%c0_5] : memref<4xf32, #tpu.memory_space<smem>>
    %11 = vector.broadcast %10 : f32 to vector<256x128xf32>
    %12 = arith.mulf %11, %9 : vector<256x128xf32>
    %c1_6 = arith.constant 1 : index
    %c0_7 = arith.constant 0 : index
    %13 = memref.load %arg1[%c1_6, %c0_7] : memref<4x3xf32, #tpu.memory_space<smem>>
    %14 = vector.broadcast %13 : f32 to vector<256x128xf32>
    %15 = arith.mulf %14, %2 : vector<256x128xf32>
    %c1_8 = arith.constant 1 : index
    %c1_9 = arith.constant 1 : index
    %16 = memref.load %arg1[%c1_8, %c1_9] : memref<4x3xf32, #tpu.memory_space<smem>>
    %17 = vector.broadcast %16 : f32 to vector<256x128xf32>
    %18 = arith.mulf %17, %2 : vector<256x128xf32>
    %19 = arith.addf %15, %18 : vector<256x128xf32>
    %c1_10 = arith.constant 1 : index
    %c2 = arith.constant 2 : index
    %20 = memref.load %arg1[%c1_10, %c2] : memref<4x3xf32, #tpu.memory_space<smem>>
    %21 = vector.broadcast %20 : f32 to vector<256x128xf32>
    %22 = arith.mulf %21, %9 : vector<256x128xf32>
    %23 = arith.addf %19, %22 : vector<256x128xf32>
    %c1_11 = arith.constant 1 : index
    %24 = memref.load %arg2[%c1_11] : memref<4xf32, #tpu.memory_space<smem>>
    %25 = vector.broadcast %24 : f32 to vector<256x128xf32>
    %26 = arith.mulf %25, %23 : vector<256x128xf32>
    %27 = arith.addf %12, %26 : vector<256x128xf32>
    %c2_12 = arith.constant 2 : index
    %c0_13 = arith.constant 0 : index
    %28 = memref.load %arg1[%c2_12, %c0_13] : memref<4x3xf32, #tpu.memory_space<smem>>
    %29 = vector.broadcast %28 : f32 to vector<256x128xf32>
    %30 = arith.mulf %29, %2 : vector<256x128xf32>
    %c2_14 = arith.constant 2 : index
    %c1_15 = arith.constant 1 : index
    %31 = memref.load %arg1[%c2_14, %c1_15] : memref<4x3xf32, #tpu.memory_space<smem>>
    %32 = vector.broadcast %31 : f32 to vector<256x128xf32>
    %33 = arith.mulf %32, %9 : vector<256x128xf32>
    %34 = arith.addf %30, %33 : vector<256x128xf32>
    %c2_16 = arith.constant 2 : index
    %c2_17 = arith.constant 2 : index
    %35 = memref.load %arg1[%c2_16, %c2_17] : memref<4x3xf32, #tpu.memory_space<smem>>
    %36 = vector.broadcast %35 : f32 to vector<256x128xf32>
    %37 = arith.mulf %36, %23 : vector<256x128xf32>
    %38 = arith.addf %34, %37 : vector<256x128xf32>
    %c2_18 = arith.constant 2 : index
    %39 = memref.load %arg2[%c2_18] : memref<4xf32, #tpu.memory_space<smem>>
    %40 = vector.broadcast %39 : f32 to vector<256x128xf32>
    %41 = arith.mulf %40, %38 : vector<256x128xf32>
    %42 = arith.addf %27, %41 : vector<256x128xf32>
    %c3 = arith.constant 3 : index
    %c0_19 = arith.constant 0 : index
    %43 = memref.load %arg1[%c3, %c0_19] : memref<4x3xf32, #tpu.memory_space<smem>>
    %44 = vector.broadcast %43 : f32 to vector<256x128xf32>
    %45 = arith.mulf %44, %9 : vector<256x128xf32>
    %c3_20 = arith.constant 3 : index
    %c1_21 = arith.constant 1 : index
    %46 = memref.load %arg1[%c3_20, %c1_21] : memref<4x3xf32, #tpu.memory_space<smem>>
    %47 = vector.broadcast %46 : f32 to vector<256x128xf32>
    %48 = arith.mulf %47, %23 : vector<256x128xf32>
    %49 = arith.addf %45, %48 : vector<256x128xf32>
    %c3_22 = arith.constant 3 : index
    %c2_23 = arith.constant 2 : index
    %50 = memref.load %arg1[%c3_22, %c2_23] : memref<4x3xf32, #tpu.memory_space<smem>>
    %51 = vector.broadcast %50 : f32 to vector<256x128xf32>
    %52 = arith.mulf %51, %38 : vector<256x128xf32>
    %53 = arith.addf %49, %52 : vector<256x128xf32>
    %c3_24 = arith.constant 3 : index
    %54 = memref.load %arg2[%c3_24] : memref<4xf32, #tpu.memory_space<smem>>
    %55 = vector.broadcast %54 : f32 to vector<256x128xf32>
    %56 = arith.mulf %55, %53 : vector<256x128xf32>
    %57 = arith.addf %42, %56 : vector<256x128xf32>
    %c16_i32 = arith.constant 16 : i32
    %58 = tpu.dynamic_rotate %53 by %c16_i32 dim 1 : vector<256x128xf32>, i32 -> vector<256x128xf32>
    %59 = arith.addf %57, %58 : vector<256x128xf32>
    %c0_25 = arith.constant 0 : index
    %c0_26 = arith.constant 0 : index
    %60 = vector.load %arg4[%c0_25, %c0_26] : memref<64x256xf32, #tpu.memory_space<vmem>>, vector<64x256xf32>
    %cst = arith.constant dense<0.000000e+00> : vector<64x128xf32>
    %61 = tpu.matmul %60, %59, %cst {dimension_numbers = #tpu.dot_dimension_numbers<[1], [0], [0], [1], [0, 0, 1, 1], [], []>} : vector<64x256xf32>, vector<256x128xf32>, vector<64x128xf32> -> vector<64x128xf32>
    %cst_27 = arith.constant 0.000000e+00 : f32
    %62 = vector.broadcast %cst_27 : f32 to vector<64x128xf32>
    %63 = arith.maximumf %61, %62 : vector<64x128xf32>
    %64 = arith.truncf %63 : vector<64x128xf32> to vector<64x128xbf16>
    %c0_28 = arith.constant 0 : index
    %c0_29 = arith.constant 0 : index
    %65 = vector.load %arg5[%c0_28, %c0_29] : memref<128x128xbf16, #tpu.memory_space<vmem>>, vector<128x128xbf16>
    %cst_30 = arith.constant dense<0.000000e+00> : vector<64x128xf32>
    %66 = tpu.matmul %64, %65, %cst_30 {dimension_numbers = #tpu.dot_dimension_numbers<[1], [0], [0], [1], [0, 0, 1, 1], [], []>} : vector<64x128xbf16>, vector<128x128xbf16>, vector<64x128xf32> -> vector<64x128xf32>
    %c0_31 = arith.constant 0 : index
    %c0_32 = arith.constant 0 : index
    %67 = vector.load %arg6[%c0_31, %c0_32] : memref<1x128xf32, #tpu.memory_space<vmem>>, vector<1x128xf32>
    %68 = vector.broadcast %67 : vector<1x128xf32> to vector<64x128xf32>
    %69 = arith.mulf %66, %68 : vector<64x128xf32>
    %c0_33 = arith.constant 0 : index
    %c0_34 = arith.constant 0 : index
    %70 = vector.load %arg7[%c0_33, %c0_34] : memref<1x128xf32, #tpu.memory_space<vmem>>, vector<1x128xf32>
    %71 = vector.broadcast %70 : vector<1x128xf32> to vector<64x128xf32>
    %72 = arith.addf %69, %71 : vector<64x128xf32>
    %73 = arith.truncf %72 : vector<64x128xf32> to vector<64x128xbf16>
    %c0_35 = arith.constant 0 : index
    %c0_36 = arith.constant 0 : index
    %c0_37 = arith.constant 0 : index
    %74 = vector.load %arg8[%c0_35, %c0_36, %c0_37] : memref<1x64x128xbf16, #tpu.memory_space<vmem>>, vector<1x64x128xbf16>
    %75 = vector.shape_cast %74 : vector<1x64x128xbf16> to vector<64x128xbf16>
    %76 = vector.shape_cast %73 : vector<64x128xbf16> to vector<1x64x128xbf16>
    tpu.vector_store %arg8[%c0_35, %c0_36, %c0_37], %76 {strides = array<i32>} : memref<1x64x128xbf16, #tpu.memory_space<vmem>>, vector<1x64x128xbf16>,
    return
  }
  func.func @transform_0(%arg0: i32) -> (i32, i32) {
    %c0_i32 = arith.constant 0 : i32
    %c0_i32_0 = arith.constant 0 : i32
    %c0_i32_1 = arith.constant 0 : i32
    return %c0_i32, %c0_i32_0 : i32, i32
  }
  func.func @transform_1(%arg0: i32) -> i32 {
    %c0_i32 = arith.constant 0 : i32
    %c0_i32_0 = arith.constant 0 : i32
    return %c0_i32 : i32
  }
  func.func @transform_2(%arg0: i32) -> (i32, i32, i32) {
    %c0_i32 = arith.constant 0 : i32
    %c0_i32_0 = arith.constant 0 : i32
    %c0_i32_1 = arith.constant 0 : i32
    return %arg0, %c0_i32, %c0_i32_0 : i32, i32, i32
  }
  func.func @transform_3(%arg0: i32) -> (i32, i32) {
    %c0_i32 = arith.constant 0 : i32
    %c0_i32_0 = arith.constant 0 : i32
    %c0_i32_1 = arith.constant 0 : i32
    return %c0_i32, %c0_i32_0 : i32, i32
  }
  func.func @transform_4(%arg0: i32) -> (i32, i32) {
    %c0_i32 = arith.constant 0 : i32
    %c0_i32_0 = arith.constant 0 : i32
    %c0_i32_1 = arith.constant 0 : i32
    return %c0_i32, %c0_i32_0 : i32, i32
  }
  func.func @transform_5(%arg0: i32) -> (i32, i32) {
    %c0_i32 = arith.constant 0 : i32
    %c0_i32_0 = arith.constant 0 : i32
    %c0_i32_1 = arith.constant 0 : i32
    return %c0_i32, %c0_i32_0 : i32, i32
  }
  func.func @transform_6(%arg0: i32) -> (i32, i32) {
    %c0_i32 = arith.constant 0 : i32
    %c0_i32_0 = arith.constant 0 : i32
    %c0_i32_1 = arith.constant 0 : i32
    return %c0_i32, %c0_i32_0 : i32, i32
  }
  func.func @transform_7(%arg0: i32) -> (i32, i32, i32) {
    %c0_i32 = arith.constant 0 : i32
    %c0_i32_0 = arith.constant 0 : i32
    %c0_i32_1 = arith.constant 0 : i32
    return %arg0, %c0_i32, %c0_i32_0 : i32, i32, i32
  }
}

module attributes {stable_mosaic.version = 11 : i64} {
  func.func @stem_kernel(%arg0: i32, %arg1: memref<1x18x18x128xbf16, #tpu.memory_space<vmem>>, %arg2: memref<9x128x128xbf16, #tpu.memory_space<vmem>>, %arg3: memref<1x128xf32, #tpu.memory_space<vmem>>, %arg4: memref<1x128xf32, #tpu.memory_space<vmem>>, %arg5: memref<1x256x128xbf16, #tpu.memory_space<vmem>>) attributes {dimension_semantics = [#tpu.dimension_semantics<parallel>], iteration_bounds = array<i64: 2>, scalar_prefetch = 0 : i64, scratch_operands = 0 : i64, tpu.core_type = #tpu.core_type<tc>, window_params = [{transform_indices = @transform_0, window_bounds = array<i64: 1, 18, 18, 128>}, {pipeline_mode = #tpu.pipeline_mode<synchronous>, transform_indices = @transform_1, window_bounds = array<i64: 9, 128, 128>}, {pipeline_mode = #tpu.pipeline_mode<synchronous>, transform_indices = @transform_2, window_bounds = array<i64: 1, 128>}, {pipeline_mode = #tpu.pipeline_mode<synchronous>, transform_indices = @transform_3, window_bounds = array<i64: 1, 128>}, {transform_indices = @transform_4, window_bounds = array<i64: 1, 256, 128>}]} {
    %c0 = arith.constant 0 : index
    %c0_0 = arith.constant 0 : index
    %c0_1 = arith.constant 0 : index
    %c0_2 = arith.constant 0 : index
    %0 = vector.load %arg1[%c0, %c0_0, %c0_1, %c0_2] : memref<1x18x18x128xbf16, #tpu.memory_space<vmem>>, vector<1x16x16x128xbf16>
    %1 = vector.shape_cast %0 : vector<1x16x16x128xbf16> to vector<16x16x128xbf16>
    %2 = vector.shape_cast %1 : vector<16x16x128xbf16> to vector<256x128xbf16>
    %c0_3 = arith.constant 0 : index
    %c0_4 = arith.constant 0 : index
    %c0_5 = arith.constant 0 : index
    %3 = vector.load %arg2[%c0_3, %c0_4, %c0_5] : memref<9x128x128xbf16, #tpu.memory_space<vmem>>, vector<1x128x128xbf16>
    %4 = vector.shape_cast %3 : vector<1x128x128xbf16> to vector<128x128xbf16>
    %cst = arith.constant dense<0.000000e+00> : vector<256x128xf32>
    %5 = tpu.matmul %2, %4, %cst {dimension_numbers = #tpu.dot_dimension_numbers<[1], [0], [0], [1], [0, 0, 1, 1], [], []>} : vector<256x128xbf16>, vector<128x128xbf16>, vector<256x128xf32> -> vector<256x128xf32>
    %c0_6 = arith.constant 0 : index
    %c0_7 = arith.constant 0 : index
    %c1 = arith.constant 1 : index
    %c0_8 = arith.constant 0 : index
    %6 = vector.load %arg1[%c0_6, %c0_7, %c1, %c0_8] : memref<1x18x18x128xbf16, #tpu.memory_space<vmem>>, vector<1x16x16x128xbf16>
    %7 = vector.shape_cast %6 : vector<1x16x16x128xbf16> to vector<16x16x128xbf16>
    %8 = vector.shape_cast %7 : vector<16x16x128xbf16> to vector<256x128xbf16>
    %c1_9 = arith.constant 1 : index
    %c0_10 = arith.constant 0 : index
    %c0_11 = arith.constant 0 : index
    %9 = vector.load %arg2[%c1_9, %c0_10, %c0_11] : memref<9x128x128xbf16, #tpu.memory_space<vmem>>, vector<1x128x128xbf16>
    %10 = vector.shape_cast %9 : vector<1x128x128xbf16> to vector<128x128xbf16>
    %cst_12 = arith.constant dense<0.000000e+00> : vector<256x128xf32>
    %11 = tpu.matmul %8, %10, %cst_12 {dimension_numbers = #tpu.dot_dimension_numbers<[1], [0], [0], [1], [0, 0, 1, 1], [], []>} : vector<256x128xbf16>, vector<128x128xbf16>, vector<256x128xf32> -> vector<256x128xf32>
    %12 = arith.addf %5, %11 : vector<256x128xf32>
    %c0_13 = arith.constant 0 : index
    %c0_14 = arith.constant 0 : index
    %c2 = arith.constant 2 : index
    %c0_15 = arith.constant 0 : index
    %13 = vector.load %arg1[%c0_13, %c0_14, %c2, %c0_15] : memref<1x18x18x128xbf16, #tpu.memory_space<vmem>>, vector<1x16x16x128xbf16>
    %14 = vector.shape_cast %13 : vector<1x16x16x128xbf16> to vector<16x16x128xbf16>
    %15 = vector.shape_cast %14 : vector<16x16x128xbf16> to vector<256x128xbf16>
    %c2_16 = arith.constant 2 : index
    %c0_17 = arith.constant 0 : index
    %c0_18 = arith.constant 0 : index
    %16 = vector.load %arg2[%c2_16, %c0_17, %c0_18] : memref<9x128x128xbf16, #tpu.memory_space<vmem>>, vector<1x128x128xbf16>
    %17 = vector.shape_cast %16 : vector<1x128x128xbf16> to vector<128x128xbf16>
    %cst_19 = arith.constant dense<0.000000e+00> : vector<256x128xf32>
    %18 = tpu.matmul %15, %17, %cst_19 {dimension_numbers = #tpu.dot_dimension_numbers<[1], [0], [0], [1], [0, 0, 1, 1], [], []>} : vector<256x128xbf16>, vector<128x128xbf16>, vector<256x128xf32> -> vector<256x128xf32>
    %19 = arith.addf %12, %18 : vector<256x128xf32>
    %c0_20 = arith.constant 0 : index
    %c1_21 = arith.constant 1 : index
    %c0_22 = arith.constant 0 : index
    %c0_23 = arith.constant 0 : index
    %20 = vector.load %arg1[%c0_20, %c1_21, %c0_22, %c0_23] : memref<1x18x18x128xbf16, #tpu.memory_space<vmem>>, vector<1x16x16x128xbf16>
    %21 = vector.shape_cast %20 : vector<1x16x16x128xbf16> to vector<16x16x128xbf16>
    %22 = vector.shape_cast %21 : vector<16x16x128xbf16> to vector<256x128xbf16>
    %c3 = arith.constant 3 : index
    %c0_24 = arith.constant 0 : index
    %c0_25 = arith.constant 0 : index
    %23 = vector.load %arg2[%c3, %c0_24, %c0_25] : memref<9x128x128xbf16, #tpu.memory_space<vmem>>, vector<1x128x128xbf16>
    %24 = vector.shape_cast %23 : vector<1x128x128xbf16> to vector<128x128xbf16>
    %cst_26 = arith.constant dense<0.000000e+00> : vector<256x128xf32>
    %25 = tpu.matmul %22, %24, %cst_26 {dimension_numbers = #tpu.dot_dimension_numbers<[1], [0], [0], [1], [0, 0, 1, 1], [], []>} : vector<256x128xbf16>, vector<128x128xbf16>, vector<256x128xf32> -> vector<256x128xf32>
    %26 = arith.addf %19, %25 : vector<256x128xf32>
    %c0_27 = arith.constant 0 : index
    %c1_28 = arith.constant 1 : index
    %c1_29 = arith.constant 1 : index
    %c0_30 = arith.constant 0 : index
    %27 = vector.load %arg1[%c0_27, %c1_28, %c1_29, %c0_30] : memref<1x18x18x128xbf16, #tpu.memory_space<vmem>>, vector<1x16x16x128xbf16>
    %28 = vector.shape_cast %27 : vector<1x16x16x128xbf16> to vector<16x16x128xbf16>
    %29 = vector.shape_cast %28 : vector<16x16x128xbf16> to vector<256x128xbf16>
    %c4 = arith.constant 4 : index
    %c0_31 = arith.constant 0 : index
    %c0_32 = arith.constant 0 : index
    %30 = vector.load %arg2[%c4, %c0_31, %c0_32] : memref<9x128x128xbf16, #tpu.memory_space<vmem>>, vector<1x128x128xbf16>
    %31 = vector.shape_cast %30 : vector<1x128x128xbf16> to vector<128x128xbf16>
    %cst_33 = arith.constant dense<0.000000e+00> : vector<256x128xf32>
    %32 = tpu.matmul %29, %31, %cst_33 {dimension_numbers = #tpu.dot_dimension_numbers<[1], [0], [0], [1], [0, 0, 1, 1], [], []>} : vector<256x128xbf16>, vector<128x128xbf16>, vector<256x128xf32> -> vector<256x128xf32>
    %33 = arith.addf %26, %32 : vector<256x128xf32>
    %c0_34 = arith.constant 0 : index
    %c1_35 = arith.constant 1 : index
    %c2_36 = arith.constant 2 : index
    %c0_37 = arith.constant 0 : index
    %34 = vector.load %arg1[%c0_34, %c1_35, %c2_36, %c0_37] : memref<1x18x18x128xbf16, #tpu.memory_space<vmem>>, vector<1x16x16x128xbf16>
    %35 = vector.shape_cast %34 : vector<1x16x16x128xbf16> to vector<16x16x128xbf16>
    %36 = vector.shape_cast %35 : vector<16x16x128xbf16> to vector<256x128xbf16>
    %c5 = arith.constant 5 : index
    %c0_38 = arith.constant 0 : index
    %c0_39 = arith.constant 0 : index
    %37 = vector.load %arg2[%c5, %c0_38, %c0_39] : memref<9x128x128xbf16, #tpu.memory_space<vmem>>, vector<1x128x128xbf16>
    %38 = vector.shape_cast %37 : vector<1x128x128xbf16> to vector<128x128xbf16>
    %cst_40 = arith.constant dense<0.000000e+00> : vector<256x128xf32>
    %39 = tpu.matmul %36, %38, %cst_40 {dimension_numbers = #tpu.dot_dimension_numbers<[1], [0], [0], [1], [0, 0, 1, 1], [], []>} : vector<256x128xbf16>, vector<128x128xbf16>, vector<256x128xf32> -> vector<256x128xf32>
    %40 = arith.addf %33, %39 : vector<256x128xf32>
    %c0_41 = arith.constant 0 : index
    %c2_42 = arith.constant 2 : index
    %c0_43 = arith.constant 0 : index
    %c0_44 = arith.constant 0 : index
    %41 = vector.load %arg1[%c0_41, %c2_42, %c0_43, %c0_44] : memref<1x18x18x128xbf16, #tpu.memory_space<vmem>>, vector<1x16x16x128xbf16>
    %42 = vector.shape_cast %41 : vector<1x16x16x128xbf16> to vector<16x16x128xbf16>
    %43 = vector.shape_cast %42 : vector<16x16x128xbf16> to vector<256x128xbf16>
    %c6 = arith.constant 6 : index
    %c0_45 = arith.constant 0 : index
    %c0_46 = arith.constant 0 : index
    %44 = vector.load %arg2[%c6, %c0_45, %c0_46] : memref<9x128x128xbf16, #tpu.memory_space<vmem>>, vector<1x128x128xbf16>
    %45 = vector.shape_cast %44 : vector<1x128x128xbf16> to vector<128x128xbf16>
    %cst_47 = arith.constant dense<0.000000e+00> : vector<256x128xf32>
    %46 = tpu.matmul %43, %45, %cst_47 {dimension_numbers = #tpu.dot_dimension_numbers<[1], [0], [0], [1], [0, 0, 1, 1], [], []>} : vector<256x128xbf16>, vector<128x128xbf16>, vector<256x128xf32> -> vector<256x128xf32>
    %47 = arith.addf %40, %46 : vector<256x128xf32>
    %c0_48 = arith.constant 0 : index
    %c2_49 = arith.constant 2 : index
    %c1_50 = arith.constant 1 : index
    %c0_51 = arith.constant 0 : index
    %48 = vector.load %arg1[%c0_48, %c2_49, %c1_50, %c0_51] : memref<1x18x18x128xbf16, #tpu.memory_space<vmem>>, vector<1x16x16x128xbf16>
    %49 = vector.shape_cast %48 : vector<1x16x16x128xbf16> to vector<16x16x128xbf16>
    %50 = vector.shape_cast %49 : vector<16x16x128xbf16> to vector<256x128xbf16>
    %c7 = arith.constant 7 : index
    %c0_52 = arith.constant 0 : index
    %c0_53 = arith.constant 0 : index
    %51 = vector.load %arg2[%c7, %c0_52, %c0_53] : memref<9x128x128xbf16, #tpu.memory_space<vmem>>, vector<1x128x128xbf16>
    %52 = vector.shape_cast %51 : vector<1x128x128xbf16> to vector<128x128xbf16>
    %cst_54 = arith.constant dense<0.000000e+00> : vector<256x128xf32>
    %53 = tpu.matmul %50, %52, %cst_54 {dimension_numbers = #tpu.dot_dimension_numbers<[1], [0], [0], [1], [0, 0, 1, 1], [], []>} : vector<256x128xbf16>, vector<128x128xbf16>, vector<256x128xf32> -> vector<256x128xf32>
    %54 = arith.addf %47, %53 : vector<256x128xf32>
    %c0_55 = arith.constant 0 : index
    %c2_56 = arith.constant 2 : index
    %c2_57 = arith.constant 2 : index
    %c0_58 = arith.constant 0 : index
    %55 = vector.load %arg1[%c0_55, %c2_56, %c2_57, %c0_58] : memref<1x18x18x128xbf16, #tpu.memory_space<vmem>>, vector<1x16x16x128xbf16>
    %56 = vector.shape_cast %55 : vector<1x16x16x128xbf16> to vector<16x16x128xbf16>
    %57 = vector.shape_cast %56 : vector<16x16x128xbf16> to vector<256x128xbf16>
    %c8 = arith.constant 8 : index
    %c0_59 = arith.constant 0 : index
    %c0_60 = arith.constant 0 : index
    %58 = vector.load %arg2[%c8, %c0_59, %c0_60] : memref<9x128x128xbf16, #tpu.memory_space<vmem>>, vector<1x128x128xbf16>
    %59 = vector.shape_cast %58 : vector<1x128x128xbf16> to vector<128x128xbf16>
    %cst_61 = arith.constant dense<0.000000e+00> : vector<256x128xf32>
    %60 = tpu.matmul %57, %59, %cst_61 {dimension_numbers = #tpu.dot_dimension_numbers<[1], [0], [0], [1], [0, 0, 1, 1], [], []>} : vector<256x128xbf16>, vector<128x128xbf16>, vector<256x128xf32> -> vector<256x128xf32>
    %61 = arith.addf %54, %60 : vector<256x128xf32>
    %c0_62 = arith.constant 0 : index
    %c0_63 = arith.constant 0 : index
    %62 = vector.load %arg3[%c0_62, %c0_63] : memref<1x128xf32, #tpu.memory_space<vmem>>, vector<1x128xf32>
    %63 = vector.broadcast %62 : vector<1x128xf32> to vector<256x128xf32>
    %64 = arith.mulf %61, %63 : vector<256x128xf32>
    %c0_64 = arith.constant 0 : index
    %c0_65 = arith.constant 0 : index
    %65 = vector.load %arg4[%c0_64, %c0_65] : memref<1x128xf32, #tpu.memory_space<vmem>>, vector<1x128xf32>
    %66 = vector.broadcast %65 : vector<1x128xf32> to vector<256x128xf32>
    %67 = arith.addf %64, %66 : vector<256x128xf32>
    %68 = arith.truncf %67 : vector<256x128xf32> to vector<256x128xbf16>
    %c0_66 = arith.constant 0 : index
    %c0_67 = arith.constant 0 : index
    %c0_68 = arith.constant 0 : index
    %69 = vector.load %arg5[%c0_66, %c0_67, %c0_68] : memref<1x256x128xbf16, #tpu.memory_space<vmem>>, vector<1x256x128xbf16>
    %70 = vector.shape_cast %69 : vector<1x256x128xbf16> to vector<256x128xbf16>
    %71 = vector.shape_cast %68 : vector<256x128xbf16> to vector<1x256x128xbf16>
    tpu.vector_store %arg5[%c0_66, %c0_67, %c0_68], %71 {strides = array<i32>} : memref<1x256x128xbf16, #tpu.memory_space<vmem>>, vector<1x256x128xbf16>,
    return
  }
  func.func @transform_0(%arg0: i32) -> (i32, i32, i32, i32) {
    %c0_i32 = arith.constant 0 : i32
    %c0_i32_0 = arith.constant 0 : i32
    %c0_i32_1 = arith.constant 0 : i32
    %c0_i32_2 = arith.constant 0 : i32
    return %arg0, %c0_i32, %c0_i32_0, %c0_i32_1 : i32, i32, i32, i32
  }
  func.func @transform_1(%arg0: i32) -> (i32, i32, i32) {
    %c0_i32 = arith.constant 0 : i32
    %c0_i32_0 = arith.constant 0 : i32
    %c0_i32_1 = arith.constant 0 : i32
    %c0_i32_2 = arith.constant 0 : i32
    return %c0_i32, %c0_i32_0, %c0_i32_1 : i32, i32, i32
  }
  func.func @transform_2(%arg0: i32) -> (i32, i32) {
    %c0_i32 = arith.constant 0 : i32
    %c0_i32_0 = arith.constant 0 : i32
    %c0_i32_1 = arith.constant 0 : i32
    return %c0_i32, %c0_i32_0 : i32, i32
  }
  func.func @transform_3(%arg0: i32) -> (i32, i32) {
    %c0_i32 = arith.constant 0 : i32
    %c0_i32_0 = arith.constant 0 : i32
    %c0_i32_1 = arith.constant 0 : i32
    return %c0_i32, %c0_i32_0 : i32, i32
  }
  func.func @transform_4(%arg0: i32) -> (i32, i32, i32) {
    %c0_i32 = arith.constant 0 : i32
    %c0_i32_0 = arith.constant 0 : i32
    %c0_i32_1 = arith.constant 0 : i32
    return %arg0, %c0_i32, %c0_i32_0 : i32, i32, i32
  }
}

module attributes {stable_mosaic.version = 11 : i64} {
  func.func @dag_reduce_kernel(%arg0: i32, %arg1: memref<4x3xf32, #tpu.memory_space<smem>>, %arg2: memref<4xf32, #tpu.memory_space<smem>>, %arg3: memref<1x64x128xbf16, #tpu.memory_space<vmem>>, %arg4: memref<16x64xf32, #tpu.memory_space<vmem>>, %arg5: memref<128x128xbf16, #tpu.memory_space<vmem>>, %arg6: memref<1x128xf32, #tpu.memory_space<vmem>>, %arg7: memref<1x128xf32, #tpu.memory_space<vmem>>, %arg8: memref<1x16x128xbf16, #tpu.memory_space<vmem>>) attributes {dimension_semantics = [#tpu.dimension_semantics<parallel>], iteration_bounds = array<i64: 2>, scalar_prefetch = 0 : i64, scratch_operands = 0 : i64, tpu.core_type = #tpu.core_type<tc>, window_params = [{transform_indices = @transform_0, window_bounds = array<i64: 4, 3>}, {transform_indices = @transform_1, window_bounds = array<i64: 4>}, {transform_indices = @transform_2, window_bounds = array<i64: 1, 64, 128>}, {pipeline_mode = #tpu.pipeline_mode<synchronous>, transform_indices = @transform_3, window_bounds = array<i64: 16, 64>}, {pipeline_mode = #tpu.pipeline_mode<synchronous>, transform_indices = @transform_4, window_bounds = array<i64: 128, 128>}, {pipeline_mode = #tpu.pipeline_mode<synchronous>, transform_indices = @transform_5, window_bounds = array<i64: 1, 128>}, {pipeline_mode = #tpu.pipeline_mode<synchronous>, transform_indices = @transform_6, window_bounds = array<i64: 1, 128>}, {transform_indices = @transform_7, window_bounds = array<i64: 1, 16, 128>}]} {
    %c0 = arith.constant 0 : index
    %c0_0 = arith.constant 0 : index
    %c0_1 = arith.constant 0 : index
    %0 = vector.load %arg3[%c0, %c0_0, %c0_1] : memref<1x64x128xbf16, #tpu.memory_space<vmem>>, vector<1x64x128xbf16>
    %1 = vector.shape_cast %0 : vector<1x64x128xbf16> to vector<64x128xbf16>
    %2 = arith.extf %1 : vector<64x128xbf16> to vector<64x128xf32>
    %c0_2 = arith.constant 0 : index
    %c0_3 = arith.constant 0 : index
    %3 = memref.load %arg1[%c0_2, %c0_3] : memref<4x3xf32, #tpu.memory_space<smem>>
    %4 = vector.broadcast %3 : f32 to vector<64x128xf32>
    %5 = arith.mulf %4, %2 : vector<64x128xf32>
    %c0_4 = arith.constant 0 : index
    %c1 = arith.constant 1 : index
    %6 = memref.load %arg1[%c0_4, %c1] : memref<4x3xf32, #tpu.memory_space<smem>>
    %7 = vector.broadcast %6 : f32 to vector<64x128xf32>
    %8 = arith.mulf %7, %2 : vector<64x128xf32>
    %9 = arith.addf %5, %8 : vector<64x128xf32>
    %c0_5 = arith.constant 0 : index
    %10 = memref.load %arg2[%c0_5] : memref<4xf32, #tpu.memory_space<smem>>
    %11 = vector.broadcast %10 : f32 to vector<64x128xf32>
    %12 = arith.mulf %11, %9 : vector<64x128xf32>
    %c1_6 = arith.constant 1 : index
    %c0_7 = arith.constant 0 : index
    %13 = memref.load %arg1[%c1_6, %c0_7] : memref<4x3xf32, #tpu.memory_space<smem>>
    %14 = vector.broadcast %13 : f32 to vector<64x128xf32>
    %15 = arith.mulf %14, %2 : vector<64x128xf32>
    %c1_8 = arith.constant 1 : index
    %c1_9 = arith.constant 1 : index
    %16 = memref.load %arg1[%c1_8, %c1_9] : memref<4x3xf32, #tpu.memory_space<smem>>
    %17 = vector.broadcast %16 : f32 to vector<64x128xf32>
    %18 = arith.mulf %17, %2 : vector<64x128xf32>
    %19 = arith.addf %15, %18 : vector<64x128xf32>
    %c1_10 = arith.constant 1 : index
    %c2 = arith.constant 2 : index
    %20 = memref.load %arg1[%c1_10, %c2] : memref<4x3xf32, #tpu.memory_space<smem>>
    %21 = vector.broadcast %20 : f32 to vector<64x128xf32>
    %22 = arith.mulf %21, %9 : vector<64x128xf32>
    %23 = arith.addf %19, %22 : vector<64x128xf32>
    %c1_11 = arith.constant 1 : index
    %24 = memref.load %arg2[%c1_11] : memref<4xf32, #tpu.memory_space<smem>>
    %25 = vector.broadcast %24 : f32 to vector<64x128xf32>
    %26 = arith.mulf %25, %23 : vector<64x128xf32>
    %27 = arith.addf %12, %26 : vector<64x128xf32>
    %c2_12 = arith.constant 2 : index
    %c0_13 = arith.constant 0 : index
    %28 = memref.load %arg1[%c2_12, %c0_13] : memref<4x3xf32, #tpu.memory_space<smem>>
    %29 = vector.broadcast %28 : f32 to vector<64x128xf32>
    %30 = arith.mulf %29, %2 : vector<64x128xf32>
    %c2_14 = arith.constant 2 : index
    %c1_15 = arith.constant 1 : index
    %31 = memref.load %arg1[%c2_14, %c1_15] : memref<4x3xf32, #tpu.memory_space<smem>>
    %32 = vector.broadcast %31 : f32 to vector<64x128xf32>
    %33 = arith.mulf %32, %9 : vector<64x128xf32>
    %34 = arith.addf %30, %33 : vector<64x128xf32>
    %c2_16 = arith.constant 2 : index
    %c2_17 = arith.constant 2 : index
    %35 = memref.load %arg1[%c2_16, %c2_17] : memref<4x3xf32, #tpu.memory_space<smem>>
    %36 = vector.broadcast %35 : f32 to vector<64x128xf32>
    %37 = arith.mulf %36, %23 : vector<64x128xf32>
    %38 = arith.addf %34, %37 : vector<64x128xf32>
    %c2_18 = arith.constant 2 : index
    %39 = memref.load %arg2[%c2_18] : memref<4xf32, #tpu.memory_space<smem>>
    %40 = vector.broadcast %39 : f32 to vector<64x128xf32>
    %41 = arith.mulf %40, %38 : vector<64x128xf32>
    %42 = arith.addf %27, %41 : vector<64x128xf32>
    %c3 = arith.constant 3 : index
    %c0_19 = arith.constant 0 : index
    %43 = memref.load %arg1[%c3, %c0_19] : memref<4x3xf32, #tpu.memory_space<smem>>
    %44 = vector.broadcast %43 : f32 to vector<64x128xf32>
    %45 = arith.mulf %44, %9 : vector<64x128xf32>
    %c3_20 = arith.constant 3 : index
    %c1_21 = arith.constant 1 : index
    %46 = memref.load %arg1[%c3_20, %c1_21] : memref<4x3xf32, #tpu.memory_space<smem>>
    %47 = vector.broadcast %46 : f32 to vector<64x128xf32>
    %48 = arith.mulf %47, %23 : vector<64x128xf32>
    %49 = arith.addf %45, %48 : vector<64x128xf32>
    %c3_22 = arith.constant 3 : index
    %c2_23 = arith.constant 2 : index
    %50 = memref.load %arg1[%c3_22, %c2_23] : memref<4x3xf32, #tpu.memory_space<smem>>
    %51 = vector.broadcast %50 : f32 to vector<64x128xf32>
    %52 = arith.mulf %51, %38 : vector<64x128xf32>
    %53 = arith.addf %49, %52 : vector<64x128xf32>
    %c3_24 = arith.constant 3 : index
    %54 = memref.load %arg2[%c3_24] : memref<4xf32, #tpu.memory_space<smem>>
    %55 = vector.broadcast %54 : f32 to vector<64x128xf32>
    %56 = arith.mulf %55, %53 : vector<64x128xf32>
    %57 = arith.addf %42, %56 : vector<64x128xf32>
    %c32_i32 = arith.constant 32 : i32
    %58 = tpu.dynamic_rotate %53 by %c32_i32 dim 1 : vector<64x128xf32>, i32 -> vector<64x128xf32>
    %59 = arith.addf %57, %58 : vector<64x128xf32>
    %c0_25 = arith.constant 0 : index
    %c0_26 = arith.constant 0 : index
    %60 = vector.load %arg4[%c0_25, %c0_26] : memref<16x64xf32, #tpu.memory_space<vmem>>, vector<16x64xf32>
    %cst = arith.constant dense<0.000000e+00> : vector<16x128xf32>
    %61 = tpu.matmul %60, %59, %cst {dimension_numbers = #tpu.dot_dimension_numbers<[1], [0], [0], [1], [0, 0, 1, 1], [], []>} : vector<16x64xf32>, vector<64x128xf32>, vector<16x128xf32> -> vector<16x128xf32>
    %cst_27 = arith.constant 0.000000e+00 : f32
    %62 = vector.broadcast %cst_27 : f32 to vector<16x128xf32>
    %63 = arith.maximumf %61, %62 : vector<16x128xf32>
    %64 = arith.truncf %63 : vector<16x128xf32> to vector<16x128xbf16>
    %c0_28 = arith.constant 0 : index
    %c0_29 = arith.constant 0 : index
    %65 = vector.load %arg5[%c0_28, %c0_29] : memref<128x128xbf16, #tpu.memory_space<vmem>>, vector<128x128xbf16>
    %cst_30 = arith.constant dense<0.000000e+00> : vector<16x128xf32>
    %66 = tpu.matmul %64, %65, %cst_30 {dimension_numbers = #tpu.dot_dimension_numbers<[1], [0], [0], [1], [0, 0, 1, 1], [], []>} : vector<16x128xbf16>, vector<128x128xbf16>, vector<16x128xf32> -> vector<16x128xf32>
    %c0_31 = arith.constant 0 : index
    %c0_32 = arith.constant 0 : index
    %67 = vector.load %arg6[%c0_31, %c0_32] : memref<1x128xf32, #tpu.memory_space<vmem>>, vector<1x128xf32>
    %68 = vector.broadcast %67 : vector<1x128xf32> to vector<16x128xf32>
    %69 = arith.mulf %66, %68 : vector<16x128xf32>
    %c0_33 = arith.constant 0 : index
    %c0_34 = arith.constant 0 : index
    %70 = vector.load %arg7[%c0_33, %c0_34] : memref<1x128xf32, #tpu.memory_space<vmem>>, vector<1x128xf32>
    %71 = vector.broadcast %70 : vector<1x128xf32> to vector<16x128xf32>
    %72 = arith.addf %69, %71 : vector<16x128xf32>
    %73 = arith.truncf %72 : vector<16x128xf32> to vector<16x128xbf16>
    %c0_35 = arith.constant 0 : index
    %c0_36 = arith.constant 0 : index
    %c0_37 = arith.constant 0 : index
    %74 = vector.load %arg8[%c0_35, %c0_36, %c0_37] : memref<1x16x128xbf16, #tpu.memory_space<vmem>>, vector<1x16x128xbf16>
    %75 = vector.shape_cast %74 : vector<1x16x128xbf16> to vector<16x128xbf16>
    %76 = vector.shape_cast %73 : vector<16x128xbf16> to vector<1x16x128xbf16>
    tpu.vector_store %arg8[%c0_35, %c0_36, %c0_37], %76 {strides = array<i32>} : memref<1x16x128xbf16, #tpu.memory_space<vmem>>, vector<1x16x128xbf16>,
    return
  }
  func.func @transform_0(%arg0: i32) -> (i32, i32) {
    %c0_i32 = arith.constant 0 : i32
    %c0_i32_0 = arith.constant 0 : i32
    %c0_i32_1 = arith.constant 0 : i32
    return %c0_i32, %c0_i32_0 : i32, i32
  }
  func.func @transform_1(%arg0: i32) -> i32 {
    %c0_i32 = arith.constant 0 : i32
    %c0_i32_0 = arith.constant 0 : i32
    return %c0_i32 : i32
  }
  func.func @transform_2(%arg0: i32) -> (i32, i32, i32) {
    %c0_i32 = arith.constant 0 : i32
    %c0_i32_0 = arith.constant 0 : i32
    %c0_i32_1 = arith.constant 0 : i32
    return %arg0, %c0_i32, %c0_i32_0 : i32, i32, i32
  }
  func.func @transform_3(%arg0: i32) -> (i32, i32) {
    %c0_i32 = arith.constant 0 : i32
    %c0_i32_0 = arith.constant 0 : i32
    %c0_i32_1 = arith.constant 0 : i32
    return %c0_i32, %c0_i32_0 : i32, i32
  }
  func.func @transform_4(%arg0: i32) -> (i32, i32) {
    %c0_i32 = arith.constant 0 : i32
    %c0_i32_0 = arith.constant 0 : i32
    %c0_i32_1 = arith.constant 0 : i32
    return %c0_i32, %c0_i32_0 : i32, i32
  }
  func.func @transform_5(%arg0: i32) -> (i32, i32) {
    %c0_i32 = arith.constant 0 : i32
    %c0_i32_0 = arith.constant 0 : i32
    %c0_i32_1 = arith.constant 0 : i32
    return %c0_i32, %c0_i32_0 : i32, i32
  }
  func.func @transform_6(%arg0: i32) -> (i32, i32) {
    %c0_i32 = arith.constant 0 : i32
    %c0_i32_0 = arith.constant 0 : i32
    %c0_i32_1 = arith.constant 0 : i32
    return %c0_i32, %c0_i32_0 : i32, i32
  }
  func.func @transform_7(%arg0: i32) -> (i32, i32, i32) {
    %c0_i32 = arith.constant 0 : i32
    %c0_i32_0 = arith.constant 0 : i32
    %c0_i32_1 = arith.constant 0 : i32
    return %arg0, %c0_i32, %c0_i32_0 : i32, i32, i32
  }
}

module attributes {stable_mosaic.version = 11 : i64} {
  func.func @dag_gap_fc_kernel(%arg0: i32, %arg1: memref<4x3xf32, #tpu.memory_space<smem>>, %arg2: memref<4xf32, #tpu.memory_space<smem>>, %arg3: memref<2x16x128xbf16, #tpu.memory_space<vmem>>, %arg4: memref<128x128xbf16, #tpu.memory_space<vmem>>, %arg5: memref<1x128xf32, #tpu.memory_space<vmem>>, %arg6: memref<2x128xf32, #tpu.memory_space<vmem>>) attributes {dimension_semantics = [#tpu.dimension_semantics<arbitrary>], iteration_bounds = array<i64: 1>, scalar_prefetch = 0 : i64, scratch_operands = 0 : i64, tpu.core_type = #tpu.core_type<tc>, window_params = [{transform_indices = @transform_0, window_bounds = array<i64: 4, 3>}, {transform_indices = @transform_1, window_bounds = array<i64: 4>}, {pipeline_mode = #tpu.pipeline_mode<synchronous>, transform_indices = @transform_2, window_bounds = array<i64: 2, 16, 128>}, {pipeline_mode = #tpu.pipeline_mode<synchronous>, transform_indices = @transform_3, window_bounds = array<i64: 128, 128>}, {pipeline_mode = #tpu.pipeline_mode<synchronous>, transform_indices = @transform_4, window_bounds = array<i64: 1, 128>}, {pipeline_mode = #tpu.pipeline_mode<synchronous>, transform_indices = @transform_5, window_bounds = array<i64: 2, 128>}]} {
    %c0 = arith.constant 0 : index
    %c0_0 = arith.constant 0 : index
    %c0_1 = arith.constant 0 : index
    %0 = vector.load %arg3[%c0, %c0_0, %c0_1] : memref<2x16x128xbf16, #tpu.memory_space<vmem>>, vector<2x16x128xbf16>
    %1 = arith.extf %0 : vector<2x16x128xbf16> to vector<2x16x128xf32>
    %2 = vector.shape_cast %1 : vector<2x16x128xf32> to vector<32x128xf32>
    %c0_2 = arith.constant 0 : index
    %c0_3 = arith.constant 0 : index
    %3 = memref.load %arg1[%c0_2, %c0_3] : memref<4x3xf32, #tpu.memory_space<smem>>
    %4 = vector.broadcast %3 : f32 to vector<32x128xf32>
    %5 = arith.mulf %4, %2 : vector<32x128xf32>
    %c0_4 = arith.constant 0 : index
    %c1 = arith.constant 1 : index
    %6 = memref.load %arg1[%c0_4, %c1] : memref<4x3xf32, #tpu.memory_space<smem>>
    %7 = vector.broadcast %6 : f32 to vector<32x128xf32>
    %8 = arith.mulf %7, %2 : vector<32x128xf32>
    %9 = arith.addf %5, %8 : vector<32x128xf32>
    %c0_5 = arith.constant 0 : index
    %10 = memref.load %arg2[%c0_5] : memref<4xf32, #tpu.memory_space<smem>>
    %11 = vector.broadcast %10 : f32 to vector<32x128xf32>
    %12 = arith.mulf %11, %9 : vector<32x128xf32>
    %c1_6 = arith.constant 1 : index
    %c0_7 = arith.constant 0 : index
    %13 = memref.load %arg1[%c1_6, %c0_7] : memref<4x3xf32, #tpu.memory_space<smem>>
    %14 = vector.broadcast %13 : f32 to vector<32x128xf32>
    %15 = arith.mulf %14, %2 : vector<32x128xf32>
    %c1_8 = arith.constant 1 : index
    %c1_9 = arith.constant 1 : index
    %16 = memref.load %arg1[%c1_8, %c1_9] : memref<4x3xf32, #tpu.memory_space<smem>>
    %17 = vector.broadcast %16 : f32 to vector<32x128xf32>
    %18 = arith.mulf %17, %2 : vector<32x128xf32>
    %19 = arith.addf %15, %18 : vector<32x128xf32>
    %c1_10 = arith.constant 1 : index
    %c2 = arith.constant 2 : index
    %20 = memref.load %arg1[%c1_10, %c2] : memref<4x3xf32, #tpu.memory_space<smem>>
    %21 = vector.broadcast %20 : f32 to vector<32x128xf32>
    %22 = arith.mulf %21, %9 : vector<32x128xf32>
    %23 = arith.addf %19, %22 : vector<32x128xf32>
    %c1_11 = arith.constant 1 : index
    %24 = memref.load %arg2[%c1_11] : memref<4xf32, #tpu.memory_space<smem>>
    %25 = vector.broadcast %24 : f32 to vector<32x128xf32>
    %26 = arith.mulf %25, %23 : vector<32x128xf32>
    %27 = arith.addf %12, %26 : vector<32x128xf32>
    %c2_12 = arith.constant 2 : index
    %c0_13 = arith.constant 0 : index
    %28 = memref.load %arg1[%c2_12, %c0_13] : memref<4x3xf32, #tpu.memory_space<smem>>
    %29 = vector.broadcast %28 : f32 to vector<32x128xf32>
    %30 = arith.mulf %29, %2 : vector<32x128xf32>
    %c2_14 = arith.constant 2 : index
    %c1_15 = arith.constant 1 : index
    %31 = memref.load %arg1[%c2_14, %c1_15] : memref<4x3xf32, #tpu.memory_space<smem>>
    %32 = vector.broadcast %31 : f32 to vector<32x128xf32>
    %33 = arith.mulf %32, %9 : vector<32x128xf32>
    %34 = arith.addf %30, %33 : vector<32x128xf32>
    %c2_16 = arith.constant 2 : index
    %c2_17 = arith.constant 2 : index
    %35 = memref.load %arg1[%c2_16, %c2_17] : memref<4x3xf32, #tpu.memory_space<smem>>
    %36 = vector.broadcast %35 : f32 to vector<32x128xf32>
    %37 = arith.mulf %36, %23 : vector<32x128xf32>
    %38 = arith.addf %34, %37 : vector<32x128xf32>
    %c2_18 = arith.constant 2 : index
    %39 = memref.load %arg2[%c2_18] : memref<4xf32, #tpu.memory_space<smem>>
    %40 = vector.broadcast %39 : f32 to vector<32x128xf32>
    %41 = arith.mulf %40, %38 : vector<32x128xf32>
    %42 = arith.addf %27, %41 : vector<32x128xf32>
    %c3 = arith.constant 3 : index
    %c0_19 = arith.constant 0 : index
    %43 = memref.load %arg1[%c3, %c0_19] : memref<4x3xf32, #tpu.memory_space<smem>>
    %44 = vector.broadcast %43 : f32 to vector<32x128xf32>
    %45 = arith.mulf %44, %9 : vector<32x128xf32>
    %c3_20 = arith.constant 3 : index
    %c1_21 = arith.constant 1 : index
    %46 = memref.load %arg1[%c3_20, %c1_21] : memref<4x3xf32, #tpu.memory_space<smem>>
    %47 = vector.broadcast %46 : f32 to vector<32x128xf32>
    %48 = arith.mulf %47, %23 : vector<32x128xf32>
    %49 = arith.addf %45, %48 : vector<32x128xf32>
    %c3_22 = arith.constant 3 : index
    %c2_23 = arith.constant 2 : index
    %50 = memref.load %arg1[%c3_22, %c2_23] : memref<4x3xf32, #tpu.memory_space<smem>>
    %51 = vector.broadcast %50 : f32 to vector<32x128xf32>
    %52 = arith.mulf %51, %38 : vector<32x128xf32>
    %53 = arith.addf %49, %52 : vector<32x128xf32>
    %c3_24 = arith.constant 3 : index
    %54 = memref.load %arg2[%c3_24] : memref<4xf32, #tpu.memory_space<smem>>
    %55 = vector.broadcast %54 : f32 to vector<32x128xf32>
    %56 = arith.mulf %55, %53 : vector<32x128xf32>
    %57 = arith.addf %42, %56 : vector<32x128xf32>
    %c64_i32 = arith.constant 64 : i32
    %58 = tpu.dynamic_rotate %53 by %c64_i32 dim 1 : vector<32x128xf32>, i32 -> vector<32x128xf32>
    %59 = arith.addf %57, %58 : vector<32x128xf32>
    %60 = vector.shape_cast %59 : vector<32x128xf32> to vector<2x16x128xf32>
    %cst = arith.constant dense<0.000000e+00> : vector<2x128xf32>
    %61 = vector.multi_reduction <add>, %60, %cst [1] : vector<2x16x128xf32> to vector<2x128xf32>
    %cst_25 = arith.constant 6.250000e-02 : f32
    %62 = vector.broadcast %cst_25 : f32 to vector<2x128xf32>
    %63 = arith.mulf %61, %62 : vector<2x128xf32>
    %64 = arith.truncf %63 : vector<2x128xf32> to vector<2x128xbf16>
    %c0_26 = arith.constant 0 : index
    %c0_27 = arith.constant 0 : index
    %65 = vector.load %arg4[%c0_26, %c0_27] : memref<128x128xbf16, #tpu.memory_space<vmem>>, vector<128x128xbf16>
    %cst_28 = arith.constant dense<0.000000e+00> : vector<2x128xf32>
    %66 = tpu.matmul %64, %65, %cst_28 {dimension_numbers = #tpu.dot_dimension_numbers<[1], [0], [0], [1], [0, 0, 1, 1], [], []>} : vector<2x128xbf16>, vector<128x128xbf16>, vector<2x128xf32> -> vector<2x128xf32>
    %c0_29 = arith.constant 0 : index
    %c0_30 = arith.constant 0 : index
    %67 = vector.load %arg5[%c0_29, %c0_30] : memref<1x128xf32, #tpu.memory_space<vmem>>, vector<1x128xf32>
    %68 = vector.broadcast %67 : vector<1x128xf32> to vector<2x128xf32>
    %69 = arith.addf %66, %68 : vector<2x128xf32>
    %c0_31 = arith.constant 0 : index
    %c0_32 = arith.constant 0 : index
    %70 = vector.load %arg6[%c0_31, %c0_32] : memref<2x128xf32, #tpu.memory_space<vmem>>, vector<2x128xf32>
    tpu.vector_store %arg6[%c0_31, %c0_32], %69 {strides = array<i32>} : memref<2x128xf32, #tpu.memory_space<vmem>>, vector<2x128xf32>,
    return
  }
  func.func @transform_0(%arg0: i32) -> (i32, i32) {
    %c0_i32 = arith.constant 0 : i32
    %c0_i32_0 = arith.constant 0 : i32
    %c0_i32_1 = arith.constant 0 : i32
    return %c0_i32, %c0_i32_0 : i32, i32
  }
  func.func @transform_1(%arg0: i32) -> i32 {
    %c0_i32 = arith.constant 0 : i32
    %c0_i32_0 = arith.constant 0 : i32
    return %c0_i32 : i32
  }
  func.func @transform_2(%arg0: i32) -> (i32, i32, i32) {
    %c0_i32 = arith.constant 0 : i32
    %c0_i32_0 = arith.constant 0 : i32
    %c0_i32_1 = arith.constant 0 : i32
    %c0_i32_2 = arith.constant 0 : i32
    return %c0_i32, %c0_i32_0, %c0_i32_1 : i32, i32, i32
  }
  func.func @transform_3(%arg0: i32) -> (i32, i32) {
    %c0_i32 = arith.constant 0 : i32
    %c0_i32_0 = arith.constant 0 : i32
    %c0_i32_1 = arith.constant 0 : i32
    return %c0_i32, %c0_i32_0 : i32, i32
  }
  func.func @transform_4(%arg0: i32) -> (i32, i32) {
    %c0_i32 = arith.constant 0 : i32
    %c0_i32_0 = arith.constant 0 : i32
    %c0_i32_1 = arith.constant 0 : i32
    return %c0_i32, %c0_i32_0 : i32, i32
  }
  func.func @transform_5(%arg0: i32) -> (i32, i32) {
    %c0_i32 = arith.constant 0 : i32
    %c0_i32_0 = arith.constant 0 : i32
    %c0_i32_1 = arith.constant 0 : i32
    return %c0_i32, %c0_i32_0 : i32, i32
  }
}

</mosaic_0001>

<bundles_post_ra>
// kernel: search_distribution_dag_forward.6
= control target key start
LH: loop header
LB: loop body
LE: loop exit
PB: predicated region body
PF: predicated region fallthrough
CT: control target
= control target key end

     0   :  { %12 = vsyncpa [#allocation3], 0  ;;  %s1568_s0 = inlined_call_operand.vmem [shape: f32[4,3], index: 0, kind: input, shape index: {}]   ;;  %s1569_s1 = inlined_call_operand.vmem [shape: f32[4], index: 1, kind: input, shape index: {}]   ;;  %s1570_s2 = inlined_call_operand.vmem [shape: bf16[2,64,128], index: 2, kind: input, shape index: {}]   ;;  %s1571_s3 = inlined_call_operand.vmem [shape: f32[16,64], index: 3, kind: input, shape index: {}]   ;;  %s1572_s4 = inlined_call_operand.vmem [shape: bf16[128,128], index: 4, kind: input, shape index: {}]   ;;  %s1573_s5 = inlined_call_operand.vmem [shape: f32[1,128], index: 5, kind: input, shape index: {}]   ;;  %s1574_s6 = inlined_call_operand.vmem [shape: f32[1,128], index: 6, kind: input, shape index: {}]   ;;  %s1575_s7 = inlined_call_operand.vmem [shape: bf16[2,16,128], index: 7, kind: output, shape index: {}]  }
   0x1   :  { %13 = vsyncpa [#allocation5], 0  ;;  %s1149_s24 = smov 0  }
   0x2 LB: > { %s1155_s25 = sadd.s32 4294967295, %s1102_s24   ;;  %p876_p0 = scmp.ge.s32.totalorder %s1102_s24, 1  ;;  %s1102_s24 = sphi %s1149_s24, %s19_s24  }
   0x3   : > { %p202_p1 = scmp.lt.s32.totalorder %s1102_s24, 3  ;;  %s215_s28 = sshll.u32 %s1568_s0, 4  ;;  %s216_s28 = int_to_ptr.vmem [resolvable:$true] %s215_s28 }
   0x4   : > { %p1576_p3 = scmp.eq.s32.totalorder %s1155_s25, 0  ;;  %s226_s9 = sshll.u32 %s1569_s1, 4  ;;  %s227_s9 = int_to_ptr.vmem [resolvable:$true] %s226_s9 }
   0x5   : > { %p1162_p2 = pnand %p876_p0, %p202_p1  ;;  %s1058_s11 = scalar_lea.vmem %s216_s28, 64 }
   0x6   : > { %p1059_p6 = scmp.ne.s32.totalorder %s216_s28, %s1058_s11  ;;  %p1066_p10 = scmp.lt.s32.totalorder %s216_s28, %s216_s28 }
   0x7   : > { %s1578_s29 = scalar_select %p1162_p2, 1, 0 }
   0x8   : > { %p1026_p4 = pneg %p1162_p2  ;;  %p1067_p11 = scmp.lt.s32.totalorder %s1058_s11, %s1058_s11 }
   0xa   : > { %p1174_p5 = pnand %p1576_p3, %p1026_p4  ;;  %p1068_p12 = por %p1067_p11, %p1066_p10 }
   0xc   : > { %p1060_p7 = pneg %p1174_p5 }
   0xe   : > { %p1061_p8 = pnand %p1060_p7, %p1059_p6 }
  0x10   : > { %p1062_p9 = pneg %p1061_p8 }
  0x12   : > { %p1069_p13 = pnand %p1068_p12, %p1062_p9 }
  0x14   : > { %1072 = shalt.err (!%p1069_p13)
}
  0x15   : > { %s1104_s12 = smov [#allocation2]   ;;  %s1073_s13 = scalar_lea.vmem %s227_s9, 16 }
  0x16   : > { %1029 = dma.vmem_to_smem (!%p1174_p5), %s216_s28, 64, %s1104_s12, [#allocation3]  }
  0x17   : > { %p1074_p0 = scmp.ne.s32.totalorder %s227_s9, %s1073_s13  ;;  %p1081_p3 = scmp.lt.s32.totalorder %s227_s9, %s227_s9 }
  0x18   : > { %p1082_p2 = scmp.lt.s32.totalorder %s1073_s13, %s1073_s13 }
  0x19   : > { %p1076_p1 = pnand %p1074_p0, %p1060_p7 }
  0x1a   : > { %p1083_p6 = por %p1082_p2, %p1081_p3 }
  0x1b   : > { %p1077_p4 = pneg %p1076_p1 }
  0x1d   : > { %p1084_p8 = pnand %p1083_p6, %p1077_p4 }
  0x1f   : > { %1087 = shalt.err (!%p1084_p8)
}
  0x20   : > { %s1105_s14 = smov [#allocation4]   ;;  %p1580_p9 = scmp.ne.s32.totalorder %s1578_s29, 0 }
  0x21   : > { %1032 = dma.vmem_to_smem (!%p1174_p5), %s227_s9, 16, %s1105_s14, [#allocation5]  }
  0x22   : > { %259 = sbr.rel (%p1580_p9) target bundleno = 666 (0x29a), region = 48  ;;  %p1581_p10 = scmp.eq.s32.totalorder (!%p1580_p9), %s1155_s25, 0 }
  0x29   : > { %1093 = dma.done.wait (%p1581_p10), [#allocation3], 64   ;;  %p1582_p11 = pmov %p1581_p10 }
  0x2a   : > { %p1583_p7 = pmov %p1581_p10 }
  0x2b   : > { %1095 = vsyncadd (%p1582_p11), [#allocation3], 4294967232 }
  0x2c   : > { %1097 = dma.done.wait (%p1583_p7), [#allocation5], 16   ;;  %p1584_p2 = pmov %p1583_p7 }
  0x2e   : > { %1099 = vsyncadd (%p1584_p2), [#allocation5], 4294967280 }
  0x2f   : > { %269 = sfence }
  0x30   : > { %p296_p3 = scmp.lt.s32.totalorder %s1155_s25, 1  ;;  %s323_s15 = sld [smem:[#allocation2]]  ;;  %vm579_vm0 = vcmask 523264   ;;  %vm1108_vm1 = vmmov 0  }
  0x31   : > { %s887_s16 = sld [smem:[#allocation2 + $0x1]]  ;;  %s888_s17 = sld [smem:[#allocation2 + $0x80]] }
  0x32   : > { %s1586_s25 = smov (!%p296_p3, %s1155_s25), 1  ;;  %s889_s18 = sld [smem:[#allocation2 + $0x81]] }
  0x33   : > { %s890_s19 = sld [smem:[#allocation2 + $0x82]]  ;;  %s916_s20 = sshll.u32 %s1586_s25, 5 }
  0x34   : > { %s892_s21 = sld [smem:[#allocation2 + $0x100]]  ;;  %s1202_s26 = scalar_lea.vmem %s1570_s2, %s916_s20 }
  0x35   : > { %s893_s27 = sld [smem:[#allocation2 + $0x101]]  ;;  %v941_v0 = vld [vmem:[%s1202_s26 + $0x8] sm:$0xff]   ;;  %s894_s28 = sld [smem:[#allocation2 + $0x102]]  ;;  %v921_v2 = vld [vmem:[%s1202_s26] sm:$0xff]   ;;  %v942_v7 = vld [vmem:[%s1202_s26 + $0x10] sm:$0xff]  }
  0x36   : > { %v1205_v1 = vstv %s323_s15  ;;  %s896_s29 = sld [smem:[#allocation2 + $0x180]]  ;;  %v926_v3 = vunpack.c.l.bf16 %v941_v0  ;;  %v927_v4 = vunpack.c.h.bf16 %v941_v0  ;;  %s897_s30 = sld [smem:[#allocation2 + $0x181]]  ;;  %v922_v8 = vunpack.c.l.bf16 %v921_v2 }
  0x37   : > { %v1208_v5 = vstv %s887_s16  ;;  %v1210_v6 = vstv %s888_s17  ;;  %s898_s8 = sld [smem:[#allocation2 + $0x182]]  ;;  %s899_s9 = sld [smem:[#allocation4 + $0x3]]  ;;  %v1213_v9 = vunpack.c.h.bf16 %v921_v2  ;;  %v1215_v10 = vunpack.c.h.bf16 %v942_v7 }
  0x38   : > { %v1217_v11 = vunpack.c.l.bf16 %v942_v7  ;;  %v327_v12 = vmul.f32 %v926_v3, %v1205_v1  ;;  %v337_v13 = vmul.f32 %v926_v3, %v1208_v5  ;;  %v365_v14 = vmul.f32 %v926_v3, %v1210_v6  ;;  %s1106_s10 = smov 32   ;;  %s1363_s11 = sld [smem:[#allocation4]] }
  0x39   : > { %v1222_v15 = vstv %s889_s18  ;;  %v1225_v17 = vstv %s890_s19  ;;  %v325_v19 = vmul.f32 %v922_v8, %v1205_v1  ;;  %v335_v23 = vmul.f32 %v922_v8, %v1208_v5  ;;  %s1393_s12 = sld [smem:[#allocation4 + $0x1]]  ;;  %s1399_s13 = sld [smem:[#allocation4 + $0x2]] }
  0x3a   : > { %v375_v16 = vmul.f32 %v926_v3, %v1222_v15  ;;  %v1227_v18 = vstv %s892_s21  ;;  %v1230_v20 = vadd.f32 %v337_v13, %v327_v12  ;;  %v363_v27 = vmul.f32 %v922_v8, %v1210_v6  ;;  %s917_s17 = sshll.u32 %s1586_s25, 3 }
  0x3b   : > { %v429_v21 = vmul.f32 %v926_v3, %v1227_v18  ;;  %v1233_v22 = vstv %s893_s27  ;;  %v1236_v25 = vstv %s894_s28  ;;  %v1253_v34 = vadd.f32 %v335_v23, %v325_v19  ;;  %s305_s20 = scalar_lea.vmem %s1575_s7, %s917_s17 }
  0x3c   : > { %v383_v24 = vadd.f32 %v375_v16, %v365_v14  ;;  %v1238_v26 = vstv %s896_s29  ;;  %v393_v28 = vmul.f32 %v1225_v17, %v1230_v20  ;;  %v439_v29 = vmul.f32 %v1233_v22, %v1230_v20 }
  0x3d   : > { %v493_v30 = vmul.f32 %v1238_v26, %v1230_v20  ;;  %v1247_v31 = vstv %s897_s30  ;;  %v1249_v32 = vstv %s898_s8  ;;  %v1251_v33 = vstv %s899_s9 }
  0x3e   : > { %v373_v35 = vmul.f32 %v922_v8, %v1222_v15  ;;  %v1256_v36 = vadd.f32 %v393_v28, %v383_v24  ;;  %v447_v37 = vadd.f32 %v439_v29, %v429_v21  ;;  %v427_v38 = vmul.f32 %v922_v8, %v1227_v18 }
  0x3f   : > { %v328_v39 = vmul.f32 %v927_v4, %v1205_v1  ;;  %v391_v41 = vmul.f32 %v1225_v17, %v1253_v34  ;;  %v437_v42 = vmul.f32 %v1233_v22, %v1253_v34  ;;  %v491_v43 = vmul.f32 %v1238_v26, %v1253_v34 }
  0x40   : > { %v381_v40 = vadd.f32 %v373_v35, %v363_v27  ;;  %v457_v44 = vmul.f32 %v1236_v25, %v1256_v36  ;;  %v503_v45 = vmul.f32 %v1247_v31, %v1256_v36  ;;  %v338_v46 = vmul.f32 %v927_v4, %v1208_v5 }
  0x41   : > { %v366_v47 = vmul.f32 %v927_v4, %v1210_v6  ;;  %v445_v49 = vadd.f32 %v437_v42, %v427_v38  ;;  %v376_v50 = vmul.f32 %v927_v4, %v1222_v15  ;;  %v430_v51 = vmul.f32 %v927_v4, %v1227_v18 }
  0x42   : > { %v1272_v48 = vadd.f32 %v391_v41, %v381_v40  ;;  %v1276_v52 = vadd.f32 %v457_v44, %v447_v37  ;;  %v511_v53 = vadd.f32 %v503_v45, %v493_v30  ;;  %v1278_v54 = vadd.f32 %v338_v46, %v328_v39 }
  0x43   : > { %v326_v55 = vmul.f32 %v1213_v9, %v1205_v1  ;;  %v384_v58 = vadd.f32 %v376_v50, %v366_v47  ;;  %v336_v59 = vmul.f32 %v1213_v9, %v1208_v5  ;;  %v364_v4 = vmul.f32 %v1213_v9, %v1210_v6 }
  0x44   : > { %v455_v56 = vmul.f32 %v1236_v25, %v1272_v48  ;;  %v501_v57 = vmul.f32 %v1247_v31, %v1272_v48  ;;  %v521_v60 = vmul.f32 %v1249_v32, %v1276_v52  ;;  %v394_v61 = vmul.f32 %v1225_v17, %v1278_v54 }
  0x45   : > { %v440_v62 = vmul.f32 %v1233_v22, %v1278_v54  ;;  %v494_v63 = vmul.f32 %v1238_v26, %v1278_v54  ;;  %v1298_v3 = vadd.f32 %v336_v59, %v326_v55  ;;  %v374_v13 = vmul.f32 %v1213_v9, %v1222_v15  ;;  %v943_v55 = vld [vmem:[%s1202_s26 + $0x18] sm:$0xff]  }
  0x46   : > { %v1296_v0 = vadd.f32 %v455_v56, %v445_v49  ;;  %v509_v2 = vadd.f32 %v501_v57, %v491_v43  ;;  %v529_v7 = vadd.f32 %v521_v60, %v511_v53  ;;  %v1302_v8 = vadd.f32 %v394_v61, %v384_v58 }
  0x47   : > { %v448_v12 = vadd.f32 %v440_v62, %v430_v51  ;;  %v392_v16 = vmul.f32 %v1225_v17, %v1298_v3  ;;  %v428_v19 = vmul.f32 %v1213_v9, %v1227_v18  ;;  %v438_v21 = vmul.f32 %v1233_v22, %v1298_v3 }
  0x48   : > { %v519_v14 = vmul.f32 %v1249_v32, %v1296_v0  ;;  %557 = vrot.lane.b32.xlu1 %v529_v7, %s1106_s10  ;;  %v1316_v23 = vmul.f32 %v1251_v33, %v529_v7  ;;  %v458_v24 = vmul.f32 %v1236_v25, %v1302_v8  ;;  %v504_v27 = vmul.f32 %v1247_v31, %v1302_v8 }
  0x49   : > { %v382_v28 = vadd.f32 %v374_v13, %v364_v4  ;;  %v446_v30 = vadd.f32 %v438_v21, %v428_v19  ;;  %v492_v9 = vmul.f32 %v1238_v26, %v1298_v3  ;;  %v330_v35 = vmul.f32 %v1215_v10, %v1205_v1 }
  0x4a   : > { %v527_v29 = vadd.f32 %v519_v14, %v509_v2  ;;  %v1326_v37 = vadd.f32 %v458_v24, %v448_v12  ;;  %v512_v38 = vadd.f32 %v504_v27, %v494_v63  ;;  %v340_v40 = vmul.f32 %v1215_v10, %v1208_v5 }
  0x4b   : > { %v1328_v39 = vadd.f32 %v392_v16, %v382_v28  ;;  %v368_v42 = vmul.f32 %v1215_v10, %v1210_v6  ;;  %v378_v43 = vmul.f32 %v1215_v10, %v1222_v15  ;;  %v432_v44 = vmul.f32 %v1215_v10, %v1227_v18 }
  0x4c   : > { %553 = vrot.lane.b32.xlu0 %v527_v29, %s1106_s10  ;;  %v1334_v41 = vmul.f32 %v1251_v33, %v527_v29  ;;  %v522_v45 = vmul.f32 %v1249_v32, %v1326_v37  ;;  %v1348_v49 = vadd.f32 %v340_v40, %v330_v35  ;;  %v329_v51 = vmul.f32 %v1217_v11, %v1205_v1 }
  0x4d   : > { %v456_v46 = vmul.f32 %v1236_v25, %v1328_v39  ;;  %v502_v47 = vmul.f32 %v1247_v31, %v1328_v39  ;;  %v386_v50 = vadd.f32 %v378_v43, %v368_v42  ;;  %v339_v53 = vmul.f32 %v1217_v11, %v1208_v5 }
  0x4e   : > { %v367_v10 = vmul.f32 %v1217_v11, %v1210_v6  ;;  %v1357_v56 = vadd.f32 %v522_v45, %v512_v38  ;;  %v396_v59 = vmul.f32 %v1225_v17, %v1348_v49  ;;  %v442_v60 = vmul.f32 %v1233_v22, %v1348_v49 }
  0x4f   : > { %v1359_v57 = vadd.f32 %v456_v46, %v446_v30  ;;  %v510_v58 = vadd.f32 %v502_v47, %v492_v9  ;;  %v496_v61 = vmul.f32 %v1238_v26, %v1348_v49  ;;  %v1369_v62 = vadd.f32 %v339_v53, %v329_v51 }
  0x50   : > { %v377_v63 = vmul.f32 %v1217_v11, %v1222_v15  ;;  %559 = vrot.lane.b32.xlu1 %v1357_v56, %s1106_s10  ;;  %v1377_v4 = vadd.f32 %v396_v59, %v386_v50  ;;  %v431_v7 = vmul.f32 %v1217_v11, %v1227_v18  ;;  %v935_v12 = vunpack.c.h.bf16 %v943_v55 }
  0x51   : > { %v520_v2 = vmul.f32 %v1249_v32, %v1359_v57  ;;  %v450_v13 = vadd.f32 %v442_v60, %v432_v44  ;;  %v395_v16 = vmul.f32 %v1225_v17, %v1369_v62  ;;  %v441_v19 = vmul.f32 %v1233_v22, %v1369_v62 }
  0x52   : > { %v385_v14 = vadd.f32 %v377_v63, %v367_v10  ;;  %v460_v24 = vmul.f32 %v1236_v25, %v1377_v4  ;;  %v506_v27 = vmul.f32 %v1247_v31, %v1377_v4  ;;  %v495_v11 = vmul.f32 %v1238_v26, %v1369_v62 }
  0x53   : > { %v1385_v21 = vadd.f32 %v520_v2, %v510_v58  ;;  %v449_v29 = vadd.f32 %v441_v19, %v431_v7  ;;  %v332_v30 = vmul.f32 %v935_v12, %v1205_v1  ;;  %v342_v9 = vmul.f32 %v935_v12, %v1208_v5 }
  0x54   : > { %v1395_v28 = vadd.f32 %v395_v16, %v385_v14  ;;  %v1403_v35 = vadd.f32 %v460_v24, %v450_v13  ;;  %v514_v38 = vadd.f32 %v506_v27, %v496_v61  ;;  %v370_v40 = vmul.f32 %v935_v12, %v1210_v6 }
  0x55   : > { %555 = vrot.lane.b32.xlu0 %v1385_v21, %s1106_s10  ;;  %v380_v42 = vmul.f32 %v935_v12, %v1222_v15  ;;  %v1411_v45 = vadd.f32 %v342_v9, %v332_v30  ;;  %v434_v46 = vmul.f32 %v935_v12, %v1227_v18  ;;  %v934_v51 = vunpack.c.l.bf16 %v943_v55 }
  0x56   : > { %v459_v43 = vmul.f32 %v1236_v25, %v1395_v28  ;;  %v505_v44 = vmul.f32 %v1247_v31, %v1395_v28  ;;  %v524_v47 = vmul.f32 %v1249_v32, %v1403_v35  ;;  %v1417_v53 = vstv %s1363_s11 }
  0x57   : > { %v388_v50 = vadd.f32 %v380_v42, %v370_v40  ;;  %v398_v59 = vmul.f32 %v1225_v17, %v1411_v45  ;;  %v444_v60 = vmul.f32 %v1233_v22, %v1411_v45  ;;  %v498_v63 = vmul.f32 %v1238_v26, %v1411_v45 }
  0x58   : > { %v1419_v10 = vadd.f32 %v459_v43, %v449_v29  ;;  %v513_v58 = vadd.f32 %v505_v44, %v495_v11  ;;  %v532_v61 = vadd.f32 %v524_v47, %v514_v38  ;;  %v331_v2 = vmul.f32 %v934_v51, %v1205_v1 }
  0x59   : > { %v341_v55 = vmul.f32 %v934_v51, %v1208_v5  ;;  %v1431_v12 = vadd.f32 %v398_v59, %v388_v50  ;;  %v452_v13 = vadd.f32 %v444_v60, %v434_v46  ;;  %v369_v14 = vmul.f32 %v934_v51, %v1210_v6 }
  0x5a   : > { %v523_v7 = vmul.f32 %v1249_v32, %v1419_v10  ;;  %563 = vrot.lane.b32.xlu1 %v532_v61, %s1106_s10  ;;  %v379_v19 = vmul.f32 %v934_v51, %v1222_v15  ;;  %v433_v24 = vmul.f32 %v934_v51, %v1227_v18  ;;  %v1440_v27 = vstv %s1393_s12 }
  0x5b   : > { %v1435_v16 = vadd.f32 %v341_v55, %v331_v2  ;;  %v462_v5 = vmul.f32 %v1236_v25, %v1431_v12  ;;  %v508_v11 = vmul.f32 %v1247_v31, %v1431_v12  ;;  %v1447_v29 = vstv %s1399_s13 }
  0x5c   : > { %v531_v1 = vadd.f32 %v523_v7, %v513_v58  ;;  %v387_v6 = vadd.f32 %v379_v19, %v369_v14  ;;  %v355_v40 = vmul.f32 %v1417_v53, %v1230_v20  ;;  %v411_v42 = vmul.f32 %v1440_v27, %v1256_v36 }
  0x5d   : > { %v397_v30 = vmul.f32 %v1225_v17, %v1435_v16  ;;  %v443_v15 = vmul.f32 %v1233_v22, %v1435_v16  ;;  %v497_v18 = vmul.f32 %v1238_v26, %v1435_v16  ;;  %v470_v9 = vadd.f32 %v462_v5, %v452_v13 }
  0x5e   : > { %561 = vrot.lane.b32.xlu0 %v531_v1, %s1106_s10  ;;  %v516_v38 = vadd.f32 %v508_v11, %v498_v63  ;;  %v475_v17 = vmul.f32 %v1447_v29, %v1276_v52  ;;  %v353_v22 = vmul.f32 %v1417_v53, %v1253_v34  ;;  %v419_v46 = vadd.f32 %v411_v42, %v355_v40 }
  0x5f   : > { %v405_v43 = vadd.f32 %v397_v30, %v387_v6  ;;  %v451_v44 = vadd.f32 %v443_v15, %v433_v24  ;;  %v526_v26 = vmul.f32 %v1249_v32, %v470_v9  ;;  %v409_v47 = vmul.f32 %v1440_v27, %v1272_v48 }
  0x60   : > { %v473_v20 = vmul.f32 %v1447_v29, %v1296_v0  ;;  %v356_v51 = vmul.f32 %v1417_v53, %v1278_v54  ;;  %v412_v52 = vmul.f32 %v1440_v27, %v1302_v8  ;;  %v483_v58 = vadd.f32 %v475_v17, %v419_v46  ;;  %v1051_v17 = vld [vmem:[%s1572_s4 + $0x8] sm:$0xff]  }
  0x61   : > { %v461_v50 = vmul.f32 %v1236_v25, %v405_v43  ;;  %v507_v36 = vmul.f32 %v1247_v31, %v405_v43  ;;  %v534_v34 = vadd.f32 %v526_v26, %v516_v38  ;;  %v417_v59 = vadd.f32 %v409_v47, %v353_v22  ;;  %v1054_v26 = vld [vmem:[%s1572_s4 + $0x20] sm:$0xff]   ;;  %v1055_v46 = vld [vmem:[%s1572_s4 + $0x28] sm:$0xff]   ;;  %v1056_v47 = vld [vmem:[%s1572_s4 + $0x30] sm:$0xff]  }
  0x62   : > { %v476_v60 = vmul.f32 %v1447_v29, %v1326_v37  ;;  %v420_v2 = vadd.f32 %v412_v52, %v356_v51  ;;  %v540_v25 = vmul.f32 %v1251_v33, %v1357_v56  ;;  %v1481_v31 = vadd.f32 %v1316_v23, %v483_v58 }
  0x63   : > { %v469_v48 = vadd.f32 %v461_v50, %v451_v44  ;;  %v515_v63 = vadd.f32 %v507_v36, %v497_v18  ;;  %567 = vrot.lane.b32.xlu1 %v534_v34, %s1106_s10  ;;  %v481_v54 = vadd.f32 %v473_v20, %v417_v59  ;;  %v354_v0 = vmul.f32 %v1417_v53, %v1298_v3 }
  0x64   : > { %v410_v8 = vmul.f32 %v1440_v27, %v1328_v39  ;;  %v484_v55 = vadd.f32 %v476_v60, %v420_v2  ;;  %v474_v7 = vmul.f32 %v1447_v29, %v1359_v57  ;;  %v538_v56 = vmul.f32 %v1251_v33, %v1385_v21 }
  0x65   : > { %v525_v37 = vmul.f32 %v1249_v32, %v469_v48  ;;  %v1493_v13 = vadd.f32 %v1334_v41, %v481_v54  ;;  %v358_v14 = vmul.f32 %v1417_v53, %v1348_v49  ;;  %v414_v3 = vmul.f32 %v1440_v27, %v1377_v4 }
  0x66   : > { %v418_v23 = vadd.f32 %v410_v8, %v354_v0  ;;  %v548_v19 = vadd.f32 %v540_v25, %v484_v55  ;;  %v478_v32 = vmul.f32 %v1447_v29, %v1403_v35  ;;  %v542_v57 = vmul.f32 %v1251_v33, %v532_v61 }
  0x67   : > { %v533_v39 = vadd.f32 %v525_v37, %v515_v63  ;;  %v422_v5 = vadd.f32 %v414_v3, %v358_v14  ;;  %v357_v41 = vmul.f32 %v1417_v53, %v1369_v62  ;;  %v413_v21 = vmul.f32 %v1440_v27, %v1395_v28 }
  0x68   : > { %v482_v24 = vadd.f32 %v474_v7, %v418_v23  ;;  %v477_v49 = vmul.f32 %v1447_v29, %v1419_v10  ;;  %v541_v4 = vmul.f32 %v1251_v33, %v531_v1  ;;  %v360_v35 = vmul.f32 %v1417_v53, %v1411_v45  ;;  %v577_v45 = vld [vmem:[%s1571_s3] sm:$0xff] }
  0x69   : > { %565 = vrot.lane.b32.xlu0 %v533_v39, %s1106_s10  ;;  %v416_v61 = vmul.f32 %v1440_v27, %v1431_v12  ;;  %v486_v6 = vadd.f32 %v478_v32, %v422_v5  ;;  %v421_v30 = vadd.f32 %v413_v21, %v357_v41  ;;  %v480_v62 = vmul.f32 %v1447_v29, %v470_v9  ;;  %v1050_v12 = vld [vmem:[%s1572_s4] sm:$0xff]  }
  0x6a   : > { %v546_v11 = vadd.f32 %v538_v56, %v482_v24  ;;  %v544_v28 = vmul.f32 %v1251_v33, %v534_v34  ;;  %v359_v18 = vmul.f32 %v1417_v53, %v1435_v16  ;;  %v415_v10 = vmul.f32 %v1440_v27, %v405_v43  ;;  %979 = vmatprep.mubr.msk.f32.mxu0 %vm579_vm0, %v577_v45  ;;  %v578_v56 = vld [vmem:[%s1571_s3 + $0x8] sm:$0xff]  ;;  %v910_v32 = vld [vmem:[%s1573_s5] ss:$0 sm:$0xff] }
  0x6b   : > { %v424_v15 = vadd.f32 %v416_v61, %v360_v35  ;;  %v550_v1 = vadd.f32 %v542_v57, %v486_v6  ;;  %v485_v38 = vadd.f32 %v477_v49, %v421_v30  ;;  %v479_v9 = vmul.f32 %v1447_v29, %v469_v48  ;;  %v1053_v29 = vld [vmem:[%s1572_s4 + $0x18] sm:$0xff]   ;;  %v911_v41 = vld [vmem:[%s1574_s6] ss:$0 sm:$0xff] }
  0x6c   : > { %v543_v40 = vmul.f32 %v1251_v33, %v533_v39  ;;  %v423_v44 = vadd.f32 %v415_v10, %v359_v18  ;;  %v1107_v16 = vmov 0.0   ;;  %v1052_v33 = vld [vmem:[%s1572_s4 + $0x10] sm:$0xff]  }
  0x6d   : > { %v488_v42 = vadd.f32 %v480_v62, %v424_v15  ;;  %v549_v53 = vadd.f32 %v541_v4, %v485_v38  ;;  %982 = vmatprep.subr.bf16.mxu1 %v1107_v16  ;;  %998 = vmatprep.mubr.msk.bf16.mxu1 %vm1108_vm1, %v1107_v16 }
  0x6e   : > { %v487_v43 = vadd.f32 %v479_v9, %v423_v44  ;;  %983 = vmatpush3.bf16.msra.mxu1 %v1050_v12 }
  0x6f   : > { %v552_v27 = vadd.f32 %v544_v28, %v488_v42  ;;  %984 = vmatprep.subr.bf16.mxu1 %v1107_v16 }
  0x70   : > { %v551_v22 = vadd.f32 %v543_v40, %v487_v43 }
  0x72   : > { %985 = vmatpush3.bf16.msra.mxu1 %v1051_v17 }
  0x73   : > { %986 = vmatprep.subr.bf16.mxu1 %v1107_v16 }
  0x76   : > { %987 = vmatpush3.bf16.msra.mxu1 %v1052_v33 }
  0x77   : > { %988 = vmatprep.subr.bf16.mxu1 %v1107_v16 }
  0x7a   : > { %989 = vmatpush3.bf16.msra.mxu1 %v1053_v29 }
  0x7b   : > { %990 = vmatprep.subr.bf16.mxu1 %v1107_v16 }
  0x7e   : > { %991 = vmatpush3.bf16.msra.mxu1 %v1054_v26 }
  0x7f   : > { %992 = vmatprep.subr.bf16.mxu1 %v1107_v16 }
  0x82   : > { %993 = vmatpush3.bf16.msra.mxu1 %v1055_v46 }
  0x83   : > { %994 = vmatprep.subr.bf16.mxu1 %v1107_v16 }
  0x86   : > { %995 = vmatpush3.bf16.msra.mxu1 %v1056_v47 }
  0x87   : > { %996 = vmatprep.subr.bf16.mxu1 %v1107_v16 }
  0xba   : > { %v558_v20 = vpop.permute.xlu1 %557 }
  0xbb   : > { %v571_v36 = vadd.f32 %v558_v20, %v1481_v31 }
  0xbe   : > { %v554_v50 = vpop.permute.xlu0 %553 }
  0xbf   : > { %v569_v59 = vadd.f32 %v554_v50, %v1493_v13  ;;  %v1057_v13 = vld [vmem:[%s1572_s4 + $0x38] sm:$0xff]  }
  0xc0   : > { %997 = vmatpush3.bf16.msra.mxu1 %v1057_v13 }
  0xc2   : > { %v560_v51 = vpop.permute.xlu1 %559 }
  0xc3   : > { %v572_v52 = vadd.f32 %v560_v51, %v548_v19 }
  0xc5   : > { %v1006_v34 = vpack.c.bf16 %v572_v52, %v571_v36 }
  0xc7   : > { %v556_v58 = vpop.permute.xlu0 %555 }
  0xc8   : > { %v570_v60 = vadd.f32 %v556_v58, %v546_v11 }
  0xca   : > { %v1002_v48 = vpack.c.bf16 %v570_v60, %v569_v59 }
  0xcc   : > { %1003 = vmatprep.subr.bf16.mxu0 %v1002_v48  ;;  %v564_v63 = vpop.permute.xlu1 %563 }
  0xcd   : > { %1005 = vmatpush3.bf16.msra.mxu0 %v1002_v48  ;;  %v574_v2 = vadd.f32 %v564_v63, %v550_v1 }
  0xce   : > { %1007 = vmatprep.subr.bf16.mxu0 %v1006_v34 }
  0xd0   : > { %v562_v25 = vpop.permute.xlu0 %561 }
  0xd1   : > { %v573_v54 = vadd.f32 %v562_v25, %v549_v53  ;;  %1009 = vmatpush3.bf16.msra.mxu0 %v1006_v34 }
  0xd3   : > { %v1010_v0 = vpack.c.bf16 %v574_v2, %v573_v54 }
  0xd5   : > { %1011 = vmatprep.subr.bf16.mxu0 %v1010_v0  ;;  %v568_v31 = vpop.permute.xlu1 %567 }
  0xd6   : > { %1013 = vmatpush3.bf16.msra.mxu0 %v1010_v0  ;;  %v576_v8 = vadd.f32 %v568_v31, %v552_v27 }
  0xdb   : > { %v566_v37 = vpop.permute.xlu0 %565 }
  0xdc   : > { %v575_v55 = vadd.f32 %v566_v37, %v551_v22 }
  0xde   : > { %v1014_v7 = vpack.c.bf16 %v576_v8, %v575_v55 }
  0xe0   : > { %1015 = vmatprep.subr.bf16.mxu0 %v1014_v7 }
  0xe1   : > { %1017 = vmatpush3.bf16.msra.mxu0 %v1014_v7 }
  0xe4   : > { %980 = vmatmul.mubr.msk.f32.vlgmr.msra.gmra.mrb[0].mxu0 %vm579_vm0, %v578_v56 }
 0x1b7   : > { %v981_v23 = vpop.f32.mrb[0].mxu0 }
 0x1b8   : > { %v662_v14 = vmax.f32 %v981_v23, 0.0  ;;  %v652_v3 = vpop.f32.mrb[1].mxu0 }
 0x1b9   : > { %v661_v39 = vmax.f32 %v652_v3, 0.0 }
 0x1bb   : > { %v663_v19 = vpack.c.bf16 %v662_v14, %v661_v39 }
 0x1bd   : > { %999 = vmatmul.mubr.bf16.vlgmr.msra.gmra.mrb[0].mxu1 %v663_v19 }
 0x290   : > { %v762_v57 = vpop.f32.mrb[0].mxu1 }
 0x291   : > { %v776_v24 = vmul.f32 %v910_v32, %v762_v57  ;;  %v1000_v5 = vpop.f32.mrb[1].mxu1 }
 0x292   : > { %v765_v21 = vpop.f32.mrb[2].mxu1 }
 0x293   : > { %v777_v49 = vmul.f32 %v910_v32, %v765_v21  ;;  %v1001_v4 = vpop.f32.mrb[3].mxu1  ;;  %v785_v35 = vadd.f32 %v911_v41, %v776_v24 }
 0x295   : > { %v786_v61 = vadd.f32 %v911_v41, %v777_v49 }
 0x297   : > { %v939_v11 = vpack.c.bf16 %v786_v61, %v785_v35 }
 0x299   : > { %940 = vst [vmem:[%s305_s20] sm:$0xff] %v939_v11  }
 0x29a PF: > { %s19_s24 = sadd.s32 1, %s1102_s24  }
 0x29b   : > { %p16_p5 = scmp.ge.s32.totalorder %s19_s24, 4  }
 0x29d   :  { %18 = sbr.rel (!%p16_p5) target bundleno = 2 (0x2), region = 87 }
 0x2a4   :  { %818 = vsyncpa [#allocation3], 1 }
 0x2a5   :  { %820 = vsyncpa [#allocation3 + $0x1], 1 }
 0x2a6   :  { %821 = vsyncpa [#allocation5], 1 }

// kernel: search_distribution_dag_forward.7
= control target key start
LH: loop header
LB: loop body
LE: loop exit
PB: predicated region body
PF: predicated region fallthrough
CT: control target
= control target key end

     0   :  { %10 = vsyncpa [#allocation4], 0  ;;  %s658_s0 = inlined_call_operand.vmem [shape: f32[4,3], index: 0, kind: input, shape index: {}]   ;;  %s659_s1 = inlined_call_operand.vmem [shape: f32[4], index: 1, kind: input, shape index: {}]   ;;  %s660_s2 = inlined_call_operand.vmem [shape: bf16[2,16,128], index: 2, kind: input, shape index: {}]   ;;  %s661_s3 = inlined_call_operand.vmem [shape: bf16[128,128], index: 3, kind: input, shape index: {}]   ;;  %s662_s4 = inlined_call_operand.vmem [shape: f32[1,128], index: 4, kind: input, shape index: {}]   ;;  %s663_s5 = inlined_call_operand.hbm [shape: f32[2,128], index: 5, kind: output, shape index: {}]  }
   0x1   :  { %11 = vsyncpa [#allocation6], 0 }
   0x2   :  { %12 = vsyncpa [#allocation3], 0  ;;  %s19_s20 = sshll.u32 %s658_s0, 4  ;;  %s29_s23 = sshll.u32 %s659_s1, 4  ;;  %s20_s20 = int_to_ptr.vmem [resolvable:$true] %s19_s20  ;;  %s30_s23 = int_to_ptr.vmem [resolvable:$true] %s29_s23 }
   0x3   :  { %s425_s24 = scalar_lea.vmem %s20_s20, 64  ;;  %p430_p1 = scmp.lt.s32.totalorder %s20_s20, %s20_s20 }
   0x4   :  { %p426_p0 = scmp.ne.s32.totalorder %s20_s20, %s425_s24  ;;  %p431_p2 = scmp.lt.s32.totalorder %s425_s24, %s425_s24 }
   0x6   :  { %p432_p3 = por %p431_p2, %p430_p1 }
   0x8   :  { %p433_p4 = pnand %p432_p3, %p426_p0 }
   0xa   :  { %436 = shalt.err (!%p433_p4)
}
   0xb   :  { %s477_s25 = smov [#allocation2]   ;;  %s437_s26 = scalar_lea.vmem %s30_s23, 16 }
   0xc   :  { %22 = dma.vmem_to_smem %s20_s20, 64, %s477_s25, [#allocation4]  }
   0xd   :  { %p438_p5 = scmp.ne.s32.totalorder %s30_s23, %s437_s26  ;;  %p442_p6 = scmp.lt.s32.totalorder %s30_s23, %s30_s23 }
   0xe   :  { %p443_p7 = scmp.lt.s32.totalorder %s437_s26, %s437_s26 }
  0x10   :  { %p444_p8 = por %p443_p7, %p442_p6 }
  0x12   :  { %p445_p9 = pnand %p444_p8, %p438_p5 }
  0x14   :  { %448 = shalt.err (!%p445_p9)
}
  0x15   :  { %s478_s0 = smov [#allocation5]  }
  0x16   :  { %32 = dma.vmem_to_smem %s30_s23, 16, %s478_s0, [#allocation6]  }
  0x17   :  { %471 = dma.done.wait [#allocation4], 64  }
  0x18   :  { %472 = vsyncadd [#allocation4], 4294967232 }
  0x19   :  { %473 = dma.done.wait [#allocation6], 16  }
  0x1a   :  { %474 = vsyncadd [#allocation6], 4294967280 }
  0x1b   :  { %45 = sfence }
  0x1c   :  { %v381_v0 = vld [vmem:[%s660_s2 + $0x8] sm:$0xff]   ;;  %s55_s28 = sld [smem:[#allocation2]]  ;;  %s351_s29 = sld [smem:[#allocation2 + $0x1]]  ;;  %v374_v1 = vld [vmem:[%s660_s2] sm:$0xff]   ;;  %v479_v4 = vmov 0.0   ;;  %vm481_vm0 = vmmov 0  }
  0x1d   :  { %s352_s30 = sld [smem:[#allocation2 + $0x80]]  ;;  %s353_s6 = sld [smem:[#allocation2 + $0x81]]  ;;  %v417_v2 = vld [vmem:[%s661_s3] sm:$0xff]   ;;  %v379_v3 = vunpack.c.l.bf16 %v381_v0  ;;  %391 = vmatprep.subr.bf16.mxu0 %v479_v4  ;;  %v380_v5 = vunpack.c.h.bf16 %v381_v0  ;;  %v375_v8 = vunpack.c.l.bf16 %v374_v1  ;;  %v530_v9 = vunpack.c.h.bf16 %v374_v1  ;;  %v418_v46 = vld [vmem:[%s661_s3 + $0x8] sm:$0xff]   ;;  %407 = vmatprep.mubr.msk.bf16.mxu0 %vm481_vm0, %v479_v4 }
  0x1e   :  { %s354_s9 = sld [smem:[#allocation2 + $0x82]]  ;;  %s356_s10 = sld [smem:[#allocation2 + $0x100]]  ;;  %392 = vmatpush3.bf16.msra.mxu0 %v417_v2  ;;  %vm242_vm1 = vcmask 1041409  }
  0x1f   :  { %s357_s13 = sld [smem:[#allocation2 + $0x101]]  ;;  %s358_s14 = sld [smem:[#allocation2 + $0x102]]  ;;  %393 = vmatprep.subr.bf16.mxu0 %v479_v4 }
  0x20   :  { %s360_s15 = sld [smem:[#allocation2 + $0x180]]  ;;  %s361_s16 = sld [smem:[#allocation2 + $0x181]] }
  0x21   :  { %s362_s17 = sld [smem:[#allocation2 + $0x182]]  ;;  %s363_s18 = sld [smem:[#allocation5 + $0x3]] }
  0x22   :  { %v56_v6 = vstv %s55_s28  ;;  %v62_v7 = vstv %s351_s29  ;;  %s574_s20 = sld [smem:[#allocation5]]  ;;  %s576_s21 = sld [smem:[#allocation5 + $0x1]]  ;;  %394 = vmatpush3.bf16.msra.mxu0 %v418_v46 }
  0x23   :  { %v59_v10 = vmul.f32 %v379_v3, %v56_v6  ;;  %v65_v11 = vmul.f32 %v379_v3, %v62_v7  ;;  %v78_v12 = vstv %s352_s30  ;;  %v84_v13 = vstv %s353_s6  ;;  %s582_s22 = sld [smem:[#allocation5 + $0x2]]  ;;  %395 = vmatprep.subr.bf16.mxu0 %v479_v4  ;;  %s480_s25 = smov 64  }
  0x24   :  { %v81_v14 = vmul.f32 %v379_v3, %v78_v12  ;;  %v87_v15 = vmul.f32 %v379_v3, %v84_v13  ;;  %v532_v16 = vstv %s354_s9  ;;  %v114_v17 = vstv %s356_s10  ;;  %s482_s10 = smov [#allocation7]  }
  0x25   :  { %v534_v18 = vadd.f32 %v65_v11, %v59_v10  ;;  %v117_v19 = vmul.f32 %v379_v3, %v114_v17  ;;  %v536_v20 = vstv %s357_s13  ;;  %v538_v21 = vstv %s358_s14  ;;  %s341_s11 = sshll.u32 %s482_s10, 4  ;;  %s342_s11 = int_to_ptr.vmem [resolvable:$true] %s341_s11 }
  0x26   :  { %v91_v22 = vadd.f32 %v87_v15, %v81_v14  ;;  %v540_v23 = vstv %s360_s15  ;;  %v542_v24 = vstv %s361_s16  ;;  %v57_v25 = vmul.f32 %v375_v8, %v56_v6  ;;  %s449_s12 = scalar_lea.vmem %s342_s11, 32  ;;  %p454_p11 = scmp.lt.s32.totalorder %s342_s11, %s342_s11 }
  0x27   :  { %v97_v26 = vmul.f32 %v532_v16, %v534_v18  ;;  %v123_v27 = vmul.f32 %v536_v20, %v534_v18  ;;  %v153_v28 = vmul.f32 %v540_v23, %v534_v18  ;;  %v550_v29 = vstv %s362_s17  ;;  %p450_p10 = scmp.ne.s32.totalorder %s342_s11, %s449_s12  ;;  %p455_p12 = scmp.lt.s32.totalorder %s449_s12, %s449_s12 }
  0x28   :  { %v552_v30 = vstv %s363_s18  ;;  %v63_v31 = vmul.f32 %v375_v8, %v62_v7  ;;  %v79_v32 = vmul.f32 %v375_v8, %v78_v12  ;;  %v85_v33 = vmul.f32 %v375_v8, %v84_v13 }
  0x29   :  { %v554_v34 = vadd.f32 %v97_v26, %v91_v22  ;;  %v127_v35 = vadd.f32 %v123_v27, %v117_v19  ;;  %v115_v36 = vmul.f32 %v375_v8, %v114_v17  ;;  %v60_v37 = vmul.f32 %v380_v5, %v56_v6  ;;  %p456_p13 = por %p455_p12, %p454_p11 }
  0x2a   :  { %v556_v38 = vadd.f32 %v63_v31, %v57_v25  ;;  %v89_v39 = vadd.f32 %v85_v33, %v79_v32  ;;  %v66_v40 = vmul.f32 %v380_v5, %v62_v7  ;;  %v82_v41 = vmul.f32 %v380_v5, %v78_v12 }
  0x2b   :  { %v133_v42 = vmul.f32 %v538_v21, %v554_v34  ;;  %v159_v43 = vmul.f32 %v542_v24, %v554_v34  ;;  %v88_v44 = vmul.f32 %v380_v5, %v84_v13  ;;  %v118_v45 = vmul.f32 %v380_v5, %v114_v17  ;;  %p457_p0 = pnand %p456_p13, %p450_p10 }
  0x2c   :  { %v95_v47 = vmul.f32 %v532_v16, %v556_v38  ;;  %v121_v48 = vmul.f32 %v536_v20, %v556_v38  ;;  %v151_v49 = vmul.f32 %v540_v23, %v556_v38  ;;  %v571_v50 = vadd.f32 %v66_v40, %v60_v37 }
  0x2d   :  { %v137_v51 = vadd.f32 %v133_v42, %v127_v35  ;;  %v163_v52 = vadd.f32 %v159_v43, %v153_v28  ;;  %v92_v53 = vadd.f32 %v88_v44, %v82_v41  ;;  %v58_v54 = vmul.f32 %v530_v9, %v56_v6 }
  0x2e   :  { %v99_v55 = vadd.f32 %v95_v47, %v89_v39  ;;  %v125_v56 = vadd.f32 %v121_v48, %v115_v36  ;;  %v98_v57 = vmul.f32 %v532_v16, %v571_v50  ;;  %v124_v58 = vmul.f32 %v536_v20, %v571_v50 }
  0x2f   :  { %v169_v59 = vmul.f32 %v550_v29, %v137_v51  ;;  %v154_v60 = vmul.f32 %v540_v23, %v571_v50  ;;  %v64_v61 = vmul.f32 %v530_v9, %v62_v7  ;;  %v80_v62 = vmul.f32 %v530_v9, %v78_v12  ;;  %v419_v12 = vld [vmem:[%s661_s3 + $0x10] sm:$0xff]  }
  0x30   :  { %v131_v63 = vmul.f32 %v538_v21, %v99_v55  ;;  %v157_v0 = vmul.f32 %v542_v24, %v99_v55  ;;  %v102_v1 = vadd.f32 %v98_v57, %v92_v53  ;;  %v128_v2 = vadd.f32 %v124_v58, %v118_v45  ;;  %396 = vmatpush3.bf16.msra.mxu0 %v419_v12 }
  0x31   :  { %v173_v3 = vadd.f32 %v169_v59, %v163_v52  ;;  %v68_v5 = vadd.f32 %v64_v61, %v58_v54  ;;  %v86_v6 = vmul.f32 %v530_v9, %v84_v13  ;;  %v116_v8 = vmul.f32 %v530_v9, %v114_v17  ;;  %397 = vmatprep.subr.bf16.mxu0 %v479_v4 }
  0x32   :  { %v135_v10 = vadd.f32 %v131_v63, %v125_v56  ;;  %v161_v11 = vadd.f32 %v157_v0, %v151_v49  ;;  %v134_v14 = vmul.f32 %v538_v21, %v102_v1  ;;  %v160_v7 = vmul.f32 %v542_v24, %v102_v1  ;;  %v421_v49 = vld [vmem:[%s661_s3 + $0x20] sm:$0xff]  }
  0x33   :  { %189 = vrot.lane.b32.xlu1 %v173_v3, %s480_s25  ;;  %v179_v15 = vmul.f32 %v552_v30, %v173_v3  ;;  %v90_v13 = vadd.f32 %v86_v6, %v80_v62  ;;  %v96_v9 = vmul.f32 %v532_v16, %v68_v5  ;;  %v122_v17 = vmul.f32 %v536_v20, %v68_v5  ;;  %v420_v20 = vld [vmem:[%s661_s3 + $0x18] sm:$0xff]  }
  0x34   :  { %v167_v19 = vmul.f32 %v550_v29, %v135_v10  ;;  %v138_v22 = vadd.f32 %v134_v14, %v128_v2  ;;  %v164_v25 = vadd.f32 %v160_v7, %v154_v60  ;;  %v152_v26 = vmul.f32 %v540_v23, %v68_v5  ;;  %398 = vmatpush3.bf16.msra.mxu0 %v420_v20  ;;  %v423_v2 = vld [vmem:[%s661_s3 + $0x30] sm:$0xff]   ;;  %v424_v3 = vld [vmem:[%s661_s3 + $0x38] sm:$0xff]  }
  0x35   :  { %v100_v27 = vadd.f32 %v96_v9, %v90_v13  ;;  %v126_v28 = vadd.f32 %v122_v17, %v116_v8  ;;  %v72_v31 = vstv %s574_s20  ;;  %v104_v32 = vstv %s576_s21  ;;  %399 = vmatprep.subr.bf16.mxu0 %v479_v4 }
  0x36   :  { %v171_v33 = vadd.f32 %v167_v19, %v161_v11  ;;  %v170_v35 = vmul.f32 %v550_v29, %v138_v22  ;;  %v140_v36 = vstv %s582_s22  ;;  %v75_v16 = vmul.f32 %v72_v31, %v534_v18 }
  0x37   :  { %v132_v37 = vmul.f32 %v538_v21, %v100_v27  ;;  %v158_v23 = vmul.f32 %v542_v24, %v100_v27  ;;  %v107_v39 = vmul.f32 %v104_v32, %v554_v34  ;;  %v143_v40 = vmul.f32 %v140_v36, %v137_v51 }
  0x38   :  { %185 = vrot.lane.b32.xlu0 %v171_v33, %s480_s25  ;;  %v177_v41 = vmul.f32 %v552_v30, %v171_v33  ;;  %v174_v42 = vadd.f32 %v170_v35, %v164_v25  ;;  %v73_v43 = vmul.f32 %v72_v31, %v556_v38  ;;  %v105_v44 = vmul.f32 %v104_v32, %v99_v55 }
  0x39   :  { %v136_v18 = vadd.f32 %v132_v37, %v126_v28  ;;  %v162_v45 = vadd.f32 %v158_v23, %v152_v26  ;;  %v111_v46 = vadd.f32 %v107_v39, %v75_v16  ;;  %v141_v47 = vmul.f32 %v140_v36, %v135_v10  ;;  %400 = vmatpush3.bf16.msra.mxu0 %v421_v49 }
  0x3a   :  { %191 = vrot.lane.b32.xlu1 %v174_v42, %s480_s25  ;;  %v109_v21 = vadd.f32 %v105_v44, %v73_v43  ;;  %v76_v24 = vmul.f32 %v72_v31, %v571_v50  ;;  %v108_v34 = vmul.f32 %v104_v32, %v102_v1  ;;  %v144_v48 = vmul.f32 %v140_v36, %v138_v22 }
  0x3b   :  { %v168_v51 = vmul.f32 %v550_v29, %v136_v18  ;;  %v147_v38 = vadd.f32 %v143_v40, %v111_v46  ;;  %v180_v52 = vmul.f32 %v552_v30, %v174_v42  ;;  %v74_v53 = vmul.f32 %v72_v31, %v68_v5  ;;  %401 = vmatprep.subr.bf16.mxu0 %v479_v4  ;;  %v422_v29 = vld [vmem:[%s661_s3 + $0x28] sm:$0xff]   ;;  %v364_v40 = vld [vmem:[%s662_s4] ss:$0 sm:$0xff] }
  0x3c   :  { %v145_v54 = vadd.f32 %v141_v47, %v109_v21  ;;  %v112_v55 = vadd.f32 %v108_v34, %v76_v24  ;;  %v106_v56 = vmul.f32 %v104_v32, %v100_v27  ;;  %v142_v57 = vmul.f32 %v140_v36, %v136_v18 }
  0x3d   :  { %v172_v58 = vadd.f32 %v168_v51, %v162_v45  ;;  %v183_v50 = vadd.f32 %v179_v15, %v147_v38  ;;  %402 = vmatpush3.bf16.msra.mxu0 %v422_v29 }
  0x3e   :  { %v181_v59 = vadd.f32 %v177_v41, %v145_v54  ;;  %v148_v60 = vadd.f32 %v144_v48, %v112_v55  ;;  %v110_v61 = vadd.f32 %v106_v56, %v74_v53  ;;  %403 = vmatprep.subr.bf16.mxu0 %v479_v4 }
  0x3f   :  { %187 = vrot.lane.b32.xlu0 %v172_v58, %s480_s25  ;;  %v178_v62 = vmul.f32 %v552_v30, %v172_v58 }
  0x40   :  { %v184_v63 = vadd.f32 %v180_v52, %v148_v60  ;;  %v146_v0 = vadd.f32 %v142_v57, %v110_v61 }
  0x41   :  { %404 = vmatpush3.bf16.msra.mxu0 %v423_v2 }
  0x42   :  { %v182_v1 = vadd.f32 %v178_v62, %v146_v0  ;;  %405 = vmatprep.subr.bf16.mxu0 %v479_v4 }
  0x45   :  { %406 = vmatpush3.bf16.msra.mxu0 %v424_v3 }
  0xa5   :  { %v190_v30 = vpop.permute.xlu1 %189 }
  0xa6   :  { %v195_v8 = vadd.f32 %v190_v30, %v183_v50 }
  0xaa   :  { %v186_v5 = vpop.permute.xlu0 %185 }
  0xab   :  { %v193_v12 = vadd.f32 %v186_v5, %v181_v59 }
  0xac   :  { %v192_v6 = vpop.permute.xlu1 %191 }
  0xad   :  { %v196_v10 = vadd.f32 %v192_v6, %v184_v63 }
  0xaf   :  { %v204_v11 = vadd.f32 %v196_v10, %v195_v8 }
  0xb1   :  { %v205_v14 = vrot.slane %v204_v11, 4  ;;  %v188_v7 = vpop.permute.xlu0 %187 }
  0xb2   :  { %v194_v15 = vadd.f32 %v188_v7, %v182_v1 }
  0xb3   :  { %v206_v13 = vadd.f32 %v205_v14, %v204_v11 }
  0xb4   :  { %v197_v9 = vadd.f32 %v194_v15, %v193_v12 }
  0xb5   :  { %v207_v17 = vrot.slane %v206_v13, 2 }
  0xb6   :  { %v198_v19 = vrot.slane %v197_v9, 4 }
  0xb7   :  { %v208_v22 = vadd.f32 %v207_v17, %v206_v13 }
  0xb8   :  { %v199_v25 = vadd.f32 %v198_v19, %v197_v9 }
  0xb9   :  { %v209_v26 = vrot.slane %v208_v22, 1 }
  0xba   :  { %v200_v27 = vrot.slane %v199_v25, 2 }
  0xbb   :  { %v210_v4 = vadd.f32 %v209_v26, %v208_v22 }
  0xbc   :  { %v201_v28 = vadd.f32 %v200_v27, %v199_v25 }
  0xbd   :  { %v212_v31 = vmul.f32 0.0625, %v210_v4 }
  0xbe   :  { %v202_v32 = vrot.slane %v201_v28, 1 }
  0xbf   :  { %v214_v35 = vpack.c.bf16 %v212_v31, %v212_v31 }
  0xc0   :  { %v203_v33 = vadd.f32 %v202_v32, %v201_v28 }
  0xc1   :  { %v241_v20 = vunpack.c.l.b16 %v214_v35 }
  0xc2   :  { %v211_v36 = vmul.f32 0.0625, %v203_v33 }
  0xc4   :  { %v213_v16 = vpack.c.bf16 %v211_v36, %v211_v36 }
  0xc6   :  { %v240_v37 = vunpack.c.l.b16 %v213_v16 }
  0xc8   :  { %v243_v23 = vsel %vm242_vm1, %v241_v20, %v240_v37 }
  0xc9   :  { %v244_v39 = vpack.c.b16 %v243_v23, %v243_v23 }
  0xcb   :  { %408 = vmatmul.mubr.bf16.vlgmr.msra.gmra.mrb[0].mxu0 %v244_v39 }
 0x19e   :  { %v328_v41 = vpop.f32.mrb[0].mxu0 }
 0x19f   :  { %v329_v42 = vadd.f32 %v364_v40, %v328_v41  ;;  %v409_v43 = vpop.f32.mrb[1].mxu0 }
 0x1a0   :  { %v331_v44 = vpop.f32.mrb[2].mxu0 }
 0x1a1   :  { %334 = vst [vmem:[#allocation7] sm:$0x3] %v329_v42  ;;  %v410_v18 = vpop.f32.mrb[3].mxu0 }
 0x1a2   :  { %460 = shalt.err (!%p457_p0)
}
 0x1a3   :  { %s461_s4 = scalar_lea.hbm %s663_s5, 32 }
 0x1a4   :  { %p462_p1 = scmp.ne.s32.totalorder %s663_s5, %s461_s4  ;;  %p465_p2 = scmp.lt.u32.totalorder %s461_s4, %s663_s5 }
 0x1a6   :  { %p467_p3 = pnand %p465_p2, %p462_p1 }
 0x1a8   :  { %470 = shalt.err (!%p467_p3)
}
 0x1a9   :  { %344 = dma.vmem_to_hbm [thread:$0]  %s342_s11, 32, %s663_s5, [#allocation3]  }
 0x1aa   :  { %475 = dma.done.wait [#allocation3], 32  }
 0x1ab   :  { %476 = vsyncadd [#allocation3], 4294967264 }
 0x1ac   :  { %348 = vsyncpa [#allocation3], 1 }
 0x1ad   :  { %349 = vsyncpa [#allocation4], 1 }
 0x1ae   :  { %350 = vsyncpa [#allocation6], 1 }

// kernel: search_distribution_dag_forward.5
= control target key start
LH: loop header
LB: loop body
LE: loop exit
PB: predicated region body
PF: predicated region fallthrough
CT: control target
= control target key end

     0   :  { %12 = vsyncpa [#allocation3], 0  ;;  %s3473_s0 = inlined_call_operand.vmem [shape: f32[4,3], index: 0, kind: input, shape index: {}]   ;;  %s3474_s1 = inlined_call_operand.vmem [shape: f32[4], index: 1, kind: input, shape index: {}]   ;;  %s3475_s2 = inlined_call_operand.vmem [shape: bf16[2,256,128], index: 2, kind: input, shape index: {}]   ;;  %s3476_s3 = inlined_call_operand.vmem [shape: f32[64,256], index: 3, kind: input, shape index: {}]   ;;  %s3477_s4 = inlined_call_operand.vmem [shape: bf16[128,128], index: 4, kind: input, shape index: {}]   ;;  %s3478_s5 = inlined_call_operand.vmem [shape: f32[1,128], index: 5, kind: input, shape index: {}]   ;;  %s3479_s6 = inlined_call_operand.vmem [shape: f32[1,128], index: 6, kind: input, shape index: {}]   ;;  %s3480_s7 = inlined_call_operand.vmem [shape: bf16[2,64,128], index: 7, kind: output, shape index: {}]  }
   0x1   :  { %13 = vsyncpa [#allocation5], 0  ;;  %s2115_s24 = smov 0  }
   0x2 LB: > { %s2121_s25 = sadd.s32 4294967295, %s2070_s24   ;;  %p1708_p0 = scmp.ge.s32.totalorder %s2070_s24, 1  ;;  %s2070_s24 = sphi %s2115_s24, %s19_s24  }
   0x3   : > { %p202_p1 = scmp.lt.s32.totalorder %s2070_s24, 3  ;;  %s215_s28 = sshll.u32 %s3473_s0, 4  ;;  %s216_s28 = int_to_ptr.vmem [resolvable:$true] %s215_s28 }
   0x4   : > { %p3481_p3 = scmp.eq.s32.totalorder %s2121_s25, 0  ;;  %s226_s9 = sshll.u32 %s3474_s1, 4  ;;  %s227_s9 = int_to_ptr.vmem [resolvable:$true] %s226_s9 }
   0x5   : > { %p2128_p2 = pnand %p1708_p0, %p202_p1  ;;  %s2026_s11 = scalar_lea.vmem %s216_s28, 64 }
   0x6   : > { %p2027_p6 = scmp.ne.s32.totalorder %s216_s28, %s2026_s11  ;;  %p2034_p10 = scmp.lt.s32.totalorder %s216_s28, %s216_s28 }
   0x7   : > { %s3571_s29 = scalar_select %p2128_p2, 1, 0 }
   0x8   : > { %p1996_p4 = pneg %p2128_p2  ;;  %p2035_p11 = scmp.lt.s32.totalorder %s2026_s11, %s2026_s11 }
   0xa   : > { %p2140_p5 = pnand %p3481_p3, %p1996_p4  ;;  %p2036_p12 = por %p2035_p11, %p2034_p10 }
   0xc   : > { %p2028_p7 = pneg %p2140_p5 }
   0xe   : > { %p2029_p8 = pnand %p2028_p7, %p2027_p6 }
  0x10   : > { %p2030_p9 = pneg %p2029_p8 }
  0x12   : > { %p2037_p13 = pnand %p2036_p12, %p2030_p9 }
  0x14   : > { %2040 = shalt.err (!%p2037_p13)
}
  0x15   : > { %s2072_s12 = smov [#allocation2]   ;;  %s2041_s13 = scalar_lea.vmem %s227_s9, 16 }
  0x16   : > { %1999 = dma.vmem_to_smem (!%p2140_p5), %s216_s28, 64, %s2072_s12, [#allocation3]  }
  0x17   : > { %p2042_p0 = scmp.ne.s32.totalorder %s227_s9, %s2041_s13  ;;  %p2049_p3 = scmp.lt.s32.totalorder %s227_s9, %s227_s9 }
  0x18   : > { %p2050_p2 = scmp.lt.s32.totalorder %s2041_s13, %s2041_s13 }
  0x19   : > { %p2044_p1 = pnand %p2042_p0, %p2028_p7 }
  0x1a   : > { %p2051_p6 = por %p2050_p2, %p2049_p3 }
  0x1b   : > { %p2045_p4 = pneg %p2044_p1 }
  0x1d   : > { %p2052_p8 = pnand %p2051_p6, %p2045_p4 }
  0x1f   : > { %2055 = shalt.err (!%p2052_p8)
}
  0x20   : > { %s2073_s14 = smov [#allocation4]   ;;  %p3573_p9 = scmp.ne.s32.totalorder %s3571_s29, 0 }
  0x21   : > { %2002 = dma.vmem_to_smem (!%p2140_p5), %s227_s9, 16, %s2073_s14, [#allocation5]  }
  0x22   : > { %259 = sbr.rel (%p3573_p9) target bundleno = 816 (0x330), region = 48 }
  0x29   : > { %p3574_p10 = scmp.eq.s32.totalorder %s2121_s25, 0 }
  0x2b   : > { %2061 = dma.done.wait (%p3574_p10), [#allocation3], 64   ;;  %p3575_p11 = pmov %p3574_p10 }
  0x2c   : > { %p3576_p7 = pmov %p3574_p10 }
  0x2d   : > { %2063 = vsyncadd (%p3575_p11), [#allocation3], 4294967232 }
  0x2e   : > { %2065 = dma.done.wait (%p3576_p7), [#allocation5], 16   ;;  %p3577_p2 = pmov %p3576_p7 }
  0x30   : > { %2067 = vsyncadd (%p3577_p2), [#allocation5], 4294967280 }
  0x31   : > { %269 = sfence }
  0x32   : > { %p296_p3 = scmp.lt.s32.totalorder %s2121_s25, 1  ;;  %s371_s15 = sld [smem:[#allocation2]] }
  0x33   : > { %s1719_s16 = sld [smem:[#allocation2 + $0x1]]  ;;  %s1720_s17 = sld [smem:[#allocation2 + $0x80]] }
  0x34   : > { %s3755_s25 = smov (!%p296_p3, %s2121_s25), 1  ;;  %s1721_s18 = sld [smem:[#allocation2 + $0x81]] }
  0x35   : > { %s1722_s19 = sld [smem:[#allocation2 + $0x82]]  ;;  %s1752_s20 = sshll.u32 %s3755_s25, 7 }
  0x36   : > { %s1724_s21 = sld [smem:[#allocation2 + $0x100]]  ;;  %s2168_s26 = scalar_lea.vmem %s3475_s2, %s1752_s20 }
  0x37   : > { %s1725_s27 = sld [smem:[#allocation2 + $0x101]]  ;;  %v1853_v0 = vld [vmem:[%s2168_s26 + $0x40] sm:$0xff]   ;;  %s1726_s28 = sld [smem:[#allocation2 + $0x102]]  ;;  %v1854_v7 = vld [vmem:[%s2168_s26 + $0x48] sm:$0xff]  }
  0x38   : > { %v2171_v1 = vstv %s371_s15  ;;  %s1728_s29 = sld [smem:[#allocation2 + $0x180]]  ;;  %v1763_v2 = vld [vmem:[%s2168_s26] sm:$0xff]   ;;  %v1796_v3 = vunpack.c.l.bf16 %v1853_v0  ;;  %v1797_v4 = vunpack.c.h.bf16 %v1853_v0  ;;  %s1729_s30 = sld [smem:[#allocation2 + $0x181]]  ;;  %v2181_v10 = vunpack.c.l.bf16 %v1854_v7 }
  0x39   : > { %v2174_v5 = vstv %s1719_s16  ;;  %v2176_v6 = vstv %s1720_s17  ;;  %s1730_s8 = sld [smem:[#allocation2 + $0x182]]  ;;  %s1731_s9 = sld [smem:[#allocation4 + $0x3]]  ;;  %v1764_v8 = vunpack.c.l.bf16 %v1763_v2  ;;  %v2179_v9 = vunpack.c.h.bf16 %v1763_v2 }
  0x3a   : > { %v2183_v11 = vunpack.c.h.bf16 %v1854_v7  ;;  %v389_v12 = vmul.f32 %v1796_v3, %v2171_v1  ;;  %v423_v13 = vmul.f32 %v1796_v3, %v2174_v5  ;;  %v523_v14 = vmul.f32 %v1796_v3, %v2176_v6  ;;  %s2074_s10 = smov 16   ;;  %s3013_s11 = sld [smem:[#allocation4]] }
  0x3b   : > { %v2188_v15 = vstv %s1721_s18  ;;  %v2191_v17 = vstv %s1722_s19  ;;  %v373_v19 = vmul.f32 %v1764_v8, %v2171_v1  ;;  %v407_v23 = vmul.f32 %v1764_v8, %v2174_v5  ;;  %s3029_s12 = sld [smem:[#allocation4 + $0x1]]  ;;  %s3036_s13 = sld [smem:[#allocation4 + $0x2]] }
  0x3c   : > { %v557_v16 = vmul.f32 %v1796_v3, %v2188_v15  ;;  %v2193_v18 = vstv %s1724_s21  ;;  %v2196_v20 = vadd.f32 %v423_v13, %v389_v12  ;;  %v507_v27 = vmul.f32 %v1764_v8, %v2176_v6 }
  0x3d   : > { %v755_v21 = vmul.f32 %v1796_v3, %v2193_v18  ;;  %v2199_v22 = vstv %s1725_s27  ;;  %v2202_v25 = vstv %s1726_s28  ;;  %v2219_v34 = vadd.f32 %v407_v23, %v373_v19 }
  0x3e   : > { %v589_v24 = vadd.f32 %v557_v16, %v523_v14  ;;  %v2204_v26 = vstv %s1728_s29  ;;  %v623_v28 = vmul.f32 %v2191_v17, %v2196_v20  ;;  %v789_v29 = vmul.f32 %v2199_v22, %v2196_v20 }
  0x3f   : > { %v987_v30 = vmul.f32 %v2204_v26, %v2196_v20  ;;  %v2213_v31 = vstv %s1729_s30  ;;  %v2215_v32 = vstv %s1730_s8  ;;  %v2217_v33 = vstv %s1731_s9 }
  0x40   : > { %v541_v35 = vmul.f32 %v1764_v8, %v2188_v15  ;;  %v2222_v36 = vadd.f32 %v623_v28, %v589_v24  ;;  %v821_v37 = vadd.f32 %v789_v29, %v755_v21  ;;  %v739_v38 = vmul.f32 %v1764_v8, %v2193_v18 }
  0x41   : > { %v390_v39 = vmul.f32 %v1797_v4, %v2171_v1  ;;  %v607_v41 = vmul.f32 %v2191_v17, %v2219_v34  ;;  %v773_v42 = vmul.f32 %v2199_v22, %v2219_v34  ;;  %v971_v43 = vmul.f32 %v2204_v26, %v2219_v34 }
  0x42   : > { %v573_v40 = vadd.f32 %v541_v35, %v507_v27  ;;  %v855_v44 = vmul.f32 %v2202_v25, %v2222_v36  ;;  %v1021_v45 = vmul.f32 %v2213_v31, %v2222_v36  ;;  %v424_v46 = vmul.f32 %v1797_v4, %v2174_v5 }
  0x43   : > { %v524_v47 = vmul.f32 %v1797_v4, %v2176_v6  ;;  %v805_v49 = vadd.f32 %v773_v42, %v739_v38  ;;  %v558_v50 = vmul.f32 %v1797_v4, %v2188_v15  ;;  %v756_v51 = vmul.f32 %v1797_v4, %v2193_v18 }
  0x44   : > { %v2238_v48 = vadd.f32 %v607_v41, %v573_v40  ;;  %v2242_v52 = vadd.f32 %v855_v44, %v821_v37  ;;  %v1053_v53 = vadd.f32 %v1021_v45, %v987_v30  ;;  %v2244_v54 = vadd.f32 %v424_v46, %v390_v39 }
  0x45   : > { %v374_v55 = vmul.f32 %v2179_v9, %v2171_v1  ;;  %v590_v58 = vadd.f32 %v558_v50, %v524_v47  ;;  %v408_v59 = vmul.f32 %v2179_v9, %v2174_v5  ;;  %v508_v4 = vmul.f32 %v2179_v9, %v2176_v6 }
  0x46   : > { %v839_v56 = vmul.f32 %v2202_v25, %v2238_v48  ;;  %v1005_v57 = vmul.f32 %v2213_v31, %v2238_v48  ;;  %v1087_v60 = vmul.f32 %v2215_v32, %v2242_v52  ;;  %v624_v61 = vmul.f32 %v2191_v17, %v2244_v54 }
  0x47   : > { %v790_v62 = vmul.f32 %v2199_v22, %v2244_v54  ;;  %v988_v63 = vmul.f32 %v2204_v26, %v2244_v54  ;;  %v2264_v3 = vadd.f32 %v408_v59, %v374_v55  ;;  %v542_v13 = vmul.f32 %v2179_v9, %v2188_v15  ;;  %v1846_v55 = vld [vmem:[%s2168_s26 + $0x8] sm:$0xff]  }
  0x48   : > { %v2262_v0 = vadd.f32 %v839_v56, %v805_v49  ;;  %v1037_v2 = vadd.f32 %v1005_v57, %v971_v43  ;;  %v1119_v7 = vadd.f32 %v1087_v60, %v1053_v53  ;;  %v2268_v8 = vadd.f32 %v624_v61, %v590_v58 }
  0x49   : > { %v822_v12 = vadd.f32 %v790_v62, %v756_v51  ;;  %v608_v16 = vmul.f32 %v2191_v17, %v2264_v3  ;;  %v740_v19 = vmul.f32 %v2179_v9, %v2193_v18  ;;  %v774_v21 = vmul.f32 %v2199_v22, %v2264_v3 }
  0x4a   : > { %v1071_v14 = vmul.f32 %v2215_v32, %v2262_v0  ;;  %1233 = vrot.lane.b32.xlu0 %v1119_v7, %s2074_s10  ;;  %v2282_v23 = vmul.f32 %v2217_v33, %v1119_v7  ;;  %v856_v24 = vmul.f32 %v2202_v25, %v2268_v8  ;;  %v1022_v27 = vmul.f32 %v2213_v31, %v2268_v8 }
  0x4b   : > { %v574_v28 = vadd.f32 %v542_v13, %v508_v4  ;;  %v806_v30 = vadd.f32 %v774_v21, %v740_v19  ;;  %v972_v9 = vmul.f32 %v2204_v26, %v2264_v3  ;;  %v391_v35 = vmul.f32 %v2181_v10, %v2171_v1 }
  0x4c   : > { %v1103_v29 = vadd.f32 %v1071_v14, %v1037_v2  ;;  %v2292_v37 = vadd.f32 %v856_v24, %v822_v12  ;;  %v1054_v38 = vadd.f32 %v1022_v27, %v988_v63  ;;  %v425_v40 = vmul.f32 %v2181_v10, %v2174_v5 }
  0x4d   : > { %v2294_v39 = vadd.f32 %v608_v16, %v574_v28  ;;  %v525_v42 = vmul.f32 %v2181_v10, %v2176_v6  ;;  %v559_v43 = vmul.f32 %v2181_v10, %v2188_v15  ;;  %v757_v44 = vmul.f32 %v2181_v10, %v2193_v18 }
  0x4e   : > { %1201 = vrot.lane.b32.xlu1 %v1103_v29, %s2074_s10  ;;  %v2300_v41 = vmul.f32 %v2217_v33, %v1103_v29  ;;  %v1088_v45 = vmul.f32 %v2215_v32, %v2292_v37  ;;  %v2314_v49 = vadd.f32 %v425_v40, %v391_v35  ;;  %v392_v51 = vmul.f32 %v2183_v11, %v2171_v1  ;;  %v1855_v35 = vld [vmem:[%s2168_s26 + $0x50] sm:$0xff]  }
  0x4f   : > { %v840_v46 = vmul.f32 %v2202_v25, %v2294_v39  ;;  %v1006_v47 = vmul.f32 %v2213_v31, %v2294_v39  ;;  %v591_v50 = vadd.f32 %v559_v43, %v525_v42  ;;  %v426_v53 = vmul.f32 %v2183_v11, %v2174_v5 }
  0x50   : > { %v526_v10 = vmul.f32 %v2183_v11, %v2176_v6  ;;  %v2323_v56 = vadd.f32 %v1088_v45, %v1054_v38  ;;  %v625_v59 = vmul.f32 %v2191_v17, %v2314_v49  ;;  %v791_v60 = vmul.f32 %v2199_v22, %v2314_v49 }
  0x51   : > { %v2325_v57 = vadd.f32 %v840_v46, %v806_v30  ;;  %v1038_v58 = vadd.f32 %v1006_v47, %v972_v9  ;;  %v989_v61 = vmul.f32 %v2204_v26, %v2314_v49  ;;  %v2333_v62 = vadd.f32 %v426_v53, %v392_v51 }
  0x52   : > { %v560_v63 = vmul.f32 %v2183_v11, %v2188_v15  ;;  %1235 = vrot.lane.b32.xlu0 %v2323_v56, %s2074_s10  ;;  %v2341_v4 = vadd.f32 %v625_v59, %v591_v50  ;;  %v758_v7 = vmul.f32 %v2183_v11, %v2193_v18  ;;  %v1768_v12 = vunpack.c.l.bf16 %v1846_v55 }
  0x53   : > { %v1072_v2 = vmul.f32 %v2215_v32, %v2325_v57  ;;  %v823_v13 = vadd.f32 %v791_v60, %v757_v44  ;;  %v626_v16 = vmul.f32 %v2191_v17, %v2333_v62  ;;  %v792_v19 = vmul.f32 %v2199_v22, %v2333_v62 }
  0x54   : > { %v592_v14 = vadd.f32 %v560_v63, %v526_v10  ;;  %v857_v24 = vmul.f32 %v2202_v25, %v2341_v4  ;;  %v1023_v27 = vmul.f32 %v2213_v31, %v2341_v4  ;;  %v990_v11 = vmul.f32 %v2204_v26, %v2333_v62 }
  0x55   : > { %v2349_v21 = vadd.f32 %v1072_v2, %v1038_v58  ;;  %v824_v29 = vadd.f32 %v792_v19, %v758_v7  ;;  %v375_v30 = vmul.f32 %v1768_v12, %v2171_v1  ;;  %v409_v9 = vmul.f32 %v1768_v12, %v2174_v5 }
  0x56   : > { %v2357_v28 = vadd.f32 %v626_v16, %v592_v14  ;;  %v2364_v38 = vadd.f32 %v857_v24, %v823_v13  ;;  %v1055_v40 = vadd.f32 %v1023_v27, %v989_v61  ;;  %v509_v42 = vmul.f32 %v1768_v12, %v2176_v6 }
  0x57   : > { %1203 = vrot.lane.b32.xlu1 %v2349_v21, %s2074_s10  ;;  %v543_v43 = vmul.f32 %v1768_v12, %v2188_v15  ;;  %v2372_v46 = vadd.f32 %v409_v9, %v375_v30  ;;  %v741_v47 = vmul.f32 %v1768_v12, %v2193_v18  ;;  %v1769_v53 = vunpack.c.h.bf16 %v1846_v55 }
  0x58   : > { %v858_v44 = vmul.f32 %v2202_v25, %v2357_v28  ;;  %v1024_v45 = vmul.f32 %v2213_v31, %v2357_v28  ;;  %v1089_v50 = vmul.f32 %v2215_v32, %v2364_v38  ;;  %v1804_v10 = vunpack.c.l.bf16 %v1855_v35 }
  0x59   : > { %v575_v51 = vadd.f32 %v543_v43, %v509_v42  ;;  %v609_v60 = vmul.f32 %v2191_v17, %v2372_v46  ;;  %v775_v61 = vmul.f32 %v2199_v22, %v2372_v46  ;;  %v973_v2 = vmul.f32 %v2204_v26, %v2372_v46 }
  0x5a   : > { %v2377_v58 = vadd.f32 %v858_v44, %v824_v29  ;;  %v1056_v59 = vadd.f32 %v1024_v45, %v990_v11  ;;  %v2383_v63 = vadd.f32 %v1089_v50, %v1055_v40  ;;  %v376_v7 = vmul.f32 %v1769_v53, %v2171_v1 }
  0x5b   : > { %v410_v12 = vmul.f32 %v1769_v53, %v2174_v5  ;;  %v2391_v13 = vadd.f32 %v609_v60, %v575_v51  ;;  %v807_v14 = vadd.f32 %v775_v61, %v741_v47  ;;  %v510_v16 = vmul.f32 %v1769_v53, %v2176_v6 }
  0x5c   : > { %v1090_v55 = vmul.f32 %v2215_v32, %v2377_v58  ;;  %1237 = vrot.lane.b32.xlu0 %v2383_v63, %s2074_s10  ;;  %v544_v24 = vmul.f32 %v1769_v53, %v2188_v15  ;;  %v742_v27 = vmul.f32 %v1769_v53, %v2193_v18  ;;  %v393_v11 = vmul.f32 %v1804_v10, %v2171_v1 }
  0x5d   : > { %v2396_v19 = vadd.f32 %v410_v12, %v376_v7  ;;  %v841_v30 = vmul.f32 %v2202_v25, %v2391_v13  ;;  %v1007_v9 = vmul.f32 %v2213_v31, %v2391_v13  ;;  %v427_v40 = vmul.f32 %v1804_v10, %v2174_v5  ;;  %v1847_v12 = vld [vmem:[%s2168_s26 + $0x10] sm:$0xff]  }
  0x5e   : > { %v2401_v29 = vadd.f32 %v1090_v55, %v1056_v59  ;;  %v576_v42 = vadd.f32 %v544_v24, %v510_v16  ;;  %v527_v53 = vmul.f32 %v1804_v10, %v2176_v6  ;;  %v561_v61 = vmul.f32 %v1804_v10, %v2188_v15 }
  0x5f   : > { %3578 = vst [vmem:[#allocation8_spill] sm:$0xff] %v2396_v19  ;;  %v610_v43 = vmul.f32 %v2191_v17, %v2396_v19  ;;  %v776_v44 = vmul.f32 %v2199_v22, %v2396_v19  ;;  %v974_v45 = vmul.f32 %v2204_v26, %v2396_v19  ;;  %v2416_v47 = vadd.f32 %v841_v30, %v807_v14 }
  0x60   : > { %1239 = vrot.lane.b32.xlu1 %v2401_v29, %s2074_s10  ;;  %v1039_v50 = vadd.f32 %v1007_v9, %v973_v2  ;;  %v2418_v51 = vadd.f32 %v427_v40, %v393_v11  ;;  %v759_v7 = vmul.f32 %v1804_v10, %v2193_v18  ;;  %v593_v10 = vadd.f32 %v561_v61, %v527_v53 }
  0x61   : > { %3579 = vst [vmem:[#allocation9_spill] sm:$0xff] %v2416_v47  ;;  %v2421_v59 = vadd.f32 %v610_v43, %v576_v42  ;;  %v808_v60 = vadd.f32 %v776_v44, %v742_v27  ;;  %v1073_v55 = vmul.f32 %v2215_v32, %v2416_v47  ;;  %v1805_v11 = vunpack.c.h.bf16 %v1855_v35 }
  0x62   : > { %3580 = vst [vmem:[#allocation10_spill] sm:$0xff] %v2418_v51  ;;  %v627_v14 = vmul.f32 %v2191_v17, %v2418_v51  ;;  %v793_v2 = vmul.f32 %v2199_v22, %v2418_v51  ;;  %v991_v16 = vmul.f32 %v2204_v26, %v2418_v51  ;;  %v1772_v40 = vunpack.c.l.bf16 %v1847_v12 }
  0x63   : > { %v842_v24 = vmul.f32 %v2202_v25, %v2421_v59  ;;  %v1008_v27 = vmul.f32 %v2213_v31, %v2421_v59  ;;  %v2438_v30 = vadd.f32 %v1073_v55, %v1039_v50  ;;  %v1773_v42 = vunpack.c.h.bf16 %v1847_v12 }
  0x64   : > { %v825_v9 = vadd.f32 %v793_v2, %v759_v7  ;;  %v2442_v19 = vadd.f32 %v627_v14, %v593_v10  ;;  %v394_v51 = vmul.f32 %v1805_v11, %v2171_v1  ;;  %v428_v47 = vmul.f32 %v1805_v11, %v2174_v5 }
  0x65   : > { %v2440_v43 = vadd.f32 %v842_v24, %v808_v60  ;;  %v1040_v44 = vadd.f32 %v1008_v27, %v974_v45  ;;  %1205 = vrot.lane.b32.xlu0 %v2438_v30, %s2074_s10  ;;  %v528_v53 = vmul.f32 %v1805_v11, %v2176_v6  ;;  %v562_v35 = vmul.f32 %v1805_v11, %v2188_v15 }
  0x66   : > { %3582 = vst [vmem:[#allocation12_spill] sm:$0xff] %v2442_v19  ;;  %v760_v50 = vmul.f32 %v1805_v11, %v2193_v18  ;;  %v859_v45 = vmul.f32 %v2202_v25, %v2442_v19  ;;  %v1025_v61 = vmul.f32 %v2213_v31, %v2442_v19  ;;  %v377_v7 = vmul.f32 %v1772_v40, %v2171_v1 }
  0x67   : > { %3581 = vst [vmem:[#allocation11_spill] sm:$0xff] %v2440_v43  ;;  %v1074_v60 = vmul.f32 %v2215_v32, %v2440_v43  ;;  %v2458_v12 = vadd.f32 %v428_v47, %v394_v51  ;;  %v594_v55 = vadd.f32 %v562_v35, %v528_v53  ;;  %v411_v14 = vmul.f32 %v1772_v40, %v2174_v5 }
  0x68   : > { %v511_v2 = vmul.f32 %v1772_v40, %v2176_v6  ;;  %v2464_v27 = vadd.f32 %v859_v45, %v825_v9  ;;  %v1057_v10 = vadd.f32 %v1025_v61, %v991_v16  ;;  %v545_v11 = vmul.f32 %v1772_v40, %v2188_v15 }
  0x69   : > { %3583 = vst [vmem:[#allocation13_spill] sm:$0xff] %v2458_v12  ;;  %v2462_v24 = vadd.f32 %v1074_v60, %v1040_v44  ;;  %v628_v19 = vmul.f32 %v2191_v17, %v2458_v12  ;;  %v794_v47 = vmul.f32 %v2199_v22, %v2458_v12  ;;  %v992_v51 = vmul.f32 %v2204_v26, %v2458_v12 }
  0x6a   : > { %3585 = vst [vmem:[#allocation15_spill] sm:$0xff] %v2464_v27  ;;  %v2473_v53 = vadd.f32 %v411_v14, %v377_v7  ;;  %v1091_v9 = vmul.f32 %v2215_v32, %v2464_v27  ;;  %v577_v16 = vadd.f32 %v545_v11, %v511_v2  ;;  %v743_v44 = vmul.f32 %v1772_v40, %v2193_v18  ;;  %v1856_v14 = vld [vmem:[%s2168_s26 + $0x58] sm:$0xff]  }
  0x6b   : > { %3584 = vst [vmem:[#allocation14_spill] sm:$0xff] %v2462_v24  ;;  %1207 = vrot.lane.b32.xlu1 %v2462_v24, %s2074_s10  ;;  %v378_v35 = vmul.f32 %v1773_v42, %v2171_v1  ;;  %v2481_v60 = vadd.f32 %v628_v19, %v594_v55  ;;  %v826_v45 = vadd.f32 %v794_v47, %v760_v50 }
  0x6c   : > { %3586 = vst [vmem:[#allocation16_spill] sm:$0xff] %v2473_v53  ;;  %v611_v61 = vmul.f32 %v2191_v17, %v2473_v53  ;;  %v777_v7 = vmul.f32 %v2199_v22, %v2473_v53  ;;  %v2488_v12 = vadd.f32 %v1091_v9, %v1057_v10  ;;  %v975_v27 = vmul.f32 %v2204_v26, %v2473_v53 }
  0x6d   : > { %3587 = vst [vmem:[#allocation17_spill] sm:$0xff] %v2481_v60  ;;  %v412_v2 = vmul.f32 %v1773_v42, %v2174_v5  ;;  %v512_v40 = vmul.f32 %v1773_v42, %v2176_v6  ;;  %v860_v19 = vmul.f32 %v2202_v25, %v2481_v60  ;;  %v1026_v50 = vmul.f32 %v2213_v31, %v2481_v60 }
  0x6e   : > { %3588 = vst [vmem:[#allocation18_spill] sm:$0xff] %v2488_v12  ;;  %v2498_v55 = vadd.f32 %v611_v61, %v577_v16  ;;  %v809_v11 = vadd.f32 %v777_v7, %v743_v44  ;;  %1241 = vrot.lane.b32.xlu0 %v2488_v12, %s2074_s10  ;;  %v546_v47 = vmul.f32 %v1773_v42, %v2188_v15  ;;  %v1808_v53 = vunpack.c.l.bf16 %v1856_v14 }
  0x6f   : > { %v2502_v10 = vadd.f32 %v412_v2, %v378_v35  ;;  %v744_v9 = vmul.f32 %v1773_v42, %v2193_v18  ;;  %v2506_v24 = vadd.f32 %v860_v19, %v826_v45  ;;  %v1058_v43 = vadd.f32 %v1026_v50, %v992_v51 }
  0x70   : > { %3589 = vst [vmem:[#allocation19_spill] sm:$0xff] %v2498_v55  ;;  %v843_v60 = vmul.f32 %v2202_v25, %v2498_v55  ;;  %v1009_v16 = vmul.f32 %v2213_v31, %v2498_v55  ;;  %v578_v44 = vadd.f32 %v546_v47, %v512_v40  ;;  %v395_v2 = vmul.f32 %v1808_v53, %v2171_v1  ;;  %v1848_v55 = vld [vmem:[%s2168_s26 + $0x18] sm:$0xff]  }
  0x71   : > { %3590 = vst [vmem:[#allocation20_spill] sm:$0xff] %v2502_v10  ;;  %3591 = vst [vmem:[#allocation21_spill] sm:$0xff] %v2506_v24  ;;  %v612_v35 = vmul.f32 %v2191_v17, %v2502_v10  ;;  %v778_v61 = vmul.f32 %v2199_v22, %v2502_v10  ;;  %v976_v42 = vmul.f32 %v2204_v26, %v2502_v10 }
  0x72   : > { %v1092_v45 = vmul.f32 %v2215_v32, %v2506_v24  ;;  %v2520_v51 = vadd.f32 %v843_v60, %v809_v11  ;;  %v1041_v7 = vadd.f32 %v1009_v16, %v975_v27  ;;  %v429_v50 = vmul.f32 %v1808_v53, %v2174_v5 }
  0x73   : > { %v2523_v19 = vadd.f32 %v612_v35, %v578_v44  ;;  %v810_v40 = vadd.f32 %v778_v61, %v744_v9  ;;  %v529_v47 = vmul.f32 %v1808_v53, %v2176_v6  ;;  %v563_v24 = vmul.f32 %v1808_v53, %v2188_v15 }
  0x74   : > { %3592 = vst [vmem:[#allocation22_spill] sm:$0xff] %v2520_v51  ;;  %v2528_v12 = vadd.f32 %v1092_v45, %v1058_v43  ;;  %v1075_v10 = vmul.f32 %v2215_v32, %v2520_v51  ;;  %v761_v60 = vmul.f32 %v1808_v53, %v2193_v18  ;;  %v2538_v9 = vadd.f32 %v429_v50, %v395_v2 }
  0x75   : > { %3593 = vst [vmem:[#allocation23_spill] sm:$0xff] %v2523_v19  ;;  %v844_v27 = vmul.f32 %v2202_v25, %v2523_v19  ;;  %v1010_v11 = vmul.f32 %v2213_v31, %v2523_v19  ;;  %v1809_v16 = vunpack.c.h.bf16 %v1856_v14  ;;  %v595_v44 = vadd.f32 %v563_v24, %v529_v47 }
  0x76   : > { %3594 = vst [vmem:[#allocation24_spill] sm:$0xff] %v2528_v12  ;;  %3595 = vst [vmem:[#allocation25_spill] sm:$0xff] %v2538_v9  ;;  %1243 = vrot.lane.b32.xlu1 %v2528_v12, %s2074_s10  ;;  %v2542_v43 = vadd.f32 %v1075_v10, %v1041_v7  ;;  %v1776_v35 = vunpack.c.l.bf16 %v1848_v55  ;;  %v1777_v61 = vunpack.c.h.bf16 %v1848_v55  ;;  %v629_v51 = vmul.f32 %v2191_v17, %v2538_v9 }
  0x77   : > { %v2544_v45 = vadd.f32 %v844_v27, %v810_v40  ;;  %v1042_v53 = vadd.f32 %v1010_v11, %v976_v42  ;;  %v795_v19 = vmul.f32 %v2199_v22, %v2538_v9  ;;  %v993_v14 = vmul.f32 %v2204_v26, %v2538_v9 }
  0x78   : > { %3596 = vst [vmem:[#allocation26_spill] sm:$0xff] %v2542_v43  ;;  %1209 = vrot.lane.b32.xlu0 %v2542_v43, %s2074_s10  ;;  %v396_v10 = vmul.f32 %v1809_v16, %v2171_v1  ;;  %v430_v24 = vmul.f32 %v1809_v16, %v2174_v5  ;;  %v530_v55 = vmul.f32 %v1809_v16, %v2176_v6 }
  0x79   : > { %3597 = vst [vmem:[#allocation27_spill] sm:$0xff] %v2544_v45  ;;  %v1076_v42 = vmul.f32 %v2215_v32, %v2544_v45  ;;  %v2559_v7 = vadd.f32 %v629_v51, %v595_v44  ;;  %v827_v2 = vadd.f32 %v795_v19, %v761_v60  ;;  %v564_v40 = vmul.f32 %v1809_v16, %v2188_v15 }
  0x7a   : > { %v2562_v50 = vadd.f32 %v430_v24, %v396_v10  ;;  %v762_v47 = vmul.f32 %v1809_v16, %v2193_v18  ;;  %v379_v27 = vmul.f32 %v1776_v35, %v2171_v1  ;;  %v413_v11 = vmul.f32 %v1776_v35, %v2174_v5 }
  0x7b   : > { %3598 = vst [vmem:[#allocation28_spill] sm:$0xff] %v2559_v7  ;;  %v2567_v9 = vadd.f32 %v1076_v42, %v1042_v53  ;;  %v861_v43 = vmul.f32 %v2202_v25, %v2559_v7  ;;  %v1027_v51 = vmul.f32 %v2213_v31, %v2559_v7  ;;  %v596_v44 = vadd.f32 %v564_v40, %v530_v55 }
  0x7c   : > { %3599 = vst [vmem:[#allocation29_spill] sm:$0xff] %v2562_v50  ;;  %v630_v19 = vmul.f32 %v2191_v17, %v2562_v50  ;;  %v796_v60 = vmul.f32 %v2199_v22, %v2562_v50  ;;  %v994_v16 = vmul.f32 %v2204_v26, %v2562_v50  ;;  %v2579_v10 = vadd.f32 %v413_v11, %v379_v27 }
  0x7d   : > { %3600 = vst [vmem:[#allocation30_spill] sm:$0xff] %v2567_v9  ;;  %1211 = vrot.lane.b32.xlu1 %v2567_v9, %s2074_s10  ;;  %v2583_v53 = vadd.f32 %v861_v43, %v827_v2  ;;  %v1059_v24 = vadd.f32 %v1027_v51, %v993_v14  ;;  %v513_v55 = vmul.f32 %v1776_v35, %v2176_v6 }
  0x7e   : > { %3601 = vst [vmem:[#allocation31_spill] sm:$0xff] %v2579_v10  ;;  %v547_v42 = vmul.f32 %v1776_v35, %v2188_v15  ;;  %v2587_v40 = vadd.f32 %v630_v19, %v596_v44  ;;  %v828_v7 = vadd.f32 %v796_v60, %v762_v47  ;;  %v613_v45 = vmul.f32 %v2191_v17, %v2579_v10  ;;  %v1857_v44 = vld [vmem:[%s2168_s26 + $0x60] sm:$0xff]  }
  0x7f   : > { %3602 = vst [vmem:[#allocation32_spill] sm:$0xff] %v2583_v53  ;;  %v745_v27 = vmul.f32 %v1776_v35, %v2193_v18  ;;  %v1093_v11 = vmul.f32 %v2215_v32, %v2583_v53  ;;  %v779_v43 = vmul.f32 %v2199_v22, %v2579_v10  ;;  %v977_v14 = vmul.f32 %v2204_v26, %v2579_v10 }
  0x80   : > { %3603 = vst [vmem:[#allocation33_spill] sm:$0xff] %v2587_v40  ;;  %v579_v50 = vadd.f32 %v547_v42, %v513_v55  ;;  %v862_v2 = vmul.f32 %v2202_v25, %v2587_v40  ;;  %v1028_v47 = vmul.f32 %v2213_v31, %v2587_v40  ;;  %v380_v51 = vmul.f32 %v1777_v61, %v2171_v1 }
  0x81   : > { %v414_v35 = vmul.f32 %v1777_v61, %v2174_v5  ;;  %v2605_v19 = vadd.f32 %v1093_v11, %v1059_v24  ;;  %v811_v55 = vadd.f32 %v779_v43, %v745_v27  ;;  %v514_v42 = vmul.f32 %v1777_v61, %v2176_v6 }
  0x82   : > { %v2607_v60 = vadd.f32 %v613_v45, %v579_v50  ;;  %v2610_v53 = vadd.f32 %v862_v2, %v828_v7  ;;  %v1060_v10 = vadd.f32 %v1028_v47, %v994_v16  ;;  %v548_v12 = vmul.f32 %v1777_v61, %v2188_v15 }
  0x83   : > { %3604 = vst [vmem:[#allocation34_spill] sm:$0xff] %v2605_v19  ;;  %v2612_v9 = vadd.f32 %v414_v35, %v380_v51  ;;  %1245 = vrot.lane.b32.xlu0 %v2605_v19, %s2074_s10  ;;  %v746_v50 = vmul.f32 %v1777_v61, %v2193_v18  ;;  %v1812_v24 = vunpack.c.l.bf16 %v1857_v44 }
  0x84   : > { %3605 = vst [vmem:[#allocation35_spill] sm:$0xff] %v2607_v60  ;;  %3606 = vst [vmem:[#allocation36_spill] sm:$0xff] %v2610_v53  ;;  %v845_v40 = vmul.f32 %v2202_v25, %v2607_v60  ;;  %v1011_v45 = vmul.f32 %v2213_v31, %v2607_v60  ;;  %v1094_v7 = vmul.f32 %v2215_v32, %v2610_v53 }
  0x85   : > { %3607 = vst [vmem:[#allocation37_spill] sm:$0xff] %v2612_v9  ;;  %v580_v16 = vadd.f32 %v548_v12, %v514_v42  ;;  %v614_v27 = vmul.f32 %v2191_v17, %v2612_v9  ;;  %v780_v11 = vmul.f32 %v2199_v22, %v2612_v9  ;;  %v978_v47 = vmul.f32 %v2204_v26, %v2612_v9  ;;  %v1849_v42 = vld [vmem:[%s2168_s26 + $0x20] sm:$0xff]  }
  0x86   : > { %v2628_v43 = vadd.f32 %v845_v40, %v811_v55  ;;  %v1043_v2 = vadd.f32 %v1011_v45, %v977_v14  ;;  %v397_v51 = vmul.f32 %v1812_v24, %v2171_v1  ;;  %v2633_v61 = vadd.f32 %v1094_v7, %v1060_v10 }
  0x87   : > { %v2635_v35 = vadd.f32 %v614_v27, %v580_v16  ;;  %v812_v19 = vadd.f32 %v780_v11, %v746_v50  ;;  %v431_v12 = vmul.f32 %v1812_v24, %v2174_v5  ;;  %v531_v40 = vmul.f32 %v1812_v24, %v2176_v6 }
  0x88   : > { %3608 = vst [vmem:[#allocation38_spill] sm:$0xff] %v2628_v43  ;;  %3609 = vst [vmem:[#allocation39_spill] sm:$0xff] %v2633_v61  ;;  %v1077_v60 = vmul.f32 %v2215_v32, %v2628_v43  ;;  %v565_v14 = vmul.f32 %v1812_v24, %v2188_v15  ;;  %v763_v55 = vmul.f32 %v1812_v24, %v2193_v18  ;;  %1247 = vrot.lane.b32.xlu1 %v2633_v61, %s2074_s10 }
  0x89   : > { %3610 = vst [vmem:[#allocation40_spill] sm:$0xff] %v2635_v35  ;;  %v846_v10 = vmul.f32 %v2202_v25, %v2635_v35  ;;  %v1012_v45 = vmul.f32 %v2213_v31, %v2635_v35  ;;  %v2650_v50 = vadd.f32 %v431_v12, %v397_v51  ;;  %v1813_v7 = vunpack.c.h.bf16 %v1857_v44 }
  0x8a   : > { %v2652_v16 = vadd.f32 %v1077_v60, %v1043_v2  ;;  %v597_v27 = vadd.f32 %v565_v14, %v531_v40  ;;  %v1780_v11 = vunpack.c.l.bf16 %v1849_v42  ;;  %v1781_v43 = vunpack.c.h.bf16 %v1849_v42 }
  0x8b   : > { %3611 = vst [vmem:[#allocation41_spill] sm:$0xff] %v2650_v50  ;;  %v2654_v9 = vadd.f32 %v846_v10, %v812_v19  ;;  %v1044_v24 = vadd.f32 %v1012_v45, %v978_v47  ;;  %v631_v61 = vmul.f32 %v2191_v17, %v2650_v50  ;;  %v797_v53 = vmul.f32 %v2199_v22, %v2650_v50 }
  0x8c   : > { %3612 = vst [vmem:[#allocation42_spill] sm:$0xff] %v2652_v16  ;;  %1213 = vrot.lane.b32.xlu0 %v2652_v16, %s2074_s10  ;;  %v995_v44 = vmul.f32 %v2204_v26, %v2650_v50  ;;  %v398_v60 = vmul.f32 %v1813_v7, %v2171_v1  ;;  %v432_v2 = vmul.f32 %v1813_v7, %v2174_v5 }
  0x8d   : > { %3613 = vst [vmem:[#allocation43_spill] sm:$0xff] %v2654_v9  ;;  %v532_v19 = vmul.f32 %v1813_v7, %v2176_v6  ;;  %v1078_v47 = vmul.f32 %v2215_v32, %v2654_v9  ;;  %v2669_v51 = vadd.f32 %v631_v61, %v597_v27  ;;  %v829_v12 = vadd.f32 %v797_v53, %v763_v55 }
  0x8e   : > { %v566_v42 = vmul.f32 %v1813_v7, %v2188_v15  ;;  %v2672_v40 = vadd.f32 %v432_v2, %v398_v60  ;;  %v764_v14 = vmul.f32 %v1813_v7, %v2193_v18  ;;  %v381_v10 = vmul.f32 %v1780_v11, %v2171_v1 }
  0x8f   : > { %3614 = vst [vmem:[#allocation44_spill] sm:$0xff] %v2669_v51  ;;  %v415_v45 = vmul.f32 %v1780_v11, %v2174_v5  ;;  %v2677_v50 = vadd.f32 %v1078_v47, %v1044_v24  ;;  %v863_v16 = vmul.f32 %v2202_v25, %v2669_v51  ;;  %v1029_v61 = vmul.f32 %v2213_v31, %v2669_v51 }
  0x90   : > { %3615 = vst [vmem:[#allocation45_spill] sm:$0xff] %v2672_v40  ;;  %v598_v27 = vadd.f32 %v566_v42, %v532_v19  ;;  %v632_v53 = vmul.f32 %v2191_v17, %v2672_v40  ;;  %v798_v55 = vmul.f32 %v2199_v22, %v2672_v40  ;;  %v996_v7 = vmul.f32 %v2204_v26, %v2672_v40 }
  0x91   : > { %3616 = vst [vmem:[#allocation46_spill] sm:$0xff] %v2677_v50  ;;  %v2689_v60 = vadd.f32 %v415_v45, %v381_v10  ;;  %1215 = vrot.lane.b32.xlu1 %v2677_v50, %s2074_s10  ;;  %v2693_v24 = vadd.f32 %v863_v16, %v829_v12  ;;  %v1061_v2 = vadd.f32 %v1029_v61, %v995_v44 }
  0x92   : > { %v515_v19 = vmul.f32 %v1780_v11, %v2176_v6  ;;  %v549_v47 = vmul.f32 %v1780_v11, %v2188_v15  ;;  %v2697_v42 = vadd.f32 %v632_v53, %v598_v27  ;;  %v830_v51 = vadd.f32 %v798_v55, %v764_v14  ;;  %v1858_v27 = vld [vmem:[%s2168_s26 + $0x68] sm:$0xff]  }
  0x93   : > { %3617 = vst [vmem:[#allocation47_spill] sm:$0xff] %v2689_v60  ;;  %3618 = vst [vmem:[#allocation48_spill] sm:$0xff] %v2693_v24  ;;  %v615_v9 = vmul.f32 %v2191_v17, %v2689_v60  ;;  %v747_v10 = vmul.f32 %v1780_v11, %v2193_v18  ;;  %v1095_v45 = vmul.f32 %v2215_v32, %v2693_v24 }
  0x94   : > { %3619 = vst [vmem:[#allocation49_spill] sm:$0xff] %v2697_v42  ;;  %v581_v50 = vadd.f32 %v549_v47, %v515_v19  ;;  %v781_v16 = vmul.f32 %v2199_v22, %v2689_v60  ;;  %v979_v44 = vmul.f32 %v2204_v26, %v2689_v60  ;;  %v864_v12 = vmul.f32 %v2202_v25, %v2697_v42 }
  0x95   : > { %v1030_v14 = vmul.f32 %v2213_v31, %v2697_v42  ;;  %v382_v61 = vmul.f32 %v1781_v43, %v2171_v1  ;;  %v416_v11 = vmul.f32 %v1781_v43, %v2174_v5  ;;  %v2715_v53 = vadd.f32 %v1095_v45, %v1061_v2 }
  0x96   : > { %v2717_v55 = vadd.f32 %v615_v9, %v581_v50  ;;  %v813_v19 = vadd.f32 %v781_v16, %v747_v10  ;;  %v516_v47 = vmul.f32 %v1781_v43, %v2176_v6  ;;  %v2720_v24 = vadd.f32 %v864_v12, %v830_v51 }
  0x97   : > { %3620 = vst [vmem:[#allocation50_spill] sm:$0xff] %v2715_v53  ;;  %v1062_v60 = vadd.f32 %v1030_v14, %v996_v7  ;;  %v2722_v40 = vadd.f32 %v416_v11, %v382_v61  ;;  %v550_v35 = vmul.f32 %v1781_v43, %v2188_v15  ;;  %1249 = vrot.lane.b32.xlu0 %v2715_v53, %s2074_s10  ;;  %v1816_v2 = vunpack.c.l.bf16 %v1858_v27 }
  0x98   : > { %3621 = vst [vmem:[#allocation51_spill] sm:$0xff] %v2717_v55  ;;  %3622 = vst [vmem:[#allocation52_spill] sm:$0xff] %v2720_v24  ;;  %v847_v42 = vmul.f32 %v2202_v25, %v2717_v55  ;;  %v1013_v9 = vmul.f32 %v2213_v31, %v2717_v55  ;;  %v748_v50 = vmul.f32 %v1781_v43, %v2193_v18 }
  0x99   : > { %3623 = vst [vmem:[#allocation53_spill] sm:$0xff] %v2722_v40  ;;  %v1096_v51 = vmul.f32 %v2215_v32, %v2720_v24  ;;  %v582_v7 = vadd.f32 %v550_v35, %v516_v47  ;;  %v616_v10 = vmul.f32 %v2191_v17, %v2722_v40  ;;  %v782_v45 = vmul.f32 %v2199_v22, %v2722_v40  ;;  %v1850_v47 = vld [vmem:[%s2168_s26 + $0x28] sm:$0xff]  }
  0x9a   : > { %v2738_v16 = vadd.f32 %v847_v42, %v813_v19  ;;  %v1045_v12 = vadd.f32 %v1013_v9, %v979_v44  ;;  %v980_v14 = vmul.f32 %v2204_v26, %v2722_v40  ;;  %v399_v61 = vmul.f32 %v1816_v2, %v2171_v1 }
  0x9b   : > { %v2743_v43 = vadd.f32 %v1096_v51, %v1062_v60  ;;  %v2745_v11 = vadd.f32 %v616_v10, %v582_v7  ;;  %v814_v55 = vadd.f32 %v782_v45, %v748_v50  ;;  %v433_v35 = vmul.f32 %v1816_v2, %v2174_v5 }
  0x9c   : > { %3624 = vst [vmem:[#allocation54_spill] sm:$0xff] %v2738_v16  ;;  %v1079_v24 = vmul.f32 %v2215_v32, %v2738_v16  ;;  %v533_v42 = vmul.f32 %v1816_v2, %v2176_v6  ;;  %v567_v44 = vmul.f32 %v1816_v2, %v2188_v15  ;;  %v765_v19 = vmul.f32 %v1816_v2, %v2193_v18 }
  0x9d   : > { %3625 = vst [vmem:[#allocation55_spill] sm:$0xff] %v2743_v43  ;;  %3626 = vst [vmem:[#allocation56_spill] sm:$0xff] %v2745_v11  ;;  %1251 = vrot.lane.b32.xlu1 %v2743_v43, %s2074_s10  ;;  %v848_v60 = vmul.f32 %v2202_v25, %v2745_v11  ;;  %v1014_v9 = vmul.f32 %v2213_v31, %v2745_v11  ;;  %v2760_v50 = vadd.f32 %v433_v35, %v399_v61 }
  0x9e   : > { %v1817_v51 = vunpack.c.h.bf16 %v1858_v27  ;;  %v2762_v7 = vadd.f32 %v1079_v24, %v1045_v12  ;;  %v599_v10 = vadd.f32 %v567_v44, %v533_v42  ;;  %v1784_v45 = vunpack.c.l.bf16 %v1850_v47 }
  0x9f   : > { %3627 = vst [vmem:[#allocation57_spill] sm:$0xff] %v2760_v50  ;;  %v1785_v40 = vunpack.c.h.bf16 %v1850_v47  ;;  %v2764_v16 = vadd.f32 %v848_v60, %v814_v55  ;;  %v1046_v2 = vadd.f32 %v1014_v9, %v980_v14  ;;  %v633_v43 = vmul.f32 %v2191_v17, %v2760_v50 }
  0xa0   : > { %3628 = vst [vmem:[#allocation58_spill] sm:$0xff] %v2762_v7  ;;  %v799_v53 = vmul.f32 %v2199_v22, %v2760_v50  ;;  %1217 = vrot.lane.b32.xlu0 %v2762_v7, %s2074_s10  ;;  %v997_v27 = vmul.f32 %v2204_v26, %v2760_v50  ;;  %v400_v24 = vmul.f32 %v1817_v51, %v2171_v1 }
  0xa1   : > { %3629 = vst [vmem:[#allocation59_spill] sm:$0xff] %v2764_v16  ;;  %v434_v12 = vmul.f32 %v1817_v51, %v2174_v5  ;;  %v534_v55 = vmul.f32 %v1817_v51, %v2176_v6  ;;  %v1080_v14 = vmul.f32 %v2215_v32, %v2764_v16  ;;  %v2779_v61 = vadd.f32 %v633_v43, %v599_v10 }
  0xa2   : > { %v831_v35 = vadd.f32 %v799_v53, %v765_v19  ;;  %v568_v47 = vmul.f32 %v1817_v51, %v2188_v15  ;;  %v766_v44 = vmul.f32 %v1817_v51, %v2193_v18  ;;  %v383_v60 = vmul.f32 %v1784_v45, %v2171_v1 }
  0xa3   : > { %3630 = vst [vmem:[#allocation60_spill] sm:$0xff] %v2779_v61  ;;  %v2782_v42 = vadd.f32 %v434_v12, %v400_v24  ;;  %v417_v9 = vmul.f32 %v1784_v45, %v2174_v5  ;;  %v2787_v11 = vadd.f32 %v1080_v14, %v1046_v2  ;;  %v865_v7 = vmul.f32 %v2202_v25, %v2779_v61 }
  0xa4   : > { %v1031_v43 = vmul.f32 %v2213_v31, %v2779_v61  ;;  %v600_v10 = vadd.f32 %v568_v47, %v534_v55  ;;  %v517_v55 = vmul.f32 %v1784_v45, %v2176_v6  ;;  %v551_v14 = vmul.f32 %v1784_v45, %v2188_v15 }
  0xa5   : > { %3631 = vst [vmem:[#allocation61_spill] sm:$0xff] %v2782_v42  ;;  %3632 = vst [vmem:[#allocation62_spill] sm:$0xff] %v2787_v11  ;;  %v634_v53 = vmul.f32 %v2191_v17, %v2782_v42  ;;  %v800_v19 = vmul.f32 %v2199_v22, %v2782_v42  ;;  %v998_v51 = vmul.f32 %v2204_v26, %v2782_v42  ;;  %1219 = vrot.lane.b32.xlu1 %v2787_v11, %s2074_s10 }
  0xa6   : > { %v2799_v24 = vadd.f32 %v417_v9, %v383_v60  ;;  %v2803_v2 = vadd.f32 %v865_v7, %v831_v35  ;;  %v1063_v12 = vadd.f32 %v1031_v43, %v997_v27  ;;  %v749_v60 = vmul.f32 %v1784_v45, %v2193_v18 }
  0xa7   : > { %v2807_v47 = vadd.f32 %v634_v53, %v600_v10  ;;  %v832_v16 = vadd.f32 %v800_v19, %v766_v44  ;;  %v583_v11 = vadd.f32 %v551_v14, %v517_v55  ;;  %v384_v43 = vmul.f32 %v1785_v40, %v2171_v1  ;;  %v1859_v10 = vld [vmem:[%s2168_s26 + $0x70] sm:$0xff]  }
  0xa8   : > { %3633 = vst [vmem:[#allocation63_spill] sm:$0xff] %v2799_v24  ;;  %3634 = vst [vmem:[#allocation64_spill] sm:$0xff] %v2803_v2  ;;  %v617_v61 = vmul.f32 %v2191_v17, %v2799_v24  ;;  %v1097_v9 = vmul.f32 %v2215_v32, %v2803_v2  ;;  %v783_v7 = vmul.f32 %v2199_v22, %v2799_v24 }
  0xa9   : > { %3635 = vst [vmem:[#allocation65_spill] sm:$0xff] %v2807_v47  ;;  %v981_v27 = vmul.f32 %v2204_v26, %v2799_v24  ;;  %v866_v35 = vmul.f32 %v2202_v25, %v2807_v47  ;;  %v1032_v44 = vmul.f32 %v2213_v31, %v2807_v47  ;;  %v418_v45 = vmul.f32 %v1785_v40, %v2174_v5 }
  0xaa   : > { %v2825_v53 = vadd.f32 %v1097_v9, %v1063_v12  ;;  %v2827_v19 = vadd.f32 %v617_v61, %v583_v11  ;;  %v815_v55 = vadd.f32 %v783_v7, %v749_v60  ;;  %v518_v14 = vmul.f32 %v1785_v40, %v2176_v6 }
  0xab   : > { %v2830_v42 = vadd.f32 %v866_v35, %v832_v16  ;;  %v1064_v24 = vadd.f32 %v1032_v44, %v998_v51  ;;  %v2832_v2 = vadd.f32 %v418_v45, %v384_v43  ;;  %v552_v50 = vmul.f32 %v1785_v40, %v2188_v15 }
  0xac   : > { %3636 = vst [vmem:[#allocation66_spill] sm:$0xff] %v2825_v53  ;;  %3637 = vst [vmem:[#allocation67_spill] sm:$0xff] %v2827_v19  ;;  %1253 = vrot.lane.b32.xlu0 %v2825_v53, %s2074_s10  ;;  %v849_v47 = vmul.f32 %v2202_v25, %v2827_v19  ;;  %v1015_v11 = vmul.f32 %v2213_v31, %v2827_v19  ;;  %v750_v61 = vmul.f32 %v1785_v40, %v2193_v18 }
  0xad   : > { %3638 = vst [vmem:[#allocation68_spill] sm:$0xff] %v2830_v42  ;;  %3639 = vst [vmem:[#allocation69_spill] sm:$0xff] %v2832_v2  ;;  %v1820_v12 = vunpack.c.l.bf16 %v1859_v10  ;;  %v1098_v16 = vmul.f32 %v2215_v32, %v2830_v42  ;;  %v584_v51 = vadd.f32 %v552_v50, %v518_v14  ;;  %v618_v60 = vmul.f32 %v2191_v17, %v2832_v2  ;;  %v1851_v14 = vld [vmem:[%s2168_s26 + $0x30] sm:$0xff]  }
  0xae   : > { %v784_v9 = vmul.f32 %v2199_v22, %v2832_v2  ;;  %v2848_v7 = vadd.f32 %v849_v47, %v815_v55  ;;  %v1047_v35 = vadd.f32 %v1015_v11, %v981_v27  ;;  %v982_v44 = vmul.f32 %v2204_v26, %v2832_v2 }
  0xaf   : > { %v401_v43 = vmul.f32 %v1820_v12, %v2171_v1  ;;  %v2853_v40 = vadd.f32 %v1098_v16, %v1064_v24  ;;  %v2855_v45 = vadd.f32 %v618_v60, %v584_v51  ;;  %v435_v50 = vmul.f32 %v1820_v12, %v2174_v5 }
  0xb0   : > { %3640 = vst [vmem:[#allocation70_spill] sm:$0xff] %v2848_v7  ;;  %v816_v53 = vadd.f32 %v784_v9, %v750_v61  ;;  %v1081_v19 = vmul.f32 %v2215_v32, %v2848_v7  ;;  %v535_v47 = vmul.f32 %v1820_v12, %v2176_v6  ;;  %v569_v27 = vmul.f32 %v1820_v12, %v2188_v15 }
  0xb1   : > { %3641 = vst [vmem:[#allocation71_spill] sm:$0xff] %v2853_v40  ;;  %3642 = vst [vmem:[#allocation72_spill] sm:$0xff] %v2855_v45  ;;  %v767_v55 = vmul.f32 %v1820_v12, %v2193_v18  ;;  %1255 = vrot.lane.b32.xlu1 %v2853_v40, %s2074_s10  ;;  %v850_v24 = vmul.f32 %v2202_v25, %v2855_v45  ;;  %v1016_v11 = vmul.f32 %v2213_v31, %v2855_v45 }
  0xb2   : > { %v2870_v61 = vadd.f32 %v435_v50, %v401_v43  ;;  %v1821_v16 = vunpack.c.h.bf16 %v1859_v10  ;;  %v2872_v51 = vadd.f32 %v1081_v19, %v1047_v35  ;;  %v601_v60 = vadd.f32 %v569_v27, %v535_v47 }
  0xb3   : > { %v1788_v9 = vunpack.c.l.bf16 %v1851_v14  ;;  %v1789_v2 = vunpack.c.h.bf16 %v1851_v14  ;;  %v2874_v7 = vadd.f32 %v850_v24, %v816_v53  ;;  %v1048_v12 = vadd.f32 %v1016_v11, %v982_v44 }
  0xb4   : > { %3643 = vst [vmem:[#allocation73_spill] sm:$0xff] %v2870_v61  ;;  %3644 = vst [vmem:[#allocation74_spill] sm:$0xff] %v2872_v51  ;;  %v635_v40 = vmul.f32 %v2191_v17, %v2870_v61  ;;  %v801_v42 = vmul.f32 %v2199_v22, %v2870_v61  ;;  %1221 = vrot.lane.b32.xlu0 %v2872_v51, %s2074_s10  ;;  %v999_v10 = vmul.f32 %v2204_v26, %v2870_v61 }
  0xb5   : > { %3645 = vst [vmem:[#allocation75_spill] sm:$0xff] %v2874_v7  ;;  %v402_v19 = vmul.f32 %v1821_v16, %v2171_v1  ;;  %v436_v35 = vmul.f32 %v1821_v16, %v2174_v5  ;;  %v536_v53 = vmul.f32 %v1821_v16, %v2176_v6  ;;  %v1082_v44 = vmul.f32 %v2215_v32, %v2874_v7 }
  0xb6   : > { %v2889_v43 = vadd.f32 %v635_v40, %v601_v60  ;;  %v833_v50 = vadd.f32 %v801_v42, %v767_v55  ;;  %v570_v14 = vmul.f32 %v1821_v16, %v2188_v15  ;;  %v768_v27 = vmul.f32 %v1821_v16, %v2193_v18 }
  0xb7   : > { %v2892_v47 = vadd.f32 %v436_v35, %v402_v19  ;;  %v385_v24 = vmul.f32 %v1788_v9, %v2171_v1  ;;  %v419_v11 = vmul.f32 %v1788_v9, %v2174_v5  ;;  %v2897_v51 = vadd.f32 %v1082_v44, %v1048_v12 }
  0xb8   : > { %3646 = vst [vmem:[#allocation76_spill] sm:$0xff] %v2889_v43  ;;  %v867_v61 = vmul.f32 %v2202_v25, %v2889_v43  ;;  %v1033_v40 = vmul.f32 %v2213_v31, %v2889_v43  ;;  %v602_v60 = vadd.f32 %v570_v14, %v536_v53  ;;  %v519_v53 = vmul.f32 %v1788_v9, %v2176_v6 }
  0xb9   : > { %3647 = vst [vmem:[#allocation77_spill] sm:$0xff] %v2892_v47  ;;  %3648 = vst [vmem:[#allocation78_spill] sm:$0xff] %v2897_v51  ;;  %v636_v42 = vmul.f32 %v2191_v17, %v2892_v47  ;;  %v802_v55 = vmul.f32 %v2199_v22, %v2892_v47  ;;  %v1000_v16 = vmul.f32 %v2204_v26, %v2892_v47  ;;  %1223 = vrot.lane.b32.xlu1 %v2897_v51, %s2074_s10 }
  0xba   : > { %v2909_v19 = vadd.f32 %v419_v11, %v385_v24  ;;  %v2913_v12 = vadd.f32 %v867_v61, %v833_v50  ;;  %v1065_v35 = vadd.f32 %v1033_v40, %v999_v10  ;;  %v553_v44 = vmul.f32 %v1788_v9, %v2188_v15 }
  0xbb   : > { %v2917_v14 = vadd.f32 %v636_v42, %v602_v60  ;;  %v834_v43 = vadd.f32 %v802_v55, %v768_v27  ;;  %v751_v24 = vmul.f32 %v1788_v9, %v2193_v18  ;;  %v386_v40 = vmul.f32 %v1789_v2, %v2171_v1  ;;  %v1860_v60 = vld [vmem:[%s2168_s26 + $0x78] sm:$0xff]  }
  0xbc   : > { %3649 = vst [vmem:[#allocation79_spill] sm:$0xff] %v2909_v19  ;;  %3650 = vst [vmem:[#allocation80_spill] sm:$0xff] %v2913_v12  ;;  %v619_v7 = vmul.f32 %v2191_v17, %v2909_v19  ;;  %v1099_v11 = vmul.f32 %v2215_v32, %v2913_v12  ;;  %v585_v51 = vadd.f32 %v553_v44, %v519_v53 }
  0xbd   : > { %3651 = vst [vmem:[#allocation81_spill] sm:$0xff] %v2917_v14  ;;  %v785_v61 = vmul.f32 %v2199_v22, %v2909_v19  ;;  %v983_v10 = vmul.f32 %v2204_v26, %v2909_v19  ;;  %v868_v50 = vmul.f32 %v2202_v25, %v2917_v14  ;;  %v1034_v27 = vmul.f32 %v2213_v31, %v2917_v14 }
  0xbe   : > { %v420_v9 = vmul.f32 %v1789_v2, %v2174_v5  ;;  %v2935_v42 = vadd.f32 %v1099_v11, %v1065_v35  ;;  %v2937_v55 = vadd.f32 %v619_v7, %v585_v51  ;;  %v520_v44 = vmul.f32 %v1789_v2, %v2176_v6 }
  0xbf   : > { %v817_v53 = vadd.f32 %v785_v61, %v751_v24  ;;  %v2940_v47 = vadd.f32 %v868_v50, %v834_v43  ;;  %v1066_v19 = vadd.f32 %v1034_v27, %v1000_v16  ;;  %v554_v45 = vmul.f32 %v1789_v2, %v2188_v15 }
  0xc0   : > { %3652 = vst [vmem:[#allocation82_spill] sm:$0xff] %v2935_v42  ;;  %3653 = vst [vmem:[#allocation83_spill] sm:$0xff] %v2937_v55  ;;  %v2942_v12 = vadd.f32 %v420_v9, %v386_v40  ;;  %1257 = vrot.lane.b32.xlu0 %v2935_v42, %s2074_s10  ;;  %v851_v14 = vmul.f32 %v2202_v25, %v2937_v55  ;;  %v1017_v7 = vmul.f32 %v2213_v31, %v2937_v55 }
  0xc1   : > { %3654 = vst [vmem:[#allocation84_spill] sm:$0xff] %v2940_v47  ;;  %v752_v51 = vmul.f32 %v1789_v2, %v2193_v18  ;;  %v1824_v35 = vunpack.c.l.bf16 %v1860_v60  ;;  %v1100_v43 = vmul.f32 %v2215_v32, %v2940_v47  ;;  %v586_v16 = vadd.f32 %v554_v45, %v520_v44  ;;  %v1852_v44 = vld [vmem:[%s2168_s26 + $0x38] sm:$0xff]   ;;  %s1753_s26 = sshll.u32 %s3755_s25, 5 }
  0xc2   : > { %3655 = vst [vmem:[#allocation85_spill] sm:$0xff] %v2942_v12  ;;  %v620_v24 = vmul.f32 %v2191_v17, %v2942_v12  ;;  %v786_v11 = vmul.f32 %v2199_v22, %v2942_v12  ;;  %v2958_v61 = vadd.f32 %v851_v14, %v817_v53  ;;  %v1049_v50 = vadd.f32 %v1017_v7, %v983_v10  ;;  %s305_s29 = scalar_lea.vmem %s3480_s7, %s1753_s26 }
  0xc3   : > { %v984_v27 = vmul.f32 %v2204_v26, %v2942_v12  ;;  %v403_v40 = vmul.f32 %v1824_v35, %v2171_v1  ;;  %v2963_v2 = vadd.f32 %v1100_v43, %v1066_v19  ;;  %v437_v45 = vmul.f32 %v1824_v35, %v2174_v5 }
  0xc4   : > { %3656 = vst [vmem:[#allocation86_spill] sm:$0xff] %v2958_v61  ;;  %v2965_v9 = vadd.f32 %v620_v24, %v586_v16  ;;  %v818_v42 = vadd.f32 %v786_v11, %v752_v51  ;;  %v1083_v55 = vmul.f32 %v2215_v32, %v2958_v61  ;;  %v537_v14 = vmul.f32 %v1824_v35, %v2176_v6 }
  0xc5   : > { %3657 = vst [vmem:[#allocation87_spill] sm:$0xff] %v2963_v2  ;;  %v571_v10 = vmul.f32 %v1824_v35, %v2188_v15  ;;  %v769_v53 = vmul.f32 %v1824_v35, %v2193_v18  ;;  %1259 = vrot.lane.b32.xlu1 %v2963_v2, %s2074_s10  ;;  %v2980_v51 = vadd.f32 %v437_v45, %v403_v40  ;;  %v1825_v43 = vunpack.c.h.bf16 %v1860_v60 }
  0xc6   : > { %v852_v19 = vmul.f32 %v2202_v25, %v2965_v9  ;;  %v1018_v7 = vmul.f32 %v2213_v31, %v2965_v9  ;;  %v2982_v16 = vadd.f32 %v1083_v55, %v1049_v50  ;;  %v1792_v11 = vunpack.c.l.bf16 %v1852_v44 }
  0xc7   : > { %3658 = vst [vmem:[#allocation88_spill] sm:$0xff] %v2980_v51  ;;  %v603_v24 = vadd.f32 %v571_v10, %v537_v14  ;;  %v1793_v12 = vunpack.c.h.bf16 %v1852_v44  ;;  %v637_v2 = vmul.f32 %v2191_v17, %v2980_v51  ;;  %v803_v47 = vmul.f32 %v2199_v22, %v2980_v51 }
  0xc8   : > { %3659 = vst [vmem:[#allocation89_spill] sm:$0xff] %v2982_v16  ;;  %v2984_v61 = vadd.f32 %v852_v19, %v818_v42  ;;  %v1050_v35 = vadd.f32 %v1018_v7, %v984_v27  ;;  %1225 = vrot.lane.b32.xlu0 %v2982_v16, %s2074_s10  ;;  %v1001_v60 = vmul.f32 %v2204_v26, %v2980_v51 }
  0xc9   : > { %v404_v55 = vmul.f32 %v1825_v43, %v2171_v1  ;;  %v438_v50 = vmul.f32 %v1825_v43, %v2174_v5  ;;  %v538_v42 = vmul.f32 %v1825_v43, %v2176_v6  ;;  %v2999_v40 = vadd.f32 %v637_v2, %v603_v24 }
  0xca   : > { %3660 = vst [vmem:[#allocation90_spill] sm:$0xff] %v2984_v61  ;;  %v1084_v27 = vmul.f32 %v2215_v32, %v2984_v61  ;;  %v835_v45 = vadd.f32 %v803_v47, %v769_v53  ;;  %v572_v44 = vmul.f32 %v1825_v43, %v2188_v15  ;;  %v770_v10 = vmul.f32 %v1825_v43, %v2193_v18 }
  0xcb   : > { %3661 = vst [vmem:[#allocation91_spill] sm:$0xff] %v2999_v40  ;;  %v3002_v14 = vadd.f32 %v438_v50, %v404_v55  ;;  %v387_v19 = vmul.f32 %v1792_v11, %v2171_v1  ;;  %v421_v7 = vmul.f32 %v1792_v11, %v2174_v5  ;;  %v869_v51 = vmul.f32 %v2202_v25, %v2999_v40 }
  0xcc   : > { %v3007_v16 = vadd.f32 %v1084_v27, %v1050_v35  ;;  %v1035_v2 = vmul.f32 %v2213_v31, %v2999_v40  ;;  %v604_v24 = vadd.f32 %v572_v44, %v538_v42  ;;  %v521_v42 = vmul.f32 %v1792_v11, %v2176_v6 }
  0xcd   : > { %3662 = vst [vmem:[#allocation92_spill] sm:$0xff] %v3002_v14  ;;  %v638_v47 = vmul.f32 %v2191_v17, %v3002_v14  ;;  %v804_v53 = vmul.f32 %v2199_v22, %v3002_v14  ;;  %v1002_v43 = vmul.f32 %v2204_v26, %v3002_v14  ;;  %v3021_v35 = vadd.f32 %v421_v7, %v387_v19 }
  0xce   : > { %3663 = vst [vmem:[#allocation93_spill] sm:$0xff] %v3007_v16  ;;  %1227 = vrot.lane.b32.xlu1 %v3007_v16, %s2074_s10  ;;  %v3025_v55 = vadd.f32 %v869_v51, %v835_v45  ;;  %v1067_v50 = vadd.f32 %v1035_v2, %v1001_v60  ;;  %v555_v27 = vmul.f32 %v1792_v11, %v2188_v15 }
  0xcf   : > { %3664 = vst [vmem:[#allocation94_spill] sm:$0xff] %v3021_v35  ;;  %v3031_v44 = vadd.f32 %v638_v47, %v604_v24  ;;  %v836_v40 = vadd.f32 %v804_v53, %v770_v10  ;;  %v621_v14 = vmul.f32 %v2191_v17, %v3021_v35  ;;  %v753_v19 = vmul.f32 %v1792_v11, %v2193_v18 }
  0xd0   : > { %3665 = vst [vmem:[#allocation95_spill] sm:$0xff] %v3025_v55  ;;  %v1101_v51 = vmul.f32 %v2215_v32, %v3025_v55  ;;  %v587_v60 = vadd.f32 %v555_v27, %v521_v42  ;;  %v787_v45 = vmul.f32 %v2199_v22, %v3021_v35  ;;  %v985_v7 = vmul.f32 %v2204_v26, %v3021_v35 }
  0xd1   : > { %v870_v10 = vmul.f32 %v2202_v25, %v3031_v44  ;;  %v1036_v2 = vmul.f32 %v2213_v31, %v3031_v44  ;;  %v388_v11 = vmul.f32 %v1793_v12, %v2171_v1  ;;  %v422_v24 = vmul.f32 %v1793_v12, %v2174_v5 }
  0xd2   : > { %v3050_v47 = vadd.f32 %v1101_v51, %v1067_v50  ;;  %v3052_v53 = vadd.f32 %v621_v14, %v587_v60  ;;  %v819_v42 = vadd.f32 %v787_v45, %v753_v19  ;;  %v522_v27 = vmul.f32 %v1793_v12, %v2176_v6  ;;  %v1234_v14 = vpop.permute.xlu0 %1233 }
  0xd3   : > { %v3055_v16 = vadd.f32 %v870_v10, %v836_v40  ;;  %v1068_v35 = vadd.f32 %v1036_v2, %v1002_v43  ;;  %v3057_v55 = vadd.f32 %v422_v24, %v388_v11  ;;  %v556_v61 = vmul.f32 %v1793_v12, %v2188_v15 }
  0xd4   : > { %1261 = vrot.lane.b32.xlu0 %v3050_v47, %s2074_s10  ;;  %v853_v1 = vmul.f32 %v2202_v25, %v3052_v53  ;;  %v1019_v5 = vmul.f32 %v2213_v31, %v3052_v53  ;;  %v754_v6 = vmul.f32 %v1793_v12, %v2193_v18  ;;  %v3068_v40 = vstv %s3013_s11  ;;  %v1202_v12 = vpop.permute.xlu1 %1201 }
  0xd5   : > { %v1102_v43 = vmul.f32 %v2215_v32, %v3055_v16  ;;  %v588_v50 = vadd.f32 %v556_v61, %v522_v27  ;;  %v622_v15 = vmul.f32 %v2191_v17, %v3057_v55  ;;  %v788_v19 = vmul.f32 %v2199_v22, %v3057_v55 }
  0xd6   : > { %v3076_v51 = vadd.f32 %v853_v1, %v819_v42  ;;  %v1051_v60 = vadd.f32 %v1019_v5, %v985_v7  ;;  %v986_v45 = vmul.f32 %v2204_v26, %v3057_v55  ;;  %v3081_v18 = vstv %s3029_s12 }
  0xd7   : > { %v3083_v10 = vadd.f32 %v1102_v43, %v1068_v35  ;;  %v3085_v2 = vadd.f32 %v622_v15, %v588_v50  ;;  %v820_v61 = vadd.f32 %v788_v19, %v754_v6  ;;  %v3088_v11 = vstv %s3036_s13  ;;  %v1298_v35 = vld [vmem:[%s3476_s3 + $0x8] sm:$0xff]  ;;  %v1236_v6 = vpop.permute.xlu0 %1235 }
  0xd8   : > { %v1085_v17 = vmul.f32 %v2215_v32, %v3076_v51  ;;  %v489_v22 = vmul.f32 %v3068_v40, %v2196_v20  ;;  %v689_v7 = vmul.f32 %v3081_v18, %v2222_v36  ;;  %v921_v26 = vmul.f32 %v3088_v11, %v2242_v52  ;;  %1377 = vmatprep.mubr.f32.mxu0 %v1298_v35  ;;  %v1204_v15 = vpop.permute.xlu1 %1203 }
  0xd9   : > { %1263 = vrot.lane.b32.xlu1 %v3083_v10, %s2074_s10  ;;  %v854_v24 = vmul.f32 %v2202_v25, %v3085_v2  ;;  %v1020_v42 = vmul.f32 %v2213_v31, %v3085_v2  ;;  %v473_v20 = vmul.f32 %v3068_v40, %v2219_v34  ;;  %v673_v36 = vmul.f32 %v3081_v18, %v2238_v48 }
  0xda   : > { %v3111_v52 = vadd.f32 %v1085_v17, %v1051_v60  ;;  %v721_v27 = vadd.f32 %v689_v7, %v489_v22  ;;  %v905_v1 = vmul.f32 %v3088_v11, %v2262_v0  ;;  %v490_v5 = vmul.f32 %v3068_v40, %v2244_v54 }
  0xdb   : > { %v3117_v25 = vadd.f32 %v854_v24, %v820_v61  ;;  %v1052_v31 = vadd.f32 %v1020_v42, %v986_v45  ;;  %v705_v43 = vadd.f32 %v673_v36, %v473_v20  ;;  %v690_v34 = vmul.f32 %v3081_v18, %v2268_v8 }
  0xdc   : > { %1229 = vrot.lane.b32.xlu0 %v3111_v52, %s2074_s10  ;;  %v953_v48 = vadd.f32 %v921_v26, %v721_v27  ;;  %v922_v50 = vmul.f32 %v3088_v11, %v2292_v37  ;;  %v1154_v0 = vmul.f32 %v2217_v33, %v2323_v56  ;;  %v474_v54 = vmul.f32 %v3068_v40, %v2264_v3  ;;  %v1240_v42 = vpop.permute.xlu1 %1239 }
  0xdd   : > { %v1086_v19 = vmul.f32 %v2215_v32, %v3117_v25  ;;  %v937_v60 = vadd.f32 %v905_v1, %v705_v43  ;;  %v722_v45 = vadd.f32 %v690_v34, %v490_v5  ;;  %v674_v8 = vmul.f32 %v3081_v18, %v2294_v39  ;;  %v3666_v5 = vld [vmem:[#allocation9_spill] sm:$0xff]  ;;  %v3667_v34 = vld [vmem:[#allocation8_spill] sm:$0xff] }
  0xde   : > { %v1185_v61 = vadd.f32 %v2282_v23, %v953_v48  ;;  %v906_v37 = vmul.f32 %v3088_v11, %v2325_v57  ;;  %v1138_v56 = vmul.f32 %v2217_v33, %v2349_v21  ;;  %v491_v3 = vmul.f32 %v3068_v40, %v2314_v49  ;;  %v1238_v21 = vpop.permute.xlu0 %1237 }
  0xdf   : > { %v3140_v17 = vadd.f32 %v1086_v19, %v1052_v31  ;;  %v1169_v32 = vadd.f32 %v2300_v41, %v937_v60  ;;  %v954_v22 = vadd.f32 %v922_v50, %v722_v45  ;;  %v706_v7 = vadd.f32 %v674_v8, %v474_v54  ;;  %v3669_v45 = vld [vmem:[#allocation14_spill] sm:$0xff] }
  0xe0   : > { %v1281_v26 = vadd.f32 %v1234_v14, %v1185_v61  ;;  %v691_v39 = vmul.f32 %v3081_v18, %v2341_v4  ;;  %v923_v23 = vmul.f32 %v3088_v11, %v2364_v38  ;;  %v1155_v57 = vmul.f32 %v2217_v33, %v2383_v63 }
  0xe1   : > { %1231 = vrot.lane.b32.xlu1 %v3140_v17, %s2074_s10  ;;  %v1265_v49 = vadd.f32 %v1202_v12, %v1169_v32  ;;  %v1186_v35 = vadd.f32 %v1154_v0, %v954_v22  ;;  %v938_v24 = vadd.f32 %v906_v37, %v706_v7  ;;  %v492_v41 = vmul.f32 %v3068_v40, %v2333_v62  ;;  %v3668_v0 = vld [vmem:[#allocation11_spill] sm:$0xff]  ;;  %v3671_v32 = vld [vmem:[#allocation12_spill] sm:$0xff] }
  0xe2   : > { %v723_v14 = vadd.f32 %v691_v39, %v491_v3  ;;  %v692_v4 = vmul.f32 %v3081_v18, %v2357_v28  ;;  %v924_v38 = vmul.f32 %v3088_v11, %v2377_v58  ;;  %v1156_v63 = vmul.f32 %v2217_v33, %v2401_v29  ;;  %v1208_v3 = vpop.permute.xlu1 %1207  ;;  %v3672_v7 = vld [vmem:[#allocation15_spill] sm:$0xff]  ;;  %v3673_v39 = vld [vmem:[#allocation18_spill] sm:$0xff] }
  0xe3   : > { %v1282_v20 = vadd.f32 %v1236_v6, %v1186_v35  ;;  %v1170_v36 = vadd.f32 %v1138_v56, %v938_v24  ;;  %v475_v12 = vmul.f32 %v3068_v40, %v2372_v46  ;;  %v675_v27 = vmul.f32 %v3081_v18, %v2391_v13  ;;  %v1206_v46 = vpop.permute.xlu0 %1205 }
  0xe4   : > { %v955_v62 = vadd.f32 %v923_v23, %v723_v14  ;;  %v724_v1 = vadd.f32 %v692_v4, %v492_v41  ;;  %v907_v28 = vmul.f32 %v3088_v11, %v3666_v5  ;;  %v1139_v58 = vmul.f32 %v2217_v33, %v2438_v30  ;;  %v3675_v41 = vld [vmem:[#allocation17_spill] sm:$0xff] }
  0xe5   : > { %v1266_v31 = vadd.f32 %v1204_v15, %v1170_v36  ;;  %v1956_v43 = vpack.c.bf16 %v1282_v20, %v1281_v26  ;;  %v707_v29 = vadd.f32 %v675_v27, %v475_v12  ;;  %v476_v6 = vmul.f32 %v3068_v40, %v3667_v34  ;;  %v3670_v15 = vld [vmem:[#allocation10_spill] sm:$0xff]  ;;  %v3677_v20 = vld [vmem:[#allocation24_spill] sm:$0xff] }
  0xe6   : > { %v1187_v48 = vadd.f32 %v1155_v57, %v955_v62  ;;  %v956_v50 = vadd.f32 %v924_v38, %v724_v1  ;;  %v676_v13 = vmul.f32 %v3081_v18, %v2421_v59  ;;  %v908_v54 = vmul.f32 %v3088_v11, %v3668_v0  ;;  %v3674_v57 = vld [vmem:[#allocation13_spill] sm:$0xff]  ;;  %v3678_v12 = vld [vmem:[#allocation16_spill] sm:$0xff]  ;;  %v3681_v34 = vld [vmem:[#allocation26_spill] sm:$0xff] }
  0xe7   : > { %1957 = vmatprep.subr.bf16.mxu0 %v1956_v43  ;;  %v1958_v19 = vpack.c.bf16 %v1266_v31, %v1265_v49  ;;  %v939_v60 = vadd.f32 %v907_v28, %v707_v29  ;;  %v1140_v30 = vmul.f32 %v2217_v33, %v3669_v45  ;;  %v493_v8 = vmul.f32 %v3068_v40, %v3670_v15  ;;  %v3676_v38 = vld [vmem:[#allocation21_spill] sm:$0xff]  ;;  %v1242_v28 = vpop.permute.xlu0 %1241  ;;  %v3680_v43 = vld [vmem:[#allocation22_spill] sm:$0xff] }
  0xe8   : > { %v1283_v61 = vadd.f32 %v1238_v21, %v1187_v48  ;;  %v1188_v37 = vadd.f32 %v1156_v63, %v956_v50  ;;  %v708_v56 = vadd.f32 %v676_v13, %v476_v6  ;;  %v693_v22 = vmul.f32 %v3081_v18, %v3671_v32  ;;  %v3682_v48 = vld [vmem:[#allocation20_spill] sm:$0xff] }
  0xe9   : > { %1959 = vmatpush3.bf16.msra.mxu0 %v1958_v19  ;;  %v1171_v59 = vadd.f32 %v1139_v58, %v939_v60  ;;  %v925_v26 = vmul.f32 %v3088_v11, %v3672_v7  ;;  %v1157_v23 = vmul.f32 %v2217_v33, %v3673_v39  ;;  %v494_v49 = vmul.f32 %v3068_v40, %v3674_v57  ;;  %v3679_v58 = vld [vmem:[#allocation19_spill] sm:$0xff] }
  0xea   : > { %v1284_v35 = vadd.f32 %v1240_v42, %v1188_v37  ;;  %v940_v24 = vadd.f32 %v908_v54, %v708_v56  ;;  %v725_v21 = vadd.f32 %v693_v22, %v493_v8  ;;  %v694_v14 = vmul.f32 %v3081_v18, %v3675_v41  ;;  %v1244_v54 = vpop.permute.xlu1 %1243  ;;  %v3683_v19 = vld [vmem:[#allocation23_spill] sm:$0xff]  ;;  %v3685_v8 = vld [vmem:[#allocation30_spill] sm:$0xff]  ;;  %v3686_v37 = vld [vmem:[#allocation25_spill] sm:$0xff] }
  0xeb   : > { %v1267_v4 = vadd.f32 %v1206_v46, %v1171_v59  ;;  %v926_v63 = vmul.f32 %v3088_v11, %v3676_v38  ;;  %v1158_v36 = vmul.f32 %v2217_v33, %v3677_v20  ;;  %v477_v27 = vmul.f32 %v3068_v40, %v3678_v12  ;;  %v3691_v20 = vld [vmem:[#allocation36_spill] sm:$0xff] }
  0xec   : > { %v1960_v62 = vpack.c.bf16 %v1284_v35, %v1283_v61  ;;  %v1172_v1 = vadd.f32 %v1140_v30, %v940_v24  ;;  %v957_v5 = vadd.f32 %v925_v26, %v725_v21  ;;  %v726_v42 = vadd.f32 %v694_v14, %v494_v49  ;;  %v3684_v30 = vld [vmem:[#allocation27_spill] sm:$0xff]  ;;  %v3687_v26 = vld [vmem:[#allocation28_spill] sm:$0xff]  ;;  %v1210_v35 = vpop.permute.xlu0 %1209  ;;  %v3689_v21 = vld [vmem:[#allocation29_spill] sm:$0xff] }
  0xed   : > { %v677_v31 = vmul.f32 %v3081_v18, %v3679_v58  ;;  %v909_v29 = vmul.f32 %v3088_v11, %v3680_v43  ;;  %v1141_v6 = vmul.f32 %v2217_v33, %v3681_v34  ;;  %v478_v50 = vmul.f32 %v3068_v40, %v3682_v48  ;;  %v3690_v14 = vld [vmem:[#allocation33_spill] sm:$0xff]  ;;  %v3693_v58 = vld [vmem:[#allocation35_spill] sm:$0xff]  ;;  %v3694_v34 = vld [vmem:[#allocation34_spill] sm:$0xff] }
  0xee   : > { %v1268_v46 = vadd.f32 %v1208_v3, %v1172_v1  ;;  %1961 = vmatprep.subr.bf16.mxu0 %v1960_v62  ;;  %v1189_v13 = vadd.f32 %v1157_v23, %v957_v5  ;;  %v958_v0 = vadd.f32 %v926_v63, %v726_v42  ;;  %v678_v60 = vmul.f32 %v3081_v18, %v3683_v19  ;;  %v3688_v23 = vld [vmem:[#allocation32_spill] sm:$0xff]  ;;  %v3692_v5 = vld [vmem:[#allocation31_spill] sm:$0xff] }
  0xef   : > { %v709_v45 = vadd.f32 %v677_v31, %v477_v27  ;;  %v910_v15 = vmul.f32 %v3088_v11, %v3684_v30  ;;  %v1142_v61 = vmul.f32 %v2217_v33, %v3685_v8  ;;  %v495_v56 = vmul.f32 %v3068_v40, %v3686_v37  ;;  %v1212_v62 = vpop.permute.xlu1 %1211  ;;  %v3695_v48 = vld [vmem:[#allocation39_spill] sm:$0xff]  ;;  %v2018_v19 = vld [vmem:[%s3477_s4] sm:$0xff]  }
  0xf0   : > { %v1962_v32 = vpack.c.bf16 %v1268_v46, %v1267_v4  ;;  %v1285_v22 = vadd.f32 %v1242_v28, %v1189_v13  ;;  %v1190_v3 = vadd.f32 %v1158_v36, %v958_v0  ;;  %v710_v59 = vadd.f32 %v678_v60, %v478_v50  ;;  %v3696_v46 = vld [vmem:[#allocation37_spill] sm:$0xff]  ;;  %v3697_v0 = vld [vmem:[#allocation40_spill] sm:$0xff]  ;;  %1932 = vmatprep.subr.bf16.mxu1 %v2018_v19 }
  0xf1   : > { %v941_v7 = vadd.f32 %v909_v29, %v709_v45  ;;  %v695_v39 = vmul.f32 %v3081_v18, %v3687_v26  ;;  %v927_v57 = vmul.f32 %v3088_v11, %v3688_v23  ;;  %v496_v41 = vmul.f32 %v3068_v40, %v3689_v21  ;;  %1933 = vmatpush3.bf16.msra.mxu1 %v2018_v19  ;;  %v3701_v23 = vld [vmem:[#allocation41_spill] sm:$0xff] }
  0xf2   : > { %v1286_v49 = vadd.f32 %v1244_v54, %v1190_v3  ;;  %1963 = vmatpush3.bf16.msra.mxu0 %v1962_v32  ;;  %v942_v24 = vadd.f32 %v910_v15, %v710_v59  ;;  %v696_v4 = vmul.f32 %v3081_v18, %v3690_v14  ;;  %v928_v36 = vmul.f32 %v3088_v11, %v3691_v20  ;;  %v3698_v15 = vld [vmem:[#allocation38_spill] sm:$0xff]  ;;  %v3700_v59 = vld [vmem:[#allocation43_spill] sm:$0xff]  ;;  %v3703_v21 = vld [vmem:[#allocation45_spill] sm:$0xff] }
  0xf3   : > { %v1173_v38 = vadd.f32 %v1141_v6, %v941_v7  ;;  %v727_v63 = vadd.f32 %v695_v39, %v495_v56  ;;  %v479_v28 = vmul.f32 %v3068_v40, %v3692_v5  ;;  %v679_v31 = vmul.f32 %v3081_v18, %v3693_v58  ;;  %v3699_v32 = vld [vmem:[#allocation42_spill] sm:$0xff]  ;;  %v3704_v14 = vld [vmem:[#allocation49_spill] sm:$0xff] }
  0xf4   : > { %v1964_v12 = vpack.c.bf16 %v1286_v49, %v1285_v22  ;;  %v1174_v27 = vadd.f32 %v1142_v61, %v942_v24  ;;  %v728_v1 = vadd.f32 %v696_v4, %v496_v41  ;;  %v1159_v6 = vmul.f32 %v2217_v33, %v3694_v34  ;;  %v2019_v61 = vld [vmem:[%s3477_s4 + $0x8] sm:$0xff]   ;;  %v3702_v49 = vld [vmem:[#allocation44_spill] sm:$0xff]  ;;  %v2020_v24 = vld [vmem:[%s3477_s4 + $0x10] sm:$0xff]  }
  0xf5   : > { %v1269_v42 = vadd.f32 %v1210_v35, %v1173_v38  ;;  %v959_v29 = vadd.f32 %v927_v57, %v727_v63  ;;  %v1160_v50 = vmul.f32 %v2217_v33, %v3695_v48  ;;  %v480_v13 = vmul.f32 %v3068_v40, %v3696_v46  ;;  %v1246_v56 = vpop.permute.xlu0 %1245  ;;  %1934 = vmatprep.subr.bf16.mxu1 %v2019_v61  ;;  %v3705_v63 = vld [vmem:[#allocation46_spill] sm:$0xff]  ;;  %v3710_v48 = vld [vmem:[#allocation60_spill] sm:$0xff] }
  0xf6   : > { %v1270_v43 = vadd.f32 %v1212_v62, %v1174_v27  ;;  %1965 = vmatprep.subr.bf16.mxu0 %v1964_v12  ;;  %v680_v54 = vmul.f32 %v3081_v18, %v3697_v0  ;;  %v960_v45 = vadd.f32 %v928_v36, %v728_v1  ;;  %v711_v30 = vadd.f32 %v679_v31, %v479_v28  ;;  %v3706_v27 = vld [vmem:[#allocation48_spill] sm:$0xff]  ;;  %v3707_v1 = vld [vmem:[#allocation50_spill] sm:$0xff]  ;;  %v3708_v28 = vld [vmem:[#allocation57_spill] sm:$0xff] }
  0xf7   : > { %v911_v8 = vmul.f32 %v3088_v11, %v3698_v15  ;;  %v1191_v37 = vadd.f32 %v1159_v6, %v959_v29  ;;  %v1143_v22 = vmul.f32 %v2217_v33, %v3699_v32  ;;  %v912_v7 = vmul.f32 %v3088_v11, %v3700_v59  ;;  %1935 = vmatpush3.bf16.msra.mxu1 %v2019_v61  ;;  %v3709_v29 = vld [vmem:[#allocation52_spill] sm:$0xff]  ;;  %v3712_v0 = vld [vmem:[#allocation61_spill] sm:$0xff]  ;;  %v3714_v15 = vld [vmem:[#allocation47_spill] sm:$0xff] }
  0xf8   : > { %v1966_v60 = vpack.c.bf16 %v1270_v43, %v1269_v42  ;;  %v712_v3 = vadd.f32 %v680_v54, %v480_v13  ;;  %v1192_v26 = vadd.f32 %v1160_v50, %v960_v45  ;;  %v497_v57 = vmul.f32 %v3068_v40, %v3701_v23  ;;  %1936 = vmatprep.subr.bf16.mxu1 %v2020_v24  ;;  %v3711_v46 = vld [vmem:[#allocation64_spill] sm:$0xff]  ;;  %v3713_v45 = vld [vmem:[#allocation55_spill] sm:$0xff]  ;;  %v3715_v61 = vld [vmem:[#allocation65_spill] sm:$0xff] }
  0xf9   : > { %v943_v39 = vadd.f32 %v911_v8, %v711_v30  ;;  %v697_v35 = vmul.f32 %v3081_v18, %v3702_v49  ;;  %v498_v41 = vmul.f32 %v3068_v40, %v3703_v21  ;;  %v698_v4 = vmul.f32 %v3081_v18, %v3704_v14  ;;  %v3716_v32 = vld [vmem:[#allocation51_spill] sm:$0xff]  ;;  %v3717_v59 = vld [vmem:[#allocation68_spill] sm:$0xff]  ;;  %v3720_v14 = vld [vmem:[#allocation70_spill] sm:$0xff] }
  0xfa   : > { %1967 = vmatpush3.bf16.msra.mxu0 %v1966_v60  ;;  %v1287_v38 = vadd.f32 %v1246_v56, %v1191_v37  ;;  %v1144_v20 = vmul.f32 %v2217_v33, %v3705_v63  ;;  %v1248_v36 = vpop.permute.xlu1 %1247  ;;  %v944_v12 = vadd.f32 %v912_v7, %v712_v3  ;;  %v929_v62 = vmul.f32 %v3088_v11, %v3706_v27  ;;  %v3718_v23 = vld [vmem:[#allocation63_spill] sm:$0xff] }
  0xfb   : > { %v1161_v5 = vmul.f32 %v2217_v33, %v3707_v1  ;;  %v499_v42 = vmul.f32 %v3068_v40, %v3708_v28  ;;  %v1288_v58 = vadd.f32 %v1248_v36, %v1192_v26  ;;  %v1175_v31 = vadd.f32 %v1143_v22, %v943_v39  ;;  %1937 = vmatpush3.bf16.msra.mxu1 %v2020_v24  ;;  %v3719_v49 = vld [vmem:[#allocation67_spill] sm:$0xff]  ;;  %v3722_v36 = vld [vmem:[#allocation72_spill] sm:$0xff]  ;;  %v3724_v28 = vld [vmem:[#allocation54_spill] sm:$0xff] }
  0xfc   : > { %v729_v43 = vadd.f32 %v697_v35, %v497_v57  ;;  %v930_v34 = vmul.f32 %v3088_v11, %v3709_v29  ;;  %v730_v6 = vadd.f32 %v698_v4, %v498_v41  ;;  %v699_v50 = vmul.f32 %v3081_v18, %v3710_v48  ;;  %v3723_v27 = vld [vmem:[#allocation75_spill] sm:$0xff]  ;;  %v3727_v48 = vld [vmem:[#allocation76_spill] sm:$0xff] }
  0xfd   : > { %v931_v13 = vmul.f32 %v3088_v11, %v3711_v46  ;;  %v500_v54 = vmul.f32 %v3068_v40, %v3712_v0  ;;  %v1968_v19 = vpack.c.bf16 %v1288_v58, %v1287_v38  ;;  %v1162_v30 = vmul.f32 %v2217_v33, %v3713_v45  ;;  %v3721_v38 = vld [vmem:[#allocation69_spill] sm:$0xff]  ;;  %v3725_v58 = vld [vmem:[#allocation58_spill] sm:$0xff] }
  0xfe   : > { %v1214_v60 = vpop.permute.xlu0 %1213  ;;  %v481_v8 = vmul.f32 %v3068_v40, %v3714_v15  ;;  %v700_v37 = vmul.f32 %v3081_v18, %v3715_v61  ;;  %v1176_v56 = vadd.f32 %v1144_v20, %v944_v12  ;;  %v681_v22 = vmul.f32 %v3081_v18, %v3716_v32  ;;  %v3729_v15 = vld [vmem:[#allocation80_spill] sm:$0xff] }
  0xff   : > { %v731_v3 = vadd.f32 %v699_v50, %v499_v42  ;;  %v932_v7 = vmul.f32 %v3088_v11, %v3717_v59  ;;  %1969 = vmatprep.subr.bf16.mxu0 %v1968_v19  ;;  %v961_v26 = vadd.f32 %v929_v62, %v729_v43  ;;  %v483_v57 = vmul.f32 %v3068_v40, %v3718_v23  ;;  %v3726_v43 = vld [vmem:[#allocation73_spill] sm:$0xff]  ;;  %v3731_v59 = vld [vmem:[#allocation56_spill] sm:$0xff] }
 0x100   : > { %v732_v39 = vadd.f32 %v700_v37, %v500_v54  ;;  %v683_v35 = vmul.f32 %v3081_v18, %v3719_v49  ;;  %v1271_v21 = vadd.f32 %v1214_v60, %v1175_v31  ;;  %v915_v4 = vmul.f32 %v3088_v11, %v3720_v14  ;;  %v3728_v19 = vld [vmem:[#allocation53_spill] sm:$0xff] }
 0x101   : > { %v3284_v41 = vadd.f32 %v931_v13, %v731_v3  ;;  %v484_v63 = vmul.f32 %v3068_v40, %v3721_v38  ;;  %v684_v12 = vmul.f32 %v3081_v18, %v3722_v36  ;;  %v916_v62 = vmul.f32 %v3088_v11, %v3723_v27  ;;  %v3730_v37 = vld [vmem:[#allocation77_spill] sm:$0xff]  ;;  %v3735_v38 = vld [vmem:[#allocation83_spill] sm:$0xff] }
 0x102   : > { %v3290_v20 = vadd.f32 %v932_v7, %v732_v39  ;;  %v715_v24 = vadd.f32 %v683_v35, %v483_v57  ;;  %v913_v42 = vmul.f32 %v3088_v11, %v3724_v28  ;;  %v1145_v31 = vmul.f32 %v2217_v33, %v3725_v58  ;;  %v3733_v57 = vld [vmem:[#allocation84_spill] sm:$0xff]  ;;  %v3734_v35 = vld [vmem:[#allocation79_spill] sm:$0xff] }
 0x103   : > { %v1216_v1 = vpop.permute.xlu1 %1215  ;;  %v501_v29 = vmul.f32 %v3068_v40, %v3726_v43  ;;  %v701_v50 = vmul.f32 %v3081_v18, %v3727_v48  ;;  %v962_v13 = vadd.f32 %v930_v34, %v730_v6  ;;  %v716_v54 = vadd.f32 %v684_v12, %v484_v63  ;;  %v3732_v34 = vld [vmem:[#allocation81_spill] sm:$0xff]  ;;  %v3739_v43 = vld [vmem:[#allocation90_spill] sm:$0xff] }
 0x104   : > { %v1272_v46 = vadd.f32 %v1216_v1, %v1176_v56  ;;  %v3304_v0 = vadd.f32 %v915_v4, %v715_v24  ;;  %v482_v60 = vmul.f32 %v3068_v40, %v3728_v19  ;;  %v933_v61 = vmul.f32 %v3088_v11, %v3729_v15  ;;  %v3736_v24 = vld [vmem:[#allocation86_spill] sm:$0xff]  ;;  %v3742_v15 = vld [vmem:[#allocation95_spill] sm:$0xff] }
 0x105   : > { %v733_v45 = vadd.f32 %v701_v50, %v501_v29  ;;  %v502_v32 = vmul.f32 %v3068_v40, %v3730_v37  ;;  %v682_v7 = vmul.f32 %v3081_v18, %v3731_v59  ;;  %v3314_v39 = vadd.f32 %v916_v62, %v716_v54  ;;  %v3738_v62 = vld [vmem:[#allocation85_spill] sm:$0xff] }
 0x106   : > { %v1970_v3 = vpack.c.bf16 %v1272_v46, %v1271_v21  ;;  %v702_v6 = vmul.f32 %v3081_v18, %v3732_v34  ;;  %v713_v56 = vadd.f32 %v681_v22, %v481_v8  ;;  %v934_v49 = vmul.f32 %v3088_v11, %v3733_v57  ;;  %v3737_v8 = vld [vmem:[#allocation59_spill] sm:$0xff]  ;;  %v3740_v46 = vld [vmem:[#allocation88_spill] sm:$0xff]  ;;  %v3744_v34 = vld [vmem:[#allocation62_spill] sm:$0xff] }
 0x107   : > { %v3318_v23 = vadd.f32 %v933_v61, %v733_v45  ;;  %v485_v14 = vmul.f32 %v3068_v40, %v3734_v35  ;;  %v1193_v4 = vadd.f32 %v1161_v5, %v961_v26  ;;  %v685_v63 = vmul.f32 %v3081_v18, %v3735_v38  ;;  %v3745_v57 = vld [vmem:[#allocation94_spill] sm:$0xff] }
 0x108   : > { %1971 = vmatpush3.bf16.msra.mxu0 %v1970_v3  ;;  %v734_v21 = vadd.f32 %v702_v6, %v502_v32  ;;  %v917_v36 = vmul.f32 %v3088_v11, %v3736_v24  ;;  %v1194_v27 = vadd.f32 %v1162_v30, %v962_v13  ;;  %v914_v22 = vmul.f32 %v3088_v11, %v3737_v8  ;;  %v3741_v13 = vld [vmem:[#allocation91_spill] sm:$0xff] }
 0x109   : > { %v1250_v12 = vpop.permute.xlu0 %1249  ;;  %v486_v1 = vmul.f32 %v3068_v40, %v3738_v62  ;;  %v686_v28 = vmul.f32 %v3081_v18, %v2965_v9  ;;  %v714_v5 = vadd.f32 %v682_v7, %v482_v60  ;;  %v717_v58 = vadd.f32 %v685_v63, %v485_v14 }
 0x10a   : > { %v3334_v26 = vadd.f32 %v934_v49, %v734_v21  ;;  %v918_v29 = vmul.f32 %v3088_v11, %v3739_v43  ;;  %v945_v48 = vadd.f32 %v913_v42, %v713_v56  ;;  %v503_v30 = vmul.f32 %v3068_v40, %v3740_v46  ;;  %v3743_v42 = vld [vmem:[#allocation92_spill] sm:$0xff]  ;;  %v3748_v46 = vld [vmem:[#allocation74_spill] sm:$0xff] }
 0x10b   : > { %v718_v50 = vadd.f32 %v686_v28, %v486_v1  ;;  %v703_v54 = vmul.f32 %v3081_v18, %v3741_v13  ;;  %v1289_v19 = vadd.f32 %v1250_v12, %v1193_v4  ;;  %v3342_v45 = vadd.f32 %v917_v36, %v717_v58  ;;  %v3746_v58 = vld [vmem:[#allocation66_spill] sm:$0xff] }
 0x10c   : > { %v935_v9 = vmul.f32 %v3088_v11, %v3742_v15  ;;  %v1167_v60 = vmul.f32 %v2217_v33, %v3050_v47  ;;  %v504_v32 = vmul.f32 %v3068_v40, %v3743_v42  ;;  %v704_v3 = vmul.f32 %v3081_v18, %v3031_v44 }
 0x10d   : > { %v3348_v61 = vadd.f32 %v918_v29, %v718_v50  ;;  %v735_v37 = vadd.f32 %v703_v54, %v503_v30  ;;  %v946_v7 = vadd.f32 %v914_v22, %v714_v5  ;;  %v1146_v6 = vmul.f32 %v2217_v33, %v3744_v34  ;;  %v3747_v29 = vld [vmem:[#allocation71_spill] sm:$0xff] }
 0x10e   : > { %v936_v56 = vmul.f32 %v3088_v11, %v3055_v16  ;;  %v487_v47 = vmul.f32 %v3068_v40, %v3745_v57  ;;  %v736_v14 = vadd.f32 %v704_v3, %v504_v32  ;;  %v1168_v4 = vmul.f32 %v2217_v33, %v3083_v10  ;;  %v3751_v34 = vld [vmem:[#allocation87_spill] sm:$0xff] }
 0x10f   : > { %v1252_v59 = vpop.permute.xlu1 %1251  ;;  %v967_v35 = vadd.f32 %v935_v9, %v735_v37  ;;  %v1177_v21 = vadd.f32 %v1145_v31, %v945_v48  ;;  %v687_v44 = vmul.f32 %v3081_v18, %v3052_v53  ;;  %v919_v38 = vmul.f32 %v3088_v11, %v3076_v51 }
 0x110   : > { %v1290_v49 = vadd.f32 %v1252_v59, %v1194_v27  ;;  %v488_v63 = vmul.f32 %v3068_v40, %v3057_v55  ;;  %v968_v36 = vadd.f32 %v936_v56, %v736_v14  ;;  %v688_v12 = vmul.f32 %v3081_v18, %v3085_v2 }
 0x111   : > { %v1199_v24 = vadd.f32 %v1167_v60, %v967_v35  ;;  %v719_v8 = vadd.f32 %v687_v44, %v487_v47  ;;  %v1151_v10 = vmul.f32 %v2217_v33, %v3111_v52  ;;  %v920_v53 = vmul.f32 %v3088_v11, %v3117_v25 }
 0x112   : > { %v1972_v16 = vpack.c.bf16 %v1290_v49, %v1289_v19  ;;  %v1218_v27 = vpop.permute.xlu0 %1217  ;;  %v1178_v31 = vadd.f32 %v1146_v6, %v946_v7  ;;  %v1200_v51 = vadd.f32 %v1168_v4, %v968_v36  ;;  %v720_v22 = vadd.f32 %v688_v12, %v488_v63  ;;  %v3749_v19 = vld [vmem:[#allocation78_spill] sm:$0xff]  ;;  %v3752_v49 = vld [vmem:[#allocation89_spill] sm:$0xff] }
 0x113   : > { %v1152_v55 = vmul.f32 %v2217_v33, %v3140_v17  ;;  %v951_v40 = vadd.f32 %v919_v38, %v719_v8  ;;  %v1273_v62 = vadd.f32 %v1218_v27, %v1177_v21  ;;  %v1163_v52 = vmul.f32 %v2217_v33, %v3746_v58  ;;  %v3753_v4 = vld [vmem:[#allocation93_spill] sm:$0xff]  ;;  %v1308_v58 = vld [vmem:[%s3476_s3 + $0x58] sm:$0xff] }
 0x114   : > { %1973 = vmatprep.subr.bf16.mxu0 %v1972_v16  ;;  %v952_v1 = vadd.f32 %v920_v53, %v720_v22  ;;  %v1164_v11 = vmul.f32 %v2217_v33, %v3747_v29  ;;  %v1147_v30 = vmul.f32 %v2217_v33, %v3748_v46  ;;  %v1148_v15 = vmul.f32 %v2217_v33, %v3749_v19  ;;  %v1309_v29 = vld [vmem:[%s3476_s3 + $0x60] sm:$0xff]  ;;  %v2024_v46 = vld [vmem:[%s3477_s4 + $0x30] sm:$0xff]  }
 0x115   : > { %v1183_v18 = vadd.f32 %v1151_v10, %v951_v40  ;;  %v1195_v25 = vadd.f32 %v1163_v52, %v3284_v41  ;;  %v1166_v6 = vmul.f32 %v2217_v33, %v3751_v34  ;;  %v1150_v21 = vmul.f32 %v2217_v33, %v3753_v4  ;;  %v1307_v52 = vld [vmem:[%s3476_s3 + $0x50] sm:$0xff] }
 0x116   : > { %v1184_v5 = vadd.f32 %v1152_v55, %v952_v1  ;;  %v1196_v17 = vadd.f32 %v1164_v11, %v3290_v20  ;;  %v1179_v60 = vadd.f32 %v1147_v30, %v3304_v0  ;;  %v1180_v42 = vadd.f32 %v1148_v15, %v3314_v39  ;;  %v3750_v20 = vld [vmem:[#allocation82_spill] sm:$0xff]  ;;  %v1301_v1 = vld [vmem:[%s3476_s3 + $0x20] sm:$0xff]  ;;  %v1312_v11 = vld [vmem:[%s3476_s3 + $0x78] sm:$0xff] }
 0x117   : > { %v1220_v28 = vpop.permute.xlu1 %1219  ;;  %v1165_v59 = vmul.f32 %v2217_v33, %v3750_v20  ;;  %v1198_v0 = vadd.f32 %v1166_v6, %v3334_v26  ;;  %v1149_v39 = vmul.f32 %v2217_v33, %v3752_v49  ;;  %v1182_v16 = vadd.f32 %v1150_v21, %v3348_v61  ;;  %v1297_v61 = vld [vmem:[%s3476_s3] sm:$0xff]  ;;  %v2025_v30 = vld [vmem:[%s3477_s4 + $0x38] sm:$0xff]  }
 0x118   : > { %v1274_v2 = vadd.f32 %v1220_v28, %v1178_v31  ;;  %v1304_v28 = vld [vmem:[%s3476_s3 + $0x38] sm:$0xff] }
 0x119   : > { %v1197_v56 = vadd.f32 %v1165_v59, %v3318_v23  ;;  %v1181_v38 = vadd.f32 %v1149_v39, %v3342_v45 }
 0x11a   : > { %v1974_v43 = vpack.c.bf16 %v1274_v2, %v1273_v62  ;;  %v1300_v62 = vld [vmem:[%s3476_s3 + $0x18] sm:$0xff]  ;;  %v1306_v2 = vld [vmem:[%s3476_s3 + $0x48] sm:$0xff] }
 0x11c   : > { %1975 = vmatpush3.bf16.msra.mxu0 %v1974_v43  ;;  %v1310_v43 = vld [vmem:[%s3476_s3 + $0x68] sm:$0xff] }
 0x11e   : > { %v1254_v48 = vpop.permute.xlu0 %1253 }
 0x11f   : > { %v1291_v50 = vadd.f32 %v1254_v48, %v1195_v25  ;;  %v1311_v25 = vld [vmem:[%s3476_s3 + $0x70] sm:$0xff]  ;;  %v2021_v48 = vld [vmem:[%s3477_s4 + $0x18] sm:$0xff]  }
 0x120   : > { %1938 = vmatprep.subr.bf16.mxu1 %v2021_v48 }
 0x121   : > { %1939 = vmatpush3.bf16.msra.mxu1 %v2021_v48 }
 0x123   : > { %v1256_v13 = vpop.permute.xlu1 %1255 }
 0x124   : > { %v1292_v54 = vadd.f32 %v1256_v13, %v1196_v17  ;;  %v2022_v17 = vld [vmem:[%s3477_s4 + $0x20] sm:$0xff]  }
 0x125   : > { %1940 = vmatprep.subr.bf16.mxu1 %v2022_v17 }
 0x126   : > { %v1976_v9 = vpack.c.bf16 %v1292_v54, %v1291_v50  ;;  %v1222_v37 = vpop.permute.xlu0 %1221  ;;  %1941 = vmatpush3.bf16.msra.mxu1 %v2022_v17  ;;  %v2023_v50 = vld [vmem:[%s3477_s4 + $0x28] sm:$0xff]  }
 0x127   : > { %v1275_v41 = vadd.f32 %v1222_v37, %v1179_v60  ;;  %1942 = vmatprep.subr.bf16.mxu1 %v2023_v50 }
 0x128   : > { %1977 = vmatprep.subr.bf16.mxu0 %v1976_v9 }
 0x12a   : > { %1943 = vmatpush3.bf16.msra.mxu1 %v2023_v50 }
 0x12b   : > { %v1224_v32 = vpop.permute.xlu1 %1223  ;;  %1944 = vmatprep.subr.bf16.mxu1 %v2024_v46 }
 0x12c   : > { %v1276_v3 = vadd.f32 %v1224_v32, %v1180_v42 }
 0x12e   : > { %v1978_v7 = vpack.c.bf16 %v1276_v3, %v1275_v41  ;;  %1945 = vmatpush3.bf16.msra.mxu1 %v2024_v46 }
 0x12f   : > { %1946 = vmatprep.subr.bf16.mxu1 %v2025_v30 }
 0x130   : > { %1979 = vmatpush3.bf16.msra.mxu0 %v1978_v7 }
 0x132   : > { %v1258_v57 = vpop.permute.xlu0 %1257  ;;  %1947 = vmatpush3.bf16.msra.mxu1 %v2025_v30 }
 0x133   : > { %v1293_v47 = vadd.f32 %v1258_v57, %v1197_v56 }
 0x137   : > { %v1260_v35 = vpop.permute.xlu1 %1259 }
 0x138   : > { %v1294_v14 = vadd.f32 %v1260_v35, %v1198_v0 }
 0x13a   : > { %v1980_v44 = vpack.c.bf16 %v1294_v14, %v1293_v47  ;;  %v1226_v63 = vpop.permute.xlu0 %1225 }
 0x13b   : > { %v1277_v23 = vadd.f32 %v1226_v63, %v1181_v38 }
 0x13c   : > { %1981 = vmatprep.subr.bf16.mxu0 %v1980_v44 }
 0x140   : > { %v1228_v36 = vpop.permute.xlu1 %1227 }
 0x141   : > { %v1278_v12 = vadd.f32 %v1228_v36, %v1182_v16 }
 0x143   : > { %v1982_v26 = vpack.c.bf16 %v1278_v12, %v1277_v23 }
 0x145   : > { %1983 = vmatpush3.bf16.msra.mxu0 %v1982_v26 }
 0x146   : > { %v1262_v27 = vpop.permute.xlu0 %1261 }
 0x147   : > { %v1295_v8 = vadd.f32 %v1262_v27, %v1199_v24  ;;  %v1299_v24 = vld [vmem:[%s3476_s3 + $0x10] sm:$0xff] }
 0x14b   : > { %v1264_v10 = vpop.permute.xlu1 %1263 }
 0x14c   : > { %v1296_v53 = vadd.f32 %v1264_v10, %v1200_v51  ;;  %v1302_v51 = vld [vmem:[%s3476_s3 + $0x28] sm:$0xff]  ;;  %v1740_v10 = vld [vmem:[%s3478_s5] ss:$0 sm:$0xff] }
 0x14e   : > { %v1984_v31 = vpack.c.bf16 %v1296_v53, %v1295_v8  ;;  %v1230_v22 = vpop.permute.xlu0 %1229 }
 0x14f   : > { %v1279_v33 = vadd.f32 %v1230_v22, %v1183_v18  ;;  %v1303_v18 = vld [vmem:[%s3476_s3 + $0x30] sm:$0xff] }
 0x150   : > { %1985 = vmatprep.subr.bf16.mxu0 %v1984_v31 }
 0x153   : > { %v1232_v55 = vpop.permute.xlu1 %1231 }
 0x154   : > { %v1280_v40 = vadd.f32 %v1232_v55, %v1184_v5  ;;  %v1305_v5 = vld [vmem:[%s3476_s3 + $0x40] sm:$0xff] }
 0x156   : > { %v1986_v45 = vpack.c.bf16 %v1280_v40, %v1279_v33  ;;  %v1741_v33 = vld [vmem:[%s3479_s6] ss:$0 sm:$0xff] }
 0x158   : > { %1987 = vmatpush3.bf16.msra.mxu0 %v1986_v45 }
 0x15b   : > { %1378 = vmatmul.mubr.f32.vlgmr.msra.gmra.mrb[0].mxu0 %v1297_v61 }
 0x15c   : > { %1382 = vmatprep.mubr.f32.mxu0 %v1300_v62 }
 0x15f   : > { %1383 = vmatmul.mubr.f32.gmra.mrb[2].mxu0 %v1299_v24 }
 0x160   : > { %1387 = vmatprep.mubr.f32.mxu0 %v1302_v51 }
 0x163   : > { %1388 = vmatmul.mubr.f32.gmra.mrb[4].mxu0 %v1301_v1 }
 0x164   : > { %1392 = vmatprep.mubr.f32.mxu0 %v1304_v28 }
 0x167   : > { %1393 = vmatmul.mubr.f32.gmra.mrb[6].mxu0 %v1303_v18 }
 0x168   : > { %1397 = vmatprep.mubr.f32.mxu0 %v1306_v2 }
 0x16b   : > { %1398 = vmatmul.mubr.f32.gmra.mrb[8].mxu0 %v1305_v5 }
 0x16c   : > { %1402 = vmatprep.mubr.f32.mxu0 %v1308_v58 }
 0x16f   : > { %1403 = vmatmul.mubr.f32.gmra.mrb[10].mxu0 %v1307_v52 }
 0x170   : > { %1407 = vmatprep.mubr.f32.mxu0 %v1310_v43 }
 0x173   : > { %1408 = vmatmul.mubr.f32.gmra.mrb[12].mxu0 %v1309_v29 }
 0x174   : > { %1412 = vmatprep.mubr.f32.mxu0 %v1312_v11 }
 0x177   : > { %1413 = vmatmul.mubr.f32.gmra.mrb[14].mxu0 %v1311_v25 }
 0x22e   : > { %v1896_v13 = vpop.f32.mrb[0].mxu0 }
 0x22f   : > { %v1897_v54 = vpop.f32.mrb[1].mxu0 }
 0x230   : > { %v1898_v19 = vadd.f32 %v1897_v54, %v1896_v13 }
 0x232   : > { %v1899_v15 = vpop.f32.mrb[2].mxu0  ;;  %v1418_v37 = vmax.f32 %v1898_v19, 0.0 }
 0x233   : > { %v1900_v9 = vpop.f32.mrb[3].mxu0 }
 0x234   : > { %v1901_v60 = vadd.f32 %v1900_v9, %v1899_v15 }
 0x236   : > { %v1419_v42 = vmax.f32 %v1901_v60, 0.0  ;;  %v1902_v41 = vpop.f32.mrb[4].mxu0 }
 0x237   : > { %v1903_v32 = vpop.f32.mrb[5].mxu0 }
 0x238   : > { %v1904_v3 = vadd.f32 %v1903_v32, %v1902_v41  ;;  %v1426_v20 = vpack.c.bf16 %v1419_v42, %v1418_v37 }
 0x23a   : > { %v1905_v59 = vpop.f32.mrb[6].mxu0  ;;  %1948 = vmatprep.mubr.bf16.mxu1 %v1426_v20  ;;  %v1420_v6 = vmax.f32 %v1904_v3, 0.0 }
 0x23b   : > { %v1906_v7 = vpop.f32.mrb[7].mxu0 }
 0x23c   : > { %v1907_v34 = vadd.f32 %v1906_v7, %v1905_v59 }
 0x23e   : > { %v1421_v56 = vmax.f32 %v1907_v34, 0.0  ;;  %v1908_v57 = vpop.f32.mrb[8].mxu0 }
 0x23f   : > { %v1909_v0 = vpop.f32.mrb[9].mxu0 }
 0x240   : > { %v1427_v47 = vpack.c.bf16 %v1421_v56, %v1420_v6  ;;  %v1910_v49 = vadd.f32 %v1909_v0, %v1908_v57 }
 0x242   : > { %v1911_v39 = vpop.f32.mrb[10].mxu0  ;;  %1949 = vmatmul.mubr.bf16.vlgmr.msra.gmra.mrb[0].mxu1 %v1427_v47  ;;  %v1422_v4 = vmax.f32 %v1910_v49, 0.0 }
 0x243   : > { %v1912_v35 = vpop.f32.mrb[11].mxu0 }
 0x244   : > { %v1913_v14 = vadd.f32 %v1912_v35, %v1911_v39 }
 0x246   : > { %v1423_v21 = vmax.f32 %v1913_v14, 0.0  ;;  %v1914_v44 = vpop.f32.mrb[12].mxu0 }
 0x247   : > { %v1915_v38 = vpop.f32.mrb[13].mxu0 }
 0x248   : > { %v1428_v63 = vpack.c.bf16 %v1423_v21, %v1422_v4  ;;  %v1916_v16 = vadd.f32 %v1915_v38, %v1914_v44 }
 0x24a   : > { %v1917_v23 = vpop.f32.mrb[14].mxu0  ;;  %1952 = vmatprep.mubr.bf16.mxu1 %v1428_v63  ;;  %v1424_v26 = vmax.f32 %v1916_v16, 0.0 }
 0x24b   : > { %v1918_v36 = vpop.f32.mrb[15].mxu0 }
 0x24c   : > { %v1919_v12 = vadd.f32 %v1918_v36, %v1917_v23 }
 0x24e   : > { %v1425_v27 = vmax.f32 %v1919_v12, 0.0 }
 0x250   : > { %v1429_v8 = vpack.c.bf16 %v1425_v27, %v1424_v26 }
 0x252   : > { %1953 = vmatmul.mubr.bf16.gmra.mrb[4].mxu1 %v1429_v8 }
 0x315   : > { %v1950_v53 = vpop.f32.mrb[0].mxu1 }
 0x316   : > { %v1568_v31 = vmul.f32 %v1950_v53, %v1740_v10  ;;  %v1528_v22 = vpop.f32.mrb[1].mxu1 }
 0x317   : > { %v1566_v55 = vmul.f32 %v1740_v10, %v1528_v22  ;;  %v1951_v40 = vpop.f32.mrb[2].mxu1 }
 0x318   : > { %v1569_v45 = vmul.f32 %v1951_v40, %v1740_v10  ;;  %v1531_v61 = vpop.f32.mrb[3].mxu1  ;;  %v1583_v24 = vadd.f32 %v1741_v33, %v1568_v31 }
 0x319   : > { %v1567_v62 = vmul.f32 %v1740_v10, %v1531_v61  ;;  %v1581_v1 = vadd.f32 %v1741_v33, %v1566_v55 }
 0x31a   : > { %v1584_v51 = vadd.f32 %v1741_v33, %v1569_v45 }
 0x31b   : > { %v1582_v28 = vadd.f32 %v1741_v33, %v1567_v62 }
 0x31c   : > { %v1834_v18 = vpack.c.bf16 %v1584_v51, %v1583_v24 }
 0x31d   : > { %v1829_v2 = vpack.c.bf16 %v1582_v28, %v1581_v1 }
 0x31e   : > { %1861 = vst [vmem:[%s305_s29 + $0x8] sm:$0xff] %v1834_v18  }
 0x31f   : > { %1830 = vst [vmem:[%s305_s29] sm:$0xff] %v1829_v2  }
 0x325   : > { %v1954_v5 = vpop.f32.mrb[4].mxu1 }
 0x326   : > { %v1572_v58 = vmul.f32 %v1954_v5, %v1740_v10  ;;  %v1544_v52 = vpop.f32.mrb[5].mxu1 }
 0x327   : > { %v1570_v43 = vmul.f32 %v1740_v10, %v1544_v52  ;;  %v1955_v29 = vpop.f32.mrb[6].mxu1 }
 0x328   : > { %v1573_v11 = vmul.f32 %v1955_v29, %v1740_v10  ;;  %v1547_v25 = vpop.f32.mrb[7].mxu1  ;;  %v1587_v17 = vadd.f32 %v1741_v33, %v1572_v58 }
 0x329   : > { %v1571_v48 = vmul.f32 %v1740_v10, %v1547_v25  ;;  %v1585_v46 = vadd.f32 %v1741_v33, %v1570_v43 }
 0x32a   : > { %v1588_v50 = vadd.f32 %v1741_v33, %v1573_v11 }
 0x32b   : > { %v1586_v30 = vadd.f32 %v1741_v33, %v1571_v48 }
 0x32c   : > { %v1844_v13 = vpack.c.bf16 %v1588_v50, %v1587_v17 }
 0x32d   : > { %v1839_v54 = vpack.c.bf16 %v1586_v30, %v1585_v46 }
 0x32e   : > { %1863 = vst [vmem:[%s305_s29 + $0x18] sm:$0xff] %v1844_v13  }
 0x32f   : > { %1862 = vst [vmem:[%s305_s29 + $0x10] sm:$0xff] %v1839_v54  }
 0x330 PF: > { %s19_s24 = sadd.s32 1, %s2070_s24  }
 0x331   : > { %p16_p5 = scmp.ge.s32.totalorder %s19_s24, 4  }
 0x333   :  { %18 = sbr.rel (!%p16_p5) target bundleno = 2 (0x2), region = 87 }
 0x33a   :  { %1650 = vsyncpa [#allocation3], 1 }
 0x33b   :  { %1652 = vsyncpa [#allocation3 + $0x1], 1 }
 0x33c   :  { %1653 = vsyncpa [#allocation5], 1 }

// kernel: search_distribution_dag_forward.4
= control target key start
LH: loop header
LB: loop body
LE: loop exit
PB: predicated region body
PF: predicated region fallthrough
CT: control target
= control target key end

     0   :  { %s7209_s15 = smov 0   ;;  %s9092_s0 = inlined_call_operand.vmem [shape: bf16[2,18,18,128], index: 0, kind: input, shape index: {}]   ;;  %s9093_s1 = inlined_call_operand.vmem [shape: bf16[9,128,128], index: 1, kind: input, shape index: {}]   ;;  %s9094_s2 = inlined_call_operand.vmem [shape: f32[1,128], index: 2, kind: input, shape index: {}]   ;;  %s9095_s3 = inlined_call_operand.vmem [shape: f32[1,128], index: 3, kind: input, shape index: {}]   ;;  %s9096_s4 = inlined_call_operand.vmem [shape: bf16[2,256,128], index: 4, kind: output, shape index: {}]  }
   0x1 LB: > { %s5301_s16 = sadd.s32 4294967295, %s7182_s15   ;;  %p5305_p0 = scmp.ge.s32.totalorder %s7182_s15, 1  ;;  %s7182_s15 = sphi %s7209_s15, %s14_s15  }
   0x2   : > { %p162_p1 = scmp.lt.s32.totalorder %s7182_s15, 3 }
   0x4   : > { %p163_p2 = pnand %p5305_p0, %p162_p1 }
   0x6   : > { %166 = sbr.rel (%p163_p2) target bundleno = 589 (0x24d), region = 36 }
   0xd   : > { %v6986_v0 = vld [vmem:[%s9093_s1 + $0x40] sm:$0xff]   ;;  %p188_p3 = scmp.lt.s32.totalorder %s5301_s16, 1  ;;  %v6988_v2 = vld [vmem:[%s9093_s1 + $0x48] sm:$0xff]   ;;  %v6990_v4 = vld [vmem:[%s9093_s1 + $0x50] sm:$0xff]   ;;  %vm263_vm0 = vsmask.f32 3328 }
   0xe   : > { %v6987_v1 = vld [vmem:[%s9093_s1 + $0x100] sm:$0xff]   ;;  %6273 = vmatprep.subr.bf16.mxu1 %v6986_v0  ;;  %v6989_v3 = vld [vmem:[%s9093_s1 + $0x108] sm:$0xff]   ;;  %v6991_v5 = vld [vmem:[%s9093_s1 + $0x110] sm:$0xff]   ;;  %vm264_vm1 = vsmask.f32 7440  ;;  %vm1293_vm3 = vcmask 1042432  }
   0xf   : > { %6465 = vmatprep.subr.bf16.mxu0 %v6987_v1  ;;  %6274 = vmatpush3.bf16.msra.mxu1 %v6986_v0  ;;  %s9164_s16 = smov (!%p188_p3, %s5301_s16), 1  ;;  %v6992_v6 = vld [vmem:[%s9093_s1 + $0x58] sm:$0xff]   ;;  %v6994_v8 = vld [vmem:[%s9093_s1 + $0x60] sm:$0xff]   ;;  %v6996_v10 = vld [vmem:[%s9093_s1 + $0x68] sm:$0xff]   ;;  %vm1294_vm4 = vcmask 1046532  }
  0x10   : > { %6466 = vmatpush3.bf16.msra.mxu0 %v6987_v1  ;;  %6275 = vmatprep.subr.bf16.mxu1 %v6988_v2  ;;  %v6993_v7 = vld [vmem:[%s9093_s1 + $0x118] sm:$0xff]   ;;  %s6977_s7 = smul.u32 216, %s9164_s16  ;;  %v6995_v9 = vld [vmem:[%s9093_s1 + $0x120] sm:$0xff]   ;;  %v6997_v11 = vld [vmem:[%s9093_s1 + $0x128] sm:$0xff]   ;;  %s5929_s22 = sshll.u32 %s9164_s16, 7 }
  0x11   : > { %6467 = vmatprep.subr.bf16.mxu0 %v6989_v3  ;;  %v6998_v25 = vld [vmem:[%s9093_s1 + $0x70] sm:$0xff]   ;;  %v7000_v36 = vld [vmem:[%s9093_s1 + $0x78] sm:$0xff]   ;;  %vm7285_vm2 = vmor %vm263_vm0, %vm264_vm1  ;;  %s9010_s25 = scalar_lea.vmem %s9096_s4, %s5929_s22 }
  0x12   : > { %s7253_s14 = scalar_lea.vmem %s9092_s0, %s6977_s7  ;;  %v6999_v30 = vld [vmem:[%s9093_s1 + $0x130] sm:$0xff]   ;;  %v7001_v51 = vld [vmem:[%s9093_s1 + $0x138] sm:$0xff]   ;;  %vm7531_vm5 = vmor %vm1293_vm3, %vm1294_vm4 }
  0x13   : > { %6276 = vmatpush3.bf16.msra.mxu1 %v6988_v2  ;;  %v199_v12 = vld [vmem:[%s7253_s14] sm:$0xf]  ;;  %v200_v13 = vld [vmem:[%s7253_s14 + $0x4] sm:$0xf]  ;;  %v247_v14 = vld [vmem:[%s7253_s14 + $0x8] sm:$0x1] }
  0x14   : > { %6468 = vmatpush3.bf16.msra.mxu0 %v6989_v3  ;;  %6277 = vmatprep.subr.bf16.mxu1 %v6990_v4  ;;  %v267_v15 = vshrl.u32 %v199_v12, 16  ;;  %v270_v16 = vshll.u32 %v199_v12, 16  ;;  %v276_v17 = vshll.u32 %v200_v13, 16  ;;  %v280_v18 = vshrl.u32 %v200_v13, 16  ;;  %v5501_v20 = vld [vmem:[%s7253_s14 + $0xc] sm:$0xf] }
  0x15   : > { %6469 = vmatprep.subr.bf16.mxu0 %v6991_v5  ;;  %v286_v19 = vshll.u32 %v247_v14, 16  ;;  %v7266_v23 = vld [vmem:[%s7253_s14 + $0x10] sm:$0xf]  ;;  %v7269_v24 = vld [vmem:[%s7253_s14 + $0x14] sm:$0x1]  ;;  %v2166_v29 = vshrl.u32 %v5501_v20, 16 }
  0x16   : > { %v269_v21 = vrot.slane %v267_v15, 4  ;;  %v272_v22 = vrot.slane %v270_v16, 5  ;;  %v278_v26 = vrot.slane %v276_v17, 5  ;;  %v282_v27 = vrot.slane %v280_v18, 4  ;;  %v201_v35 = vld [vmem:[%s7253_s14 + $0xc] sm:$0xf] }
  0x17   : > { %6278 = vmatpush3.bf16.msra.mxu1 %v6990_v4  ;;  %v288_v28 = vrot.slane %v286_v19, 5  ;;  %v2169_v32 = vshll.u32 %v5501_v20, 16  ;;  %v2175_v33 = vshll.u32 %v7266_v23, 16  ;;  %v2179_v34 = vshrl.u32 %v7266_v23, 16  ;;  %v202_v42 = vld [vmem:[%s7253_s14 + $0x10] sm:$0xf] }
  0x18   : > { %6470 = vmatpush3.bf16.msra.mxu0 %v6991_v5  ;;  %6279 = vmatprep.subr.bf16.mxu1 %v6992_v6  ;;  %v273_v31 = vor.u32 %v272_v22, %v269_v21  ;;  %v283_v38 = vor.u32 %v282_v27, %v278_v26  ;;  %v2168_v39 = vrot.slane %v2166_v29, 4  ;;  %v2185_v40 = vshll.u32 %v7269_v24, 16  ;;  %v248_v55 = vld [vmem:[%s7253_s14 + $0x14] sm:$0x1]  ;;  %v5504_v57 = vld [vmem:[%s7253_s14 + $0x18] sm:$0xf] }
  0x19   : > { %6471 = vmatprep.subr.bf16.mxu0 %v6993_v7  ;;  %v2940_v41 = vrot.slane %v7269_v24, 5  ;;  %v2171_v44 = vrot.slane %v2169_v32, 5  ;;  %v2177_v45 = vrot.slane %v2175_v33, 5  ;;  %v2181_v46 = vrot.slane %v2179_v34, 4  ;;  %v7302_v62 = vld [vmem:[%s7253_s14 + $0x1c] sm:$0xf] }
  0x1a   : > { %v274_v43 = vrot.slane %v273_v31, 4  ;;  %v284_v47 = vrot.slane %v283_v38, 4  ;;  %v2187_v48 = vrot.slane %v2185_v40, 5  ;;  %v291_v49 = vshrl.u32 %v201_v35, 16  ;;  %v7002_v3 = vld [vmem:[%s9093_s1] sm:$0xff]  }
  0x1b   : > { %6280 = vmatpush3.bf16.msra.mxu1 %v6992_v6  ;;  %v294_v50 = vshll.u32 %v201_v35, 16  ;;  %v2172_v53 = vor.u32 %v2171_v44, %v2168_v39  ;;  %v2182_v54 = vor.u32 %v2181_v46, %v2177_v45  ;;  %v300_v56 = vshll.u32 %v202_v42, 16  ;;  %v7310_v4 = vld [vmem:[%s9093_s1 + $0x140] sm:$0xff]   ;;  %v203_v21 = vld [vmem:[%s7253_s14 + $0x18] sm:$0xf]  ;;  %v7005_v46 = vld [vmem:[%s9093_s1 + $0x8] sm:$0xff]  }
  0x1c   : > { %6472 = vmatpush3.bf16.msra.mxu0 %v6993_v7  ;;  %6281 = vmatprep.subr.bf16.mxu1 %v6994_v8  ;;  %v279_v52 = vsel %vm7285_vm2, %v274_v43, %v278_v26  ;;  %v289_v58 = vsel %vm7285_vm2, %v284_v47, %v288_v28  ;;  %v293_v59 = vrot.slane %v291_v49, 4  ;;  %v304_v61 = vshrl.u32 %v202_v42, 16  ;;  %v204_v28 = vld [vmem:[%s7253_s14 + $0x1c] sm:$0xf]  ;;  %v249_v33 = vld [vmem:[%s7253_s14 + $0x20] sm:$0x1] }
  0x1d   : > { %6473 = vmatprep.subr.bf16.mxu0 %v6995_v9  ;;  %v296_v60 = vrot.slane %v294_v50, 5  ;;  %v5325_v63 = vcombine.low %v279_v52, %v289_v58  ;;  %v2173_v0 = vrot.slane %v2172_v53, 4  ;;  %v2183_v1 = vrot.slane %v2182_v54, 4  ;;  %v5507_v39 = vld [vmem:[%s7253_s14 + $0x24] sm:$0xf] }
  0x1e   : > { %v302_v2 = vrot.slane %v300_v56, 5  ;;  %v306_v6 = vrot.slane %v304_v61, 4  ;;  %v310_v7 = vshll.u32 %v248_v55, 16  ;;  %v2193_v12 = vshll.u32 %v5504_v57, 16  ;;  %v205_v52 = vld [vmem:[%s7253_s14 + $0x24] sm:$0xf] }
  0x1f   : > { %6282 = vmatpush3.bf16.msra.mxu1 %v6994_v8  ;;  %v297_v5 = vor.u32 %v296_v60, %v293_v59  ;;  %v7313_v8 = vld [vmem:[%s7253_s14 + $0x20] sm:$0x1]  ;;  %6289 = vmatprep.mubr.bf16.mxu1 %v5325_v63  ;;  %v2199_v19 = vshll.u32 %v7302_v62, 16  ;;  %v2203_v20 = vshrl.u32 %v7302_v62, 16  ;;  %v2944_v27 = vrot.slane %v7302_v62, 5  ;;  %v7004_v63 = vld [vmem:[%s9093_s1 + $0x148] sm:$0xff]  }
  0x20   : > { %6474 = vmatpush3.bf16.msra.mxu0 %v6995_v9  ;;  %6283 = vmatprep.subr.bf16.mxu1 %v6996_v10  ;;  %v2178_v9 = vsel %vm7285_vm2, %v2173_v0, %v2177_v45  ;;  %v307_v15 = vor.u32 %v306_v6, %v302_v2  ;;  %v312_v16 = vrot.slane %v310_v7, 5  ;;  %v2195_v18 = vrot.slane %v2193_v12, 5  ;;  %v7338_v45 = vld [vmem:[%s7253_s14 + $0x28] sm:$0xf] }
  0x21   : > { %6475 = vmatprep.subr.bf16.mxu0 %v6997_v11  ;;  %v298_v14 = vrot.slane %v297_v5, 4  ;;  %v2209_v26 = vshll.u32 %v7313_v8, 16  ;;  %v2205_v31 = vrot.slane %v2203_v20, 4  ;;  %v2947_v32 = vrot.slane %v7313_v8, 5  ;;  %v206_v5 = vld [vmem:[%s7253_s14 + $0x28] sm:$0xf] }
  0x22   : > { %v315_v38 = vshrl.u32 %v203_v21, 16  ;;  %v318_v44 = vshll.u32 %v203_v21, 16  ;;  %v328_v49 = vshrl.u32 %v204_v28, 16  ;;  %v334_v50 = vshll.u32 %v249_v33, 16  ;;  %v7369_v33 = vld [vmem:[%s7253_s14 + $0x34] sm:$0xf] }
  0x23   : > { %6284 = vmatpush3.bf16.msra.mxu1 %v6996_v10  ;;  %v2188_v10 = vsel %vm7285_vm2, %v2183_v1, %v2187_v48  ;;  %v303_v22 = vsel %vm7285_vm2, %v298_v14, %v302_v2  ;;  %v2211_v35 = vrot.slane %v2209_v26, 5  ;;  %v324_v48 = vshll.u32 %v204_v28, 16 }
  0x24   : > { %6476 = vmatpush3.bf16.msra.mxu0 %v6997_v11  ;;  %6285 = vmatprep.subr.bf16.mxu1 %v6998_v25  ;;  %v2190_v11 = vshrl.u32 %v5504_v57, 16  ;;  %v5565_v13 = vcombine.low %v2178_v9, %v2188_v10  ;;  %v317_v47 = vrot.slane %v315_v38, 4  ;;  %v320_v55 = vrot.slane %v318_v44, 5 }
  0x25   : > { %6477 = vmatprep.subr.bf16.mxu0 %v6999_v30  ;;  %v2214_v56 = vshrl.u32 %v5507_v39, 16  ;;  %v326_v57 = vrot.slane %v324_v48, 5  ;;  %v330_v58 = vrot.slane %v328_v49, 4  ;;  %v336_v59 = vrot.slane %v334_v50, 5  ;;  %v7007_v48 = vld [vmem:[%s9093_s1 + $0x158] sm:$0xff]  }
  0x26   : > { %v2192_v17 = vrot.slane %v2190_v11, 4  ;;  %6481 = vmatprep.mubr.bf16.mxu0 %v5565_v13  ;;  %v2217_v60 = vshll.u32 %v5507_v39, 16  ;;  %v321_v0 = vor.u32 %v320_v55, %v317_v47  ;;  %v2223_v2 = vshll.u32 %v7338_v45, 16  ;;  %v250_v11 = vld [vmem:[%s7253_s14 + $0x2c] sm:$0x1] }
  0x27   : > { %6286 = vmatpush3.bf16.msra.mxu1 %v6998_v25  ;;  %v308_v25 = vrot.slane %v307_v15, 4  ;;  %v2216_v1 = vrot.slane %v2214_v56, 4  ;;  %v331_v7 = vor.u32 %v330_v58, %v326_v57  ;;  %v2227_v10 = vshrl.u32 %v7338_v45, 16 }
  0x28   : > { %6478 = vmatpush3.bf16.msra.mxu0 %v6999_v30  ;;  %6287 = vmatprep.subr.bf16.mxu1 %v7000_v36  ;;  %v2196_v29 = vor.u32 %v2195_v18, %v2192_v17  ;;  %v2201_v30 = vrot.slane %v2199_v19, 5  ;;  %v2219_v9 = vrot.slane %v2217_v60, 5  ;;  %v322_v12 = vrot.slane %v321_v0, 4  ;;  %v7014_v60 = vld [vmem:[%s9093_s1 + $0x20] sm:$0xff]  }
  0x29   : > { %6479 = vmatprep.subr.bf16.mxu0 %v7001_v51  ;;  %v313_v34 = vsel %vm7285_vm2, %v308_v25, %v312_v16  ;;  %v2225_v13 = vrot.slane %v2223_v2, 5  ;;  %v339_v15 = vshrl.u32 %v205_v52, 16  ;;  %v5510_v16 = vld [vmem:[%s7253_s14 + $0x30] sm:$0xf]  ;;  %v332_v17 = vrot.slane %v331_v7, 4 }
  0x2a   : > { %v5326_v40 = vcombine.low %v303_v22, %v313_v34  ;;  %v2197_v42 = vrot.slane %v2196_v29, 4  ;;  %v2206_v43 = vor.u32 %v2205_v31, %v2201_v30  ;;  %v2220_v18 = vor.u32 %v2219_v9, %v2216_v1  ;;  %v7011_v34 = vld [vmem:[%s9093_s1 + $0x18] sm:$0xff]  }
  0x2b   : > { %6288 = vmatpush3.bf16.msra.mxu1 %v7000_v36  ;;  %v7334_v36 = vrot.slane %v2944_v27, 4  ;;  %v2229_v19 = vrot.slane %v2227_v10, 4  ;;  %v342_v20 = vshll.u32 %v205_v52, 16  ;;  %v327_v21 = vsel %vm7285_vm2, %v322_v12, %v326_v57  ;;  %v251_v2 = vld [vmem:[%s7253_s14 + $0x38] sm:$0x1] }
  0x2c   : > { %6480 = vmatpush3.bf16.msra.mxu0 %v7001_v51  ;;  %6321 = vmatprep.subr.bf16.mxu1 %v7002_v3  ;;  %v7344_v51 = vld [vmem:[%s7253_s14 + $0x2c] sm:$0x1]  ;;  %v2202_v53 = vsel %vm7285_vm2, %v2197_v42, %v2201_v30  ;;  %v2207_v54 = vrot.slane %v2206_v43, 4  ;;  %v341_v25 = vrot.slane %v339_v15, 4  ;;  %v348_v26 = vshll.u32 %v206_v5, 16 }
  0x2d   : > { %6513 = vmatprep.subr.bf16.mxu0 %v7310_v4  ;;  %v2233_v14 = vshll.u32 %v7344_v51, 16  ;;  %v337_v28 = vsel %vm7285_vm2, %v332_v17, %v336_v59  ;;  %v2221_v29 = vrot.slane %v2220_v18, 4  ;;  %v2230_v30 = vor.u32 %v2229_v19, %v2225_v13  ;;  %v208_v59 = vld [vmem:[%s7253_s14 + $0x34] sm:$0xf]  ;;  %v5513_v9 = vld [vmem:[%s7253_s14 + $0x3c] sm:$0xf] }
  0x2e   : > { %6290 = vmatmul.mubr.bf16.vlgmr.msra.gmra.mrb[0].mxu1 %v5326_v40  ;;  %v2212_v61 = vsel %vm7285_vm2, %v2207_v54, %v2211_v35  ;;  %v344_v31 = vrot.slane %v342_v20, 5  ;;  %v5327_v35 = vcombine.low %v327_v21, %v337_v28  ;;  %v350_v38 = vrot.slane %v348_v26, 5  ;;  %v207_v54 = vld [vmem:[%s7253_s14 + $0x30] sm:$0xf]  ;;  %v7403_v19 = vld [vmem:[%s7253_s14 + $0x40] sm:$0xf] }
  0x2f   : > { %6322 = vmatpush3.bf16.msra.mxu1 %v7002_v3  ;;  %v7008_v3 = vld [vmem:[%s9093_s1 + $0x10] sm:$0xff]   ;;  %v5566_v6 = vcombine.low %v2202_v53, %v2212_v61  ;;  %v2235_v22 = vrot.slane %v2233_v14, 5  ;;  %v352_v39 = vshrl.u32 %v206_v5, 16  ;;  %v358_v40 = vshll.u32 %v250_v11, 16  ;;  %v7016_v14 = vld [vmem:[%s9093_s1 + $0x28] sm:$0xff]   ;;  %v7009_v20 = vld [vmem:[%s9093_s1 + $0x160] sm:$0xff]  }
  0x30   : > { %6323 = vmatprep.subr.bf16.mxu1 %v7005_v46  ;;  %v2226_v42 = vsel %vm7285_vm2, %v2221_v29, %v2225_v13  ;;  %v2231_v43 = vrot.slane %v2230_v30, 4  ;;  %v345_v44 = vor.u32 %v344_v31, %v341_v25  ;;  %v2238_v47 = vshrl.u32 %v5510_v16, 16  ;;  %6293 = vmatprep.mubr.bf16.mxu1 %v5327_v35  ;;  %v7411_v28 = vld [vmem:[%s7253_s14 + $0x44] sm:$0x1]  ;;  %v7018_v35 = vld [vmem:[%s9093_s1 + $0x30] sm:$0xff]  }
  0x31   : > { %6482 = vmatmul.mubr.bf16.vlgmr.msra.gmra.mrb[0].mxu0 %v5566_v6  ;;  %v354_v49 = vrot.slane %v352_v39, 4  ;;  %v360_v50 = vrot.slane %v358_v40, 5  ;;  %v2241_v52 = vshll.u32 %v5510_v16, 16  ;;  %v2247_v53 = vshll.u32 %v7369_v33, 16 }
  0x32   : > { %6514 = vmatpush3.bf16.msra.mxu0 %v7310_v4  ;;  %v7006_v4 = vld [vmem:[%s9093_s1 + $0x150] sm:$0xff]   ;;  %v2236_v55 = vsel %vm7285_vm2, %v2231_v43, %v2235_v22  ;;  %v346_v56 = vrot.slane %v345_v44, 4  ;;  %v2240_v57 = vrot.slane %v2238_v47, 4  ;;  %v2251_v58 = vshrl.u32 %v7369_v33, 16 }
  0x33   : > { %6324 = vmatpush3.bf16.msra.mxu1 %v7005_v46  ;;  %6515 = vmatprep.subr.bf16.mxu0 %v7004_v63  ;;  %v7380_v46 = vld [vmem:[%s7253_s14 + $0x38] sm:$0x1]  ;;  %v5567_v61 = vcombine.low %v2226_v42, %v2236_v55  ;;  %v2243_v0 = vrot.slane %v2241_v52, 5  ;;  %v2249_v1 = vrot.slane %v2247_v53, 5  ;;  %v363_v7 = vshrl.u32 %v207_v54, 16 }
  0x34   : > { %6325 = vmatprep.subr.bf16.mxu1 %v7008_v3  ;;  %v351_v5 = vsel %vm7285_vm2, %v346_v56, %v350_v38  ;;  %v2257_v6 = vshll.u32 %v7380_v46, 16  ;;  %v366_v12 = vshll.u32 %v207_v54, 16  ;;  %v372_v13 = vshll.u32 %v208_v59, 16  ;;  %v210_v55 = vld [vmem:[%s7253_s14 + $0x40] sm:$0xf] }
  0x35   : > { %6485 = vmatprep.mubr.bf16.mxu0 %v5567_v61  ;;  %v2244_v11 = vor.u32 %v2243_v0, %v2240_v57  ;;  %v365_v17 = vrot.slane %v363_v7, 4  ;;  %v376_v18 = vshrl.u32 %v208_v59, 16  ;;  %v2262_v40 = vshrl.u32 %v5513_v9, 16 }
  0x36   : > { %6516 = vmatpush3.bf16.msra.mxu0 %v7004_v63  ;;  %v355_v63 = vor.u32 %v354_v49, %v350_v38  ;;  %v2259_v16 = vrot.slane %v2257_v6, 5  ;;  %v368_v25 = vrot.slane %v366_v12, 5  ;;  %v374_v26 = vrot.slane %v372_v13, 5 }
  0x37   : > { %6326 = vmatpush3.bf16.msra.mxu1 %v7008_v3  ;;  %6517 = vmatprep.subr.bf16.mxu0 %v7006_v4  ;;  %v2253_v3 = vrot.slane %v2251_v58, 4  ;;  %v2245_v22 = vrot.slane %v2244_v11, 4  ;;  %v378_v31 = vrot.slane %v376_v18, 4  ;;  %v2265_v42 = vshll.u32 %v5513_v9, 16  ;;  %v5516_v9 = vld [vmem:[%s7253_s14 + $0x48] sm:$0xf] }
  0x38   : > { %6327 = vmatprep.subr.bf16.mxu1 %v7011_v34  ;;  %v356_v10 = vrot.slane %v355_v63, 4  ;;  %v369_v39 = vor.u32 %v368_v25, %v365_v17  ;;  %v2271_v49 = vshll.u32 %v7403_v19, 16  ;;  %v2264_v53 = vrot.slane %v2262_v40, 4  ;;  %v252_v63 = vld [vmem:[%s7253_s14 + $0x44] sm:$0x1] }
  0x39   : > { %v2254_v15 = vor.u32 %v2253_v3, %v2249_v1  ;;  %v2250_v38 = vsel %vm7285_vm2, %v2245_v22, %v2249_v1  ;;  %v379_v44 = vor.u32 %v378_v31, %v374_v26  ;;  %v2267_v54 = vrot.slane %v2265_v42, 5  ;;  %v7444_v22 = vld [vmem:[%s7253_s14 + $0x50] sm:$0x1]  ;;  %v7013_v31 = vld [vmem:[%s9093_s1 + $0x178] sm:$0xff]  }
  0x3a   : > { %6518 = vmatpush3.bf16.msra.mxu0 %v7006_v4  ;;  %v361_v21 = vsel %vm7285_vm2, %v356_v10, %v360_v50  ;;  %v382_v4 = vshll.u32 %v251_v2, 16  ;;  %v370_v52 = vrot.slane %v369_v39, 4  ;;  %v2273_v57 = vrot.slane %v2271_v49, 5  ;;  %v7020_v2 = vld [vmem:[%s9093_s1 + $0x38] sm:$0xff]  }
  0x3b   : > { %6328 = vmatpush3.bf16.msra.mxu1 %v7011_v34  ;;  %6519 = vmatprep.subr.bf16.mxu0 %v7007_v48  ;;  %v5328_v29 = vcombine.low %v351_v5, %v361_v21  ;;  %v2255_v30 = vrot.slane %v2254_v15, 4  ;;  %v209_v34 = vld [vmem:[%s7253_s14 + $0x3c] sm:$0xf]  ;;  %v380_v56 = vrot.slane %v379_v44, 4  ;;  %v2275_v58 = vshrl.u32 %v7403_v19, 16  ;;  %v7012_v15 = vld [vmem:[%s9093_s1 + $0x170] sm:$0xff]  }
  0x3c   : > { %6329 = vmatprep.subr.bf16.mxu1 %v7014_v60  ;;  %v384_v47 = vrot.slane %v382_v4, 5  ;;  %v2281_v59 = vshll.u32 %v7411_v28, 16  ;;  %v2268_v61 = vor.u32 %v2267_v54, %v2264_v53  ;;  %v387_v0 = vshrl.u32 %v209_v34, 16  ;;  %v7455_v4 = vld [vmem:[%s9093_s1 + $0x80] sm:$0xff]   ;;  %v212_v53 = vld [vmem:[%s7253_s14 + $0x4c] sm:$0xf] }
  0x3d   : > { %6294 = vmatmul.mubr.bf16.gmra.mrb[4].mxu1 %v5328_v29  ;;  %v2260_v43 = vsel %vm7285_vm2, %v2255_v30, %v2259_v16  ;;  %v390_v1 = vshll.u32 %v209_v34, 16  ;;  %v2277_v3 = vrot.slane %v2275_v58, 4  ;;  %v396_v7 = vshll.u32 %v210_v55, 16  ;;  %v211_v30 = vld [vmem:[%s7253_s14 + $0x48] sm:$0xf] }
  0x3e   : > { %6520 = vmatpush3.bf16.msra.mxu0 %v7007_v48  ;;  %v5568_v50 = vcombine.low %v2250_v38, %v2260_v43  ;;  %v7010_v48 = vld [vmem:[%s9093_s1 + $0x168] sm:$0xff]   ;;  %v385_v5 = vsel %vm7285_vm2, %v380_v56, %v384_v47  ;;  %v2283_v6 = vrot.slane %v2281_v59, 5  ;;  %v2269_v11 = vrot.slane %v2268_v61, 4  ;;  %v253_v54 = vld [vmem:[%s7253_s14 + $0x50] sm:$0x1] }
  0x3f   : > { %6330 = vmatpush3.bf16.msra.mxu1 %v7014_v60  ;;  %6521 = vmatprep.subr.bf16.mxu0 %v7009_v20  ;;  %v375_v60 = vsel %vm7285_vm2, %v370_v52, %v374_v26  ;;  %v389_v12 = vrot.slane %v387_v0, 4  ;;  %v392_v13 = vrot.slane %v390_v1, 5  ;;  %v2278_v16 = vor.u32 %v2277_v3, %v2273_v57  ;;  %v5519_v58 = vld [vmem:[%s7253_s14 + $0x54] sm:$0xf]  ;;  %v7469_v0 = vld [vmem:[%s7253_s14 + $0x58] sm:$0xf] }
  0x40   : > { %6331 = vmatprep.subr.bf16.mxu1 %v7016_v14  ;;  %6486 = vmatmul.mubr.bf16.gmra.mrb[4].mxu0 %v5568_v50  ;;  %v5329_v10 = vcombine.low %v375_v60, %v385_v5  ;;  %v398_v17 = vrot.slane %v396_v7, 5  ;;  %v400_v18 = vshrl.u32 %v210_v55, 16  ;;  %v406_v21 = vshll.u32 %v252_v63, 16 }
  0x41   : > { %v393_v25 = vor.u32 %v392_v13, %v389_v12  ;;  %v2286_v26 = vshrl.u32 %v5516_v9, 16  ;;  %v2289_v29 = vshll.u32 %v5516_v9, 16  ;;  %v2279_v34 = vrot.slane %v2278_v16, 4 }
  0x42   : > { %6522 = vmatpush3.bf16.msra.mxu0 %v7009_v20  ;;  %6297 = vmatprep.mubr.bf16.mxu1 %v5329_v10  ;;  %v2274_v20 = vsel %vm7285_vm2, %v2269_v11, %v2273_v57  ;;  %v408_v38 = vrot.slane %v406_v21, 5  ;;  %v2305_v52 = vshll.u32 %v7444_v22, 16  ;;  %v411_v61 = vshrl.u32 %v211_v30, 16 }
  0x43   : > { %6332 = vmatpush3.bf16.msra.mxu1 %v7016_v14  ;;  %v7438_v14 = vld [vmem:[%s7253_s14 + $0x4c] sm:$0xf]  ;;  %6523 = vmatprep.subr.bf16.mxu0 %v7010_v48  ;;  %v394_v40 = vrot.slane %v393_v25, 4  ;;  %v2288_v42 = vrot.slane %v2286_v26, 4  ;;  %v2291_v43 = vrot.slane %v2289_v29, 5  ;;  %v2284_v47 = vsel %vm7285_vm2, %v2279_v34, %v2283_v6  ;;  %v7474_v6 = vld [vmem:[%s9093_s1 + $0x180] sm:$0xff]  }
  0x44   : > { %6333 = vmatprep.subr.bf16.mxu1 %v7018_v35  ;;  %v2295_v39 = vshll.u32 %v7438_v14, 16  ;;  %v2299_v44 = vshrl.u32 %v7438_v14, 16  ;;  %v5569_v55 = vcombine.low %v2274_v20, %v2284_v47  ;;  %v2307_v60 = vrot.slane %v2305_v52, 5  ;;  %v7481_v20 = vld [vmem:[%s7253_s14 + $0x5c] sm:$0x1] }
  0x45   : > { %v2292_v56 = vor.u32 %v2291_v43, %v2288_v42  ;;  %v414_v63 = vshll.u32 %v211_v30, 16  ;;  %v424_v3 = vshrl.u32 %v212_v53, 16  ;;  %v413_v9 = vrot.slane %v411_v61, 4  ;;  %v214_v43 = vld [vmem:[%s7253_s14 + $0x58] sm:$0xf] }
  0x46   : > { %6524 = vmatpush3.bf16.msra.mxu0 %v7010_v48  ;;  %v2297_v50 = vrot.slane %v2295_v39, 5  ;;  %v399_v48 = vsel %vm7285_vm2, %v394_v40, %v398_v17  ;;  %v2301_v57 = vrot.slane %v2299_v44, 4  ;;  %6489 = vmatprep.mubr.bf16.mxu0 %v5569_v55  ;;  %v430_v11 = vshll.u32 %v253_v54, 16  ;;  %v5522_v52 = vld [vmem:[%s7253_s14 + $0x60] sm:$0xf] }
  0x47   : > { %6334 = vmatpush3.bf16.msra.mxu1 %v7018_v35  ;;  %v402_v35 = vrot.slane %v400_v18, 4  ;;  %6525 = vmatprep.subr.bf16.mxu0 %v7012_v15  ;;  %v2293_v1 = vrot.slane %v2292_v56, 4  ;;  %v416_v10 = vrot.slane %v414_v63, 5  ;;  %v426_v18 = vrot.slane %v424_v3, 4 }
  0x48   : > { %6335 = vmatprep.subr.bf16.mxu1 %v7020_v2  ;;  %v2302_v5 = vor.u32 %v2301_v57, %v2297_v50  ;;  %v432_v21 = vrot.slane %v430_v11, 5  ;;  %v2310_v25 = vshrl.u32 %v5519_v58, 16  ;;  %v2313_v29 = vshll.u32 %v5519_v58, 16 }
  0x49   : > { %v403_v49 = vor.u32 %v402_v35, %v398_v17  ;;  %v2298_v13 = vsel %vm7285_vm2, %v2293_v1, %v2297_v50  ;;  %v417_v17 = vor.u32 %v416_v10, %v413_v9  ;;  %v2319_v30 = vshll.u32 %v7469_v0, 16  ;;  %v213_v35 = vld [vmem:[%s7253_s14 + $0x54] sm:$0xf]  ;;  %v254_v50 = vld [vmem:[%s7253_s14 + $0x5c] sm:$0x1] }
  0x4a   : > { %6526 = vmatpush3.bf16.msra.mxu0 %v7012_v15  ;;  %v2303_v15 = vrot.slane %v2302_v5, 4  ;;  %v2323_v34 = vshrl.u32 %v7469_v0, 16  ;;  %v2312_v42 = vrot.slane %v2310_v25, 4  ;;  %v435_v55 = vshrl.u32 %v213_v35, 16  ;;  %v7509_v25 = vld [vmem:[%s7253_s14 + $0x60] sm:$0xf] }
  0x4b   : > { %6336 = vmatpush3.bf16.msra.mxu1 %v7020_v2  ;;  %v404_v59 = vrot.slane %v403_v49, 4  ;;  %v420_v2 = vshll.u32 %v212_v53, 16  ;;  %6527 = vmatprep.subr.bf16.mxu0 %v7013_v31  ;;  %v418_v39 = vrot.slane %v417_v17, 4  ;;  %v2321_v44 = vrot.slane %v2319_v30, 5  ;;  %v7505_v17 = vld [vmem:[%s7253_s14 + $0x68] sm:$0x1] }
  0x4c   : > { %6369 = vmatprep.subr.bf16.mxu1 %v7455_v4  ;;  %v2308_v26 = vsel %vm7285_vm2, %v2303_v15, %v2307_v60  ;;  %v2325_v47 = vrot.slane %v2323_v34, 4  ;;  %v2329_v49 = vshll.u32 %v7481_v20, 16  ;;  %v7496_v60 = vld [vmem:[%s7253_s14 + $0x64] sm:$0xf]  ;;  %v437_v63 = vrot.slane %v435_v55, 4 }
  0x4d   : > { %v409_v7 = vsel %vm7285_vm2, %v404_v59, %v408_v38  ;;  %v422_v16 = vrot.slane %v420_v2, 5  ;;  %v5570_v38 = vcombine.low %v2298_v13, %v2308_v26  ;;  %v444_v59 = vshll.u32 %v214_v43, 16 }
  0x4e   : > { %v5330_v12 = vcombine.low %v399_v48, %v409_v7  ;;  %6528 = vmatpush3.bf16.msra.mxu0 %v7013_v31  ;;  %v2315_v31 = vrot.slane %v2313_v29, 5  ;;  %v438_v48 = vshll.u32 %v213_v35, 16  ;;  %v2326_v57 = vor.u32 %v2325_v47, %v2321_v44  ;;  %v7512_v35 = vld [vmem:[%s7253_s14 + $0x64] sm:$0xf] }
  0x4f   : > { %6561 = vmatprep.subr.bf16.mxu0 %v7474_v6  ;;  %v427_v40 = vor.u32 %v426_v18, %v422_v16  ;;  %6490 = vmatmul.mubr.bf16.gmra.mrb[8].mxu0 %v5570_v38  ;;  %v423_v53 = vsel %vm7285_vm2, %v418_v39, %v422_v16  ;;  %v2331_v58 = vrot.slane %v2329_v49, 5  ;;  %v448_v5 = vshrl.u32 %v214_v43, 16  ;;  %v255_v43 = vld [vmem:[%s7253_s14 + $0x68] sm:$0x1] }
  0x50   : > { %6298 = vmatmul.mubr.bf16.gmra.mrb[8].mxu1 %v5330_v12  ;;  %v2316_v56 = vor.u32 %v2315_v31, %v2312_v42  ;;  %v440_v1 = vrot.slane %v438_v48, 5  ;;  %v2327_v7 = vrot.slane %v2326_v57, 4  ;;  %v446_v9 = vrot.slane %v444_v59, 5 }
  0x51   : > { %v428_v54 = vrot.slane %v427_v40, 4  ;;  %v450_v11 = vrot.slane %v448_v5, 4  ;;  %v454_v12 = vshll.u32 %v254_v50, 16  ;;  %v2334_v13 = vshrl.u32 %v5522_v52, 16  ;;  %v5589_v50 = vld [vmem:[%s7253_s14 + $0xc] sm:$0xe] }
  0x52   : > { %v2317_v3 = vrot.slane %v2316_v56, 4  ;;  %v441_v10 = vor.u32 %v440_v1, %v437_v63  ;;  %v2332_v16 = vsel %vm7285_vm2, %v2327_v7, %v2331_v58  ;;  %v2337_v18 = vshll.u32 %v5522_v52, 16  ;;  %v7527_v5 = vld [vmem:[%s7253_s14 + $0x6c] sm:$0xf] }
  0x53   : > { %v433_v61 = vsel %vm7285_vm2, %v428_v54, %v432_v21  ;;  %v2343_v21 = vshll.u32 %v7496_v60, 16  ;;  %v451_v30 = vor.u32 %v450_v11, %v446_v9  ;;  %v456_v34 = vrot.slane %v454_v12, 5 }
  0x54   : > { %v5331_v2 = vcombine.low %v423_v53, %v433_v61  ;;  %v2322_v15 = vsel %vm7285_vm2, %v2317_v3, %v2321_v44  ;;  %v442_v29 = vrot.slane %v441_v10, 4  ;;  %v2336_v38 = vrot.slane %v2334_v13, 4 }
  0x55   : > { %v5571_v26 = vcombine.low %v2322_v15, %v2332_v16  ;;  %v2339_v39 = vrot.slane %v2337_v18, 5  ;;  %v2345_v40 = vrot.slane %v2343_v21, 5  ;;  %v2347_v42 = vshrl.u32 %v7496_v60, 16  ;;  %v7539_v21 = vld [vmem:[%s7253_s14 + $0x70] sm:$0xf] }
  0x56   : > { %6301 = vmatprep.mubr.bf16.mxu1 %v5331_v2  ;;  %v447_v31 = vsel %vm7285_vm2, %v442_v29, %v446_v9  ;;  %v452_v44 = vrot.slane %v451_v30, 4  ;;  %v2353_v47 = vshll.u32 %v7505_v17, 16  ;;  %v459_v49 = vshrl.u32 %v7509_v25, 16  ;;  %v7104_v9 = vld [vmem:[%s7253_s14 + $0xb4] sm:$0xff]  }
  0x57   : > { %6493 = vmatprep.mubr.bf16.mxu0 %v5571_v26  ;;  %v2340_v52 = vor.u32 %v2339_v39, %v2336_v38  ;;  %v2349_v53 = vrot.slane %v2347_v42, 4  ;;  %v462_v54 = vshll.u32 %v7509_v25, 16  ;;  %v468_v55 = vshll.u32 %v7512_v35, 16 }
  0x58   : > { %v457_v48 = vsel %vm7285_vm2, %v452_v44, %v456_v34  ;;  %v2355_v56 = vrot.slane %v2353_v47, 5  ;;  %v461_v57 = vrot.slane %v459_v49, 4  ;;  %v472_v58 = vshrl.u32 %v7512_v35, 16  ;;  %v7550_v47 = vld [vmem:[%s7253_s14 + $0x78] sm:$0xf] }
  0x59   : > { %v5332_v59 = vcombine.low %v447_v31, %v457_v48  ;;  %v2341_v61 = vrot.slane %v2340_v52, 4  ;;  %v2350_v63 = vor.u32 %v2349_v53, %v2345_v40  ;;  %v464_v1 = vrot.slane %v462_v54, 5  ;;  %v7561_v54 = vld [vmem:[%s7253_s14 + $0x7c] sm:$0xf] }
  0x5a   : > { %v470_v2 = vrot.slane %v468_v55, 5  ;;  %v474_v3 = vrot.slane %v472_v58, 4  ;;  %v478_v7 = vshll.u32 %v255_v43, 16  ;;  %v5605_v10 = vrot.slane %v5589_v50, 9  ;;  %v257_v58 = vld [vmem:[%s7253_s14 + $0x80] sm:$0x1] }
  0x5b   : > { %6302 = vmatmul.mubr.bf16.gmra.mrb[12].mxu1 %v5332_v59  ;;  %v2346_v11 = vsel %vm7285_vm2, %v2341_v61, %v2345_v40  ;;  %v2351_v12 = vrot.slane %v2350_v63, 4  ;;  %v465_v13 = vor.u32 %v464_v1, %v461_v57  ;;  %v2937_v15 = vrot.slane %v7266_v23, 5  ;;  %v256_v40 = vld [vmem:[%s7253_s14 + $0x74] sm:$0x1]  ;;  %v5590_v23 = vld [vmem:[%s7253_s14 + $0x18] sm:$0xe] }
  0x5c   : > { %v475_v16 = vor.u32 %v474_v3, %v470_v2  ;;  %v480_v18 = vrot.slane %v478_v7, 5  ;;  %v483_v26 = vshrl.u32 %v7527_v5, 16  ;;  %v486_v29 = vshll.u32 %v7527_v5, 16 }
  0x5d   : > { %v2356_v30 = vsel %vm7285_vm2, %v2351_v12, %v2355_v56  ;;  %v466_v34 = vrot.slane %v465_v13, 4  ;;  %v2938_v38 = vsel %vm7531_vm5, %v5605_v10, %v2937_v15  ;;  %v2939_v39 = vrot.slane %v2937_v15, 4  ;;  %v5591_v13 = vld [vmem:[%s7253_s14 + $0x24] sm:$0xe] }
  0x5e   : > { %v5572_v42 = vcombine.low %v2346_v11, %v2356_v30  ;;  %v476_v43 = vrot.slane %v475_v16, 4  ;;  %v485_v31 = vrot.slane %v483_v26, 4  ;;  %v488_v44 = vrot.slane %v486_v29, 5  ;;  %v7583_v16 = vld [vmem:[%s7253_s14 + $0x84] sm:$0xf]  ;;  %v7017_v29 = vld [vmem:[%s9093_s1 + $0x188] sm:$0xff]  }
  0x5f   : > { %v471_v49 = vsel %vm7285_vm2, %v466_v34, %v470_v2  ;;  %v2941_v50 = vsel %vm7531_vm5, %v2939_v39, %v2940_v41  ;;  %v492_v52 = vshll.u32 %v7539_v21, 16  ;;  %v496_v53 = vshrl.u32 %v7539_v21, 16 }
  0x60   : > { %6494 = vmatmul.mubr.bf16.gmra.mrb[12].mxu0 %v5572_v42  ;;  %v481_v55 = vsel %vm7285_vm2, %v476_v43, %v480_v18  ;;  %v5637_v48 = vcombine.low %v2938_v38, %v2941_v50  ;;  %v489_v56 = vor.u32 %v488_v44, %v485_v31  ;;  %v502_v57 = vshll.u32 %v256_v40, 16  ;;  %v7591_v40 = vld [vmem:[%s7253_s14 + $0x88] sm:$0xf]  ;;  %v258_v31 = vld [vmem:[%s7253_s14 + $0x8c] sm:$0x1] }
  0x61   : > { %v5333_v59 = vcombine.low %v471_v49, %v481_v55  ;;  %v494_v24 = vrot.slane %v492_v52, 5  ;;  %v498_v61 = vrot.slane %v496_v53, 4  ;;  %v5606_v63 = vrot.slane %v5590_v23, 9 }
  0x62   : > { %6529 = vmatprep.mubr.bf16.mxu0 %v5637_v48  ;;  %v490_v41 = vrot.slane %v489_v56, 4  ;;  %v504_v1 = vrot.slane %v502_v57, 5  ;;  %v2948_v2 = vsel %vm7531_vm5, %v7334_v36, %v2947_v32  ;;  %v507_v3 = vshrl.u32 %v7550_v47, 16 }
  0x63   : > { %6305 = vmatprep.mubr.bf16.mxu1 %v5333_v59  ;;  %v499_v7 = vor.u32 %v498_v61, %v494_v24  ;;  %v2945_v10 = vsel %vm7531_vm5, %v5606_v63, %v2944_v27  ;;  %v510_v11 = vshll.u32 %v7550_v47, 16  ;;  %v516_v12 = vshll.u32 %v7561_v54, 16 }
  0x64   : > { %v495_v8 = vsel %vm7285_vm2, %v490_v41, %v494_v24  ;;  %v5638_v15 = vcombine.low %v2945_v10, %v2948_v2  ;;  %v509_v32 = vrot.slane %v507_v3, 4  ;;  %v520_v36 = vshrl.u32 %v7561_v54, 16  ;;  %v7612_v2 = vld [vmem:[%s7253_s14 + $0x90] sm:$0xf]  ;;  %v7615_v3 = vld [vmem:[%s7253_s14 + $0x94] sm:$0xf] }
  0x65   : > { %v500_v62 = vrot.slane %v499_v7, 4  ;;  %v512_v18 = vrot.slane %v510_v11, 5  ;;  %v518_v26 = vrot.slane %v516_v12, 5  ;;  %v526_v27 = vshll.u32 %v257_v58, 16 }
  0x66   : > { %v522_v30 = vrot.slane %v520_v36, 4  ;;  %v5607_v34 = vrot.slane %v5591_v13, 9  ;;  %v2951_v38 = vrot.slane %v7338_v45, 5  ;;  %v2954_v39 = vrot.slane %v7344_v51, 5  ;;  %v5592_v45 = vld [vmem:[%s7253_s14 + $0x30] sm:$0xe] }
  0x67   : > { %v505_v23 = vsel %vm7285_vm2, %v500_v62, %v504_v1  ;;  %v513_v42 = vor.u32 %v512_v18, %v509_v32  ;;  %v528_v43 = vrot.slane %v526_v27, 5  ;;  %v531_v44 = vshrl.u32 %v7583_v16, 16  ;;  %v259_v62 = vld [vmem:[%s7253_s14 + $0x98] sm:$0x1] }
  0x68   : > { %v5334_v49 = vcombine.low %v495_v8, %v505_v23  ;;  %6530 = vmatmul.mubr.bf16.vlgmr.msra.gmra.mrb[0].mxu0 %v5638_v15  ;;  %v523_v50 = vor.u32 %v522_v30, %v518_v26  ;;  %v2952_v52 = vsel %vm7531_vm5, %v5607_v34, %v2951_v38  ;;  %v2953_v53 = vrot.slane %v2951_v38, 4  ;;  %v7021_v30 = vld [vmem:[%s9093_s1 + $0x198] sm:$0xff]  }
  0x69   : > { %6562 = vmatpush3.bf16.msra.mxu0 %v7474_v6  ;;  %v514_v51 = vrot.slane %v513_v42, 4  ;;  %v533_v55 = vrot.slane %v531_v44, 4  ;;  %v534_v48 = vshll.u32 %v7583_v16, 16  ;;  %v540_v56 = vshll.u32 %v7591_v40, 16  ;;  %v7019_v6 = vld [vmem:[%s9093_s1 + $0x190] sm:$0xff]  }
  0x6a   : > { %6306 = vmatmul.mubr.bf16.gmra.mrb[16].mxu1 %v5334_v49  ;;  %v524_v57 = vrot.slane %v523_v50, 4  ;;  %v2955_v58 = vsel %vm7531_vm5, %v2953_v53, %v2954_v39  ;;  %v544_v59 = vshrl.u32 %v7591_v40, 16  ;;  %v550_v24 = vshll.u32 %v258_v31, 16  ;;  %6563 = vmatprep.subr.bf16.mxu0 %v7017_v29  ;;  %v5593_v38 = vld [vmem:[%s7253_s14 + $0x3c] sm:$0xe] }
  0x6b   : > { %v519_v61 = vsel %vm7285_vm2, %v514_v51, %v518_v26  ;;  %v5639_v63 = vcombine.low %v2952_v52, %v2955_v58  ;;  %v536_v41 = vrot.slane %v534_v48, 5  ;;  %v542_v1 = vrot.slane %v540_v56, 5  ;;  %v7633_v31 = vld [vmem:[%s7253_s14 + $0x9c] sm:$0xf]  ;;  %v7642_v48 = vld [vmem:[%s7253_s14 + $0xa0] sm:$0xf] }
  0x6c   : > { %v529_v7 = vsel %vm7285_vm2, %v524_v57, %v528_v43  ;;  %v546_v10 = vrot.slane %v544_v59, 4  ;;  %v552_v11 = vrot.slane %v550_v24, 5  ;;  %v5608_v12 = vrot.slane %v5592_v45, 9  ;;  %v7025_v56 = vld [vmem:[%s9093_s1 + $0x1a0] sm:$0xff]  }
  0x6d   : > { %v5335_v13 = vcombine.low %v519_v61, %v529_v7  ;;  %6533 = vmatprep.mubr.bf16.mxu0 %v5639_v63  ;;  %v537_v8 = vor.u32 %v536_v41, %v533_v55  ;;  %v2958_v15 = vrot.slane %v7369_v33, 5  ;;  %v2961_v32 = vrot.slane %v7380_v46, 5  ;;  %6564 = vmatpush3.bf16.msra.mxu0 %v7017_v29  ;;  %v260_v61 = vld [vmem:[%s7253_s14 + $0xa4] sm:$0x1] }
  0x6e   : > { %v547_v36 = vor.u32 %v546_v10, %v542_v1  ;;  %v555_v18 = vshrl.u32 %v7612_v2, 16  ;;  %v558_v26 = vshll.u32 %v7612_v2, 16  ;;  %v564_v27 = vshll.u32 %v7615_v3, 16  ;;  %6565 = vmatprep.subr.bf16.mxu0 %v7019_v6 }
  0x6f   : > { %6309 = vmatprep.mubr.bf16.mxu1 %v5335_v13  ;;  %v538_v34 = vrot.slane %v537_v8, 4  ;;  %v2959_v33 = vsel %vm7531_vm5, %v5608_v12, %v2958_v15  ;;  %v2960_v46 = vrot.slane %v2958_v15, 4  ;;  %v568_v29 = vshrl.u32 %v7615_v3, 16  ;;  %v5594_v15 = vld [vmem:[%s7253_s14 + $0x48] sm:$0xe] }
  0x70   : > { %v548_v39 = vrot.slane %v547_v36, 4  ;;  %v557_v23 = vrot.slane %v555_v18, 4  ;;  %v560_v42 = vrot.slane %v558_v26, 5  ;;  %v566_v43 = vrot.slane %v564_v27, 5  ;;  %v7667_v27 = vld [vmem:[%s7253_s14 + $0xa8] sm:$0xf] }
  0x71   : > { %v543_v44 = vsel %vm7285_vm2, %v538_v34, %v542_v1  ;;  %v2962_v49 = vsel %vm7531_vm5, %v2960_v46, %v2961_v32  ;;  %v570_v50 = vrot.slane %v568_v29, 4  ;;  %v574_v52 = vshll.u32 %v259_v62, 16  ;;  %6566 = vmatpush3.bf16.msra.mxu0 %v7019_v6  ;;  %v7029_v32 = vld [vmem:[%s9093_s1 + $0x1a8] sm:$0xff]  }
  0x72   : > { %v553_v53 = vsel %vm7285_vm2, %v548_v39, %v552_v11  ;;  %v5640_v45 = vcombine.low %v2959_v33, %v2962_v49  ;;  %v561_v51 = vor.u32 %v560_v42, %v557_v23  ;;  %v5609_v55 = vrot.slane %v5593_v38, 9  ;;  %6567 = vmatprep.subr.bf16.mxu0 %v7021_v30  ;;  %v7670_v29 = vld [vmem:[%s7253_s14 + $0xac] sm:$0xf] }
  0x73   : > { %v5336_v57 = vcombine.low %v543_v44, %v553_v53  ;;  %v571_v58 = vor.u32 %v570_v50, %v566_v43  ;;  %v576_v59 = vrot.slane %v574_v52, 5  ;;  %v2965_v24 = vrot.slane %v7403_v19, 5  ;;  %v5595_v53 = vld [vmem:[%s7253_s14 + $0x54] sm:$0xe] }
  0x74   : > { %6534 = vmatmul.mubr.bf16.gmra.mrb[4].mxu0 %v5640_v45  ;;  %v562_v6 = vrot.slane %v561_v51, 4  ;;  %v2968_v63 = vrot.slane %v7411_v28, 5  ;;  %v579_v41 = vshrl.u32 %v7633_v31, 16  ;;  %v582_v1 = vshll.u32 %v7633_v31, 16  ;;  %v7033_v45 = vld [vmem:[%s9093_s1 + $0x1b0] sm:$0xff]  }
  0x75   : > { %6310 = vmatmul.mubr.bf16.gmra.mrb[20].mxu1 %v5336_v57  ;;  %v572_v7 = vrot.slane %v571_v58, 4  ;;  %v2966_v10 = vsel %vm7531_vm5, %v5609_v55, %v2965_v24  ;;  %v2967_v11 = vrot.slane %v2965_v24, 4  ;;  %v588_v12 = vshll.u32 %v7642_v48, 16  ;;  %6568 = vmatpush3.bf16.msra.mxu0 %v7021_v30 }
  0x76   : > { %v567_v19 = vsel %vm7285_vm2, %v562_v6, %v566_v43  ;;  %v581_v13 = vrot.slane %v579_v41, 4  ;;  %v584_v28 = vrot.slane %v582_v1, 5  ;;  %v592_v8 = vshrl.u32 %v7642_v48, 16  ;;  %6569 = vmatprep.subr.bf16.mxu0 %v7025_v56  ;;  %v261_v43 = vld [vmem:[%s7253_s14 + $0xb0] sm:$0x1] }
  0x77   : > { %v577_v36 = vsel %vm7285_vm2, %v572_v7, %v576_v59  ;;  %v2969_v62 = vsel %vm7531_vm5, %v2967_v11, %v2968_v63  ;;  %v590_v18 = vrot.slane %v588_v12, 5  ;;  %v598_v26 = vshll.u32 %v260_v61, 16  ;;  %v7690_v41 = vld [vmem:[%s7253_s14 + $0xb4] sm:$0xf]  ;;  %v7695_v12 = vld [vmem:[%s7253_s14 + $0xb8] sm:$0xf] }
  0x78   : > { %v5337_v30 = vcombine.low %v567_v19, %v577_v36  ;;  %v5641_v34 = vcombine.low %v2966_v10, %v2969_v62  ;;  %v585_v33 = vor.u32 %v584_v28, %v581_v13  ;;  %v594_v46 = vrot.slane %v592_v8, 4  ;;  %v262_v19 = vld [vmem:[%s7253_s14 + $0xbc] sm:$0x1] }
  0x79   : > { %v600_v38 = vrot.slane %v598_v26, 5  ;;  %v5610_v39 = vrot.slane %v5594_v15, 9  ;;  %v2972_v23 = vrot.slane %v7438_v14, 5  ;;  %v2975_v42 = vrot.slane %v7444_v22, 5  ;;  %6570 = vmatpush3.bf16.msra.mxu0 %v7025_v56  ;;  %v7037_v13 = vld [vmem:[%s9093_s1 + $0x1b8] sm:$0xff]  }
  0x7a   : > { %6313 = vmatprep.mubr.bf16.mxu1 %v5337_v30  ;;  %6537 = vmatprep.mubr.bf16.mxu0 %v5641_v34  ;;  %v586_v44 = vrot.slane %v585_v33, 4  ;;  %v595_v49 = vor.u32 %v594_v46, %v590_v18  ;;  %v603_v50 = vshrl.u32 %v7667_v27, 16  ;;  %v606_v52 = vshll.u32 %v7667_v27, 16  ;;  %v5596_v30 = vld [vmem:[%s7253_s14 + $0x60] sm:$0xe] }
  0x7b   : > { %v2973_v14 = vsel %vm7531_vm5, %v5610_v39, %v2972_v23  ;;  %v2974_v22 = vrot.slane %v2972_v23, 4  ;;  %v612_v51 = vshll.u32 %v7670_v29, 16  ;;  %v616_v55 = vshrl.u32 %v7670_v29, 16  ;;  %6571 = vmatprep.subr.bf16.mxu0 %v7029_v32  ;;  %v5526_v39 = vld [vmem:[%s7253_s14 + $0x70] sm:$0xf] }
  0x7c   : > { %v591_v56 = vsel %vm7285_vm2, %v586_v44, %v590_v18  ;;  %v596_v57 = vrot.slane %v595_v49, 4  ;;  %v605_v58 = vrot.slane %v603_v50, 4  ;;  %v608_v59 = vrot.slane %v606_v52, 5  ;;  %v7717_v44 = vld [vmem:[%s9093_s1 + $0x1c0] sm:$0xff]  }
  0x7d   : > { %v2976_v24 = vsel %vm7531_vm5, %v2974_v22, %v2975_v42  ;;  %v614_v61 = vrot.slane %v612_v51, 5  ;;  %v618_v6 = vrot.slane %v616_v55, 4  ;;  %v622_v63 = vshll.u32 %v261_v43, 16  ;;  %6572 = vmatpush3.bf16.msra.mxu0 %v7029_v32  ;;  %v5597_v43 = vld [vmem:[%s7253_s14 + $0x6c] sm:$0xe] }
  0x7e   : > { %v601_v1 = vsel %vm7285_vm2, %v596_v57, %v600_v38  ;;  %v5642_v7 = vcombine.low %v2973_v14, %v2976_v24  ;;  %v609_v10 = vor.u32 %v608_v59, %v605_v58  ;;  %v5611_v11 = vrot.slane %v5595_v53, 9  ;;  %6573 = vmatprep.subr.bf16.mxu0 %v7033_v45  ;;  %v5527_v55 = vld [vmem:[%s7253_s14 + $0x74] sm:$0x1]  ;;  %v5598_v24 = vld [vmem:[%s7253_s14 + $0x78] sm:$0xe] }
  0x7f   : > { %v5338_v28 = vcombine.low %v591_v56, %v601_v1  ;;  %v619_v8 = vor.u32 %v618_v6, %v614_v61  ;;  %v624_v15 = vrot.slane %v622_v63, 5  ;;  %v2979_v32 = vrot.slane %v7469_v0, 5 }
  0x80   : > { %6538 = vmatmul.mubr.bf16.gmra.mrb[8].mxu0 %v5642_v7  ;;  %v610_v36 = vrot.slane %v609_v10, 4  ;;  %v2982_v62 = vrot.slane %v7481_v20, 5  ;;  %v627_v18 = vshrl.u32 %v7690_v41, 16  ;;  %v630_v26 = vshll.u32 %v7690_v41, 16 }
  0x81   : > { %6314 = vmatmul.mubr.bf16.gmra.mrb[24].mxu1 %v5338_v28  ;;  %v620_v34 = vrot.slane %v619_v8, 4  ;;  %v2980_v33 = vsel %vm7531_vm5, %v5611_v11, %v2979_v32  ;;  %v2981_v46 = vrot.slane %v2979_v32, 4  ;;  %v636_v38 = vshll.u32 %v7695_v12, 16  ;;  %6574 = vmatpush3.bf16.msra.mxu0 %v7033_v45  ;;  %v7730_v11 = vld [vmem:[%s7253_s14 + $0x7c] sm:$0xf] }
  0x82   : > { %v615_v0 = vsel %vm7285_vm2, %v610_v36, %v614_v61  ;;  %v629_v20 = vrot.slane %v627_v18, 4  ;;  %v632_v23 = vrot.slane %v630_v26, 5  ;;  %v640_v42 = vshrl.u32 %v7695_v12, 16  ;;  %6575 = vmatprep.subr.bf16.mxu0 %v7037_v13  ;;  %v7106_v36 = vld [vmem:[%s7253_s14] sm:$0xf] }
  0x83   : > { %v625_v49 = vsel %vm7285_vm2, %v620_v34, %v624_v15  ;;  %v2983_v50 = vsel %vm7531_vm5, %v2981_v46, %v2982_v62  ;;  %v638_v52 = vrot.slane %v636_v38, 5  ;;  %v646_v53 = vshll.u32 %v262_v19, 16  ;;  %v5532_v15 = vld [vmem:[%s7253_s14 + $0x88] sm:$0xf]  ;;  %v7745_v62 = vld [vmem:[%s7253_s14 + $0x4] sm:$0xf] }
  0x84   : > { %v5339_v45 = vcombine.low %v615_v0, %v625_v49  ;;  %v5643_v14 = vcombine.low %v2980_v33, %v2983_v50  ;;  %v633_v22 = vor.u32 %v632_v23, %v629_v20  ;;  %v642_v51 = vrot.slane %v640_v42, 4  ;;  %v5533_v26 = vld [vmem:[%s7253_s14 + $0x8c] sm:$0x1]  ;;  %v5536_v23 = vld [vmem:[%s7253_s14 + $0x98] sm:$0x1] }
  0x85   : > { %v648_v56 = vrot.slane %v646_v53, 5  ;;  %v5612_v57 = vrot.slane %v5596_v30, 9  ;;  %v2986_v58 = vrot.slane %v7496_v60, 5  ;;  %v2989_v59 = vrot.slane %v7505_v17, 5  ;;  %6576 = vmatpush3.bf16.msra.mxu0 %v7037_v13  ;;  %v7733_v17 = vld [vmem:[%s7253_s14 + $0x80] sm:$0x1] }
  0x86   : > { %6317 = vmatprep.mubr.bf16.mxu1 %v5339_v45  ;;  %6541 = vmatprep.mubr.bf16.mxu0 %v5643_v14  ;;  %v634_v61 = vrot.slane %v633_v22, 4  ;;  %v643_v6 = vor.u32 %v642_v51, %v638_v52  ;;  %v5613_v63 = vrot.slane %v5597_v43, 9  ;;  %v2993_v1 = vrot.slane %v5526_v39, 5  ;;  %v5599_v30 = vld [vmem:[%s7253_s14 + $0x84] sm:$0xe] }
  0x87   : > { %v2987_v7 = vsel %vm7531_vm5, %v5612_v57, %v2986_v58  ;;  %v2988_v10 = vrot.slane %v2986_v58, 4  ;;  %v2996_v60 = vrot.slane %v5527_v55, 5  ;;  %6609 = vmatprep.subr.bf16.mxu0 %v7717_v44  ;;  %v5349_v18 = vcombine.low %v7106_v36, %v7745_v62  ;;  %v5535_v39 = vld [vmem:[%s7253_s14 + $0x94] sm:$0xf]  ;;  %v5600_v42 = vld [vmem:[%s7253_s14 + $0x90] sm:$0xe] }
  0x88   : > { %v639_v19 = vsel %vm7285_vm2, %v634_v61, %v638_v52  ;;  %v644_v13 = vrot.slane %v643_v6, 4  ;;  %v2994_v28 = vsel %vm7531_vm5, %v5613_v63, %v2993_v1  ;;  %v2995_v8 = vrot.slane %v2993_v1, 4  ;;  %v5601_v50 = vld [vmem:[%s7253_s14 + $0x9c] sm:$0xe]  ;;  %v5538_v14 = vld [vmem:[%s7253_s14 + $0xa0] sm:$0xf] }
  0x89   : > { %v2990_v32 = vsel %vm7531_vm5, %v2988_v10, %v2989_v59  ;;  %v5614_v38 = vrot.slane %v5598_v24, 9  ;;  %v3000_v43 = vrot.slane %v7730_v11, 5  ;;  %v3003_v49 = vrot.slane %v7733_v17, 5  ;;  %v5539_v22 = vld [vmem:[%s7253_s14 + $0xa4] sm:$0x1] }
  0x8a   : > { %v649_v34 = vsel %vm7285_vm2, %v644_v13, %v648_v56  ;;  %v5644_v33 = vcombine.low %v2987_v7, %v2990_v32  ;;  %v2997_v46 = vsel %vm7531_vm5, %v2995_v8, %v2996_v60  ;;  %v5615_v52 = vrot.slane %v5599_v30, 9  ;;  %v5541_v59 = vld [vmem:[%s7253_s14 + $0xac] sm:$0xf]  ;;  %v7769_v61 = vld [vmem:[%s7253_s14 + $0x10] sm:$0xf] }
  0x8b   : > { %v5340_v0 = vcombine.low %v639_v19, %v649_v34  ;;  %v5645_v20 = vcombine.low %v2994_v28, %v2997_v46  ;;  %v3007_v53 = vrot.slane %v5532_v15, 5  ;;  %v3010_v45 = vrot.slane %v5533_v26, 5  ;;  %v7108_v24 = vld [vmem:[%s7253_s14 + $0xc] sm:$0xf]  ;;  %v7110_v8 = vld [vmem:[%s7253_s14 + $0x18] sm:$0xf] }
  0x8c   : > { %6542 = vmatmul.mubr.bf16.gmra.mrb[12].mxu0 %v5644_v33  ;;  %v3001_v51 = vsel %vm7531_vm5, %v5614_v38, %v3000_v43  ;;  %v3002_v55 = vrot.slane %v3000_v43, 4  ;;  %v3014_v58 = vrot.slane %v5535_v39, 5  ;;  %v5350_v6 = vcombine.low %v7108_v24, %v7769_v61  ;;  %v7028_v19 = vld [vmem:[%s9093_s1 + $0x88] sm:$0xff]   ;;  %v7781_v15 = vld [vmem:[%s7253_s14 + $0x1c] sm:$0xf] }
  0x8d   : > { %6318 = vmatmul.mubr.bf16.gmra.mrb[28].mxu1 %v5340_v0  ;;  %6545 = vmatprep.mubr.bf16.mxu0 %v5645_v20  ;;  %v3008_v56 = vsel %vm7531_vm5, %v5615_v52, %v3007_v53  ;;  %v3009_v57 = vrot.slane %v3007_v53, 4  ;;  %v5616_v1 = vrot.slane %v5600_v42, 9  ;;  %v3017_v7 = vrot.slane %v5536_v23, 5  ;;  %v5542_v30 = vld [vmem:[%s7253_s14 + $0xb0] sm:$0x1] }
  0x8e   : > { %6337 = vmatprep.mubr.bf16.mxu1 %v5349_v18  ;;  %v3004_v63 = vsel %vm7531_vm5, %v3002_v55, %v3003_v49  ;;  %v3016_v13 = vrot.slane %v3014_v58, 4  ;;  %v5617_v28 = vrot.slane %v5601_v50, 9  ;;  %v5351_v32 = vcombine.low %v7110_v8, %v7781_v15  ;;  %v5602_v34 = vld [vmem:[%s7253_s14 + $0xa8] sm:$0xe]  ;;  %v5544_v33 = vld [vmem:[%s7253_s14 + $0xb8] sm:$0xf] }
  0x8f   : > { %v5646_v10 = vcombine.low %v3001_v51, %v3004_v63  ;;  %v3011_v60 = vsel %vm7531_vm5, %v3009_v57, %v3010_v45  ;;  %v3021_v18 = vrot.slane %v5538_v14, 5  ;;  %v3024_v26 = vrot.slane %v5539_v22, 5  ;;  %v5545_v20 = vld [vmem:[%s7253_s14 + $0xbc] sm:$0x1]  ;;  %v5603_v23 = vld [vmem:[%s7253_s14 + $0xb4] sm:$0xe] }
  0x90   : > { %v5647_v36 = vcombine.low %v3008_v56, %v3011_v60  ;;  %v3028_v38 = vrot.slane %v5541_v59, 5  ;;  %v3015_v39 = vsel %vm7531_vm5, %v5616_v1, %v3014_v58  ;;  %v3018_v0 = vsel %vm7531_vm5, %v3016_v13, %v3017_v7  ;;  %v7032_v50 = vld [vmem:[%s9093_s1 + $0x90] sm:$0xff]   ;;  %v5547_v53 = vld [vmem:[%s7253_s14 + $0xc4] sm:$0xf]  ;;  %v7804_v51 = vld [vmem:[%s7253_s14 + $0x28] sm:$0xf] }
  0x91   : > { %v3023_v46 = vrot.slane %v3021_v18, 4  ;;  %v3022_v42 = vsel %vm7531_vm5, %v5617_v28, %v3021_v18  ;;  %v3035_v49 = vrot.slane %v5544_v33, 5  ;;  %v5618_v52 = vrot.slane %v5602_v34, 9  ;;  %v7112_v22 = vld [vmem:[%s7253_s14 + $0x24] sm:$0xf]  ;;  %v7036_v1 = vld [vmem:[%s9093_s1 + $0x98] sm:$0xff]  }
  0x92   : > { %v5648_v45 = vcombine.low %v3015_v39, %v3018_v0  ;;  %v3030_v14 = vrot.slane %v3028_v38, 4  ;;  %v5352_v55 = vcombine.low %v7112_v22, %v7804_v51  ;;  %v7114_v57 = vld [vmem:[%s7253_s14 + $0x30] sm:$0xf]  ;;  %v7809_v58 = vld [vmem:[%s7253_s14 + $0x34] sm:$0xf]  ;;  %v5619_v24 = vrot.slane %v5603_v23, 9 }
  0x93   : > { %v3025_v43 = vsel %vm7531_vm5, %v3023_v46, %v3024_v26  ;;  %v5353_v59 = vcombine.low %v7114_v57, %v7809_v58  ;;  %v3038_v63 = vrot.slane %v5545_v20, 5  ;;  %v5604_v7 = vld [vmem:[%s7253_s14 + $0xc0] sm:$0xe]  ;;  %v3029_v60 = vsel %vm7531_vm5, %v5618_v52, %v3028_v38  ;;  %v5548_v8 = vld [vmem:[%s7253_s14 + $0xc8] sm:$0x1]  ;;  %v7039_v22 = vld [vmem:[%s7253_s14 + $0x18] sm:$0xff]  }
  0x94   : > { %6546 = vmatmul.mubr.bf16.gmra.mrb[16].mxu0 %v5646_v10  ;;  %v5649_v56 = vcombine.low %v3022_v42, %v3025_v43  ;;  %v3042_v10 = vrot.slane %v5547_v53, 5  ;;  %v3036_v13 = vsel %vm7531_vm5, %v5619_v24, %v3035_v49  ;;  %v5620_v18 = vrot.slane %v5604_v7, 9  ;;  %v7116_v26 = vld [vmem:[%s7253_s14 + $0x3c] sm:$0xf]  ;;  %v7118_v39 = vld [vmem:[%s7253_s14 + $0x48] sm:$0xf] }
  0x95   : > { %6338 = vmatmul.mubr.bf16.vlgmr.msra.gmra.mrb[0].mxu1 %v5350_v6  ;;  %6549 = vmatprep.mubr.bf16.mxu0 %v5647_v36  ;;  %v3037_v6 = vrot.slane %v3035_v49, 4  ;;  %v3045_v38 = vrot.slane %v5548_v8, 5  ;;  %v7835_v0 = vld [vmem:[%s7253_s14 + $0x4c] sm:$0xf]  ;;  %v7053_v49 = vld [vmem:[%s9093_s1 + $0xb0] sm:$0xff]   ;;  %v2395_v52 = vshrl.u32 %v7730_v11, 16 }
  0x96   : > { %6370 = vmatpush3.bf16.msra.mxu1 %v7455_v4  ;;  %6341 = vmatprep.mubr.bf16.mxu1 %v5351_v32  ;;  %v3031_v4 = vrot.slane %v5542_v30, 5  ;;  %v7041_v32 = vld [vmem:[%s9093_s1 + $0xa0] sm:$0xff]   ;;  %v3044_v46 = vrot.slane %v3042_v10, 4  ;;  %v5355_v20 = vcombine.low %v7118_v39, %v7835_v0  ;;  %v7047_v23 = vld [vmem:[%s9093_s1 + $0xa8] sm:$0xff]   ;;  %v3043_v42 = vsel %vm7531_vm5, %v5620_v18, %v3042_v10  ;;  %v7045_v18 = vld [vmem:[%s7253_s14 + $0x30] sm:$0xff]  }
  0x97   : > { %6371 = vmatprep.subr.bf16.mxu1 %v7028_v19  ;;  %v3039_v28 = vsel %vm7531_vm5, %v3037_v6, %v3038_v63  ;;  %v7830_v30 = vld [vmem:[%s7253_s14 + $0x40] sm:$0xf]  ;;  %v7863_v57 = vrot.slane %v2395_v52, 4  ;;  %v7042_v6 = vld [vmem:[%s7253_s14 + $0x24] sm:$0xff]   ;;  %v1305_v7 = vrot.slane %v7769_v61, 5  ;;  %v2401_v8 = vshll.u32 %v7733_v17, 16 }
  0x98   : > { %v5354_v34 = vcombine.low %v7116_v26, %v7830_v30  ;;  %v5651_v33 = vcombine.low %v3036_v13, %v3039_v28  ;;  %v3046_v43 = vsel %vm7531_vm5, %v3044_v46, %v3045_v38  ;;  %v1245_v63 = vld [vmem:[%s7253_s14] sm:$0xe]  ;;  %v1246_v10 = vld [vmem:[%s7253_s14 + $0xc] sm:$0xe]  ;;  %v1312_v13 = vrot.slane %v7781_v15, 5 }
  0x99   : > { %v5652_v53 = vcombine.low %v3043_v42, %v3046_v43  ;;  %v1248_v61 = vld [vmem:[%s7253_s14 + $0x24] sm:$0xe]  ;;  %v5360_v15 = vcombine.low %v7583_v16, %v7591_v40  ;;  %v5361_v26 = vcombine.low %v7612_v2, %v7615_v3  ;;  %v5373_v17 = vrot.slane %v1245_v63, 9  ;;  %v7124_v38 = vld [vmem:[%s7253_s14 + $0x20] sm:$0x1]  ;;  %v7054_v2 = vld [vmem:[%s7253_s14 + $0x54] sm:$0xff]  }
  0x9a   : > { %6372 = vmatpush3.bf16.msra.mxu1 %v7028_v19  ;;  %v3032_v19 = vsel %vm7531_vm5, %v3030_v14, %v3031_v4  ;;  %v7852_v14 = vld [vmem:[%s7253_s14 + $0x58] sm:$0xf]  ;;  %v1314_v46 = vrot.slane %v1312_v13, 4  ;;  %v1315_v39 = vrot.slane %v7124_v38, 5  ;;  %v7125_v43 = vld [vmem:[%s7253_s14 + $0x2c] sm:$0x1] }
  0x9b   : > { %6373 = vmatprep.subr.bf16.mxu1 %v7032_v50  ;;  %v5650_v36 = vcombine.low %v3029_v60, %v3032_v19  ;;  %v7878_v60 = vld [vmem:[%s9093_s1 + $0xc0] sm:$0xff]   ;;  %v1247_v19 = vld [vmem:[%s7253_s14 + $0x18] sm:$0xe]  ;;  %v7128_v38 = vld [vmem:[%s7253_s14 + $0x50] sm:$0x1]  ;;  %v1347_v16 = vrot.slane %v7852_v14, 5 }
  0x9c   : > { %6550 = vmatmul.mubr.bf16.gmra.mrb[20].mxu0 %v5648_v45  ;;  %v7120_v45 = vld [vmem:[%s7253_s14 + $0x54] sm:$0xf]  ;;  %v8001_v40 = vld [vmem:[%s7253_s14 + $0x64] sm:$0xf] }
  0x9d   : > { %6342 = vmatmul.mubr.bf16.gmra.mrb[4].mxu1 %v5352_v55  ;;  %6553 = vmatprep.mubr.bf16.mxu0 %v5649_v56  ;;  %v5356_v4 = vcombine.low %v7120_v45, %v7852_v14  ;;  %v5357_v55 = vcombine.low %v7509_v25, %v7512_v35  ;;  %v7059_v56 = vld [vmem:[%s9093_s1 + $0xb8] sm:$0xff]   ;;  %v7123_v25 = vld [vmem:[%s7253_s14 + $0x14] sm:$0x1]  ;;  %v7057_v3 = vld [vmem:[%s7253_s14 + $0x60] sm:$0xff]  }
  0x9e   : > { %6345 = vmatprep.mubr.bf16.mxu1 %v5353_v59  ;;  %6374 = vmatpush3.bf16.msra.mxu1 %v7032_v50  ;;  %v2391_v50 = vshll.u32 %v7730_v11, 16  ;;  %v7866_v59 = vld [vmem:[%s7253_s14 + $0x8] sm:$0x1]  ;;  %v1308_v35 = vrot.slane %v7123_v25, 5 }
  0x9f   : > { %6375 = vmatprep.subr.bf16.mxu1 %v7036_v1  ;;  %v1301_v24 = vrot.slane %v7866_v59, 5 }
  0xa0   : > { %v7861_v11 = vrot.slane %v2391_v50, 5 }
  0xa2   : > { %6376 = vmatpush3.bf16.msra.mxu1 %v7036_v1  ;;  %v1298_v1 = vrot.slane %v7745_v62, 5  ;;  %v5358_v62 = vcombine.low %v7527_v5, %v7539_v21  ;;  %v5374_v21 = vrot.slane %v1246_v10, 9  ;;  %v5733_v10 = vld [vmem:[%s7253_s14 + $0x18] sm:$0xf] }
  0xa3   : > { %6377 = vmatprep.subr.bf16.mxu1 %v7041_v32 }
  0xa4   : > { %6554 = vmatmul.mubr.bf16.gmra.mrb[24].mxu0 %v5650_v36  ;;  %v5359_v36 = vcombine.low %v7550_v47, %v7561_v54  ;;  %v1300_v5 = vrot.slane %v1298_v1, 4  ;;  %v7049_v47 = vld [vmem:[%s9093_s1 + $0x1c8] sm:$0xff]   ;;  %v5375_v54 = vrot.slane %v1247_v19, 9  ;;  %v7921_v59 = vsel %vm7531_vm5, %v5373_v17, %v1298_v1  ;;  %v5734_v19 = vld [vmem:[%s7253_s14 + $0x1c] sm:$0xf] }
  0xa5   : > { %6346 = vmatmul.mubr.bf16.gmra.mrb[8].mxu1 %v5354_v34  ;;  %6557 = vmatprep.mubr.bf16.mxu0 %v5651_v33  ;;  %v1326_v34 = vrot.slane %v7809_v58, 5  ;;  %v1307_v33 = vrot.slane %v1305_v7, 4  ;;  %v5376_v58 = vrot.slane %v1248_v61, 9  ;;  %v1340_v1 = vrot.slane %v7835_v0, 5  ;;  %v7051_v0 = vld [vmem:[%s7253_s14 + $0x48] sm:$0xff]  }
  0xa6   : > { %6349 = vmatprep.mubr.bf16.mxu1 %v5355_v20  ;;  %6378 = vmatpush3.bf16.msra.mxu1 %v7041_v32  ;;  %v1319_v32 = vrot.slane %v7804_v51, 5  ;;  %v1249_v51 = vld [vmem:[%s7253_s14 + $0x30] sm:$0xe]  ;;  %v5362_v20 = vcombine.low %v7633_v31, %v7642_v48  ;;  %v7929_v25 = vsel %vm7531_vm5, %v1300_v5, %v1301_v24  ;;  %v7937_v63 = vsel %vm7531_vm5, %v5375_v54, %v1312_v13  ;;  %v1251_v13 = vld [vmem:[%s7253_s14 + $0x48] sm:$0xe] }
  0xa7   : > { %6379 = vmatprep.subr.bf16.mxu1 %v7047_v23  ;;  %v5377_v50 = vrot.slane %v1249_v51, 9  ;;  %v1328_v52 = vrot.slane %v1326_v34, 4  ;;  %v3805_v5 = vshrl.u32 %v5733_v10, 16  ;;  %v3818_v51 = vshrl.u32 %v5734_v19, 16  ;;  %v7060_v48 = vld [vmem:[%s7253_s14 + $0x6c] sm:$0xff]  }
  0xa8   : > { %v1321_v42 = vrot.slane %v1319_v32, 4  ;;  %v7949_v24 = vsel %vm7531_vm5, %v5376_v58, %v1319_v32  ;;  %v7127_v32 = vld [vmem:[%s7253_s14 + $0x44] sm:$0x1]  ;;  %v5379_v54 = vrot.slane %v1251_v13, 9  ;;  %v5737_v13 = vld [vmem:[%s7253_s14 + $0x28] sm:$0xf] }
  0xa9   : > { %v7959_v61 = vsel %vm7531_vm5, %v5377_v50, %v1326_v34  ;;  %v1336_v17 = vrot.slane %v7127_v32, 5  ;;  %v5735_v50 = vld [vmem:[%s7253_s14 + $0x20] sm:$0x1]  ;;  %v1253_v32 = vld [vmem:[%s7253_s14 + $0x60] sm:$0xe] }
  0xaa   : > { %6380 = vmatpush3.bf16.msra.mxu1 %v7047_v23  ;;  %v5363_v23 = vcombine.low %v7667_v27, %v7670_v29 }
  0xab   : > { %6381 = vmatprep.subr.bf16.mxu1 %v7053_v49 }
  0xac   : > { %6558 = vmatmul.mubr.bf16.gmra.mrb[28].mxu0 %v5652_v53  ;;  %v7126_v53 = vld [vmem:[%s7253_s14 + $0x38] sm:$0x1] }
  0xad   : > { %6350 = vmatmul.mubr.bf16.gmra.mrb[12].mxu1 %v5356_v4  ;;  %6577 = vmatprep.mubr.bf16.mxu0 %v7039_v22  ;;  %v1329_v45 = vrot.slane %v7126_v53, 5  ;;  %v1250_v4 = vld [vmem:[%s7253_s14 + $0x3c] sm:$0xe]  ;;  %v1333_v22 = vrot.slane %v7830_v30, 5  ;;  %v7925_v30 = vsel %vm7531_vm5, %v5374_v21, %v1305_v7  ;;  %v3808_v21 = vshll.u32 %v5733_v10, 16  ;;  %v7065_v53 = vld [vmem:[%s9093_s1 + $0x1e0] sm:$0xff]  }
  0xae   : > { %6353 = vmatprep.mubr.bf16.mxu1 %v5357_v55  ;;  %6382 = vmatpush3.bf16.msra.mxu1 %v7053_v49  ;;  %v1322_v49 = vrot.slane %v7125_v43, 5  ;;  %v7912_v55 = vrot.slane %v2401_v8, 5  ;;  %v7048_v7 = vld [vmem:[%s7253_s14 + $0x3c] sm:$0xff]   ;;  %v7945_v8 = vsel %vm7531_vm5, %v1314_v46, %v1315_v39  ;;  %v1342_v46 = vrot.slane %v1340_v1, 4  ;;  %v5739_v43 = vld [vmem:[%s7253_s14 + $0x30] sm:$0xf] }
  0xaf   : > { %6383 = vmatprep.subr.bf16.mxu1 %v7059_v56  ;;  %v1343_v39 = vrot.slane %v7128_v38, 5  ;;  %v3807_v10 = vrot.slane %v3805_v5, 4 }
  0xb0   : > { %9115 = vst [vmem:[#allocation2_spill] sm:$0xff] %v7912_v55 }
  0xb2   : > { %6384 = vmatpush3.bf16.msra.mxu1 %v7059_v56  ;;  %v7055_v56 = vld [vmem:[%s9093_s1 + $0x1d0] sm:$0xff]  }
  0xb3   : > { %6417 = vmatprep.subr.bf16.mxu1 %v7878_v60 }
  0xb4   : > { %6578 = vmatmul.mubr.bf16.vlgmr.msra.gmra.mrb[0].mxu0 %v7042_v6  ;;  %v7933_v6 = vsel %vm7531_vm5, %v1307_v33, %v1308_v35  ;;  %v7953_v35 = vsel %vm7531_vm5, %v1321_v42, %v1322_v49  ;;  %v3814_v33 = vshll.u32 %v5734_v19, 16  ;;  %v3810_v19 = vrot.slane %v3808_v21, 5  ;;  %v1254_v21 = vld [vmem:[%s7253_s14 + $0x6c] sm:$0xe] }
  0xb5   : > { %6354 = vmatmul.mubr.bf16.gmra.mrb[16].mxu1 %v5358_v62  ;;  %6610 = vmatpush3.bf16.msra.mxu0 %v7717_v44  ;;  %v5378_v62 = vrot.slane %v1250_v4, 9  ;;  %v5382_v58 = vrot.slane %v1254_v21, 9 }
  0xb6   : > { %6357 = vmatprep.mubr.bf16.mxu1 %v5359_v36  ;;  %6581 = vmatprep.mubr.bf16.mxu0 %v7045_v18  ;;  %v7963_v36 = vsel %vm7531_vm5, %v1328_v52, %v1329_v45  ;;  %v1335_v18 = vrot.slane %v1333_v22, 4  ;;  %v5736_v52 = vld [vmem:[%s7253_s14 + $0x24] sm:$0xf]  ;;  %v3842_v45 = vshrl.u32 %v5737_v13, 16 }
  0xb7   : > { %6611 = vmatprep.subr.bf16.mxu0 %v7049_v47  ;;  %v7980_v49 = vsel %vm7531_vm5, %v5378_v62, %v1333_v22  ;;  %v7997_v22 = vld [vmem:[%s7253_s14 + $0x54] sm:$0xe]  ;;  %v3820_v62 = vrot.slane %v3818_v51, 4  ;;  %v3829_v38 = vshrl.u32 %v5736_v52, 16  ;;  %v3832_v28 = vshll.u32 %v5736_v52, 16 }
  0xb8   : > { %v7994_v4 = vsel %vm7531_vm5, %v1335_v18, %v1336_v17  ;;  %v3824_v17 = vshll.u32 %v5735_v50, 16  ;;  %v5380_v5 = vrot.slane %v7997_v22, 9  ;;  %v7069_v50 = vld [vmem:[%s9093_s1 + $0x1e8] sm:$0xff]   ;;  %v1349_v52 = vrot.slane %v1347_v16, 4 }
  0xb9   : > { %6612 = vmatpush3.bf16.msra.mxu0 %v7049_v47  ;;  %v7061_v47 = vld [vmem:[%s9093_s1 + $0x1d8] sm:$0xff]   ;;  %v3811_v22 = vor.u32 %v3810_v19, %v3807_v10  ;;  %v3831_v34 = vrot.slane %v3829_v38, 4  ;;  %v3834_v44 = vrot.slane %v3832_v28, 5  ;;  %v7133_v10 = vld [vmem:[%s7253_s14 + $0x74] sm:$0x1]  ;;  %v3844_v28 = vrot.slane %v3842_v45, 4 }
  0xba   : > { %6613 = vmatprep.subr.bf16.mxu0 %v7055_v56  ;;  %v8035_v42 = vrot.slane %v3824_v17, 5  ;;  %v1364_v19 = vrot.slane %v7133_v10, 5  ;;  %v3853_v38 = vshrl.u32 %v5739_v43, 16  ;;  %v8060_v27 = vsel %vm7531_vm5, %v5380_v5, %v1347_v16 }
  0xbb   : > { %v3812_v21 = vrot.slane %v3811_v22, 4 }
  0xbc   : > { %6582 = vmatmul.mubr.bf16.gmra.mrb[4].mxu0 %v7048_v7  ;;  %v8007_v7 = vrot.slane %v3814_v33, 5  ;;  %v7131_v33 = vld [vmem:[%s7253_s14 + $0x70] sm:$0xf] }
  0xbd   : > { %6358 = vmatmul.mubr.bf16.gmra.mrb[20].mxu1 %v5360_v15  ;;  %6585 = vmatprep.mubr.bf16.mxu0 %v7051_v0  ;;  %v1354_v15 = vrot.slane %v8001_v40, 5  ;;  %v7130_v0 = vld [vmem:[%s7253_s14 + $0x5c] sm:$0x1]  ;;  %v1361_v51 = vrot.slane %v7131_v33, 5 }
  0xbe   : > { %6361 = vmatprep.mubr.bf16.mxu1 %v5361_v26  ;;  %6614 = vmatpush3.bf16.msra.mxu0 %v7055_v56  ;;  %v1350_v18 = vrot.slane %v7130_v0, 5  ;;  %v8016_v26 = vsel %vm7531_vm5, %v5379_v54, %v1340_v1  ;;  %v8020_v56 = vsel %vm7531_vm5, %v1342_v46, %v1343_v39  ;;  %v7132_v1 = vld [vmem:[%s7253_s14 + $0x68] sm:$0x1]  ;;  %v3838_v0 = vshll.u32 %v5737_v13, 16  ;;  %v7077_v40 = vld [vmem:[%s9093_s1 + $0x1f8] sm:$0xff]  }
  0xbf   : > { %6615 = vmatprep.subr.bf16.mxu0 %v7061_v47  ;;  %v1357_v54 = vrot.slane %v7132_v1, 5  ;;  %v5381_v46 = vrot.slane %v1253_v32, 9  ;;  %v1356_v39 = vrot.slane %v1354_v15, 4  ;;  %v3821_v33 = vor.u32 %v3820_v62, %v8007_v7  ;;  %v5740_v1 = vld [vmem:[%s7253_s14 + $0x34] sm:$0xf] }
  0xc0   : > { %v1363_v32 = vrot.slane %v1361_v51, 4  ;;  %v5738_v62 = vld [vmem:[%s7253_s14 + $0x2c] sm:$0x1]  ;;  %v8047_v17 = vrot.slane %v3838_v0, 5  ;;  %v3862_v13 = vshll.u32 %v5740_v1, 16  ;;  %v3866_v31 = vshrl.u32 %v5740_v1, 16 }
  0xc1   : > { %v3822_v10 = vrot.slane %v3821_v33, 4  ;;  %v8064_v29 = vsel %vm7531_vm5, %v1349_v52, %v1350_v18  ;;  %v8071_v45 = vsel %vm7531_vm5, %v5381_v46, %v1354_v15  ;;  %v8075_v14 = vsel %vm7531_vm5, %v1356_v39, %v1357_v54  ;;  %v1255_v18 = vld [vmem:[%s7253_s14 + $0x78] sm:$0xe] }
  0xc2   : > { %6616 = vmatpush3.bf16.msra.mxu0 %v7061_v47  ;;  %v8079_v16 = vsel %vm7531_vm5, %v5382_v58, %v1361_v51  ;;  %v8089_v15 = vsel %vm7531_vm5, %v1363_v32, %v1364_v19  ;;  %v3845_v5 = vor.u32 %v3844_v28, %v8047_v17  ;;  %v3855_v52 = vrot.slane %v3853_v38, 4  ;;  %v5742_v58 = vld [vmem:[%s7253_s14 + $0x3c] sm:$0xf]  ;;  %v5743_v51 = vld [vmem:[%s7253_s14 + $0x40] sm:$0xf] }
  0xc3   : > { %6617 = vmatprep.subr.bf16.mxu0 %v7065_v53  ;;  %v3817_v0 = vsel %vm7285_vm2, %v3812_v21, %v8007_v7  ;;  %v3827_v46 = vsel %vm7285_vm2, %v3822_v10, %v8035_v42  ;;  %v8100_v39 = vrot.slane %v3862_v13, 5  ;;  %v3868_v22 = vrot.slane %v3866_v31, 4  ;;  %v7135_v19 = vld [vmem:[%s7253_s14 + $0x80] sm:$0x1]  ;;  %v8259_v47 = vld [vmem:[%s7253_s14 + $0x68] sm:$0x1] }
  0xc4   : > { %6586 = vmatmul.mubr.bf16.gmra.mrb[8].mxu0 %v7054_v2  ;;  %v3856_v2 = vshll.u32 %v5739_v43, 16  ;;  %v3848_v43 = vshll.u32 %v5738_v62, 16  ;;  %v5383_v32 = vrot.slane %v1255_v18, 9  ;;  %v1256_v62 = vld [vmem:[%s7253_s14 + $0x84] sm:$0xe]  ;;  %v3877_v28 = vshrl.u32 %v5742_v58, 16 }
  0xc5   : > { %6362 = vmatmul.mubr.bf16.gmra.mrb[24].mxu1 %v5362_v20  ;;  %6589 = vmatprep.mubr.bf16.mxu0 %v7057_v3  ;;  %v7073_v20 = vld [vmem:[%s9093_s1 + $0x1f0] sm:$0xff]   ;;  %v7134_v3 = vld [vmem:[%s7253_s14 + $0x7c] sm:$0xf]  ;;  %v3880_v7 = vshll.u32 %v5742_v58, 16  ;;  %v3886_v38 = vshll.u32 %v5743_v51, 16  ;;  %v9116_v42 = vcombine.low %v7690_v41, %v7695_v12  ;;  %v8111_v13 = vrot.slane %v3845_v5, 4 }
  0xc6   : > { %6365 = vmatprep.mubr.bf16.mxu1 %v5363_v23  ;;  %6618 = vmatpush3.bf16.msra.mxu0 %v7065_v53  ;;  %v3835_v23 = vor.u32 %v3834_v44, %v3831_v34  ;;  %v7062_v53 = vld [vmem:[%s7253_s14 + $0x78] sm:$0xff]   ;;  %v1368_v44 = vrot.slane %v7134_v3, 5  ;;  %v3858_v54 = vrot.slane %v3856_v2, 5  ;;  %v8104_v1 = vrot.slane %v3848_v43, 5  ;;  %v8116_v21 = vld [vmem:[%s9093_s1 + $0x200] sm:$0xff]   ;;  %9124 = vst [vmem:[#allocation5_spill] sm:$0xff] %v8259_v47 }
  0xc7   : > { %6619 = vmatprep.subr.bf16.mxu0 %v7069_v50  ;;  %v5741_v34 = vld [vmem:[%s7253_s14 + $0x38] sm:$0x1]  ;;  %v3890_v2 = vshrl.u32 %v5743_v51, 16  ;;  %v7064_v43 = vld [vmem:[%s7253_s14 + $0x84] sm:$0xff]   ;;  %v3869_v12 = vor.u32 %v3868_v22, %v8100_v39  ;;  %v3882_v58 = vrot.slane %v3880_v7, 5  ;;  %v8138_v51 = vrot.slane %v3886_v38, 5 }
  0xc8   : > { %v8102_v33 = vrot.slane %v3835_v23, 4  ;;  %v1370_v10 = vrot.slane %v1368_v44, 4  ;;  %v3859_v31 = vor.u32 %v3858_v54, %v3855_v52  ;;  %v9117_v23 = vcombine.low %v7921_v59, %v7929_v25  ;;  %v7136_v18 = vld [vmem:[%s7253_s14 + $0x88] sm:$0xf]  ;;  %v5744_v5 = vld [vmem:[%s7253_s14 + $0x44] sm:$0x1] }
  0xc9   : > { %v1375_v3 = vrot.slane %v7136_v18, 5  ;;  %v8129_v59 = vcombine.low %v3817_v0, %v3827_v46  ;;  %v5745_v52 = vld [vmem:[%s7253_s14 + $0x48] sm:$0xf]  ;;  %v3879_v54 = vrot.slane %v3877_v28, 4  ;;  %v3892_v22 = vrot.slane %v3890_v2, 4 }
  0xca   : > { %6620 = vmatpush3.bf16.msra.mxu0 %v7069_v50  ;;  %v1371_v50 = vrot.slane %v7135_v19, 5  ;;  %v7066_v19 = vld [vmem:[%s7253_s14 + $0x90] sm:$0xff]   ;;  %v3841_v0 = vsel %vm7285_vm2, %v8102_v33, %v8047_v17  ;;  %v3860_v46 = vrot.slane %v3859_v31, 4  ;;  %v3851_v28 = vsel %vm7285_vm2, %v8111_v13, %v8104_v1  ;;  %v8160_v33 = vld [vmem:[%s7253_s14 + $0x58] sm:$0xf]  ;;  %v7067_v31 = vld [vmem:[%s9093_s1 + $0xc8] sm:$0xff]  }
  0xcb   : > { %6621 = vmatprep.subr.bf16.mxu0 %v7073_v20  ;;  %v3870_v38 = vrot.slane %v3869_v12, 4  ;;  %v1377_v2 = vrot.slane %v1375_v3, 4  ;;  %v5748_v17 = vld [vmem:[%s7253_s14 + $0x54] sm:$0xf]  ;;  %v3896_v1 = vshll.u32 %v5744_v5, 16  ;;  %v3901_v13 = vshrl.u32 %v5745_v52, 16 }
  0xcc   : > { %6590 = vmatmul.mubr.bf16.gmra.mrb[12].mxu0 %v7060_v48  ;;  %v3872_v48 = vshll.u32 %v5741_v34, 16  ;;  %v8156_v7 = vsel %vm7531_vm5, %v1370_v10, %v1371_v50  ;;  %v3904_v50 = vshll.u32 %v5745_v52, 16  ;;  %v3883_v10 = vor.u32 %v3882_v58, %v3879_v54  ;;  %v7068_v54 = vld [vmem:[%s7253_s14 + $0x9c] sm:$0xff]   ;;  %v7142_v41 = vld [vmem:[%s7253_s14 + $0xac] sm:$0xf] }
  0xcd   : > { %6366 = vmatmul.mubr.bf16.gmra.mrb[28].mxu1 %v9116_v42  ;;  %6593 = vmatprep.mubr.bf16.mxu0 %v7062_v53  ;;  %v5384_v53 = vrot.slane %v1256_v62, 9  ;;  %v7137_v42 = vld [vmem:[%s7253_s14 + $0x8c] sm:$0x1]  ;;  %v3934_v5 = vshll.u32 %v8160_v33, 16  ;;  %v9119_v52 = vcombine.low %v7937_v63, %v7945_v8  ;;  %v8196_v63 = vld [vmem:[%s7253_s14 + $0x50] sm:$0x1] }
  0xce   : > { %6385 = vmatprep.mubr.bf16.mxu1 %v9117_v23  ;;  %6622 = vmatpush3.bf16.msra.mxu0 %v7073_v20  ;;  %v8135_v20 = vsel %vm7531_vm5, %v5383_v32, %v1368_v44  ;;  %v3874_v62 = vrot.slane %v3872_v48, 5  ;;  %v1378_v23 = vrot.slane %v7137_v42, 5  ;;  %v1257_v44 = vld [vmem:[%s7253_s14 + $0x90] sm:$0xe]  ;;  %v8148_v32 = vld [vmem:[%s7253_s14 + $0x4c] sm:$0xf]  ;;  %v3893_v48 = vor.u32 %v3892_v22, %v8138_v51 }
  0xcf   : > { %6623 = vmatprep.subr.bf16.mxu0 %v7077_v40  ;;  %v3910_v12 = vshll.u32 %v8148_v32, 16  ;;  %v3914_v18 = vshrl.u32 %v8148_v32, 16  ;;  %v9118_v42 = vcombine.low %v7925_v30, %v7933_v6  ;;  %v7071_v30 = vld [vmem:[%s9093_s1 + $0xd0] sm:$0xff]   ;;  %v3865_v6 = vsel %vm7285_vm2, %v3860_v46, %v8100_v39  ;;  %v7070_v8 = vld [vmem:[%s7253_s14 + $0xa8] sm:$0xff]   ;;  %v8203_v39 = vld [vmem:[%s7253_s14 + $0x5c] sm:$0x1] }
  0xd0   : > { %v3875_v58 = vsel %vm7285_vm2, %v3870_v38, %v3874_v62  ;;  %v5385_v22 = vrot.slane %v1257_v44, 9  ;;  %v3906_v25 = vrot.slane %v3904_v50, 5  ;;  %9120 = vst [vmem:[#allocation3_spill] sm:$0xff] %v8203_v39  ;;  %v3884_v46 = vrot.slane %v3883_v10, 4 }
  0xd1   : > { %v3894_v62 = vrot.slane %v3893_v48, 4  ;;  %v8205_v38 = vrot.slane %v3910_v12, 5  ;;  %v8207_v34 = vrot.slane %v3934_v5, 5  ;;  %v8212_v50 = vcombine.low %v3841_v0, %v3851_v28  ;;  %v5751_v28 = vld [vmem:[%s7253_s14 + $0x60] sm:$0xf] }
  0xd2   : > { %6624 = vmatpush3.bf16.msra.mxu0 %v7077_v40  ;;  %v8168_v40 = vsel %vm7531_vm5, %v5384_v53, %v1375_v3  ;;  %v3925_v53 = vshrl.u32 %v5748_v17, 16  ;;  %v3928_v3 = vshll.u32 %v5748_v17, 16  ;;  %v7138_v17 = vld [vmem:[%s7253_s14 + $0x94] sm:$0xf]  ;;  %v8216_v48 = vcombine.low %v3865_v6, %v3875_v58 }
  0xd3   : > { %6657 = vmatprep.subr.bf16.mxu0 %v8116_v21  ;;  %v3920_v0 = vshll.u32 %v8196_v63, 16  ;;  %v3889_v6 = vsel %vm7285_vm2, %v3884_v46, %v8138_v51  ;;  %v9123_v46 = vcombine.low %v7959_v61, %v7963_v36 }
  0xd4   : > { %6594 = vmatmul.mubr.bf16.gmra.mrb[16].mxu0 %v7064_v43  ;;  %v3938_v43 = vshrl.u32 %v8160_v33, 16  ;;  %v3927_v44 = vrot.slane %v3925_v53, 4  ;;  %v7139_v53 = vld [vmem:[%s7253_s14 + $0x98] sm:$0x1] }
  0xd5   : > { %6386 = vmatmul.mubr.bf16.vlgmr.msra.gmra.mrb[0].mxu1 %v9118_v42  ;;  %6597 = vmatprep.mubr.bf16.mxu0 %v7066_v19  ;;  %v8199_v19 = vrot.slane %v3896_v1, 5  ;;  %v1382_v42 = vrot.slane %v7138_v17, 5  ;;  %v7140_v17 = vld [vmem:[%s7253_s14 + $0xa0] sm:$0xf]  ;;  %v3922_v36 = vrot.slane %v3920_v0, 5 }
  0xd6   : > { %6418 = vmatpush3.bf16.msra.mxu1 %v7878_v60  ;;  %6389 = vmatprep.mubr.bf16.mxu1 %v9119_v52  ;;  %v8193_v60 = vsel %vm7531_vm5, %v1377_v2, %v1378_v23  ;;  %v3903_v52 = vrot.slane %v3901_v13, 4  ;;  %v3916_v23 = vrot.slane %v3914_v18, 4  ;;  %v3930_v2 = vrot.slane %v3928_v3, 5  ;;  %v7075_v13 = vld [vmem:[%s9093_s1 + $0xd8] sm:$0xff]  }
  0xd7   : > { %6419 = vmatprep.subr.bf16.mxu1 %v7067_v31  ;;  %v3940_v1 = vrot.slane %v3938_v43, 4  ;;  %v1258_v18 = vld [vmem:[%s7253_s14 + $0x9c] sm:$0xe]  ;;  %v1385_v3 = vrot.slane %v7139_v53, 5  ;;  %v8229_v43 = vld [vmem:[%s7253_s14 + $0x64] sm:$0xf] }
  0xd8   : > { %v3907_v5 = vor.u32 %v3906_v25, %v3903_v52  ;;  %9121 = vst [vmem:[#allocation4_spill] sm:$0xff] %v8229_v43  ;;  %v3917_v58 = vor.u32 %v3916_v23, %v8205_v38  ;;  %v1389_v12 = vrot.slane %v7140_v17, 5  ;;  %v9122_v25 = vcombine.low %v7949_v24, %v7953_v35  ;;  %v7072_v23 = vld [vmem:[%s7253_s14 + $0xb4] sm:$0xff]   ;;  %v7078_v24 = vld [vmem:[%s9093_s1 + $0xe0] sm:$0xff]   ;;  %v5754_v17 = vld [vmem:[%s7253_s14 + $0x6c] sm:$0xf] }
  0xd9   : > { %v1384_v52 = vrot.slane %v1382_v42, 4  ;;  %v3931_v53 = vor.u32 %v3930_v2, %v3927_v44  ;;  %v3941_v51 = vor.u32 %v3940_v1, %v8207_v34  ;;  %v3949_v35 = vshrl.u32 %v5751_v28, 16  ;;  %v7141_v2 = vld [vmem:[%s7253_s14 + $0xa4] sm:$0x1] }
  0xda   : > { %6420 = vmatpush3.bf16.msra.mxu1 %v7067_v31  ;;  %v8223_v31 = vsel %vm7531_vm5, %v5385_v22, %v1382_v42  ;;  %v3944_v22 = vshll.u32 %v8203_v39, 16  ;;  %v3962_v42 = vshrl.u32 %v8229_v43, 16  ;;  %v3908_v61 = vrot.slane %v3907_v5, 4  ;;  %v8398_v39 = vld [vmem:[%s7253_s14 + $0x98] sm:$0x1] }
  0xdb   : > { %6421 = vmatprep.subr.bf16.mxu1 %v7071_v30  ;;  %v5386_v44 = vrot.slane %v1258_v18, 9  ;;  %v1392_v1 = vrot.slane %v7141_v2, 5  ;;  %v3932_v5 = vrot.slane %v3931_v53, 4  ;;  %v3942_v18 = vrot.slane %v3941_v51, 4  ;;  %9137 = vst [vmem:[#allocation14_spill] sm:$0xff] %v8398_v39 }
  0xdc   : > { %6598 = vmatmul.mubr.bf16.gmra.mrb[20].mxu0 %v7068_v54  ;;  %v3899_v54 = vsel %vm7285_vm2, %v3894_v62, %v8199_v19  ;;  %v3958_v19 = vshll.u32 %v8229_v43, 16  ;;  %v7074_v62 = vld [vmem:[%s7253_s14 + $0xc0] sm:$0xff]   ;;  %v3946_v10 = vrot.slane %v3944_v22, 5  ;;  %v8265_v43 = vsel %vm7531_vm5, %v1384_v52, %v1385_v3 }
  0xdd   : > { %6390 = vmatmul.mubr.bf16.gmra.mrb[4].mxu1 %v9122_v25  ;;  %6601 = vmatprep.mubr.bf16.mxu0 %v7070_v8  ;;  %v3952_v8 = vshll.u32 %v5751_v28, 16  ;;  %v3918_v25 = vrot.slane %v3917_v58, 4  ;;  %v1396_v28 = vrot.slane %v7142_v41, 5  ;;  %v8261_v55 = vcombine.low %v3889_v6, %v3899_v54  ;;  %v7080_v41 = vld [vmem:[%s9093_s1 + $0xe8] sm:$0xff]  }
  0xde   : > { %6393 = vmatprep.mubr.bf16.mxu1 %v9123_v46  ;;  %6422 = vmatpush3.bf16.msra.mxu1 %v7071_v30  ;;  %v1259_v30 = vld [vmem:[%s7253_s14 + $0xa8] sm:$0xe]  ;;  %v1391_v46 = vrot.slane %v1389_v12, 4  ;;  %v3951_v0 = vrot.slane %v3949_v35, 4  ;;  %v8267_v58 = vrot.slane %v3958_v19, 5  ;;  %v3964_v22 = vrot.slane %v3962_v42, 4 }
  0xdf   : > { %6423 = vmatprep.subr.bf16.mxu1 %v7075_v13  ;;  %v3954_v2 = vrot.slane %v3952_v8, 5  ;;  %v3913_v3 = vsel %vm7285_vm2, %v3908_v61, %v8205_v38  ;;  %v8277_v6 = vsel %vm7531_vm5, %v5386_v44, %v1389_v12  ;;  %v3973_v54 = vshrl.u32 %v5754_v17, 16  ;;  %v7143_v38 = vld [vmem:[%s7253_s14 + $0xb0] sm:$0x1]  ;;  %v1260_v19 = vld [vmem:[%s7253_s14 + $0xb4] sm:$0xe] }
  0xe0   : > { %v3976_v52 = vshll.u32 %v5754_v17, 16  ;;  %v3923_v53 = vsel %vm7285_vm2, %v3918_v25, %v3922_v36  ;;  %v8286_v51 = vsel %vm7531_vm5, %v1391_v46, %v1392_v1  ;;  %v5387_v35 = vrot.slane %v1259_v30, 9  ;;  %v8308_v30 = vld [vmem:[%s7253_s14 + $0x74] sm:$0x1]  ;;  %v7144_v25 = vld [vmem:[%s7253_s14 + $0xb8] sm:$0xf] }
  0xe1   : > { %v1399_v8 = vrot.slane %v7143_v38, 5  ;;  %v9126_v12 = vcombine.low %v7980_v49, %v7994_v4  ;;  %v3937_v42 = vsel %vm7285_vm2, %v3932_v5, %v8207_v34  ;;  %v3947_v61 = vsel %vm7285_vm2, %v3942_v18, %v3946_v10  ;;  %v7076_v4 = vld [vmem:[%s7253_s14 + $0xcc] sm:$0xff]   ;;  %9128 = vst [vmem:[#allocation7_spill] sm:$0xff] %v8308_v30  ;;  %v5760_v38 = vld [vmem:[%s7253_s14 + $0x84] sm:$0xf] }
  0xe2   : > { %6424 = vmatpush3.bf16.msra.mxu1 %v7075_v13  ;;  %v8280_v13 = vld [vmem:[%s7253_s14 + $0x70] sm:$0xf]  ;;  %v1398_v36 = vrot.slane %v1396_v28, 4  ;;  %v3968_v44 = vshll.u32 %v8259_v47, 16  ;;  %v9127_v49 = vcombine.low %v8016_v26, %v8020_v56  ;;  %v3965_v1 = vor.u32 %v3964_v22, %v8267_v58  ;;  %v8325_v22 = vld [vmem:[%s7253_s14 + $0x7c] sm:$0xf] }
  0xe3   : > { %6425 = vmatprep.subr.bf16.mxu1 %v7078_v24  ;;  %9125 = vst [vmem:[#allocation6_spill] sm:$0xff] %v8280_v13  ;;  %v3982_v34 = vshll.u32 %v8280_v13, 16  ;;  %v3986_v10 = vshrl.u32 %v8280_v13, 16  ;;  %v5388_v17 = vrot.slane %v1260_v19, 9  ;;  %v1403_v46 = vrot.slane %v7144_v25, 5  ;;  %9129 = vst [vmem:[#allocation8_spill] sm:$0xff] %v8325_v22 }
  0xe4   : > { %6602 = vmatmul.mubr.bf16.gmra.mrb[24].mxu0 %v7072_v23  ;;  %v7082_v23 = vld [vmem:[%s9093_s1 + $0xf0] sm:$0xff]   ;;  %v3975_v26 = vrot.slane %v3973_v54, 4  ;;  %v3978_v56 = vrot.slane %v3976_v52, 5  ;;  %v8316_v18 = vcombine.low %v3913_v3, %v3923_v53  ;;  %v8328_v19 = vcombine.low %v3937_v42, %v3947_v61  ;;  %v7145_v3 = vld [vmem:[%s7253_s14 + $0xbc] sm:$0x1] }
  0xe5   : > { %6394 = vmatmul.mubr.bf16.gmra.mrb[8].mxu1 %v9126_v12  ;;  %6605 = vmatprep.mubr.bf16.mxu0 %v7074_v62  ;;  %v3955_v62 = vor.u32 %v3954_v2, %v3951_v0  ;;  %v8322_v2 = vsel %vm7531_vm5, %v5387_v35, %v1396_v28  ;;  %v8332_v54 = vsel %vm7531_vm5, %v1398_v36, %v1399_v8  ;;  %v8334_v52 = vrot.slane %v3968_v44, 5  ;;  %v7084_v12 = vld [vmem:[%s9093_s1 + $0xf8] sm:$0xff]   ;;  %v8341_v28 = vld [vmem:[%s7253_s14 + $0x88] sm:$0xf] }
  0xe6   : > { %6397 = vmatprep.mubr.bf16.mxu1 %v9127_v49  ;;  %6426 = vmatpush3.bf16.msra.mxu1 %v7078_v24  ;;  %v5757_v24 = vld [vmem:[%s7253_s14 + $0x78] sm:$0xf]  ;;  %v1406_v53 = vrot.slane %v7145_v3, 5  ;;  %9130 = vst [vmem:[#allocation9_spill] sm:$0xff] %v8341_v28  ;;  %v8345_v42 = vrot.slane %v3965_v1, 4  ;;  %v8347_v61 = vrot.slane %v3982_v34, 5  ;;  %v8351_v36 = vsel %vm7531_vm5, %v5388_v17, %v1403_v46 }
  0xe7   : > { %6427 = vmatprep.subr.bf16.mxu1 %v7080_v41  ;;  %v8343_v35 = vrot.slane %v3955_v62, 4  ;;  %v3988_v8 = vrot.slane %v3986_v10, 4  ;;  %v1405_v44 = vrot.slane %v1403_v46, 4  ;;  %v3979_v49 = vor.u32 %v3978_v56, %v3975_v26  ;;  %v5763_v3 = vld [vmem:[%s7253_s14 + $0x90] sm:$0xf] }
  0xe8   : > { %v3992_v25 = vshll.u32 %v8308_v30, 16  ;;  %v4000_v0 = vshll.u32 %v5757_v24, 16  ;;  %v4006_v62 = vshll.u32 %v8325_v22, 16  ;;  %v4010_v1 = vshrl.u32 %v8325_v22, 16  ;;  %v8358_v34 = vld [vmem:[%s7253_s14 + $0x94] sm:$0xf] }
  0xe9   : > { %9131 = vst [vmem:[#allocation10_spill] sm:$0xff] %v8358_v34  ;;  %v9132_v10 = vcombine.low %v8060_v27, %v8064_v29  ;;  %v4021_v17 = vshrl.u32 %v5760_v38, 16  ;;  %v4024_v46 = vshll.u32 %v5760_v38, 16  ;;  %v4034_v26 = vshrl.u32 %v8341_v28, 16  ;;  %v5766_v38 = vld [vmem:[%s7253_s14 + $0x9c] sm:$0xf] }
  0xea   : > { %6428 = vmatpush3.bf16.msra.mxu1 %v7080_v41  ;;  %v3997_v41 = vshrl.u32 %v5757_v24, 16  ;;  %v9133_v56 = vcombine.low %v8071_v45, %v8075_v14  ;;  %v3989_v29 = vor.u32 %v3988_v8, %v8347_v61  ;;  %v4048_v24 = vshll.u32 %v5763_v3, 16  ;;  %v8380_v45 = vld [vmem:[%s7253_s14 + $0x80] sm:$0x1] }
  0xeb   : > { %6429 = vmatprep.subr.bf16.mxu1 %v7082_v23  ;;  %v8377_v5 = vrot.slane %v3992_v25, 5  ;;  %9134 = vst [vmem:[#allocation11_spill] sm:$0xff] %v8380_v45  ;;  %v4054_v14 = vshll.u32 %v8358_v34, 16  ;;  %v4002_v27 = vrot.slane %v4000_v0, 5  ;;  %v4012_v8 = vrot.slane %v4010_v1, 4 }
  0xec   : > { %6606 = vmatmul.mubr.bf16.gmra.mrb[28].mxu0 %v7076_v4  ;;  %v4030_v4 = vshll.u32 %v8341_v28, 16  ;;  %v8384_v28 = vrot.slane %v4006_v62, 5  ;;  %v8390_v22 = vld [vmem:[%s7253_s14 + $0xa0] sm:$0xf]  ;;  %v4023_v25 = vrot.slane %v4021_v17, 4  ;;  %v4026_v30 = vrot.slane %v4024_v46, 5 }
  0xed   : > { %6398 = vmatmul.mubr.bf16.gmra.mrb[12].mxu1 %v9132_v10  ;;  %6625 = vmatprep.mubr.bf16.mxu0 %v8129_v59  ;;  %v4045_v59 = vshrl.u32 %v5763_v3, 16  ;;  %v8375_v10 = vrot.slane %v3979_v49, 4  ;;  %v8387_v3 = vld [vmem:[%s7253_s14 + $0x8c] sm:$0x1]  ;;  %9136 = vst [vmem:[#allocation13_spill] sm:$0xff] %v8390_v22  ;;  %v4036_v47 = vrot.slane %v4034_v26, 4  ;;  %v8407_v62 = vsel %vm7531_vm5, %v1405_v44, %v1406_v53 }
  0xee   : > { %6401 = vmatprep.mubr.bf16.mxu1 %v9133_v56  ;;  %6430 = vmatpush3.bf16.msra.mxu1 %v7082_v23  ;;  %v4058_v23 = vshrl.u32 %v8358_v34, 16  ;;  %v3999_v56 = vrot.slane %v3997_v41, 4  ;;  %9135 = vst [vmem:[#allocation12_spill] sm:$0xff] %v8387_v3  ;;  %v7081_v49 = vld [vmem:[%s9093_s1 + $0x208] sm:$0xff]   ;;  %v8395_v13 = vrot.slane %v4030_v4, 5  ;;  %v4050_v34 = vrot.slane %v4048_v24, 5 }
  0xef   : > { %6431 = vmatprep.subr.bf16.mxu1 %v7084_v12  ;;  %v5769_v41 = vld [vmem:[%s7253_s14 + $0xa8] sm:$0xf]  ;;  %v4047_v1 = vrot.slane %v4045_v59, 4  ;;  %v8412_v17 = vld [vmem:[%s9093_s1 + $0x100] sm:$0xff]   ;;  %v8415_v46 = vrot.slane %v4054_v14, 5  ;;  %v4069_v26 = vshrl.u32 %v5766_v38, 16  ;;  %v9139_v24 = vcombine.low %v8079_v16, %v8089_v15 }
  0xf0   : > { %9138 = vst [vmem:[#allocation15_spill] sm:$0xff] %v8412_v17  ;;  %v4060_v4 = vrot.slane %v4058_v23, 4  ;;  %v4072_v0 = vshll.u32 %v5766_v38, 16  ;;  %v8418_v53 = vrot.slane %v3989_v29, 4  ;;  %v4078_v44 = vshll.u32 %v8390_v22, 16  ;;  %v7083_v16 = vld [vmem:[%s9093_s1 + $0x210] sm:$0xff]  }
  0xf1   : > { %v4082_v59 = vshrl.u32 %v8390_v22, 16  ;;  %v4003_v14 = vor.u32 %v4002_v27, %v3999_v56  ;;  %v4013_v38 = vor.u32 %v4012_v8, %v8384_v28  ;;  %v4027_v23 = vor.u32 %v4026_v30, %v4023_v25  ;;  %v8430_v29 = vld [vmem:[%s7253_s14 + $0xac] sm:$0xf]  ;;  %v8443_v25 = vld [vmem:[%s7253_s14 + $0xa4] sm:$0x1] }
  0xf2   : > { %6432 = vmatpush3.bf16.msra.mxu1 %v7084_v12  ;;  %v4016_v12 = vshll.u32 %v8380_v45, 16  ;;  %9140 = vst [vmem:[#allocation16_spill] sm:$0xff] %v8430_v29  ;;  %v4037_v15 = vor.u32 %v4036_v47, %v8395_v13  ;;  %v4093_v27 = vshrl.u32 %v5769_v41, 16  ;;  %v4096_v30 = vshll.u32 %v5769_v41, 16 }
  0xf3   : > { %6705 = vmatprep.subr.bf16.mxu1 %v8412_v17  ;;  %v9141_v17 = vcombine.low %v8135_v20, %v8156_v7  ;;  %v4051_v56 = vor.u32 %v4050_v34, %v4047_v1  ;;  %v4061_v8 = vor.u32 %v4060_v4, %v8415_v46  ;;  %v4071_v20 = vrot.slane %v4069_v26, 4 }
  0xf4   : > { %6626 = vmatmul.mubr.bf16.vlgmr.msra.gmra.mrb[0].mxu0 %v8212_v50  ;;  %v4040_v50 = vshll.u32 %v8387_v3, 16  ;;  %v4074_v7 = vrot.slane %v4072_v0, 5  ;;  %v4106_v22 = vshrl.u32 %v8430_v29, 16  ;;  %v4004_v47 = vrot.slane %v4003_v14, 4  ;;  %v7085_v0 = vld [vmem:[%s9093_s1 + $0x218] sm:$0xff]  }
  0xf5   : > { %6402 = vmatmul.mubr.bf16.gmra.mrb[16].mxu1 %v9139_v24  ;;  %6658 = vmatpush3.bf16.msra.mxu0 %v8116_v21  ;;  %v4064_v21 = vshll.u32 %v8398_v39, 16  ;;  %v4102_v24 = vshll.u32 %v8430_v29, 16  ;;  %v4014_v39 = vrot.slane %v4013_v38, 4  ;;  %v4018_v3 = vrot.slane %v4016_v12, 5 }
  0xf6   : > { %6405 = vmatprep.mubr.bf16.mxu1 %v9141_v17  ;;  %6629 = vmatprep.mubr.bf16.mxu0 %v8216_v48  ;;  %v8445_v17 = vrot.slane %v4078_v44, 5  ;;  %v4084_v48 = vrot.slane %v4082_v59, 4  ;;  %v4042_v41 = vrot.slane %v4040_v50, 5  ;;  %v4028_v34 = vrot.slane %v4027_v23, 4 }
  0xf7   : > { %6659 = vmatprep.subr.bf16.mxu0 %v7081_v49  ;;  %v4038_v1 = vrot.slane %v4037_v15, 4  ;;  %v4095_v4 = vrot.slane %v4093_v27, 4  ;;  %v4098_v45 = vrot.slane %v4096_v30, 5  ;;  %v4052_v26 = vrot.slane %v4051_v56, 4  ;;  %v8511_v27 = vld [vmem:[%s7253_s14 + $0xbc] sm:$0x1] }
  0xf8   : > { %v4066_v44 = vrot.slane %v4064_v21, 5  ;;  %v4075_v59 = vor.u32 %v4074_v7, %v4071_v20  ;;  %v4088_v29 = vshll.u32 %v8443_v25, 16  ;;  %v4085_v12 = vor.u32 %v4084_v48, %v8445_v17  ;;  %v8478_v21 = vld [vmem:[%s7253_s14 + $0xb0] sm:$0x1] }
  0xf9   : > { %6660 = vmatpush3.bf16.msra.mxu0 %v7081_v49  ;;  %v4062_v49 = vrot.slane %v4061_v8, 4  ;;  %v8455_v14 = vrot.slane %v4102_v24, 5  ;;  %v4108_v38 = vrot.slane %v4106_v22, 4  ;;  %v9142_v23 = vor.u32 %v7863_v57, %v7861_v11 }
  0xfa   : > { %6661 = vmatprep.subr.bf16.mxu0 %v7083_v16  ;;  %v9143_v15 = vcombine.low %v8168_v40, %v8193_v60  ;;  %v3995_v22 = vsel %vm7285_vm2, %v8418_v53, %v8377_v5  ;;  %v4009_v57 = vsel %vm7285_vm2, %v4004_v47, %v8384_v28  ;;  %v9144_v40 = vcombine.low %v8223_v31, %v8265_v43  ;;  %v7088_v31 = vld [vmem:[%s9093_s1 + $0x220] sm:$0xff]  }
  0xfb   : > { %v8460_v50 = vrot.slane %v9142_v23, 4  ;;  %v4019_v60 = vsel %vm7285_vm2, %v4014_v39, %v4018_v3  ;;  %v4099_v5 = vor.u32 %v4098_v45, %v4095_v4  ;;  %v4043_v28 = vsel %vm7285_vm2, %v4038_v1, %v4042_v41  ;;  %v5825_v41 = vld [vmem:[%s7253_s14 + $0x48] sm:$0xe] }
  0xfc   : > { %6630 = vmatmul.mubr.bf16.gmra.mrb[4].mxu0 %v8261_v55  ;;  %v3985_v55 = vsel %vm7285_vm2, %v8375_v10, %v8347_v61  ;;  %v5772_v61 = vld [vmem:[%s7253_s14 + $0xb4] sm:$0xf]  ;;  %v8490_v10 = vld [vmem:[%s7253_s14 + $0xb8] sm:$0xf]  ;;  %v4057_v39 = vsel %vm7285_vm2, %v4052_v26, %v8415_v46  ;;  %v8500_v43 = vrot.slane %v4075_v59, 4  ;;  %v8502_v3 = vrot.slane %v4088_v29, 5 }
  0xfd   : > { %6406 = vmatmul.mubr.bf16.gmra.mrb[20].mxu1 %v9143_v15  ;;  %6633 = vmatprep.mubr.bf16.mxu0 %v8316_v18  ;;  %v4033_v18 = vsel %vm7285_vm2, %v4028_v34, %v8395_v13  ;;  %v4067_v13 = vsel %vm7285_vm2, %v4062_v49, %v4066_v44  ;;  %v8506_v45 = vrot.slane %v4085_v12, 4  ;;  %v4109_v53 = vor.u32 %v4108_v38, %v8455_v14  ;;  %v5826_v26 = vld [vmem:[%s7253_s14 + $0x54] sm:$0xe] }
  0xfe   : > { %6409 = vmatprep.mubr.bf16.mxu1 %v9144_v40  ;;  %6662 = vmatpush3.bf16.msra.mxu0 %v7083_v16  ;;  %v4112_v16 = vshll.u32 %v8478_v21, 16  ;;  %v9145_v46 = vsel %vm7285_vm2, %v8345_v42, %v8334_v52  ;;  %v9146_v29 = vsel %vm7285_vm2, %v8343_v35, %v8267_v58  ;;  %v4117_v56 = vshrl.u32 %v5772_v61, 16 }
  0xff   : > { %6663 = vmatprep.subr.bf16.mxu0 %v7085_v0  ;;  %v5803_v30 = vcombine.low %v9146_v29, %v9145_v46  ;;  %v4120_v8 = vshll.u32 %v5772_v61, 16  ;;  %v4126_v20 = vshll.u32 %v8490_v10, 16  ;;  %v5419_v7 = vcombine.low %v8322_v2, %v8332_v54  ;;  %v7091_v2 = vld [vmem:[%s9093_s1 + $0x228] sm:$0xff]   ;;  %v5775_v54 = vld [vmem:[%s7253_s14 + $0xc0] sm:$0xf]  ;;  %v9150_v29 = vld [vmem:[#allocation5_spill] sm:$0xff] }
 0x100   : > { %v5420_v48 = vcombine.low %v8351_v36, %v8407_v62  ;;  %v5804_v24 = vcombine.low %v3985_v55, %v3995_v22  ;;  %v8528_v52 = vrot.slane %v4099_v5, 4  ;;  %v5805_v42 = vcombine.low %v4009_v57, %v4019_v60 }
 0x101   : > { %v8530_v58 = vcombine.low %v4033_v18, %v4043_v28  ;;  %v8532_v35 = vcombine.low %v4057_v39, %v4067_v13  ;;  %v4081_v47 = vsel %vm7285_vm2, %v8500_v43, %v8445_v17  ;;  %v4091_v34 = vsel %vm7285_vm2, %v8506_v45, %v8502_v3  ;;  %v5828_v28 = vld [vmem:[%s7253_s14 + $0x6c] sm:$0xe] }
 0x102   : > { %6664 = vmatpush3.bf16.msra.mxu0 %v7085_v0  ;;  %v8548_v1 = vrot.slane %v4109_v53, 4  ;;  %v8550_v4 = vrot.slane %v4112_v16, 5  ;;  %v4130_v0 = vshrl.u32 %v8490_v10, 16  ;;  %v9147_v44 = vcombine.low %v8277_v6, %v8286_v51  ;;  %v7094_v6 = vld [vmem:[%s9093_s1 + $0x230] sm:$0xff]   ;;  %v8572_v51 = vld [vmem:[%s7253_s14 + $0xc4] sm:$0xf] }
 0x103   : > { %6665 = vmatprep.subr.bf16.mxu0 %v7088_v31  ;;  %v8557_v59 = vrot.slane %v4117_v56, 4  ;;  %v8561_v49 = vrot.slane %v4126_v20, 5  ;;  %v4136_v12 = vshll.u32 %v8511_v27, 16  ;;  %v4105_v38 = vsel %vm7285_vm2, %v8528_v52, %v8455_v14  ;;  %v5827_v14 = vld [vmem:[%s7253_s14 + $0x60] sm:$0xe]  ;;  %v9148_v39 = vld [vmem:[#allocation3_spill] sm:$0xff] }
 0x104   : > { %6634 = vmatmul.mubr.bf16.gmra.mrb[8].mxu0 %v8328_v19  ;;  %v8559_v19 = vrot.slane %v4120_v8, 5  ;;  %v4141_v23 = vshrl.u32 %v5775_v54, 16  ;;  %v5841_v15 = vrot.slane %v5825_v41, 9  ;;  %v4604_v55 = vrot.slane %v8148_v32, 5  ;;  %v7086_v13 = vld [vmem:[%s7253_s14 + $0xc] sm:$0xff]   ;;  %v7097_v56 = vld [vmem:[%s9093_s1 + $0x238] sm:$0xff]  }
 0x105   : > { %6410 = vmatmul.mubr.bf16.gmra.mrb[24].mxu1 %v9147_v44  ;;  %6637 = vmatprep.mubr.bf16.mxu0 %v5803_v30  ;;  %v4144_v22 = vshll.u32 %v5775_v54, 16  ;;  %v4607_v57 = vrot.slane %v8196_v63, 5  ;;  %v5842_v40 = vrot.slane %v5826_v26, 9  ;;  %v4611_v60 = vrot.slane %v8160_v33, 5  ;;  %v9149_v16 = vld [vmem:[#allocation4_spill] sm:$0xff]  ;;  %v9151_v52 = vld [vmem:[#allocation6_spill] sm:$0xff] }
 0x106   : > { %6413 = vmatprep.mubr.bf16.mxu1 %v5419_v7  ;;  %6666 = vmatpush3.bf16.msra.mxu0 %v7088_v31  ;;  %v4115_v18 = vsel %vm7285_vm2, %v8548_v1, %v8550_v4  ;;  %v8582_v5 = vrot.slane %v4130_v0, 4  ;;  %v8586_v61 = vsel %vm7531_vm5, %v5841_v15, %v4604_v55  ;;  %v4606_v32 = vrot.slane %v4604_v55, 4  ;;  %v9152_v4 = vld [vmem:[#allocation7_spill] sm:$0xff] }
 0x107   : > { %6667 = vmatprep.subr.bf16.mxu0 %v7091_v2  ;;  %v4150_v31 = vshll.u32 %v8572_v51, 16  ;;  %v8592_v63 = vsel %vm7531_vm5, %v5842_v40, %v4611_v60  ;;  %v4613_v33 = vrot.slane %v4611_v60, 4  ;;  %v4614_v3 = vrot.slane %v9148_v39, 5  ;;  %v8623_v26 = vld [vmem:[%s7253_s14 + $0xc8] sm:$0x1]  ;;  %v7087_v40 = vld [vmem:[%s7253_s14 + $0x18] sm:$0xff]  }
 0x108   : > { %v8598_v45 = vsel %vm7531_vm5, %v4606_v32, %v4607_v57  ;;  %v5843_v53 = vrot.slane %v5827_v14, 9  ;;  %v4618_v46 = vrot.slane %v9149_v16, 5  ;;  %v4621_v30 = vrot.slane %v9150_v29, 5  ;;  %v7089_v39 = vld [vmem:[%s7253_s14 + $0x24] sm:$0xff]  }
 0x109   : > { %v5873_v8 = vcombine.low %v8586_v61, %v8598_v45  ;;  %v8609_v20 = vsel %vm7531_vm5, %v4613_v33, %v4614_v3  ;;  %v5844_v7 = vrot.slane %v5828_v28, 9  ;;  %v4628_v0 = vrot.slane %v9152_v4, 5  ;;  %v9154_v28 = vld [vmem:[#allocation11_spill] sm:$0xff]  ;;  %v5534_v61 = vld [vmem:[%s7253_s14 + $0x90] sm:$0xf] }
 0x10a   : > { %6668 = vmatpush3.bf16.msra.mxu0 %v7091_v2  ;;  %v4625_v2 = vrot.slane %v9151_v52, 5  ;;  %v5874_v54 = vcombine.low %v8592_v63, %v8609_v20  ;;  %v8616_v41 = vsel %vm7531_vm5, %v5843_v53, %v4618_v46  ;;  %v4620_v1 = vrot.slane %v4618_v46, 4  ;;  %v9155_v53 = vld [vmem:[#allocation2_spill] sm:$0xff]  ;;  %v7103_v45 = vld [vmem:[%s7253_s14 + $0xa8] sm:$0xff]  }
 0x10b   : > { %6669 = vmatprep.subr.bf16.mxu0 %v7094_v6  ;;  %v8625_v44 = vrot.slane %v4141_v23, 4  ;;  %v8638_v36 = vcombine.low %v4081_v47, %v4091_v34  ;;  %v4123_v62 = vor.u32 %v8559_v19, %v8557_v59  ;;  %v5829_v23 = vld [vmem:[%s7253_s14 + $0x78] sm:$0xe]  ;;  %v8650_v57 = vrot.slane %v4136_v12, 5  ;;  %v5778_v12 = vld [vmem:[%s7253_s14 + $0xcc] sm:$0xf] }
 0x10c   : > { %6638 = vmatmul.mubr.bf16.gmra.mrb[12].mxu0 %v5804_v24  ;;  %v8627_v24 = vrot.slane %v4144_v22, 5  ;;  %v8631_v15 = vsel %vm7531_vm5, %v5844_v7, %v4625_v2  ;;  %v4627_v55 = vrot.slane %v4625_v2, 4  ;;  %v8648_v22 = vcombine.low %v4105_v38, %v4115_v18  ;;  %v5528_v47 = vld [vmem:[%s7253_s14 + $0x78] sm:$0xf]  ;;  %v9153_v18 = vld [vmem:[#allocation8_spill] sm:$0xff] }
 0x10d   : > { %6414 = vmatmul.mubr.bf16.gmra.mrb[28].mxu1 %v5420_v48  ;;  %6641 = vmatprep.mubr.bf16.mxu0 %v5805_v42  ;;  %v4154_v48 = vshrl.u32 %v8572_v51, 16  ;;  %v8645_v42 = vsel %vm7531_vm5, %v4620_v1, %v4621_v30  ;;  %v4133_v34 = vor.u32 %v8582_v5, %v8561_v49  ;;  %v8661_v59 = vrot.slane %v4150_v31, 5  ;;  %v8675_v31 = vld [vmem:[%s7253_s14 + $0xd0] sm:$0xf]  ;;  %v9156_v1 = vld [vmem:[#allocation9_spill] sm:$0xff] }
 0x10e   : > { %6433 = vmatprep.mubr.bf16.mxu1 %v7086_v13  ;;  %6670 = vmatpush3.bf16.msra.mxu0 %v7094_v6  ;;  %v5875_v17 = vcombine.low %v8616_v41, %v8645_v42  ;;  %v8656_v43 = vsel %vm7531_vm5, %v4627_v55, %v4628_v0  ;;  %v4160_v19 = vshll.u32 %v8623_v26, 16  ;;  %v5830_v6 = vld [vmem:[%s7253_s14 + $0x84] sm:$0xe]  ;;  %v4147_v60 = vor.u32 %v8627_v24, %v8625_v44  ;;  %v9157_v24 = vld [vmem:[#allocation12_spill] sm:$0xff]  ;;  %v7167_v63 = vld [vmem:[%s7253_s14 + $0x8c] sm:$0x1] }
 0x10f   : > { %6671 = vmatprep.subr.bf16.mxu0 %v7097_v56  ;;  %v5876_v38 = vcombine.low %v8631_v15, %v8656_v43  ;;  %v5845_v14 = vrot.slane %v5829_v23, 9  ;;  %v4632_v32 = vrot.slane %v9153_v18, 5  ;;  %v4635_v33 = vrot.slane %v9154_v28, 5 }
 0x110   : > { %v4156_v5 = vrot.slane %v4154_v48, 4  ;;  %v2382_v3 = vshrl.u32 %v5528_v47, 16  ;;  %v2385_v13 = vshll.u32 %v5528_v47, 16  ;;  %v2404_v16 = vsel %vm7285_vm2, %v8460_v50, %v9155_v53 }
 0x111   : > { %v4165_v46 = vshrl.u32 %v5778_v12, 16  ;;  %v8683_v29 = vsel %vm7531_vm5, %v5845_v14, %v4632_v32  ;;  %v4634_v30 = vrot.slane %v4632_v32, 4  ;;  %v5846_v7 = vrot.slane %v5830_v6, 9  ;;  %v7147_v6 = vld [vmem:[%s9093_s1 + $0x108] sm:$0xff]  }
 0x112   : > { %6672 = vmatpush3.bf16.msra.mxu0 %v7097_v56  ;;  %v4168_v52 = vshll.u32 %v5778_v12, 16  ;;  %v2384_v2 = vrot.slane %v2382_v3, 4  ;;  %v2387_v56 = vrot.slane %v2385_v13, 5  ;;  %v4639_v4 = vrot.slane %v9156_v1, 5  ;;  %v5831_v12 = vld [vmem:[%s7253_s14 + $0x90] sm:$0xe] }
 0x113   : > { %v4174_v50 = vshll.u32 %v8675_v31, 16  ;;  %v4178_v0 = vshrl.u32 %v8675_v31, 16  ;;  %v8692_v44 = vsel %vm7531_vm5, %v4634_v30, %v4635_v33  ;;  %v4642_v55 = vrot.slane %v9157_v24, 5  ;;  %v7090_v3 = vld [vmem:[%s7253_s14 + $0x30] sm:$0xff]  }
 0x114   : > { %6642 = vmatmul.mubr.bf16.gmra.mrb[16].mxu0 %v8530_v58  ;;  %v9158_v58 = vld [vmem:[#allocation15_spill] sm:$0xff]  ;;  %v4157_v48 = vor.u32 %v4156_v5, %v8661_v59  ;;  %v2388_v23 = vor.u32 %v2387_v56, %v2384_v2  ;;  %v4641_v47 = vrot.slane %v4639_v4, 4  ;;  %v4134_v14 = vrot.slane %v4133_v34, 4  ;;  %v8713_v13 = vld [vmem:[%s7253_s14 + $0xd4] sm:$0x1]  ;;  %v9159_v2 = vld [vmem:[#allocation10_spill] sm:$0xff] }
 0x115   : > { %6434 = vmatmul.mubr.bf16.vlgmr.msra.gmra.mrb[0].mxu1 %v7087_v40  ;;  %6645 = vmatprep.mubr.bf16.mxu0 %v8532_v35  ;;  %v5877_v35 = vcombine.low %v8683_v29, %v8692_v44  ;;  %v4124_v40 = vrot.slane %v4123_v62, 4  ;;  %v4162_v18 = vrot.slane %v4160_v19, 5  ;;  %v8705_v32 = vsel %vm7531_vm5, %v5846_v7, %v4639_v4  ;;  %v7092_v19 = vld [vmem:[%s7253_s14 + $0x3c] sm:$0xff]   ;;  %v7148_v1 = vld [vmem:[%s9093_s1 + $0x110] sm:$0xff]  }
 0x116   : > { %6713 = vmatpush3.bf16.msra.mxu1 %v9158_v58  ;;  %6437 = vmatprep.mubr.bf16.mxu1 %v7089_v39  ;;  %v4167_v28 = vrot.slane %v4165_v46, 4  ;;  %v4170_v33 = vrot.slane %v4168_v52, 5  ;;  %v2389_v39 = vrot.slane %v2388_v23, 4  ;;  %v8709_v5 = vsel %vm7531_vm5, %v4641_v47, %v4642_v55  ;;  %v7149_v47 = vld [vmem:[%s7253_s14 + $0x1c] sm:$0xf] }
 0x117   : > { %6706 = vmatprep.subr.bf16.mxu1 %v7147_v6  ;;  %v8715_v53 = vrot.slane %v4174_v50, 5  ;;  %v4180_v30 = vrot.slane %v4178_v0, 4  ;;  %v5878_v62 = vcombine.low %v8705_v32, %v8709_v5  ;;  %v5847_v34 = vrot.slane %v5831_v12, 9 }
 0x118   : > { %v4148_v7 = vrot.slane %v4147_v60, 4  ;;  %v4158_v46 = vrot.slane %v4157_v48, 4  ;;  %v2394_v52 = vsel %vm7285_vm2, %v2389_v39, %v7861_v11  ;;  %v4646_v56 = vrot.slane %v9159_v2, 5  ;;  %v9160_v11 = vld [vmem:[#allocation14_spill] sm:$0xff]  ;;  %v7093_v39 = vld [vmem:[%s7253_s14 + $0x48] sm:$0xff]  }
 0x119   : > { %v4129_v4 = vsel %vm7285_vm2, %v4124_v40, %v8561_v49  ;;  %v4139_v60 = vsel %vm7285_vm2, %v4134_v14, %v8650_v57  ;;  %v8733_v50 = vcombine.low %v2394_v52, %v2404_v16  ;;  %v4649_v0 = vrot.slane %v9160_v11, 5  ;;  %v5821_v57 = vld [vmem:[%s7253_s14 + $0x18] sm:$0xe]  ;;  %v5832_v16 = vld [vmem:[%s7253_s14 + $0x9c] sm:$0xe] }
 0x11a   : > { %6714 = vmatpush3.bf16.msra.mxu1 %v7147_v6  ;;  %v4171_v24 = vor.u32 %v4170_v33, %v4167_v28  ;;  %v4184_v55 = vshll.u32 %v8713_v13, 16  ;;  %v8740_v58 = vsel %vm7531_vm5, %v5847_v34, %v4646_v56  ;;  %v4648_v48 = vrot.slane %v4646_v56, 4  ;;  %v7150_v40 = vld [vmem:[%s9093_s1 + $0x118] sm:$0xff]   ;;  %v7151_v2 = vld [vmem:[%s7253_s14 + $0x20] sm:$0x1] }
 0x11b   : > { %6707 = vmatprep.subr.bf16.mxu1 %v7148_v1  ;;  %v4181_v49 = vor.u32 %v4180_v30, %v8715_v53  ;;  %v4163_v23 = vsel %vm7285_vm2, %v4158_v46, %v4162_v18  ;;  %v4576_v12 = vrot.slane %v7149_v47, 5  ;;  %v5810_v6 = vcombine.low %v4129_v4, %v4139_v60  ;;  %v9161_v34 = vld [vmem:[#allocation13_spill] sm:$0xff]  ;;  %v5833_v11 = vld [vmem:[%s7253_s14 + $0xa8] sm:$0xe] }
 0x11c   : > { %6646 = vmatmul.mubr.bf16.gmra.mrb[20].mxu0 %v8638_v36  ;;  %v4153_v36 = vsel %vm7285_vm2, %v4148_v7, %v8661_v59  ;;  %v4172_v14 = vrot.slane %v4171_v24, 4  ;;  %v4186_v28 = vrot.slane %v4184_v55, 5  ;;  %v5837_v18 = vrot.slane %v5821_v57, 9  ;;  %v7095_v46 = vld [vmem:[%s7253_s14 + $0x54] sm:$0xff]   ;;  %v5822_v55 = vld [vmem:[%s7253_s14 + $0x24] sm:$0xe] }
 0x11d   : > { %6438 = vmatmul.mubr.bf16.gmra.mrb[4].mxu1 %v7090_v3  ;;  %6649 = vmatprep.mubr.bf16.mxu0 %v8648_v22  ;;  %v8754_v22 = vsel %vm7531_vm5, %v4648_v48, %v4649_v0  ;;  %v5848_v33 = vrot.slane %v5832_v16, 9  ;;  %v5811_v3 = vcombine.low %v4153_v36, %v4163_v23  ;;  %v4182_v30 = vrot.slane %v4181_v49, 4  ;;  %v7153_v48 = vld [vmem:[%s7253_s14 + $0x28] sm:$0xf]  ;;  %v7154_v36 = vld [vmem:[%s7253_s14 + $0x34] sm:$0xf] }
 0x11e   : > { %6441 = vmatprep.mubr.bf16.mxu1 %v7092_v19  ;;  %6715 = vmatpush3.bf16.msra.mxu1 %v7148_v1  ;;  %v5879_v59 = vcombine.low %v8740_v58, %v8754_v22  ;;  %v4653_v19 = vrot.slane %v9161_v34, 5  ;;  %v4656_v7 = vrot.slane %v8443_v25, 5  ;;  %v4578_v52 = vrot.slane %v4576_v12, 4  ;;  %v7152_v1 = vld [vmem:[%s9093_s1 + $0x120] sm:$0xff]  }
 0x11f   : > { %6708 = vmatprep.subr.bf16.mxu1 %v7150_v40  ;;  %v4579_v56 = vrot.slane %v7151_v2, 5  ;;  %v4577_v25 = vsel %vm7531_vm5, %v5837_v18, %v4576_v12  ;;  %v4177_v0 = vsel %vm7285_vm2, %v4172_v14, %v8715_v53  ;;  %v4187_v24 = vsel %vm7285_vm2, %v4182_v30, %v4186_v28  ;;  %v5823_v12 = vld [vmem:[%s7253_s14 + $0x30] sm:$0xe]  ;;  %v7096_v30 = vld [vmem:[%s7253_s14 + $0x60] sm:$0xff]  }
 0x120   : > { %v8771_v4 = vsel %vm7531_vm5, %v5848_v33, %v4653_v19  ;;  %v4655_v60 = vrot.slane %v4653_v19, 4  ;;  %v4583_v49 = vrot.slane %v7153_v48, 5  ;;  %v4590_v23 = vrot.slane %v7154_v36, 5  ;;  %v7156_v33 = vld [vmem:[%s7253_s14 + $0x2c] sm:$0x1] }
 0x121   : > { %v4580_v16 = vsel %vm7531_vm5, %v4578_v52, %v4579_v56  ;;  %v5849_v47 = vrot.slane %v5833_v11, 9  ;;  %v5812_v28 = vcombine.low %v4177_v0, %v4187_v24  ;;  %v5838_v18 = vrot.slane %v5822_v55, 9  ;;  %v7098_v52 = vld [vmem:[%s7253_s14 + $0x6c] sm:$0xff]   ;;  %v5834_v11 = vld [vmem:[%s7253_s14 + $0xb4] sm:$0xe] }
 0x122   : > { %6716 = vmatpush3.bf16.msra.mxu1 %v7150_v40  ;;  %v8785_v57 = vsel %vm7531_vm5, %v4655_v60, %v4656_v7  ;;  %v9162_v40 = vld [vmem:[#allocation16_spill] sm:$0xff]  ;;  %v5869_v34 = vcombine.low %v4577_v25, %v4580_v16  ;;  %v4585_v19 = vrot.slane %v4583_v49, 4  ;;  %v5839_v2 = vrot.slane %v5823_v12, 9  ;;  %v5824_v0 = vld [vmem:[%s7253_s14 + $0x3c] sm:$0xe] }
 0x123   : > { %6709 = vmatprep.subr.bf16.mxu1 %v7152_v1  ;;  %v5880_v53 = vcombine.low %v8771_v4, %v8785_v57  ;;  %v4660_v14 = vrot.slane %v9162_v40, 5  ;;  %v4592_v56 = vrot.slane %v4590_v23, 4  ;;  %v7158_v24 = vld [vmem:[%s7253_s14 + $0x40] sm:$0xf]  ;;  %v4584_v48 = vsel %vm7531_vm5, %v5838_v18, %v4583_v49  ;;  %v7160_v18 = vld [vmem:[%s7253_s14 + $0x44] sm:$0x1] }
 0x124   : > { %6650 = vmatmul.mubr.bf16.gmra.mrb[24].mxu0 %v5810_v6  ;;  %v7155_v6 = vld [vmem:[%s9093_s1 + $0x128] sm:$0xff]   ;;  %v4597_v55 = vrot.slane %v7158_v24, 5  ;;  %v4667_v12 = vrot.slane %v8490_v10, 5  ;;  %v4591_v49 = vsel %vm7531_vm5, %v5839_v2, %v4590_v23  ;;  %v7161_v10 = vld [vmem:[%s9093_s1 + $0x138] sm:$0xff]   ;;  %v5835_v23 = vld [vmem:[%s7253_s14 + $0xc0] sm:$0xe] }
 0x125   : > { %6442 = vmatmul.mubr.bf16.gmra.mrb[8].mxu1 %v7093_v39  ;;  %6653 = vmatprep.mubr.bf16.mxu0 %v5811_v3  ;;  %v4586_v39 = vrot.slane %v7156_v33, 5  ;;  %v4663_v3 = vrot.slane %v8478_v21, 5  ;;  %v8802_v7 = vsel %vm7531_vm5, %v5849_v47, %v4660_v14  ;;  %v7159_v21 = vld [vmem:[%s9093_s1 + $0x130] sm:$0xff]   ;;  %v5850_v47 = vrot.slane %v5834_v11, 9 }
 0x126   : > { %6445 = vmatprep.mubr.bf16.mxu1 %v7095_v46  ;;  %6717 = vmatpush3.bf16.msra.mxu1 %v7152_v1  ;;  %v4662_v46 = vrot.slane %v4660_v14, 4  ;;  %v7157_v1 = vld [vmem:[%s7253_s14 + $0x38] sm:$0x1]  ;;  %v5840_v14 = vrot.slane %v5824_v0, 9  ;;  %v4600_v33 = vrot.slane %v7160_v18, 5  ;;  %v4674_v11 = vrot.slane %v8572_v51, 5 }
 0x127   : > { %6710 = vmatprep.subr.bf16.mxu1 %v7155_v6  ;;  %v4593_v60 = vrot.slane %v7157_v1, 5  ;;  %v4587_v36 = vsel %vm7531_vm5, %v4585_v19, %v4586_v39  ;;  %v4669_v39 = vrot.slane %v4667_v12, 4  ;;  %v5525_v19 = vld [vmem:[%s7253_s14 + $0x6c] sm:$0xf]  ;;  %v7101_v18 = vld [vmem:[%s7253_s14 + $0x90] sm:$0xff]   ;;  %v2425_v20 = vshll.u32 %v7167_v63, 16 }
 0x128   : > { %v8814_v25 = vsel %vm7531_vm5, %v4662_v46, %v4663_v3  ;;  %v5870_v3 = vcombine.low %v4584_v48, %v4587_v36  ;;  %v4598_v1 = vsel %vm7531_vm5, %v5840_v14, %v4597_v55  ;;  %v2358_v0 = vshrl.u32 %v5525_v19, 16  ;;  %v5836_v51 = vld [vmem:[%s7253_s14 + $0xcc] sm:$0xe] }
 0x129   : > { %v5881_v16 = vcombine.low %v8802_v7, %v8814_v25  ;;  %v4594_v40 = vsel %vm7531_vm5, %v4592_v56, %v4593_v60  ;;  %v5851_v56 = vrot.slane %v5835_v23, 9  ;;  %v2361_v24 = vshll.u32 %v5525_v19, 16 }
 0x12a   : > { %6718 = vmatpush3.bf16.msra.mxu1 %v7155_v6  ;;  %v4670_v6 = vrot.slane %v8511_v27, 5  ;;  %v8834_v27 = vsel %vm7531_vm5, %v5850_v47, %v4667_v12  ;;  %v4677_v36 = vrot.slane %v8623_v26, 5  ;;  %v4676_v12 = vrot.slane %v4674_v11, 4 }
 0x12b   : > { %6711 = vmatprep.subr.bf16.mxu1 %v7159_v21  ;;  %v2363_v26 = vrot.slane %v2361_v24, 5  ;;  %v4684_v23 = vrot.slane %v8713_v13, 5 }
 0x12c   : > { %6654 = vmatmul.mubr.bf16.gmra.mrb[28].mxu0 %v5812_v28  ;;  %v4599_v28 = vrot.slane %v4597_v55, 4  ;;  %v8841_v46 = vsel %vm7531_vm5, %v4669_v39, %v4670_v6  ;;  %v8855_v55 = vsel %vm7531_vm5, %v5851_v56, %v4674_v11  ;;  %v4681_v39 = vrot.slane %v8675_v31, 5  ;;  %v7163_v56 = vld [vmem:[%s7253_s14 + $0x74] sm:$0x1] }
 0x12d   : > { %6446 = vmatmul.mubr.bf16.gmra.mrb[12].mxu1 %v7096_v30  ;;  %6673 = vmatprep.mubr.bf16.mxu0 %v5869_v34  ;;  %v7099_v30 = vld [vmem:[%s7253_s14 + $0x78] sm:$0xff]   ;;  %v5871_v34 = vcombine.low %v4591_v49, %v4594_v40  ;;  %v5882_v2 = vcombine.low %v8834_v27, %v8841_v46  ;;  %v8860_v49 = vsel %vm7531_vm5, %v4676_v12, %v4677_v36  ;;  %v2360_v40 = vrot.slane %v2358_v0, 4  ;;  %v7164_v0 = vld [vmem:[%s7253_s14 + $0x88] sm:$0xf] }
 0x12e   : > { %6449 = vmatprep.mubr.bf16.mxu1 %v7098_v52  ;;  %6719 = vmatpush3.bf16.msra.mxu1 %v7159_v21  ;;  %v7100_v52 = vld [vmem:[%s7253_s14 + $0x84] sm:$0xff]   ;;  %v4601_v60 = vsel %vm7531_vm5, %v4599_v28, %v4600_v33  ;;  %v7162_v21 = vld [vmem:[%s7253_s14 + $0x70] sm:$0xf]  ;;  %v5883_v28 = vcombine.low %v8855_v55, %v8860_v49  ;;  %v4683_v19 = vrot.slane %v4681_v39, 4  ;;  %v2415_v24 = vshll.u32 %v7164_v0, 16 }
 0x12f   : > { %6712 = vmatprep.subr.bf16.mxu1 %v7161_v10  ;;  %v2367_v48 = vshll.u32 %v7162_v21, 16  ;;  %v2371_v47 = vshrl.u32 %v7162_v21, 16  ;;  %v5872_v6 = vcombine.low %v4598_v1, %v4601_v60  ;;  %v2377_v1 = vshll.u32 %v7163_v56, 16 }
 0x130   : > { %v8882_v11 = vsel %vm7531_vm5, %v4683_v19, %v4684_v23  ;;  %v2419_v21 = vshrl.u32 %v7164_v0, 16  ;;  %v7166_v19 = vld [vmem:[%s7253_s14 + $0xa0] sm:$0xf] }
 0x131   : > { %v8862_v14 = vrot.slane %v2367_v48, 5  ;;  %v2373_v33 = vrot.slane %v2371_v47, 4  ;;  %v2467_v56 = vshrl.u32 %v7166_v19, 16 }
 0x132   : > { %6720 = vmatpush3.bf16.msra.mxu1 %v7161_v10  ;;  %v5852_v10 = vrot.slane %v5836_v51, 9 }
 0x133   : > { %v2374_v31 = vor.u32 %v2373_v33, %v8862_v14  ;;  %v2433_v33 = vshll.u32 %v5534_v61, 16 }
 0x134   : > { %6674 = vmatmul.mubr.bf16.vlgmr.msra.gmra.mrb[0].mxu0 %v5870_v3  ;;  %v7102_v3 = vld [vmem:[%s7253_s14 + $0x9c] sm:$0xff]  }
 0x135   : > { %6450 = vmatmul.mubr.bf16.gmra.mrb[16].mxu1 %v7099_v30  ;;  %6677 = vmatprep.mubr.bf16.mxu0 %v5871_v34  ;;  %v5531_v30 = vld [vmem:[%s7253_s14 + $0x84] sm:$0xf]  ;;  %v8873_v34 = vsel %vm7531_vm5, %v5852_v10, %v4681_v39  ;;  %v2375_v47 = vrot.slane %v2374_v31, 4  ;;  %v7165_v10 = vld [vmem:[%s7253_s14 + $0x94] sm:$0xf]  ;;  %v2435_v0 = vrot.slane %v2433_v33, 5 }
 0x136   : > { %6453 = vmatprep.mubr.bf16.mxu1 %v7100_v52  ;;  %v2364_v52 = vor.u32 %v2363_v26, %v2360_v40  ;;  %v2406_v13 = vshrl.u32 %v5531_v30, 16  ;;  %v2409_v60 = vshll.u32 %v5531_v30, 16  ;;  %v5884_v48 = vcombine.low %v8873_v34, %v8882_v11 }
 0x137   : > { %v8891_v40 = vrot.slane %v2415_v24, 5  ;;  %v2421_v26 = vrot.slane %v2419_v21, 4  ;;  %v2439_v39 = vshll.u32 %v7165_v10, 16  ;;  %v2443_v23 = vshrl.u32 %v7165_v10, 16  ;;  %v7169_v10 = vld [vmem:[%s7253_s14 + $0xa4] sm:$0x1] }
 0x138   : > { %v2365_v36 = vrot.slane %v2364_v52, 4  ;;  %v2408_v12 = vrot.slane %v2406_v13, 4  ;;  %v2411_v51 = vrot.slane %v2409_v60, 5  ;;  %v2463_v52 = vshll.u32 %v7166_v19, 16  ;;  %v7170_v19 = vld [vmem:[%s7253_s14 + $0xac] sm:$0xf] }
 0x139   : > { %v2422_v13 = vor.u32 %v2421_v26, %v8891_v40  ;;  %v8908_v41 = vrot.slane %v2439_v39, 5  ;;  %v2445_v42 = vrot.slane %v2443_v23, 4  ;;  %v2469_v21 = vrot.slane %v2467_v56, 4  ;;  %v5543_v23 = vld [vmem:[%s7253_s14 + $0xb4] sm:$0xf] }
 0x13a   : > { %v2473_v39 = vshll.u32 %v7169_v10, 16  ;;  %v2491_v15 = vshrl.u32 %v7170_v19, 16  ;;  %v2505_v63 = vshll.u32 %v5543_v23, 16 }
 0x13b   : > { %v2446_v26 = vor.u32 %v2445_v42, %v8908_v41 }
 0x13c   : > { %6678 = vmatmul.mubr.bf16.gmra.mrb[4].mxu0 %v5872_v6  ;;  %v5537_v6 = vld [vmem:[%s7253_s14 + $0x9c] sm:$0xf] }
 0x13d   : > { %6454 = vmatmul.mubr.bf16.gmra.mrb[20].mxu1 %v7101_v18  ;;  %6681 = vmatprep.mubr.bf16.mxu0 %v5873_v8  ;;  %v2379_v8 = vrot.slane %v2377_v1, 5  ;;  %v2430_v18 = vshrl.u32 %v5534_v61, 16  ;;  %v2457_v30 = vshll.u32 %v5537_v6, 16  ;;  %v2370_v1 = vsel %vm7285_vm2, %v2365_v36, %v8862_v14  ;;  %v7105_v61 = vld [vmem:[%s7253_s14 + $0xc0] sm:$0xff]  }
 0x13e   : > { %6457 = vmatprep.mubr.bf16.mxu1 %v7102_v3  ;;  %v2454_v3 = vshrl.u32 %v5537_v6, 16  ;;  %v8910_v14 = vrot.slane %v2463_v52, 5  ;;  %v2487_v52 = vshll.u32 %v7170_v19, 16 }
 0x13f   : > { %v2380_v31 = vsel %vm7285_vm2, %v2375_v47, %v2379_v8  ;;  %v2432_v60 = vrot.slane %v2430_v18, 4  ;;  %v2459_v24 = vrot.slane %v2457_v30, 5  ;;  %v2427_v8 = vrot.slane %v2425_v20, 5  ;;  %v7171_v20 = vld [vmem:[%s7253_s14 + $0xb8] sm:$0xf] }
 0x140   : > { %v2423_v47 = vrot.slane %v2422_v13, 4  ;;  %v2470_v33 = vor.u32 %v2469_v21, %v8910_v14  ;;  %v2511_v29 = vshll.u32 %v7171_v20, 16  ;;  %v2515_v44 = vshrl.u32 %v7171_v20, 16 }
 0x142   : > { %v2471_v13 = vrot.slane %v2470_v33, 4 }
 0x144   : > { %6682 = vmatmul.mubr.bf16.gmra.mrb[8].mxu0 %v5874_v54  ;;  %v2412_v54 = vor.u32 %v2411_v51, %v2408_v12  ;;  %v2436_v12 = vor.u32 %v2435_v0, %v2432_v60  ;;  %v7168_v51 = vld [vmem:[%s7253_s14 + $0x98] sm:$0x1]  ;;  %v2475_v60 = vrot.slane %v2473_v39, 5 }
 0x145   : > { %6458 = vmatmul.mubr.bf16.gmra.mrb[24].mxu1 %v7103_v45  ;;  %6685 = vmatprep.mubr.bf16.mxu0 %v5875_v17  ;;  %v2456_v17 = vrot.slane %v2454_v3, 4  ;;  %v5573_v45 = vcombine.low %v2370_v1, %v2380_v31  ;;  %v2449_v6 = vshll.u32 %v7168_v51, 16  ;;  %v2502_v31 = vshrl.u32 %v5543_v23, 16 }
 0x146   : > { %6461 = vmatprep.mubr.bf16.mxu1 %v7104_v9  ;;  %v2413_v36 = vrot.slane %v2412_v54, 4  ;;  %v5540_v9 = vld [vmem:[%s7253_s14 + $0xa8] sm:$0xf]  ;;  %v2437_v56 = vrot.slane %v2436_v12, 4  ;;  %v2476_v32 = vsel %vm7285_vm2, %v2471_v13, %v2475_v60 }
 0x147   : > { %v2460_v18 = vor.u32 %v2459_v24, %v2456_v17  ;;  %v2478_v3 = vshrl.u32 %v5540_v9, 16  ;;  %v2481_v30 = vshll.u32 %v5540_v9, 16  ;;  %v2451_v1 = vrot.slane %v2449_v6, 5 }
 0x148   : > { %v2418_v43 = vsel %vm7285_vm2, %v2413_v36, %v8891_v40  ;;  %v2489_v17 = vrot.slane %v2487_v52, 5  ;;  %v2493_v24 = vrot.slane %v2491_v15, 4  ;;  %v2504_v21 = vrot.slane %v2502_v31, 4  ;;  %v5546_v36 = vld [vmem:[%s7253_s14 + $0xc0] sm:$0xf] }
 0x149   : > { %v2461_v54 = vrot.slane %v2460_v18, 4  ;;  %v2480_v0 = vrot.slane %v2478_v3, 4  ;;  %v2483_v42 = vrot.slane %v2481_v30, 5  ;;  %v2526_v9 = vshrl.u32 %v5546_v36, 16  ;;  %v7173_v18 = vld [vmem:[%s7253_s14 + $0xc4] sm:$0xf] }
 0x14a   : > { %v2535_v33 = vshll.u32 %v7173_v18, 16 }
 0x14b   : > { %v2466_v51 = vsel %vm7285_vm2, %v2461_v54, %v8910_v14  ;;  %v2484_v5 = vor.u32 %v2483_v42, %v2480_v0  ;;  %v2539_v14 = vshrl.u32 %v7173_v18, 16  ;;  %v2528_v19 = vrot.slane %v2526_v9, 4 }
 0x14c   : > { %6686 = vmatmul.mubr.bf16.gmra.mrb[12].mxu0 %v5876_v38  ;;  %v2428_v38 = vsel %vm7285_vm2, %v2423_v47, %v2427_v8  ;;  %v2517_v8 = vrot.slane %v2515_v44, 4  ;;  %v2442_v47 = vsel %vm7285_vm2, %v2437_v56, %v8908_v41  ;;  %v7172_v41 = vld [vmem:[%s7253_s14 + $0xb0] sm:$0x1]  ;;  %v5577_v58 = vcombine.low %v2466_v51, %v2476_v32  ;;  %v7175_v44 = vld [vmem:[%s7253_s14 + $0xc8] sm:$0x1] }
 0x14d   : > { %6462 = vmatmul.mubr.bf16.gmra.mrb[28].mxu1 %v7105_v61  ;;  %6689 = vmatprep.mubr.bf16.mxu0 %v5877_v35  ;;  %v2447_v35 = vrot.slane %v2446_v26, 4  ;;  %v5575_v40 = vcombine.low %v2418_v43, %v2428_v38  ;;  %v2507_v61 = vrot.slane %v2505_v63, 5  ;;  %v2497_v6 = vshll.u32 %v7172_v41, 16  ;;  %v8998_v41 = vld [vmem:[%s9095_s3] ss:$0 sm:$0xff] }
 0x14e   : > { %6497 = vmatprep.mubr.bf16.mxu1 %v5573_v45  ;;  %v2513_v45 = vrot.slane %v2511_v29, 5  ;;  %v2529_v26 = vshll.u32 %v5546_v36, 16  ;;  %v2485_v22 = vrot.slane %v2484_v5, 4  ;;  %v2537_v15 = vrot.slane %v2535_v33, 5 }
 0x14f   : > { %v2452_v12 = vsel %vm7285_vm2, %v2447_v35, %v2451_v1  ;;  %v2508_v10 = vor.u32 %v2507_v61, %v2504_v21  ;;  %v2499_v30 = vrot.slane %v2497_v6, 5  ;;  %v2541_v43 = vrot.slane %v2539_v14, 4 }
 0x150   : > { %v2518_v39 = vor.u32 %v2517_v8, %v2513_v45  ;;  %v5576_v3 = vcombine.low %v2442_v47, %v2452_v12  ;;  %v2531_v52 = vrot.slane %v2529_v26, 5  ;;  %v2490_v31 = vsel %vm7285_vm2, %v2485_v22, %v2489_v17  ;;  %v8992_v8 = vld [vmem:[%s9094_s2] ss:$0 sm:$0xff] }
 0x151   : > { %v2509_v38 = vrot.slane %v2508_v10, 4  ;;  %v2542_v29 = vor.u32 %v2541_v43, %v2537_v15  ;;  %v2545_v35 = vshll.u32 %v7175_v44, 16 }
 0x152   : > { %v2519_v56 = vrot.slane %v2518_v39, 4  ;;  %v2532_v20 = vor.u32 %v2531_v52, %v2528_v19 }
 0x153   : > { %v2514_v4 = vsel %vm7285_vm2, %v2509_v38, %v2513_v45  ;;  %v2547_v54 = vrot.slane %v2545_v35, 5 }
 0x154   : > { %6690 = vmatmul.mubr.bf16.gmra.mrb[16].mxu0 %v5878_v62  ;;  %v2494_v62 = vor.u32 %v2493_v24, %v2489_v17  ;;  %v2533_v25 = vrot.slane %v2532_v20, 4 }
 0x155   : > { %6498 = vmatmul.mubr.bf16.vlgmr.msra.gmra.mrb[16].mxu1 %v8733_v50  ;;  %6693 = vmatprep.mubr.bf16.mxu0 %v5879_v59  ;;  %v7174_v50 = vld [vmem:[%s7253_s14 + $0xbc] sm:$0x1] }
 0x156   : > { %6501 = vmatprep.mubr.bf16.mxu1 %v5575_v40  ;;  %v2521_v23 = vshll.u32 %v7174_v50, 16  ;;  %v2495_v59 = vrot.slane %v2494_v62, 4  ;;  %v2538_v13 = vsel %vm7285_vm2, %v2533_v25, %v2537_v15 }
 0x158   : > { %v2523_v1 = vrot.slane %v2521_v23, 5  ;;  %v2500_v63 = vsel %vm7285_vm2, %v2495_v59, %v2499_v30 }
 0x15a   : > { %v2524_v57 = vsel %vm7285_vm2, %v2519_v56, %v2523_v1 }
 0x15b   : > { %v5579_v7 = vcombine.low %v2514_v4, %v2524_v57 }
 0x15c   : > { %6694 = vmatmul.mubr.bf16.gmra.mrb[20].mxu0 %v5880_v53  ;;  %v5578_v53 = vcombine.low %v2490_v31, %v2500_v63 }
 0x15d   : > { %6502 = vmatmul.mubr.bf16.gmra.mrb[20].mxu1 %v5576_v3  ;;  %6697 = vmatprep.mubr.bf16.mxu0 %v5881_v16  ;;  %v2543_v16 = vrot.slane %v2542_v29, 4 }
 0x15e   : > { %6505 = vmatprep.mubr.bf16.mxu1 %v5577_v58 }
 0x15f   : > { %v2548_v60 = vsel %vm7285_vm2, %v2543_v16, %v2547_v54 }
 0x160   : > { %v5580_v0 = vcombine.low %v2538_v13, %v2548_v60 }
 0x164   : > { %6698 = vmatmul.mubr.bf16.gmra.mrb[24].mxu0 %v5882_v2 }
 0x165   : > { %6506 = vmatmul.mubr.bf16.gmra.mrb[24].mxu1 %v5578_v53  ;;  %6701 = vmatprep.mubr.bf16.mxu0 %v5883_v28 }
 0x166   : > { %6509 = vmatprep.mubr.bf16.mxu1 %v5579_v7 }
 0x16c   : > { %6702 = vmatmul.mubr.bf16.gmra.mrb[28].mxu0 %v5884_v48 }
 0x16d   : > { %6510 = vmatmul.mubr.bf16.gmra.mrb[28].mxu1 %v5580_v0 }
 0x1e8   : > { %v6435_v27 = vpop.f32.mrb[0].mxu1 }
 0x1e9   : > { %v1958_v46 = vpop.f32.mrb[1].mxu1 }
 0x1ea   : > { %v6436_v2 = vpop.f32.mrb[2].mxu1 }
 0x1eb   : > { %v1961_v42 = vpop.f32.mrb[3].mxu1 }
 0x1f0   : > { %v6439_v17 = vpop.f32.mrb[4].mxu1 }
 0x1f1   : > { %v1974_v55 = vpop.f32.mrb[5].mxu1 }
 0x1f2   : > { %v6440_v49 = vpop.f32.mrb[6].mxu1 }
 0x1f3   : > { %v1977_v28 = vpop.f32.mrb[7].mxu1 }
 0x1f8   : > { %v6443_v24 = vpop.f32.mrb[8].mxu1 }
 0x1f9   : > { %v1990_v40 = vpop.f32.mrb[9].mxu1 }
 0x1fa   : > { %v6444_v21 = vpop.f32.mrb[10].mxu1 }
 0x1fb   : > { %v1993_v61 = vpop.f32.mrb[11].mxu1 }
 0x200   : > { %v8981_v37 = vpop.f32.mrb[12].mxu1 }
 0x201   : > { %v8983_v45 = vpop.f32.mrb[13].mxu1 }
 0x202   : > { %v8985_v34 = vpop.f32.mrb[14].mxu1 }
 0x203   : > { %v8987_v11 = vpop.f32.mrb[15].mxu1 }
 0x207   : > { %v6675_v48 = vpop.f32.mrb[0].mxu0 }
 0x208   : > { %v6721_v36 = vadd.f32 %v6675_v48, %v6435_v27  ;;  %v4849_v47 = vpop.f32.mrb[1].mxu0 }
 0x209   : > { %v6722_v12 = vadd.f32 %v4849_v47, %v1958_v46  ;;  %v6676_v51 = vpop.f32.mrb[2].mxu0 }
 0x20a   : > { %v5017_v32 = vmul.f32 %v6721_v36, %v8992_v8  ;;  %v6723_v5 = vadd.f32 %v6676_v51, %v6436_v2  ;;  %v4852_v62 = vpop.f32.mrb[3].mxu0 }
 0x20b   : > { %v5015_v6 = vmul.f32 %v6722_v12, %v8992_v8  ;;  %v6724_v9 = vadd.f32 %v4852_v62, %v1961_v42 }
 0x20c   : > { %v5018_v26 = vmul.f32 %v6723_v5, %v8992_v8  ;;  %v5056_v33 = vadd.f32 %v8998_v41, %v5017_v32 }
 0x20d   : > { %v5016_v18 = vmul.f32 %v6724_v9, %v8992_v8  ;;  %v5054_v10 = vadd.f32 %v8998_v41, %v5015_v6 }
 0x20e   : > { %v5057_v14 = vadd.f32 %v8998_v41, %v5018_v26 }
 0x20f   : > { %v5055_v39 = vadd.f32 %v8998_v41, %v5016_v18  ;;  %v6679_v50 = vpop.f32.mrb[4].mxu0 }
 0x210   : > { %v5970_v23 = vpack.c.bf16 %v5057_v14, %v5056_v33  ;;  %v6725_v3 = vadd.f32 %v6679_v50, %v6439_v17  ;;  %v4865_v58 = vpop.f32.mrb[5].mxu0 }
 0x211   : > { %v5965_v22 = vpack.c.bf16 %v5055_v39, %v5054_v10  ;;  %v6726_v59 = vadd.f32 %v4865_v58, %v1974_v55  ;;  %v6680_v30 = vpop.f32.mrb[6].mxu0 }
 0x212   : > { %6042 = vst [vmem:[%s9010_s25 + $0x8] sm:$0xff] %v5970_v23   ;;  %v5021_v19 = vmul.f32 %v6725_v3, %v8992_v8  ;;  %v6727_v52 = vadd.f32 %v6680_v30, %v6440_v49  ;;  %v4868_v15 = vpop.f32.mrb[7].mxu0 }
 0x213   : > { %5966 = vst [vmem:[%s9010_s25] sm:$0xff] %v5965_v22   ;;  %v5019_v43 = vmul.f32 %v6726_v59, %v8992_v8  ;;  %v6728_v38 = vadd.f32 %v4868_v15, %v1977_v28 }
 0x214   : > { %v5022_v56 = vmul.f32 %v6727_v52, %v8992_v8  ;;  %v5060_v31 = vadd.f32 %v8998_v41, %v5021_v19 }
 0x215   : > { %v5020_v1 = vmul.f32 %v6728_v38, %v8992_v8  ;;  %v5058_v20 = vadd.f32 %v8998_v41, %v5019_v43 }
 0x216   : > { %v5061_v63 = vadd.f32 %v8998_v41, %v5022_v56 }
 0x217   : > { %v5059_v29 = vadd.f32 %v8998_v41, %v5020_v1  ;;  %v6683_v44 = vpop.f32.mrb[8].mxu0 }
 0x218   : > { %v5980_v35 = vpack.c.bf16 %v5061_v63, %v5060_v31  ;;  %v6729_v4 = vadd.f32 %v6683_v44, %v6443_v24  ;;  %v4881_v57 = vpop.f32.mrb[9].mxu0 }
 0x219   : > { %v5975_v53 = vpack.c.bf16 %v5059_v29, %v5058_v20  ;;  %v6730_v7 = vadd.f32 %v4881_v57, %v1990_v40  ;;  %v6684_v25 = vpop.f32.mrb[10].mxu0 }
 0x21a   : > { %6044 = vst [vmem:[%s9010_s25 + $0x18] sm:$0xff] %v5980_v35   ;;  %v5025_v16 = vmul.f32 %v6729_v4, %v8992_v8  ;;  %v6731_v54 = vadd.f32 %v6684_v25, %v6444_v21  ;;  %v4884_v13 = vpop.f32.mrb[11].mxu0 }
 0x21b   : > { %6043 = vst [vmem:[%s9010_s25 + $0x10] sm:$0xff] %v5975_v53   ;;  %v5023_v60 = vmul.f32 %v6730_v7, %v8992_v8  ;;  %v6732_v0 = vadd.f32 %v4884_v13, %v1993_v61 }
 0x21c   : > { %v5026_v27 = vmul.f32 %v6731_v54, %v8992_v8  ;;  %v5064_v2 = vadd.f32 %v8998_v41, %v5025_v16 }
 0x21d   : > { %v5024_v46 = vmul.f32 %v6732_v0, %v8992_v8  ;;  %v5062_v17 = vadd.f32 %v8998_v41, %v5023_v60 }
 0x21e   : > { %v5065_v42 = vadd.f32 %v8998_v41, %v5026_v27 }
 0x21f   : > { %v5063_v55 = vadd.f32 %v8998_v41, %v5024_v46  ;;  %v6687_v49 = vpop.f32.mrb[12].mxu0 }
 0x220   : > { %v5990_v28 = vpack.c.bf16 %v5065_v42, %v5064_v2  ;;  %v6733_v24 = vadd.f32 %v6687_v49, %v8981_v37  ;;  %v4897_v40 = vpop.f32.mrb[13].mxu0 }
 0x221   : > { %v5985_v21 = vpack.c.bf16 %v5063_v55, %v5062_v17  ;;  %v6734_v61 = vadd.f32 %v4897_v40, %v8983_v45  ;;  %v6688_v48 = vpop.f32.mrb[14].mxu0 }
 0x222   : > { %6046 = vst [vmem:[%s9010_s25 + $0x28] sm:$0xff] %v5990_v28   ;;  %v5029_v36 = vmul.f32 %v6733_v24, %v8992_v8  ;;  %v6735_v47 = vadd.f32 %v6688_v48, %v8985_v34  ;;  %v4900_v12 = vpop.f32.mrb[15].mxu0 }
 0x223   : > { %6045 = vst [vmem:[%s9010_s25 + $0x20] sm:$0xff] %v5985_v21   ;;  %v5027_v51 = vmul.f32 %v6734_v61, %v8992_v8  ;;  %v6736_v32 = vadd.f32 %v4900_v12, %v8987_v11 }
 0x224   : > { %v5030_v5 = vmul.f32 %v6735_v47, %v8992_v8  ;;  %v5068_v62 = vadd.f32 %v8998_v41, %v5029_v36 }
 0x225   : > { %v5028_v37 = vmul.f32 %v6736_v32, %v8992_v8  ;;  %v5066_v6 = vadd.f32 %v8998_v41, %v5027_v51 }
 0x226   : > { %v5069_v45 = vadd.f32 %v8998_v41, %v5030_v5 }
 0x227   : > { %v5067_v34 = vadd.f32 %v8998_v41, %v5028_v37  ;;  %v6691_v9 = vpop.f32.mrb[16].mxu0 }
 0x228   : > { %v6000_v26 = vpack.c.bf16 %v5069_v45, %v5068_v62  ;;  %v6499_v18 = vpop.f32.mrb[16].mxu1  ;;  %v4913_v33 = vpop.f32.mrb[17].mxu0 }
 0x229   : > { %v5995_v14 = vpack.c.bf16 %v5067_v34, %v5066_v6  ;;  %v6737_v10 = vadd.f32 %v6691_v9, %v6499_v18  ;;  %v2776_v11 = vpop.f32.mrb[17].mxu1  ;;  %v6692_v39 = vpop.f32.mrb[18].mxu0 }
 0x22a   : > { %6048 = vst [vmem:[%s9010_s25 + $0x38] sm:$0xff] %v6000_v26   ;;  %v6738_v50 = vadd.f32 %v4913_v33, %v2776_v11  ;;  %v6500_v23 = vpop.f32.mrb[18].mxu1  ;;  %v4916_v3 = vpop.f32.mrb[19].mxu0 }
 0x22b   : > { %6047 = vst [vmem:[%s9010_s25 + $0x30] sm:$0xff] %v5995_v14   ;;  %v5033_v58 = vmul.f32 %v6737_v10, %v8992_v8  ;;  %v6739_v22 = vadd.f32 %v6692_v39, %v6500_v23  ;;  %v2779_v59 = vpop.f32.mrb[19].mxu1 }
 0x22c   : > { %v5031_v30 = vmul.f32 %v6738_v50, %v8992_v8  ;;  %v6740_v19 = vadd.f32 %v4916_v3, %v2779_v59 }
 0x22d   : > { %v5034_v52 = vmul.f32 %v6739_v22, %v8992_v8  ;;  %v5072_v43 = vadd.f32 %v8998_v41, %v5033_v58 }
 0x22e   : > { %v5032_v15 = vmul.f32 %v6740_v19, %v8992_v8  ;;  %v5070_v1 = vadd.f32 %v8998_v41, %v5031_v30 }
 0x22f   : > { %v5073_v38 = vadd.f32 %v8998_v41, %v5034_v52  ;;  %v6695_v56 = vpop.f32.mrb[20].mxu0 }
 0x230   : > { %v5071_v31 = vadd.f32 %v8998_v41, %v5032_v15  ;;  %v6503_v63 = vpop.f32.mrb[20].mxu1  ;;  %v4929_v20 = vpop.f32.mrb[21].mxu0 }
 0x231   : > { %v6010_v29 = vpack.c.bf16 %v5073_v38, %v5072_v43  ;;  %v6741_v44 = vadd.f32 %v6695_v56, %v6503_v63  ;;  %v2792_v35 = vpop.f32.mrb[21].mxu1  ;;  %v6696_v4 = vpop.f32.mrb[22].mxu0 }
 0x232   : > { %v6005_v57 = vpack.c.bf16 %v5071_v31, %v5070_v1  ;;  %v6742_v53 = vadd.f32 %v4929_v20, %v2792_v35  ;;  %v6504_v7 = vpop.f32.mrb[22].mxu1  ;;  %v4932_v25 = vpop.f32.mrb[23].mxu0 }
 0x233   : > { %6050 = vst [vmem:[%s9010_s25 + $0x48] sm:$0xff] %v6010_v29   ;;  %v5037_v16 = vmul.f32 %v6741_v44, %v8992_v8  ;;  %v6743_v54 = vadd.f32 %v6696_v4, %v6504_v7  ;;  %v2795_v13 = vpop.f32.mrb[23].mxu1 }
 0x234   : > { %6049 = vst [vmem:[%s9010_s25 + $0x40] sm:$0xff] %v6005_v57   ;;  %v5035_v60 = vmul.f32 %v6742_v53, %v8992_v8  ;;  %v6744_v0 = vadd.f32 %v4932_v25, %v2795_v13 }
 0x235   : > { %v5038_v27 = vmul.f32 %v6743_v54, %v8992_v8  ;;  %v5076_v2 = vadd.f32 %v8998_v41, %v5037_v16 }
 0x236   : > { %v5036_v46 = vmul.f32 %v6744_v0, %v8992_v8  ;;  %v5074_v55 = vadd.f32 %v8998_v41, %v5035_v60 }
 0x237   : > { %v5077_v42 = vadd.f32 %v8998_v41, %v5038_v27  ;;  %v6699_v17 = vpop.f32.mrb[24].mxu0 }
 0x238   : > { %v5075_v49 = vadd.f32 %v8998_v41, %v5036_v46  ;;  %v6507_v28 = vpop.f32.mrb[24].mxu1  ;;  %v4945_v24 = vpop.f32.mrb[25].mxu0 }
 0x239   : > { %v6020_v40 = vpack.c.bf16 %v5077_v42, %v5076_v2  ;;  %v6745_v21 = vadd.f32 %v6699_v17, %v6507_v28  ;;  %v2808_v61 = vpop.f32.mrb[25].mxu1  ;;  %v6700_v48 = vpop.f32.mrb[26].mxu0 }
 0x23a   : > { %v6015_v36 = vpack.c.bf16 %v5075_v49, %v5074_v55  ;;  %v6746_v47 = vadd.f32 %v4945_v24, %v2808_v61  ;;  %v6508_v12 = vpop.f32.mrb[26].mxu1  ;;  %v4948_v51 = vpop.f32.mrb[27].mxu0 }
 0x23b   : > { %6052 = vst [vmem:[%s9010_s25 + $0x58] sm:$0xff] %v6020_v40   ;;  %v5041_v32 = vmul.f32 %v6745_v21, %v8992_v8  ;;  %v6747_v5 = vadd.f32 %v6700_v48, %v6508_v12  ;;  %v2811_v37 = vpop.f32.mrb[27].mxu1 }
 0x23c   : > { %6051 = vst [vmem:[%s9010_s25 + $0x50] sm:$0xff] %v6015_v36   ;;  %v5039_v62 = vmul.f32 %v6746_v47, %v8992_v8  ;;  %v6748_v45 = vadd.f32 %v4948_v51, %v2811_v37 }
 0x23d   : > { %v5042_v6 = vmul.f32 %v6747_v5, %v8992_v8  ;;  %v5080_v9 = vadd.f32 %v8998_v41, %v5041_v32 }
 0x23e   : > { %v5040_v34 = vmul.f32 %v6748_v45, %v8992_v8  ;;  %v5078_v33 = vadd.f32 %v8998_v41, %v5039_v62 }
 0x23f   : > { %v5081_v26 = vadd.f32 %v8998_v41, %v5042_v6  ;;  %v6703_v18 = vpop.f32.mrb[28].mxu0 }
 0x240   : > { %v5079_v14 = vadd.f32 %v8998_v41, %v5040_v34  ;;  %v6511_v10 = vpop.f32.mrb[28].mxu1  ;;  %v4961_v11 = vpop.f32.mrb[29].mxu0 }
 0x241   : > { %v6030_v39 = vpack.c.bf16 %v5081_v26, %v5080_v9  ;;  %v6749_v50 = vadd.f32 %v6703_v18, %v6511_v10  ;;  %v2824_v23 = vpop.f32.mrb[29].mxu1  ;;  %v6704_v3 = vpop.f32.mrb[30].mxu0 }
 0x242   : > { %v6025_v58 = vpack.c.bf16 %v5079_v14, %v5078_v33  ;;  %v6750_v22 = vadd.f32 %v4961_v11, %v2824_v23  ;;  %v6512_v59 = vpop.f32.mrb[30].mxu1  ;;  %v4964_v30 = vpop.f32.mrb[31].mxu0 }
 0x243   : > { %6054 = vst [vmem:[%s9010_s25 + $0x68] sm:$0xff] %v6030_v39   ;;  %v5045_v19 = vmul.f32 %v6749_v50, %v8992_v8  ;;  %v6751_v52 = vadd.f32 %v6704_v3, %v6512_v59  ;;  %v2827_v15 = vpop.f32.mrb[31].mxu1 }
 0x244   : > { %6053 = vst [vmem:[%s9010_s25 + $0x60] sm:$0xff] %v6025_v58   ;;  %v5043_v43 = vmul.f32 %v6750_v22, %v8992_v8  ;;  %v6752_v38 = vadd.f32 %v4964_v30, %v2827_v15 }
 0x245   : > { %v5046_v56 = vmul.f32 %v6751_v52, %v8992_v8  ;;  %v5084_v31 = vadd.f32 %v8998_v41, %v5045_v19 }
 0x246   : > { %v5044_v1 = vmul.f32 %v6752_v38, %v8992_v8  ;;  %v5082_v20 = vadd.f32 %v8998_v41, %v5043_v43 }
 0x247   : > { %v5085_v63 = vadd.f32 %v8998_v41, %v5046_v56 }
 0x248   : > { %v5083_v29 = vadd.f32 %v8998_v41, %v5044_v1 }
 0x249   : > { %v6040_v44 = vpack.c.bf16 %v5085_v63, %v5084_v31 }
 0x24a   : > { %v6035_v35 = vpack.c.bf16 %v5083_v29, %v5082_v20 }
 0x24b   : > { %6056 = vst [vmem:[%s9010_s25 + $0x78] sm:$0xff] %v6040_v44  }
 0x24c   : > { %6055 = vst [vmem:[%s9010_s25 + $0x70] sm:$0xff] %v6035_v35  }
 0x24d PF: > { %s14_s15 = sadd.s32 1, %s7182_s15  }
 0x24e   : > { %p11_p4 = scmp.ge.s32.totalorder %s14_s15, 4  }
 0x250   :  { %13 = sbr.rel (!%p11_p4) target bundleno = 1 (0x1), region = 76 }

</bundles_post_ra>
